<compile_context>
chip_gen: v5e
topology: v5e:2x2
jax: 0.10.0
libtpu: 0.0.40
codegen_flags: <defaults>
</compile_context>

<pallas_src>
import jax
import jax.numpy as jnp
from jax.experimental import pallas as pl
from jax.experimental.pallas import tpu as pltpu


# ----------------------------------------------------------------------------
# Hardware probes (defensive: default to 1 TC / 64 MiB VMEM if unavailable).
# ----------------------------------------------------------------------------
def _num_tensorcores():
    try:
        info = pltpu.get_tpu_info()
        for attr in ("num_cores", "core_count", "tensorcores_per_chip",
                     "num_tensorcores"):
            v = getattr(info, attr, None)
            if v:
                return max(1, int(v))
    except Exception:
        pass
    try:
        v = getattr(jax.devices()[0], "num_cores", None)
        if v:
            return max(1, int(v))
    except Exception:
        pass
    return 1


def _vmem_budget_bytes():
    """Conservative scoped-VMEM budget: leave headroom vs. physical VMEM."""
    try:
        cap = int(pltpu.get_tpu_info().vmem_capacity_bytes)
    except Exception:
        cap = 64 << 20  # assume the smallest (v7x per-TC) physical VMEM
    return min(cap - (16 << 20), 64 << 20)


# ----------------------------------------------------------------------------
# Kernel A: attention_conv as a K-tiled matmul (+ bias + ReLU).
#   x_flat : (BT, K) bf16    K = feat_dim * 7 * 4 (channel-major, then spatial)
#   w_flat : (K, M)  bf16
#   bias   : (1, M)  f32
#   out a  : (BT, M) f32     ReLU applied
# ----------------------------------------------------------------------------
def _att_conv_kernel(x_ref, w_ref, b_ref, a_ref):
    k = pl.program_id(2)

    @pl.when(k == 0)
    def _():
        a_ref[...] = jnp.zeros_like(a_ref)

    # bf16 x bf16 -> f32, accumulate directly into the resident output block.
    # (Correct because K is the innermost, "arbitrary" grid axis and the
    #  output block index is constant across it.)
    a_ref[...] += jnp.dot(x_ref[...], w_ref[...],
                          preferred_element_type=jnp.float32)

    @pl.when(k == pl.num_programs(2) - 1)
    def _():
        a_ref[...] = jnp.maximum(a_ref[...] + b_ref[...], 0.0)


def _att_conv_vmem_bytes(tr, tk, tm):
    # double-buffered bf16 x/w tiles + f32 bias + double-buffered f32 output
    return 2 * (tr * tk * 2 + tk * tm * 2 + tm * 4 + tr * tm * 4)


def _pick_tk(K, tr, tm, cap, vmem_budget):
    """Largest lane-aligned (multiple of 128) divisor of K <= cap that fits
    the VMEM budget; never silently exceeds the budget."""
    def fits(tk):
        return _att_conv_vmem_bytes(tr, tk, tm) <= vmem_budget

    start = min(cap, K)
    start -= start % 128
    for cand in range(start, 0, -128):
        if K % cand == 0 and fits(cand):
            return cand
    if fits(K):
        return K  # no lane-aligned divisor under the cap; use the full extent
    raise ValueError(f"no K tile for K={K} fits VMEM budget {vmem_budget}")


def attention_conv(x_flat, w_flat, bias, *, tk_cap=8192):
    bt, K = x_flat.shape
    M = w_flat.shape[1]

    # M-split only when >=2 TensorCores are actually available (v7x megacore).
    cores = _num_tensorcores()
    nm = 2 if (cores >= 2 and M % 256 == 0) else 1
    tm = M // nm

    # Guard the BT axis: tile rows only when the clip count gets large.
    tr = bt
    if bt > 512 and bt % 8 == 0:
        for cand in range(512, 7, -8):
            if bt % cand == 0:
                tr = cand
                break
    nr = bt // tr

    budget = _vmem_budget_bytes()
    tk = _pick_tk(K, tr, tm, cap=tk_cap, vmem_budget=budget)
    assert K % tk == 0

    vmem_limit = int(min(max(_att_conv_vmem_bytes(tr, tk, tm) + (4 << 20),
                             32 << 20), budget))

    return pl.pallas_call(
        _att_conv_kernel,
        out_shape=jax.ShapeDtypeStruct((bt, M), jnp.float32),
        grid_spec=pltpu.PrefetchScalarGridSpec(
            num_scalar_prefetch=0,
            grid=(nr, nm, K // tk),
            in_specs=[
                pl.BlockSpec((tr, tk), lambda r, m, k: (r, k)),
                pl.BlockSpec((tk, tm), lambda r, m, k: (k, m)),
                pl.BlockSpec((1, tm), lambda r, m, k: (0, m)),
            ],
            out_specs=pl.BlockSpec((tr, tm), lambda r, m, k: (r, m)),
        ),
        compiler_params=pltpu.CompilerParams(
            dimension_semantics=("parallel", "parallel", "arbitrary"),
            vmem_limit_bytes=vmem_limit,
        ),
    )(x_flat, w_flat, bias)


# ----------------------------------------------------------------------------
# Kernel B: fused temporal-attention head, all (or b/num_cores) batch rows per
# grid step.
#   a_pad  : (b, t+2, M) f32   attention features, zero-padded on t
#   wt     : (3, M)      f32   Conv1d(M->1, k=3) weights, wt[k, c] = w[0, c, k]
#   tb     : (1,)        f32   Conv1d bias (SMEM)
#   pooled : (b, t, F)   f32   spatially avg-pooled backbone features
#   wcls   : (F, Cp)     bf16  classifier weight (pre-transposed, class-padded)
#   bcls   : (1, Cp)     f32
# outputs:
#   y : (b, Cp) f32 logits (padded classes)      f : (b, F) f32 pooled feature
# ----------------------------------------------------------------------------
def _ta_head_kernel(a_pad_ref, wt_ref, tb_ref, pooled_ref, wcls_ref, bcls_ref,
                    y_ref, f_ref):
    bb, tp2, _ = a_pad_ref.shape
    t = tp2 - 2

    a_pad = a_pad_ref[...]                          # (bb, t+2, M)
    wt = wt_ref[...]                                # (3, M)

    # attention_tconv: Conv1d(M -> 1, kernel=3, padding=1) + bias + ReLU
    s = jnp.zeros((bb, t), jnp.float32)
    for k in range(3):                              # static unroll
        s = s + jnp.sum(a_pad[:, k:k + t, :] * wt[k][None, None, :], axis=-1)
    s = jnp.maximum(s + tb_ref[0], 0.0)             # (bb, t)

    # softmax over the temporal axis (approx reciprocal -> EUP slot)
    s = s - jnp.max(s, axis=1, keepdims=True)
    e = jnp.exp(s)
    attn = e * pl.reciprocal(jnp.sum(e, axis=1, keepdims=True), approx=True)

    # attention-weighted temporal aggregation of the pre-pooled features
    f = jnp.sum(attn[:, :, None] * pooled_ref[...], axis=1)   # (bb, F)
    f_ref[...] = f

    # classifier: single (bb, F) x (F, Cp) matmul, bf16 weights, f32 accumulate
    y_ref[...] = (jnp.dot(f.astype(wcls_ref.dtype), wcls_ref[...],
                          preferred_element_type=jnp.float32)
                  + bcls_ref[...])


def ta_head(a_pad, wt, tb, pooled, wcls, bcls):
    b, tp2, M = a_pad.shape
    t = tp2 - 2
    F = pooled.shape[-1]
    Cp = wcls.shape[1]

    # Split the batch only across real TensorCores; otherwise one grid step.
    cores = _num_tensorcores()
    nb = cores if (cores > 1 and b % cores == 0) else 1
    bb = b // nb

    return pl.pallas_call(
        _ta_head_kernel,
        out_shape=(jax.ShapeDtypeStruct((b, Cp), jnp.float32),
                   jax.ShapeDtypeStruct((b, F), jnp.float32)),
        grid_spec=pltpu.PrefetchScalarGridSpec(
            num_scalar_prefetch=0,
            grid=(nb,),
            in_specs=[
                pl.BlockSpec((bb, tp2, M), lambda i: (i, 0, 0)),
                pl.BlockSpec((3, M), lambda i: (0, 0)),
                pl.BlockSpec(memory_space=pltpu.MemorySpace.SMEM),
                pl.BlockSpec((bb, t, F), lambda i: (i, 0, 0)),
                pl.BlockSpec((F, Cp), lambda i: (0, 0)),
                pl.BlockSpec((1, Cp), lambda i: (0, 0)),
            ],
            out_specs=(pl.BlockSpec((bb, Cp), lambda i: (i, 0)),
                       pl.BlockSpec((bb, F), lambda i: (i, 0))),
        ),
        compiler_params=pltpu.CompilerParams(
            dimension_semantics=("parallel",),
            vmem_limit_bytes=32 * 1024 * 1024,
        ),
    )(a_pad, wt, tb, pooled, wcls, bcls)


# ----------------------------------------------------------------------------
# One-time parameter preparation (transpose / bf16 cast / class padding).
# ----------------------------------------------------------------------------
def prepare_params(params):
    M, F, H, W = params["w_conv"].shape
    C = params["w_cls"].shape[0]
    Cp = ((C + 127) // 128) * 128

    w_flat = params["w_conv"].reshape(M, F * H * W).T.astype(jnp.bfloat16)
    b_conv = params["b_conv"].reshape(1, M).astype(jnp.float32)
    wt = params["w_tconv"][0].T.astype(jnp.float32)            # (3, M)
    tb = params["b_tconv"].reshape(1).astype(jnp.float32)      # SMEM scalar
    wcls = jnp.zeros((F, Cp), jnp.bfloat16).at[:, :C].set(
        params["w_cls"].T.astype(jnp.bfloat16))
    bcls = jnp.zeros((1, Cp), jnp.float32).at[:, :C].set(
        params["b_cls"][None, :].astype(jnp.float32))

    return dict(w_flat=w_flat, b_conv=b_conv, wt=wt, tb=tb,
                wcls=wcls, bcls=bcls, num_classes=C,
                feat_dim=F, middle_dim=M, ksize=(H, W))


# ----------------------------------------------------------------------------
# Forward pass (everything after `self.base`), mirroring ResNet50TA.forward.
# ----------------------------------------------------------------------------
def resnet50ta_forward(feats, prepped, *, training=True):
    """feats: (b, t, F, 7, 4) float32 (or bfloat16) backbone feature maps."""
    b, t, F, H, W = feats.shape
    M = prepped["middle_dim"]
    C = prepped["num_classes"]
    assert (H, W) == prepped["ksize"]

    # Single bf16 copy of the feature map; both Kernel A and the pooling pass
    # read this copy (no second f32 pass over feats).
    x_flat = feats.reshape(b * t, F * H * W).astype(jnp.bfloat16)

    # --- Kernel A: attention_conv (full-spatial Conv2d) as a matmul + ReLU ---
    a = attention_conv(x_flat, prepped["w_flat"], prepped["b_conv"])

    # a.view(b,t,M).permute(0,2,1) -> Conv1d(pad=1): zero-pad the t axis here.
    a_pad = jnp.pad(a.reshape(b, t, M), ((0, 0), (1, 1), (0, 0)))

    # F.avg_pool2d over the full 7x4 extent, from the bf16 copy (f32 result).
    pooled = x_flat.reshape(b, t, F, H * W).astype(jnp.float32).mean(axis=-1)

    y_pad, f = ta_head(a_pad, prepped["wt"], prepped["tb"], pooled,
                       prepped["wcls"], prepped["bcls"])
    if not training:
        return f                       # eval path of the module
    return y_pad[:, :C]                # training path with loss == {'xent'}


# ----------------------------------------------------------------------------
# Pure-JAX reference (for a correctness check of the Pallas kernels).
# ----------------------------------------------------------------------------
def _reference(feats, params):
    b, t, F, H, W = feats.shape
    M = params["w_conv"].shape[0]
    hi = jax.lax.Precision.HIGHEST
    x = feats.reshape(b * t, F, H, W)
    a = jnp.einsum("nfhw,mfhw->nm", x, params["w_conv"],
                   precision=hi) + params["b_conv"]
    a = jax.nn.relu(a).reshape(b, t, M).transpose(0, 2, 1)   # (b, M, t)
    a_pad = jnp.pad(a, ((0, 0), (0, 0), (1, 1)))
    s = jnp.zeros((b, t), jnp.float32)
    for k in range(3):
        s = s + jnp.einsum("bct,c->bt", a_pad[:, :, k:k + t],
                           params["w_tconv"][0, :, k], precision=hi)
    s = jax.nn.relu(s + params["b_tconv"][0])
    attn = jax.nn.softmax(s, axis=1)
    pooled = x.mean(axis=(2, 3)).reshape(b, t, F)
    f = jnp.sum(attn[:, :, None] * pooled, axis=1)
    y = jnp.dot(f, params["w_cls"].T, precision=hi) + params["b_cls"]
    return y, f


if __name__ == "__main__":
    key = jax.random.PRNGKey(0)
    b, t = 2, 4
    feat_dim, middle_dim, num_classes = 256, 256, 10   # feat_dim stand-in for 2048
    H, W = 7, 4   # attention_conv kernel size is hard-coded [7, 4] in the module

    ks = jax.random.split(key, 7)
    params = dict(
        w_conv=0.02 * jax.random.normal(ks[0], (middle_dim, feat_dim, H, W), jnp.float32),
        b_conv=0.02 * jax.random.normal(ks[1], (middle_dim,), jnp.float32),
        w_tconv=0.10 * jax.random.normal(ks[2], (1, middle_dim, 3), jnp.float32),
        b_tconv=0.10 * jax.random.normal(ks[3], (1,), jnp.float32),
        w_cls=0.02 * jax.random.normal(ks[4], (num_classes, feat_dim), jnp.float32),
        b_cls=0.02 * jax.random.normal(ks[5], (num_classes,), jnp.float32),
    )
    feats = jax.random.normal(ks[6], (b, t, feat_dim, H, W), jnp.float32)

    prepped = prepare_params(params)   # one-time weight preprocessing

    y = jax.block_until_ready(resnet50ta_forward(feats, prepped, training=True))
    f = jax.block_until_ready(resnet50ta_forward(feats, prepped, training=False))

    y_ref, f_ref = _reference(feats, params)
    assert y.shape == (b, num_classes) and f.shape == (b, feat_dim)
    # bf16 weight/activation streams (f32 accumulate) vs f32-HIGHEST reference.
    assert jnp.allclose(y, y_ref, rtol=2e-2, atol=2e-2), "y mismatch"
    assert jnp.allclose(f, f_ref, rtol=2e-2, atol=2e-2), "f mismatch"
    print("KERNEL_OK")
</pallas_src>

<mosaic_0001>
module attributes {stable_mosaic.version = 11 : i64} {
  func.func @_att_conv_kernel(%arg0: i32, %arg1: i32, %arg2: i32, %arg3: memref<8x7168xbf16, #tpu.memory_space<vmem>>, %arg4: memref<7168x256xbf16, #tpu.memory_space<vmem>>, %arg5: memref<1x256xf32, #tpu.memory_space<vmem>>, %arg6: memref<8x256xf32, #tpu.memory_space<vmem>>) attributes {dimension_semantics = [#tpu.dimension_semantics<parallel>, #tpu.dimension_semantics<parallel>, #tpu.dimension_semantics<arbitrary>], iteration_bounds = array<i64: 1, 1, 1>, scalar_prefetch = 0 : i64, scratch_operands = 0 : i64, tpu.core_type = #tpu.core_type<tc>, window_params = [{transform_indices = @transform_0, window_bounds = array<i64: 8, 7168>}, {transform_indices = @transform_1, window_bounds = array<i64: 7168, 256>}, {transform_indices = @transform_2, window_bounds = array<i64: 1, 256>}, {transform_indices = @transform_3, window_bounds = array<i64: 8, 256>}]} {
    %c0_i32 = arith.constant 0 : i32
    %0 = arith.cmpi eq, %arg2, %c0_i32 : i32
    %1 = arith.extui %0 : i1 to i32
    %c0_i32_0 = arith.constant 0 : i32
    %2 = arith.cmpi ne, %1, %c0_i32_0 : i32
    scf.if %2 {
      %cst_10 = arith.constant 0.000000e+00 : f32
      %12 = vector.broadcast %cst_10 : f32 to vector<8x256xf32>
      %c0_11 = arith.constant 0 : index
      %c0_12 = arith.constant 0 : index
      %13 = vector.load %arg6[%c0_11, %c0_12] : memref<8x256xf32, #tpu.memory_space<vmem>>, vector<8x256xf32>
      tpu.vector_store %arg6[%c0_11, %c0_12], %12 {strides = array<i32>} : memref<8x256xf32, #tpu.memory_space<vmem>>, vector<8x256xf32>,
    } else {
    }
    %c0 = arith.constant 0 : index
    %c0_1 = arith.constant 0 : index
    %3 = vector.load %arg6[%c0, %c0_1] : memref<8x256xf32, #tpu.memory_space<vmem>>, vector<8x256xf32>
    %c0_2 = arith.constant 0 : index
    %c0_3 = arith.constant 0 : index
    %4 = vector.load %arg3[%c0_2, %c0_3] : memref<8x7168xbf16, #tpu.memory_space<vmem>>, vector<8x7168xbf16>
    %c0_4 = arith.constant 0 : index
    %c0_5 = arith.constant 0 : index
    %5 = vector.load %arg4[%c0_4, %c0_5] : memref<7168x256xbf16, #tpu.memory_space<vmem>>, vector<7168x256xbf16>
    %cst = arith.constant dense<0.000000e+00> : vector<8x256xf32>
    %6 = tpu.matmul %4, %5, %cst {dimension_numbers = #tpu.dot_dimension_numbers<[1], [0], [0], [1], [0, 0, 1, 1], [], []>} : vector<8x7168xbf16>, vector<7168x256xbf16>, vector<8x256xf32> -> vector<8x256xf32>
    %7 = arith.addf %3, %6 : vector<8x256xf32>
    %c0_6 = arith.constant 0 : index
    %c0_7 = arith.constant 0 : index
    %8 = vector.load %arg6[%c0_6, %c0_7] : memref<8x256xf32, #tpu.memory_space<vmem>>, vector<8x256xf32>
    tpu.vector_store %arg6[%c0_6, %c0_7], %7 {strides = array<i32>} : memref<8x256xf32, #tpu.memory_space<vmem>>, vector<8x256xf32>,
    %c0_i32_8 = arith.constant 0 : i32
    %9 = arith.cmpi eq, %arg2, %c0_i32_8 : i32
    %10 = arith.extui %9 : i1 to i32
    %c0_i32_9 = arith.constant 0 : i32
    %11 = arith.cmpi ne, %10, %c0_i32_9 : i32
    scf.if %11 {
      %c0_10 = arith.constant 0 : index
      %c0_11 = arith.constant 0 : index
      %12 = vector.load %arg6[%c0_10, %c0_11] : memref<8x256xf32, #tpu.memory_space<vmem>>, vector<8x256xf32>
      %c0_12 = arith.constant 0 : index
      %c0_13 = arith.constant 0 : index
      %13 = vector.load %arg5[%c0_12, %c0_13] : memref<1x256xf32, #tpu.memory_space<vmem>>, vector<1x256xf32>
      %14 = vector.broadcast %13 : vector<1x256xf32> to vector<8x256xf32>
      %15 = arith.addf %12, %14 : vector<8x256xf32>
      %cst_14 = arith.constant 0.000000e+00 : f32
      %16 = vector.broadcast %cst_14 : f32 to vector<8x256xf32>
      %17 = arith.maximumf %15, %16 : vector<8x256xf32>
      %c0_15 = arith.constant 0 : index
      %c0_16 = arith.constant 0 : index
      %18 = vector.load %arg6[%c0_15, %c0_16] : memref<8x256xf32, #tpu.memory_space<vmem>>, vector<8x256xf32>
      tpu.vector_store %arg6[%c0_15, %c0_16], %17 {strides = array<i32>} : memref<8x256xf32, #tpu.memory_space<vmem>>, vector<8x256xf32>,
    } else {
    }
    return
  }
  func.func @transform_0(%arg0: i32, %arg1: i32, %arg2: i32) -> (i32, i32) {
    %c0_i32 = arith.constant 0 : i32
    return %arg0, %arg2 : i32, i32
  }
  func.func @transform_1(%arg0: i32, %arg1: i32, %arg2: i32) -> (i32, i32) {
    %c0_i32 = arith.constant 0 : i32
    return %arg2, %arg1 : i32, i32
  }
  func.func @transform_2(%arg0: i32, %arg1: i32, %arg2: i32) -> (i32, i32) {
    %c0_i32 = arith.constant 0 : i32
    %c0_i32_0 = arith.constant 0 : i32
    return %c0_i32, %arg1 : i32, i32
  }
  func.func @transform_3(%arg0: i32, %arg1: i32, %arg2: i32) -> (i32, i32) {
    %c0_i32 = arith.constant 0 : i32
    return %arg0, %arg1 : i32, i32
  }
}

</mosaic_0001>

<bundles_post_ra>
// kernel: tpu_custom_call.1
= control target key start
LH: loop header
LB: loop body
LE: loop exit
PB: predicated region body
PF: predicated region fallthrough
CT: control target
= control target key end

     0   :  { %8 = vsyncpa [#allocation3], 0  ;;  %s12094_s0 = inlined_call_operand.hbm [shape: bf16[8,7168], index: 0, kind: input, shape index: {}]   ;;  %s12095_s1 = inlined_call_operand.hbm [shape: bf16[7168,256], index: 1, kind: input, shape index: {}]   ;;  %s12096_s2 = inlined_call_operand.hbm [shape: f32[1,256], index: 2, kind: input, shape index: {}]   ;;  %s12097_s3 = inlined_call_operand.hbm [shape: f32[8,256], index: 3, kind: output, shape index: {}]  }
   0x1   :  { %9 = vsyncpa [#allocation6], 0  ;;  %s26_s14 = sshll.u32 %s12095_s1, 4  ;;  %s27_s14 = int_to_ptr.hbm [resolvable:$true] %s26_s14 }
   0x2   :  { %10 = vsyncpa [#allocation4], 0  ;;  %s11751_s15 = smov [#allocation5]   ;;  %s16_s19 = sshll.u32 %s12094_s0, 4  ;;  %s17_s19 = int_to_ptr.hbm [resolvable:$true] %s16_s19 }
   0x3   :  { %s28_s16 = sshll.u32 %s11751_s15, 4  ;;  %s11752_s20 = smov 128   ;;  %s29_s16 = int_to_ptr.vmem [resolvable:$true] %s28_s16 }
   0x4   :  { %s11753_s21 = smov 8   ;;  %s11754_s22 = smov [#allocation2]  }
   0x5   :  { %34 = dma.hbm_to_vmem [thread:$0]  %s27_s14, 114688, %s29_s16, [#allocation6], %s11752_s20, %s11752_s20, %s11753_s21  }
   0x6   :  { %s18_s23 = sshll.u32 %s11754_s22, 4  ;;  %s40_s26 = sshll.u32 %s12096_s2, 4  ;;  %s19_s23 = int_to_ptr.vmem [resolvable:$true] %s18_s23  ;;  %s41_s26 = int_to_ptr.hbm [resolvable:$true] %s40_s26 }
   0x7   :  { %21 = dma.hbm_to_vmem [thread:$0]  %s17_s19, 3584, %s19_s23, [#allocation3]  }
   0x8   :  { %s11755_s1 = smov [#allocation7]  }
   0x9   :  { %s42_s27 = sshll.u32 %s11755_s1, 4  ;;  %s43_s27 = int_to_ptr.vmem [resolvable:$true] %s42_s27 }
   0xa   :  { %45 = dma.hbm_to_vmem [thread:$0]  %s41_s26, 32, %s43_s27, [#allocation6]  }
   0xb   :  { %11745 = dma.done.wait [#allocation3], 3584  }
   0xc   :  { %11746 = vsyncadd [#allocation3], 4294963712 }
   0xd   :  { %11747 = dma.done.wait [#allocation6], 114720  }
   0xe   :  { %11748 = vsyncadd [#allocation6], 4294852576  ;;  %v7219_v0 = vld [vmem:[#allocation5 + $0x70] sm:$0xf]  ;;  %v10760_v1 = vld [vmem:[#allocation5 + $0x74] sm:$0xf0] }
   0xf   :  { %v7283_v2 = vld [vmem:[#allocation5 + $0xf0] sm:$0xf]  ;;  %v7220_v3 = vor.u32 %v10760_v1, %v7219_v0  ;;  %v10776_v4 = vld [vmem:[#allocation5 + $0xf4] sm:$0xf0]  ;;  %v7211_v11 = vld [vmem:[#allocation5 + $0x60] sm:$0xf] }
  0x10   :  { %v7347_v5 = vld [vmem:[#allocation5 + $0x170] sm:$0xf]  ;;  %v10792_v6 = vld [vmem:[#allocation5 + $0x174] sm:$0xf0]  ;;  %v7284_v7 = vor.u32 %v10776_v4, %v7283_v2  ;;  %v10758_v13 = vld [vmem:[#allocation5 + $0x64] sm:$0xf0] }
  0x11   :  { %v7348_v8 = vor.u32 %v10792_v6, %v7347_v5  ;;  %v7411_v9 = vld [vmem:[#allocation5 + $0x1f0] sm:$0xf]  ;;  %v10808_v10 = vld [vmem:[#allocation5 + $0x1f4] sm:$0xf0]  ;;  %5666 = vmatpush.bf16.msra.mxu0 %v7220_v3  ;;  %v7275_v14 = vld [vmem:[#allocation5 + $0xe0] sm:$0xf]  ;;  %v7212_v16 = vor.u32 %v10758_v13, %v7211_v11 }
  0x12   :  { %v7412_v12 = vor.u32 %v10808_v10, %v7411_v9  ;;  %v10774_v15 = vld [vmem:[#allocation5 + $0xe4] sm:$0xf0]  ;;  %5679 = vmatpush.bf16.msra.mxu1 %v7284_v7  ;;  %v7339_v18 = vld [vmem:[#allocation5 + $0x160] sm:$0xf]  ;;  %v7203_v23 = vld [vmem:[#allocation5 + $0x50] sm:$0xf] }
  0x13   :  { %5692 = vmatpush.bf16.msra.mxu2 %v7348_v8  ;;  %v7276_v17 = vor.u32 %v10774_v15, %v7275_v14  ;;  %v10790_v19 = vld [vmem:[#allocation5 + $0x164] sm:$0xf0]  ;;  %v7403_v20 = vld [vmem:[#allocation5 + $0x1e0] sm:$0xf]  ;;  %v10756_v24 = vld [vmem:[#allocation5 + $0x54] sm:$0xf0] }
  0x14   :  { %5705 = vmatpush.bf16.msra.mxu3 %v7412_v12  ;;  %v7340_v21 = vor.u32 %v10790_v19, %v7339_v18  ;;  %v10806_v22 = vld [vmem:[#allocation5 + $0x1e4] sm:$0xf0]  ;;  %v7267_v26 = vld [vmem:[#allocation5 + $0xd0] sm:$0xf]  ;;  %v10772_v27 = vld [vmem:[#allocation5 + $0xd4] sm:$0xf0]  ;;  %v7204_v29 = vor.u32 %v10756_v24, %v7203_v23 }
  0x15   :  { %v7404_v25 = vor.u32 %v10806_v22, %v7403_v20  ;;  %v7331_v28 = vld [vmem:[#allocation5 + $0x150] sm:$0xf]  ;;  %5667 = vmatpush.bf16.msra.mxu0 %v7212_v16  ;;  %v10788_v30 = vld [vmem:[#allocation5 + $0x154] sm:$0xf0]  ;;  %v7268_v33 = vor.u32 %v10772_v27, %v7267_v26  ;;  %v7195_v35 = vld [vmem:[#allocation5 + $0x40] sm:$0xf] }
  0x16   :  { %v7395_v31 = vld [vmem:[#allocation5 + $0x1d0] sm:$0xf]  ;;  %v10804_v32 = vld [vmem:[#allocation5 + $0x1d4] sm:$0xf0]  ;;  %5680 = vmatpush.bf16.msra.mxu1 %v7276_v17  ;;  %v7332_v34 = vor.u32 %v10788_v30, %v7331_v28  ;;  %v10754_v36 = vld [vmem:[#allocation5 + $0x44] sm:$0xf0] }
  0x17   :  { %5693 = vmatpush.bf16.msra.mxu2 %v7340_v21  ;;  %v7259_v37 = vld [vmem:[#allocation5 + $0xc0] sm:$0xf]  ;;  %v7396_v38 = vor.u32 %v10804_v32, %v7395_v31  ;;  %v10770_v39 = vld [vmem:[#allocation5 + $0xc4] sm:$0xf0]  ;;  %v7196_v44 = vor.u32 %v10754_v36, %v7195_v35  ;;  %v7187_v47 = vld [vmem:[#allocation5 + $0x30] sm:$0xf] }
  0x18   :  { %5706 = vmatpush.bf16.msra.mxu3 %v7404_v25  ;;  %v7323_v40 = vld [vmem:[#allocation5 + $0x140] sm:$0xf]  ;;  %v10786_v41 = vld [vmem:[#allocation5 + $0x144] sm:$0xf0]  ;;  %v7260_v45 = vor.u32 %v10770_v39, %v7259_v37  ;;  %v10752_v48 = vld [vmem:[#allocation5 + $0x34] sm:$0xf0] }
  0x19   :  { %v7387_v42 = vld [vmem:[#allocation5 + $0x1c0] sm:$0xf]  ;;  %v10802_v43 = vld [vmem:[#allocation5 + $0x1c4] sm:$0xf0]  ;;  %5668 = vmatpush.bf16.msra.mxu0 %v7204_v29  ;;  %v7324_v46 = vor.u32 %v10786_v41, %v7323_v40  ;;  %v7251_v49 = vld [vmem:[#allocation5 + $0xb0] sm:$0xf]  ;;  %v7188_v56 = vor.u32 %v10752_v48, %v7187_v47 }
  0x1a   :  { %5681 = vmatpush.bf16.msra.mxu1 %v7268_v33  ;;  %v7388_v50 = vor.u32 %v10802_v43, %v7387_v42  ;;  %v10768_v51 = vld [vmem:[#allocation5 + $0xb4] sm:$0xf0]  ;;  %v7315_v52 = vld [vmem:[#allocation5 + $0x130] sm:$0xf]  ;;  %v7179_v59 = vld [vmem:[#allocation5 + $0x20] sm:$0xf] }
  0x1b   :  { %5694 = vmatpush.bf16.msra.mxu2 %v7332_v34  ;;  %v10784_v53 = vld [vmem:[#allocation5 + $0x134] sm:$0xf0]  ;;  %v7379_v54 = vld [vmem:[#allocation5 + $0x1b0] sm:$0xf]  ;;  %v7252_v57 = vor.u32 %v10768_v51, %v7251_v49  ;;  %v10750_v60 = vld [vmem:[#allocation5 + $0x24] sm:$0xf0] }
  0x1c   :  { %5707 = vmatpush.bf16.msra.mxu3 %v7396_v38  ;;  %v10800_v55 = vld [vmem:[#allocation5 + $0x1b4] sm:$0xf0]  ;;  %v7316_v58 = vor.u32 %v10784_v53, %v7315_v52  ;;  %v7243_v61 = vld [vmem:[#allocation5 + $0xa0] sm:$0xf]  ;;  %v10766_v63 = vld [vmem:[#allocation5 + $0xa4] sm:$0xf0]  ;;  %v7180_v4 = vor.u32 %v10750_v60, %v7179_v59 }
  0x1d   :  { %5669 = vmatpush.bf16.msra.mxu0 %v7196_v44  ;;  %v7380_v62 = vor.u32 %v10800_v55, %v7379_v54  ;;  %v7307_v0 = vld [vmem:[#allocation5 + $0x120] sm:$0xf]  ;;  %v10782_v1 = vld [vmem:[#allocation5 + $0x124] sm:$0xf0]  ;;  %v7244_v5 = vor.u32 %v10766_v63, %v7243_v61  ;;  %v7171_v7 = vld [vmem:[#allocation5 + $0x10] sm:$0xf] }
  0x1e   :  { %5682 = vmatpush.bf16.msra.mxu1 %v7260_v45  ;;  %v7371_v2 = vld [vmem:[#allocation5 + $0x1a0] sm:$0xf]  ;;  %v10798_v3 = vld [vmem:[#allocation5 + $0x1a4] sm:$0xf0]  ;;  %v7308_v6 = vor.u32 %v10782_v1, %v7307_v0  ;;  %v10748_v8 = vld [vmem:[#allocation5 + $0x14] sm:$0xf0] }
  0x1f   :  { %5695 = vmatpush.bf16.msra.mxu2 %v7324_v46  ;;  %v7235_v9 = vld [vmem:[#allocation5 + $0x90] sm:$0xf]  ;;  %v7372_v10 = vor.u32 %v10798_v3, %v7371_v2  ;;  %v10764_v11 = vld [vmem:[#allocation5 + $0x94] sm:$0xf0]  ;;  %v7172_v16 = vor.u32 %v10748_v8, %v7171_v7  ;;  %v7163_v17 = vld [vmem:[#allocation5] sm:$0xf] }
  0x20   :  { %5708 = vmatpush.bf16.msra.mxu3 %v7388_v50  ;;  %v7299_v12 = vld [vmem:[#allocation5 + $0x110] sm:$0xf]  ;;  %v10780_v13 = vld [vmem:[#allocation5 + $0x114] sm:$0xf0]  ;;  %v10746_v18 = vld [vmem:[#allocation5 + $0x4] sm:$0xf0]  ;;  %v7236_v19 = vor.u32 %v10764_v11, %v7235_v9 }
  0x21   :  { %5670 = vmatpush.bf16.msra.mxu0 %v7188_v56  ;;  %v7363_v14 = vld [vmem:[#allocation5 + $0x190] sm:$0xf]  ;;  %v10796_v15 = vld [vmem:[#allocation5 + $0x194] sm:$0xf0]  ;;  %v7300_v20 = vor.u32 %v10780_v13, %v7299_v12  ;;  %v7227_v21 = vld [vmem:[#allocation5 + $0x80] sm:$0xf]  ;;  %v7164_v31 = vor.u32 %v10746_v18, %v7163_v17 }
  0x22   :  { %5683 = vmatpush.bf16.msra.mxu1 %v7252_v57  ;;  %v10762_v22 = vld [vmem:[#allocation5 + $0x84] sm:$0xf0]  ;;  %v7291_v23 = vld [vmem:[#allocation5 + $0x100] sm:$0xf]  ;;  %v7364_v24 = vor.u32 %v10796_v15, %v7363_v14  ;;  %v7475_v28 = vld [vmem:[#allocation5 + $0x270] sm:$0xf] }
  0x23   :  { %5696 = vmatpush.bf16.msra.mxu2 %v7316_v58  ;;  %v10778_v25 = vld [vmem:[#allocation5 + $0x104] sm:$0xf0]  ;;  %v7355_v26 = vld [vmem:[#allocation5 + $0x180] sm:$0xf]  ;;  %v10824_v29 = vld [vmem:[#allocation5 + $0x274] sm:$0xf0]  ;;  %v7228_v35 = vor.u32 %v10762_v22, %v7227_v21 }
  0x24   :  { %5709 = vmatpush.bf16.msra.mxu3 %v7380_v62  ;;  %v10794_v27 = vld [vmem:[#allocation5 + $0x184] sm:$0xf0]  ;;  %v7539_v30 = vld [vmem:[#allocation5 + $0x2f0] sm:$0xf]  ;;  %v10840_v32 = vld [vmem:[#allocation5 + $0x2f4] sm:$0xf0]  ;;  %v7292_v36 = vor.u32 %v10778_v25, %v7291_v23  ;;  %v7476_v40 = vor.u32 %v10824_v29, %v7475_v28 }
  0x25   :  { %5671 = vmatpush.bf16.msra.mxu0 %v7180_v4  ;;  %v7603_v33 = vld [vmem:[#allocation5 + $0x370] sm:$0xf]  ;;  %v10856_v34 = vld [vmem:[#allocation5 + $0x374] sm:$0xf0]  ;;  %v7356_v39 = vor.u32 %v10794_v27, %v7355_v26  ;;  %v7540_v41 = vor.u32 %v10840_v32, %v7539_v30  ;;  %v7467_v43 = vld [vmem:[#allocation5 + $0x260] sm:$0xf] }
  0x26   :  { %5684 = vmatpush.bf16.msra.mxu1 %v7244_v5  ;;  %v7667_v37 = vld [vmem:[#allocation5 + $0x3f0] sm:$0xf]  ;;  %v10872_v38 = vld [vmem:[#allocation5 + $0x3f4] sm:$0xf0]  ;;  %v7604_v42 = vor.u32 %v10856_v34, %v7603_v33  ;;  %v10822_v44 = vld [vmem:[#allocation5 + $0x264] sm:$0xf0] }
  0x27   :  { %5697 = vmatpush.bf16.msra.mxu2 %v7308_v6  ;;  %v7531_v45 = vld [vmem:[#allocation5 + $0x2e0] sm:$0xf]  ;;  %v7668_v46 = vor.u32 %v10872_v38, %v7667_v37  ;;  %v10838_v47 = vld [vmem:[#allocation5 + $0x2e4] sm:$0xf0]  ;;  %v7468_v52 = vor.u32 %v10822_v44, %v7467_v43  ;;  %v7459_v53 = vld [vmem:[#allocation5 + $0x250] sm:$0xf] }
  0x28   :  { %5710 = vmatpush.bf16.msra.mxu3 %v7372_v10  ;;  %v7595_v48 = vld [vmem:[#allocation5 + $0x360] sm:$0xf]  ;;  %v10854_v49 = vld [vmem:[#allocation5 + $0x364] sm:$0xf0]  ;;  %v7532_v54 = vor.u32 %v10838_v47, %v7531_v45  ;;  %v10820_v56 = vld [vmem:[#allocation5 + $0x254] sm:$0xf0] }
  0x29   :  { %5672 = vmatpush.bf16.msra.mxu0 %v7172_v16  ;;  %v7659_v50 = vld [vmem:[#allocation5 + $0x3e0] sm:$0xf]  ;;  %v10870_v51 = vld [vmem:[#allocation5 + $0x3e4] sm:$0xf0]  ;;  %v7596_v55 = vor.u32 %v10854_v49, %v7595_v48  ;;  %v7523_v57 = vld [vmem:[#allocation5 + $0x2d0] sm:$0xf]  ;;  %v7460_v3 = vor.u32 %v10820_v56, %v7459_v53 }
  0x2a   :  { %5685 = vmatpush.bf16.msra.mxu1 %v7236_v19  ;;  %v67_v58 = vld [vmem:[#allocation2 + $0x8] sm:$0xff]  ;;  %v7660_v59 = vor.u32 %v10870_v51, %v7659_v50  ;;  %v10836_v60 = vld [vmem:[#allocation5 + $0x2d4] sm:$0xf0]  ;;  %v7587_v61 = vld [vmem:[#allocation5 + $0x350] sm:$0xf]  ;;  %s11756_s0 = smov [#allocation8]  }
  0x2b   :  { %5698 = vmatpush.bf16.msra.mxu2 %v7300_v20  ;;  %v10852_v62 = vld [vmem:[#allocation5 + $0x354] sm:$0xf0]  ;;  %v1020_v63 = vunpack.c.l.b16 %v67_v58  ;;  %v1021_v0 = vunpack.c.h.b16 %v67_v58  ;;  %v7651_v1 = vld [vmem:[#allocation5 + $0x3d0] sm:$0xf]  ;;  %v66_v5 = vld [vmem:[#allocation2] sm:$0xff]  ;;  %v7524_v7 = vor.u32 %v10836_v60, %v7523_v57  ;;  %s7148_s2 = sshll.u32 %s11756_s0, 4  ;;  %s7149_s2 = int_to_ptr.vmem [resolvable:$true] %s7148_s2 }
  0x2c   :  { %5711 = vmatpush.bf16.msra.mxu3 %v7364_v24  ;;  %v10868_v2 = vld [vmem:[#allocation5 + $0x3d4] sm:$0xf0]  ;;  %v7588_v8 = vor.u32 %v10852_v62, %v7587_v61  ;;  %v7451_v9 = vld [vmem:[#allocation5 + $0x240] sm:$0xf]  ;;  %v10818_v10 = vld [vmem:[#allocation5 + $0x244] sm:$0xf0]  ;;  %v1018_v12 = vunpack.c.l.b16 %v66_v5  ;;  %v1019_v13 = vunpack.c.h.b16 %v66_v5 }
  0x2d   :  { %5673 = vmatpush.bf16.msra.mxu0 %v7164_v31  ;;  %v11786_v4 = vpack.c.b16 %v1020_v63, %v1020_v63  ;;  %v11788_v6 = vpack.c.b16 %v1021_v0, %v1021_v0  ;;  %v7515_v11 = vld [vmem:[#allocation5 + $0x2c0] sm:$0xf]  ;;  %v7652_v14 = vor.u32 %v10868_v2, %v7651_v1  ;;  %v10834_v15 = vld [vmem:[#allocation5 + $0x2c4] sm:$0xf0]  ;;  %v7452_v22 = vor.u32 %v10818_v10, %v7451_v9  ;;  %v7443_v25 = vld [vmem:[#allocation5 + $0x230] sm:$0xf] }
  0x2e   :  { %5686 = vmatpush.bf16.msra.mxu1 %v7228_v35  ;;  %v7579_v16 = vld [vmem:[#allocation5 + $0x340] sm:$0xf]  ;;  %v10850_v17 = vld [vmem:[#allocation5 + $0x344] sm:$0xf0]  ;;  %v11791_v20 = vpack.c.b16 %v1018_v12, %v1018_v12  ;;  %v11794_v21 = vpack.c.b16 %v1019_v13, %v1019_v13  ;;  %v7516_v23 = vor.u32 %v10834_v15, %v7515_v11  ;;  %v10816_v26 = vld [vmem:[#allocation5 + $0x234] sm:$0xf0] }
  0x2f   :  { %5699 = vmatpush.bf16.msra.mxu2 %v7292_v36  ;;  %v7643_v18 = vld [vmem:[#allocation5 + $0x3c0] sm:$0xf]  ;;  %v10866_v19 = vld [vmem:[#allocation5 + $0x3c4] sm:$0xf0]  ;;  %v7580_v24 = vor.u32 %v10850_v17, %v7579_v16  ;;  %v7507_v27 = vld [vmem:[#allocation5 + $0x2b0] sm:$0xf]  ;;  %v7444_v34 = vor.u32 %v10816_v26, %v7443_v25 }
  0x30   :  { %5712 = vmatpush.bf16.msra.mxu3 %v7356_v39  ;;  %v7644_v28 = vor.u32 %v10866_v19, %v7643_v18  ;;  %v10832_v29 = vld [vmem:[#allocation5 + $0x2b4] sm:$0xf0]  ;;  %v7571_v30 = vld [vmem:[#allocation5 + $0x330] sm:$0xf]  ;;  %5674 = vmatmul.bf16.vlgmr.msra.gmra.mxu0 %v11791_v20  ;;  %v7435_v37 = vld [vmem:[#allocation5 + $0x220] sm:$0xf] }
  0x31   :  { %5718 = vmatpush.bf16.msrb.mxu0 %v7476_v40  ;;  %v10848_v31 = vld [vmem:[#allocation5 + $0x334] sm:$0xf0]  ;;  %v7635_v32 = vld [vmem:[#allocation5 + $0x3b0] sm:$0xf]  ;;  %5687 = vmatmul.bf16.vlgmr.msra.gmra.mxu1 %v11794_v21  ;;  %v7508_v35 = vor.u32 %v10832_v29, %v7507_v27  ;;  %v10814_v38 = vld [vmem:[#allocation5 + $0x224] sm:$0xf0] }
  0x32   :  { %5731 = vmatpush.bf16.msrb.mxu1 %v7540_v41  ;;  %5700 = vmatmul.bf16.vlgmr.msra.gmra.mxu2 %v11786_v4  ;;  %v10864_v33 = vld [vmem:[#allocation5 + $0x3b4] sm:$0xf0]  ;;  %v7572_v36 = vor.u32 %v10848_v31, %v7571_v30  ;;  %v7499_v39 = vld [vmem:[#allocation5 + $0x2a0] sm:$0xf]  ;;  %v10830_v41 = vld [vmem:[#allocation5 + $0x2a4] sm:$0xf0] }
  0x33   :  { %5744 = vmatpush.bf16.msrb.mxu2 %v7604_v42  ;;  %5713 = vmatmul.bf16.vlgmr.msra.gmra.mxu3 %v11788_v6  ;;  %v7636_v40 = vor.u32 %v10864_v33, %v7635_v32  ;;  %v7563_v42 = vld [vmem:[#allocation5 + $0x320] sm:$0xf]  ;;  %v10846_v43 = vld [vmem:[#allocation5 + $0x324] sm:$0xf0]  ;;  %v7500_v47 = vor.u32 %v10830_v41, %v7499_v39  ;;  %v7427_v49 = vld [vmem:[#allocation5 + $0x210] sm:$0xf] }
  0x34   :  { %5757 = vmatpush.bf16.msrb.mxu3 %v7668_v46  ;;  %v7627_v44 = vld [vmem:[#allocation5 + $0x3a0] sm:$0xf]  ;;  %v10862_v45 = vld [vmem:[#allocation5 + $0x3a4] sm:$0xf0]  ;;  %v7436_v46 = vor.u32 %v10814_v38, %v7435_v37  ;;  %v7564_v48 = vor.u32 %v10846_v43, %v7563_v42  ;;  %v10812_v50 = vld [vmem:[#allocation5 + $0x214] sm:$0xf0] }
  0x35   :  { %5719 = vmatpush.bf16.msrb.mxu0 %v7468_v52  ;;  %v7491_v51 = vld [vmem:[#allocation5 + $0x290] sm:$0xf]  ;;  %v7628_v52 = vor.u32 %v10862_v45, %v7627_v44  ;;  %v10828_v53 = vld [vmem:[#allocation5 + $0x294] sm:$0xf0]  ;;  %v7419_v58 = vld [vmem:[#allocation5 + $0x200] sm:$0xf] }
  0x36   :  { %5732 = vmatpush.bf16.msrb.mxu1 %v7532_v54  ;;  %v7555_v54 = vld [vmem:[#allocation5 + $0x310] sm:$0xf]  ;;  %v10860_v57 = vld [vmem:[#allocation5 + $0x394] sm:$0xf0]  ;;  %v10810_v60 = vld [vmem:[#allocation5 + $0x204] sm:$0xf0]  ;;  %v7492_v63 = vor.u32 %v10828_v53, %v7491_v51 }
  0x37   :  { %5745 = vmatpush.bf16.msrb.mxu2 %v7596_v55  ;;  %v10844_v55 = vld [vmem:[#allocation5 + $0x314] sm:$0xf0]  ;;  %v7619_v56 = vld [vmem:[#allocation5 + $0x390] sm:$0xf]  ;;  %v7483_v61 = vld [vmem:[#allocation5 + $0x280] sm:$0xf]  ;;  %v7420_v13 = vor.u32 %v10810_v60, %v7419_v58 }
  0x38   :  { %5758 = vmatpush.bf16.msrb.mxu3 %v7660_v59  ;;  %v7428_v59 = vor.u32 %v10812_v50, %v7427_v49  ;;  %v10826_v62 = vld [vmem:[#allocation5 + $0x284] sm:$0xf0]  ;;  %v7556_v0 = vor.u32 %v10844_v55, %v7555_v54  ;;  %v7547_v1 = vld [vmem:[#allocation5 + $0x300] sm:$0xf]  ;;  %v7620_v5 = vor.u32 %v10860_v57, %v7619_v56  ;;  %v68_v9 = vld [vmem:[#allocation2 + $0x10] sm:$0xff]  ;;  %s7150_s30 = sshll.u32 %s12097_s3, 4  ;;  %s7151_s30 = int_to_ptr.hbm [resolvable:$true] %s7150_s30 }
  0x39   :  { %5720 = vmatpush.bf16.msrb.mxu0 %v7460_v3  ;;  %v10842_v2 = vld [vmem:[#allocation5 + $0x304] sm:$0xf0]  ;;  %v69_v3 = vld [vmem:[#allocation2 + $0x18] sm:$0xff]  ;;  %v7731_v10 = vld [vmem:[#allocation5 + $0x470] sm:$0xf]  ;;  %v7484_v18 = vor.u32 %v10826_v62, %v7483_v61 }
  0x3a   :  { %5733 = vmatpush.bf16.msrb.mxu1 %v7524_v7  ;;  %v7611_v7 = vld [vmem:[#allocation5 + $0x380] sm:$0xf]  ;;  %v10888_v11 = vld [vmem:[#allocation5 + $0x474] sm:$0xf0]  ;;  %v7795_v12 = vld [vmem:[#allocation5 + $0x4f0] sm:$0xf]  ;;  %v1024_v17 = vunpack.c.l.b16 %v69_v3  ;;  %v7548_v19 = vor.u32 %v10842_v2, %v7547_v1  ;;  %v1025_v25 = vunpack.c.h.b16 %v69_v3 }
  0x3b   :  { %5746 = vmatpush.bf16.msrb.mxu2 %v7588_v8  ;;  %v10858_v8 = vld [vmem:[#allocation5 + $0x384] sm:$0xf0]  ;;  %v7859_v15 = vld [vmem:[#allocation5 + $0x570] sm:$0xf]  ;;  %v10920_v16 = vld [vmem:[#allocation5 + $0x574] sm:$0xf0]  ;;  %v7732_v27 = vor.u32 %v10888_v11, %v7731_v10 }
  0x3c   :  { %5759 = vmatpush.bf16.msrb.mxu3 %v7652_v14  ;;  %v10904_v14 = vld [vmem:[#allocation5 + $0x4f4] sm:$0xf0]  ;;  %v7612_v26 = vor.u32 %v10858_v8, %v7611_v7  ;;  %v7860_v30 = vor.u32 %v10920_v16, %v7859_v15  ;;  %v7723_v31 = vld [vmem:[#allocation5 + $0x460] sm:$0xf]  ;;  %v10886_v32 = vld [vmem:[#allocation5 + $0x464] sm:$0xf0]  ;;  %v11798_v38 = vpack.c.b16 %v1024_v17, %v1024_v17  ;;  %v11802_v42 = vpack.c.b16 %v1025_v25, %v1025_v25 }
  0x3d   :  { %5721 = vmatpush.bf16.msrb.mxu0 %v7452_v22  ;;  %v7923_v22 = vld [vmem:[#allocation5 + $0x5f0] sm:$0xf]  ;;  %v7796_v29 = vor.u32 %v10904_v14, %v7795_v12  ;;  %v7787_v33 = vld [vmem:[#allocation5 + $0x4e0] sm:$0xf]  ;;  %v10918_v37 = vld [vmem:[#allocation5 + $0x564] sm:$0xf0]  ;;  %v7724_v43 = vor.u32 %v10886_v32, %v7723_v31 }
  0x3e   :  { %5734 = vmatpush.bf16.msrb.mxu1 %v7516_v23  ;;  %v10936_v23 = vld [vmem:[#allocation5 + $0x5f4] sm:$0xf0]  ;;  %v7915_v39 = vld [vmem:[#allocation5 + $0x5e0] sm:$0xf]  ;;  %v7779_v49 = vld [vmem:[#allocation5 + $0x4d0] sm:$0xf] }
  0x3f   :  { %5747 = vmatpush.bf16.msrb.mxu2 %v7580_v24  ;;  %v1022_v24 = vunpack.c.l.b16 %v68_v9  ;;  %v10900_v51 = vld [vmem:[#allocation5 + $0x4d4] sm:$0xf0]  ;;  %v7907_v54 = vld [vmem:[#allocation5 + $0x5d0] sm:$0xf]  ;;  %v10882_v60 = vld [vmem:[#allocation5 + $0x444] sm:$0xf0] }
  0x40   :  { %5760 = vmatpush.bf16.msrb.mxu3 %v7644_v28  ;;  %v1023_v28 = vunpack.c.h.b16 %v68_v9  ;;  %v10916_v53 = vld [vmem:[#allocation5 + $0x554] sm:$0xf0]  ;;  %v7780_v57 = vor.u32 %v10900_v51, %v7779_v49  ;;  %v7771_v61 = vld [vmem:[#allocation5 + $0x4c0] sm:$0xf]  ;;  %v10914_v1 = vld [vmem:[#allocation5 + $0x544] sm:$0xf0] }
  0x41   :  { %5722 = vmatpush.bf16.msrb.mxu0 %v7444_v34  ;;  %v7924_v34 = vor.u32 %v10936_v23, %v7923_v22  ;;  %v11800_v41 = vpack.c.b16 %v1022_v24, %v1022_v24  ;;  %v10932_v55 = vld [vmem:[#allocation5 + $0x5d4] sm:$0xf0]  ;;  %v7899_v2 = vld [vmem:[#allocation5 + $0x5c0] sm:$0xf]  ;;  %v10930_v3 = vld [vmem:[#allocation5 + $0x5c4] sm:$0xf0] }
  0x42   :  { %5735 = vmatpush.bf16.msrb.mxu1 %v7508_v35  ;;  %v10902_v35 = vld [vmem:[#allocation5 + $0x4e4] sm:$0xf0]  ;;  %v11804_v44 = vpack.c.b16 %v1023_v28, %v1023_v28  ;;  %v7908_v62 = vor.u32 %v10932_v55, %v7907_v54  ;;  %v7699_v9 = vld [vmem:[#allocation5 + $0x430] sm:$0xf]  ;;  %v10880_v10 = vld [vmem:[#allocation5 + $0x434] sm:$0xf0]  ;;  %v7900_v12 = vor.u32 %v10930_v3, %v7899_v2 }
  0x43   :  { %5748 = vmatpush.bf16.msrb.mxu2 %v7572_v36  ;;  %v7851_v36 = vld [vmem:[#allocation5 + $0x560] sm:$0xf]  ;;  %v7788_v45 = vor.u32 %v10902_v35, %v7787_v33  ;;  %v7763_v11 = vld [vmem:[#allocation5 + $0x4b0] sm:$0xf]  ;;  %v10912_v15 = vld [vmem:[#allocation5 + $0x534] sm:$0xf0] }
  0x44   :  { %5761 = vmatpush.bf16.msrb.mxu3 %v7636_v40  ;;  %v10934_v40 = vld [vmem:[#allocation5 + $0x5e4] sm:$0xf0]  ;;  %v7827_v14 = vld [vmem:[#allocation5 + $0x530] sm:$0xf]  ;;  %v10928_v17 = vld [vmem:[#allocation5 + $0x5b4] sm:$0xf0] }
  0x45   :  { %5723 = vmatpush.bf16.msrb.mxu0 %v7436_v46  ;;  %v7852_v46 = vor.u32 %v10918_v37, %v7851_v36  ;;  %v7916_v50 = vor.u32 %v10934_v40, %v7915_v39  ;;  %v7891_v16 = vld [vmem:[#allocation5 + $0x5b0] sm:$0xf]  ;;  %v7828_v22 = vor.u32 %v10912_v15, %v7827_v14  ;;  %v7691_v23 = vld [vmem:[#allocation5 + $0x420] sm:$0xf]  ;;  %v10878_v24 = vld [vmem:[#allocation5 + $0x424] sm:$0xf0] }
  0x46   :  { %5736 = vmatpush.bf16.msrb.mxu1 %v7500_v47  ;;  %v7715_v47 = vld [vmem:[#allocation5 + $0x450] sm:$0xf]  ;;  %v7755_v25 = vld [vmem:[#allocation5 + $0x4a0] sm:$0xf]  ;;  %v10926_v31 = vld [vmem:[#allocation5 + $0x5a4] sm:$0xf0]  ;;  %v7692_v32 = vor.u32 %v10878_v24, %v7691_v23 }
  0x47   :  { %5749 = vmatpush.bf16.msrb.mxu2 %v7564_v48  ;;  %v10884_v48 = vld [vmem:[#allocation5 + $0x454] sm:$0xf0]  ;;  %v7819_v28 = vld [vmem:[#allocation5 + $0x520] sm:$0xf]  ;;  %v7683_v35 = vld [vmem:[#allocation5 + $0x410] sm:$0xf] }
  0x48   :  { %5762 = vmatpush.bf16.msrb.mxu3 %v7628_v52  ;;  %v7843_v52 = vld [vmem:[#allocation5 + $0x550] sm:$0xf]  ;;  %v7716_v56 = vor.u32 %v10884_v48, %v7715_v47  ;;  %v10876_v36 = vld [vmem:[#allocation5 + $0x414] sm:$0xf0]  ;;  %v7675_v48 = vld [vmem:[#allocation5 + $0x400] sm:$0xf] }
  0x49   :  { %5724 = vmatpush.bf16.msrb.mxu0 %v7428_v59  ;;  %v7844_v58 = vor.u32 %v10916_v53, %v7843_v52  ;;  %v7707_v59 = vld [vmem:[#allocation5 + $0x440] sm:$0xf]  ;;  %v7747_v37 = vld [vmem:[#allocation5 + $0x490] sm:$0xf]  ;;  %v10892_v40 = vld [vmem:[#allocation5 + $0x494] sm:$0xf0]  ;;  %v7684_v49 = vor.u32 %v10876_v36, %v7683_v35 }
  0x4a   :  { %5737 = vmatpush.bf16.msrb.mxu1 %v7492_v63  ;;  %v10898_v63 = vld [vmem:[#allocation5 + $0x4c4] sm:$0xf0]  ;;  %v10924_v47 = vld [vmem:[#allocation5 + $0x594] sm:$0xf0]  ;;  %v7739_v51 = vld [vmem:[#allocation5 + $0x480] sm:$0xf]  ;;  %v7748_v53 = vor.u32 %v10892_v40, %v7747_v37 }
  0x4b   :  { %5750 = vmatpush.bf16.msrb.mxu2 %v7556_v0  ;;  %v7835_v0 = vld [vmem:[#allocation5 + $0x540] sm:$0xf]  ;;  %v7772_v7 = vor.u32 %v10898_v63, %v7771_v61  ;;  %v10890_v52 = vld [vmem:[#allocation5 + $0x484] sm:$0xf0]  ;;  %v10952_v63 = vld [vmem:[#allocation5 + $0x674] sm:$0xf0] }
  0x4c   :  { %5763 = vmatpush.bf16.msrb.mxu3 %v7620_v5  ;;  %v7708_v5 = vor.u32 %v10882_v60, %v7707_v59  ;;  %v7836_v8 = vor.u32 %v10914_v1, %v7835_v0  ;;  %v7803_v55 = vld [vmem:[#allocation5 + $0x500] sm:$0xf]  ;;  %v10922_v60 = vld [vmem:[#allocation5 + $0x584] sm:$0xf0]  ;;  %v8051_v0 = vld [vmem:[#allocation5 + $0x6f0] sm:$0xf] }
  0x4d   :  { %5725 = vmatpush.bf16.msrb.mxu0 %v7420_v13  ;;  %v10896_v13 = vld [vmem:[#allocation5 + $0x4b4] sm:$0xf0]  ;;  %v7867_v59 = vld [vmem:[#allocation5 + $0x580] sm:$0xf]  ;;  %v71_v61 = vld [vmem:[#allocation2 + $0x28] sm:$0xff] }
  0x4e   :  { %5738 = vmatpush.bf16.msrb.mxu1 %v7484_v18  ;;  %v7700_v18 = vor.u32 %v10880_v10, %v7699_v9  ;;  %v10968_v2 = vld [vmem:[#allocation5 + $0x6f4] sm:$0xf0]  ;;  %v8115_v3 = vld [vmem:[#allocation5 + $0x770] sm:$0xf]  ;;  %v7868_v14 = vor.u32 %v10922_v60, %v7867_v59  ;;  %v8043_v23 = vld [vmem:[#allocation5 + $0x6e0] sm:$0xf] }
  0x4f   :  { %5751 = vmatpush.bf16.msrb.mxu2 %v7548_v19  ;;  %v7764_v19 = vor.u32 %v10896_v13, %v7763_v11  ;;  %v8179_v10 = vld [vmem:[#allocation5 + $0x7f0] sm:$0xf]  ;;  %v11000_v11 = vld [vmem:[#allocation5 + $0x7f4] sm:$0xf0]  ;;  %v10978_v59 = vld [vmem:[#allocation5 + $0x744] sm:$0xf0] }
  0x50   :  { %5764 = vmatpush.bf16.msrb.mxu3 %v7612_v26  ;;  %5726 = vmatmul.bf16.vlgmr.msrb.gmra.mxu0 %v11800_v41  ;;  %v7892_v26 = vor.u32 %v10928_v17, %v7891_v16  ;;  %v1029_v16 = vunpack.c.h.b16 %v71_v61  ;;  %v8052_v17 = vor.u32 %v10968_v2, %v8051_v0  ;;  %v8180_v24 = vor.u32 %v11000_v11, %v8179_v10  ;;  %v7971_v37 = vld [vmem:[#allocation5 + $0x650] sm:$0xf]  ;;  %v8155_v60 = vld [vmem:[#allocation5 + $0x7c0] sm:$0xf]  ;;  %v10944_v2 = vld [vmem:[#allocation5 + $0x634] sm:$0xf0] }
  0x51   :  { %5770 = vmatpush.bf16.msra.mxu0 %v7732_v27  ;;  %5739 = vmatmul.bf16.vlgmr.msrb.gmra.mxu1 %v11804_v44  ;;  %v10894_v27 = vld [vmem:[#allocation5 + $0x4a4] sm:$0xf0]  ;;  %v8035_v40 = vld [vmem:[#allocation5 + $0x6d0] sm:$0xf]  ;;  %v10992_v11 = vld [vmem:[#allocation5 + $0x7b4] sm:$0xf0] }
  0x52   :  { %5783 = vmatpush.bf16.msra.mxu1 %v7796_v29  ;;  %5752 = vmatmul.bf16.vlgmr.msrb.gmra.mxu2 %v11798_v38  ;;  %v10910_v29 = vld [vmem:[#allocation5 + $0x524] sm:$0xf0]  ;;  %v7756_v33 = vor.u32 %v10894_v27, %v7755_v25  ;;  %v8107_v27 = vld [vmem:[#allocation5 + $0x760] sm:$0xf]  ;;  %v8147_v10 = vld [vmem:[#allocation5 + $0x7b0] sm:$0xf] }
  0x53   :  { %5796 = vmatpush.bf16.msra.mxu2 %v7860_v30  ;;  %5765 = vmatmul.bf16.vlgmr.msrb.gmra.mxu3 %v11802_v42  ;;  %v7883_v30 = vld [vmem:[#allocation5 + $0x5a0] sm:$0xf] }
  0x54   :  { %5809 = vmatpush.bf16.msra.mxu3 %v7924_v34  ;;  %v7820_v34 = vor.u32 %v10910_v29, %v7819_v28  ;;  %v7884_v39 = vor.u32 %v10926_v31, %v7883_v30  ;;  %v10982_v28 = vld [vmem:[#allocation5 + $0x764] sm:$0xf0]  ;;  %v8171_v31 = vld [vmem:[#allocation5 + $0x7e0] sm:$0xf] }
  0x55   :  { %5771 = vmatpush.bf16.msra.mxu0 %v7724_v43  ;;  %v7811_v43 = vld [vmem:[#allocation5 + $0x510] sm:$0xf]  ;;  %v8108_v36 = vor.u32 %v10982_v28, %v8107_v27 }
  0x56   :  { %5784 = vmatpush.bf16.msra.mxu1 %v7788_v45  ;;  %v10908_v45 = vld [vmem:[#allocation5 + $0x514] sm:$0xf0] }
  0x57   :  { %5797 = vmatpush.bf16.msra.mxu2 %v7852_v46  ;;  %v7875_v46 = vld [vmem:[#allocation5 + $0x590] sm:$0xf]  ;;  %v7812_v54 = vor.u32 %v10908_v45, %v7811_v43  ;;  %v10964_v45 = vld [vmem:[#allocation5 + $0x6d4] sm:$0xf0] }
  0x58   :  { %5810 = vmatpush.bf16.msra.mxu3 %v7916_v50  ;;  %v10874_v50 = vld [vmem:[#allocation5 + $0x404] sm:$0xf0] }
  0x59   :  { %5772 = vmatpush.bf16.msra.mxu0 %v7716_v56  ;;  %v10906_v56 = vld [vmem:[#allocation5 + $0x504] sm:$0xf0]  ;;  %v7676_v1 = vor.u32 %v10874_v50, %v7675_v48  ;;  %v8163_v48 = vld [vmem:[#allocation5 + $0x7d0] sm:$0xf] }
  0x5a   :  { %5785 = vmatpush.bf16.msra.mxu1 %v7780_v57  ;;  %v70_v57 = vld [vmem:[#allocation2 + $0x20] sm:$0xff]  ;;  %v7804_v9 = vor.u32 %v10906_v56, %v7803_v55 }
  0x5b   :  { %5798 = vmatpush.bf16.msra.mxu2 %v7844_v58  ;;  %v7876_v58 = vor.u32 %v10924_v47, %v7875_v46  ;;  %v1027_v13 = vunpack.c.h.b16 %v70_v57  ;;  %v8099_v46 = vld [vmem:[#allocation5 + $0x750] sm:$0xf]  ;;  %v10980_v47 = vld [vmem:[#allocation5 + $0x754] sm:$0xf0]  ;;  %v8027_v55 = vld [vmem:[#allocation5 + $0x6c0] sm:$0xf] }
  0x5c   :  { %5811 = vmatpush.bf16.msra.mxu3 %v7908_v62  ;;  %v7987_v62 = vld [vmem:[#allocation5 + $0x670] sm:$0xf] }
  0x5d   :  { %5773 = vmatpush.bf16.msra.mxu0 %v7708_v5  ;;  %v10984_v5 = vld [vmem:[#allocation5 + $0x774] sm:$0xf0]  ;;  %v7988_v15 = vor.u32 %v10952_v63, %v7987_v62  ;;  %v11814_v30 = vpack.c.b16 %v1027_v13, %v1027_v13 }
  0x5e   :  { %5786 = vmatpush.bf16.msra.mxu1 %v7772_v7  ;;  %v1026_v7 = vunpack.c.l.b16 %v70_v57  ;;  %v10962_v57 = vld [vmem:[#allocation5 + $0x6c4] sm:$0xf0] }
  0x5f   :  { %5799 = vmatpush.bf16.msra.mxu2 %v7836_v8  ;;  %v7740_v8 = vor.u32 %v10890_v52, %v7739_v51  ;;  %v8036_v51 = vor.u32 %v10964_v45, %v8035_v40  ;;  %v8100_v52 = vor.u32 %v10980_v47, %v8099_v46  ;;  %v8028_v63 = vor.u32 %v10962_v57, %v8027_v55  ;;  %v10972_v40 = vld [vmem:[#allocation5 + $0x714] sm:$0xf0]  ;;  %v7931_v46 = vld [vmem:[#allocation5 + $0x600] sm:$0xf]  ;;  %v72_v55 = vld [vmem:[#allocation2 + $0x30] sm:$0xff] }
  0x60   :  { %5812 = vmatpush.bf16.msra.mxu3 %v7900_v12  ;;  %v1028_v12 = vunpack.c.l.b16 %v71_v61  ;;  %v11810_v25 = vpack.c.b16 %v1026_v7, %v1026_v7  ;;  %v10994_v61 = vld [vmem:[#allocation5 + $0x7c4] sm:$0xf0]  ;;  %v10960_v7 = vld [vmem:[#allocation5 + $0x6b4] sm:$0xf0]  ;;  %v8123_v57 = vld [vmem:[#allocation5 + $0x780] sm:$0xf] }
  0x61   :  { %5774 = vmatpush.bf16.msra.mxu0 %v7700_v18  ;;  %v8116_v18 = vor.u32 %v10984_v5, %v8115_v3  ;;  %v8019_v3 = vld [vmem:[#allocation5 + $0x6b0] sm:$0xf]  ;;  %v8156_v5 = vor.u32 %v10994_v61, %v8155_v60  ;;  %v10988_v45 = vld [vmem:[#allocation5 + $0x794] sm:$0xf0] }
  0x62   :  { %5787 = vmatpush.bf16.msra.mxu1 %v7764_v19  ;;  %v7979_v19 = vld [vmem:[#allocation5 + $0x660] sm:$0xf]  ;;  %v11812_v29 = vpack.c.b16 %v1028_v12, %v1028_v12  ;;  %v8020_v13 = vor.u32 %v10960_v7, %v8019_v3  ;;  %v8243_v60 = vld [vmem:[#allocation5 + $0x870] sm:$0xf]  ;;  %v11016_v61 = vld [vmem:[#allocation5 + $0x874] sm:$0xf0]  ;;  %v1030_v3 = vunpack.c.l.b16 %v72_v55 }
  0x63   :  { %5800 = vmatpush.bf16.msra.mxu2 %v7828_v22  ;;  %v10950_v22 = vld [vmem:[#allocation5 + $0x664] sm:$0xf0] }
  0x64   :  { %5813 = vmatpush.bf16.msra.mxu3 %v7892_v26  ;;  %v10966_v26 = vld [vmem:[#allocation5 + $0x6e4] sm:$0xf0] }
  0x65   :  { %5775 = vmatpush.bf16.msra.mxu0 %v7692_v32  ;;  %v10998_v32 = vld [vmem:[#allocation5 + $0x7e4] sm:$0xf0]  ;;  %v8044_v35 = vor.u32 %v10966_v26, %v8043_v23 }
  0x66   :  { %5788 = vmatpush.bf16.msra.mxu1 %v7756_v33  ;;  %v11816_v33 = vpack.c.b16 %v1029_v16, %v1029_v16  ;;  %v8172_v43 = vor.u32 %v10998_v32, %v8171_v31  ;;  %v10942_v16 = vld [vmem:[#allocation5 + $0x624] sm:$0xf0]  ;;  %v7939_v32 = vld [vmem:[#allocation5 + $0x610] sm:$0xf] }
  0x67   :  { %5801 = vmatpush.bf16.msra.mxu2 %v7820_v34  ;;  %v7980_v34 = vor.u32 %v10950_v22, %v7979_v19  ;;  %v10958_v19 = vld [vmem:[#allocation5 + $0x6a4] sm:$0xf0]  ;;  %v8075_v22 = vld [vmem:[#allocation5 + $0x720] sm:$0xf] }
  0x68   :  { %5814 = vmatpush.bf16.msra.mxu3 %v7884_v39  ;;  %v10948_v39 = vld [vmem:[#allocation5 + $0x654] sm:$0xf0]  ;;  %v10974_v23 = vld [vmem:[#allocation5 + $0x724] sm:$0xf0] }
  0x69   :  { %5776 = vmatpush.bf16.msra.mxu0 %v7684_v49  ;;  %v10996_v49 = vld [vmem:[#allocation5 + $0x7d4] sm:$0xf0]  ;;  %v7972_v50 = vor.u32 %v10948_v39, %v7971_v37  ;;  %v10990_v26 = vld [vmem:[#allocation5 + $0x7a4] sm:$0xf0]  ;;  %v8076_v31 = vor.u32 %v10974_v23, %v8075_v22  ;;  %v8067_v39 = vld [vmem:[#allocation5 + $0x710] sm:$0xf]  ;;  %v11822_v23 = vpack.c.b16 %v1030_v3, %v1030_v3 }
  0x6a   :  { %5789 = vmatpush.bf16.msra.mxu1 %v7748_v53  ;;  %v7963_v53 = vld [vmem:[#allocation5 + $0x640] sm:$0xf]  ;;  %v8164_v56 = vor.u32 %v10996_v49, %v8163_v48  ;;  %v10956_v37 = vld [vmem:[#allocation5 + $0x694] sm:$0xf0]  ;;  %v10938_v48 = vld [vmem:[#allocation5 + $0x604] sm:$0xf0] }
  0x6b   :  { %5802 = vmatpush.bf16.msra.mxu2 %v7812_v54  ;;  %v10946_v54 = vld [vmem:[#allocation5 + $0x644] sm:$0xf0]  ;;  %v7995_v49 = vld [vmem:[#allocation5 + $0x680] sm:$0xf]  ;;  %v8211_v3 = vld [vmem:[#allocation5 + $0x830] sm:$0xf] }
  0x6c   :  { %5815 = vmatpush.bf16.msra.mxu3 %v7876_v58  ;;  %v8091_v58 = vld [vmem:[#allocation5 + $0x740] sm:$0xf]  ;;  %v7964_v62 = vor.u32 %v10946_v54, %v7963_v53  ;;  %v10970_v54 = vld [vmem:[#allocation5 + $0x704] sm:$0xf0] }
  0x6d   :  { %5777 = vmatpush.bf16.msra.mxu0 %v7676_v1  ;;  %v8092_v0 = vor.u32 %v10978_v59, %v8091_v58  ;;  %v7955_v1 = vld [vmem:[#allocation5 + $0x630] sm:$0xf]  ;;  %v8059_v53 = vld [vmem:[#allocation5 + $0x700] sm:$0xf]  ;;  %v10986_v58 = vld [vmem:[#allocation5 + $0x784] sm:$0xf0] }
  0x6e   :  { %5790 = vmatpush.bf16.msra.mxu1 %v7740_v8  ;;  %v8083_v8 = vld [vmem:[#allocation5 + $0x730] sm:$0xf]  ;;  %v7956_v12 = vor.u32 %v10944_v2, %v7955_v1  ;;  %v73_v59 = vld [vmem:[#allocation2 + $0x38] sm:$0xff]  ;;  %v8060_v7 = vor.u32 %v10970_v54, %v8059_v53 }
  0x6f   :  { %5803 = vmatpush.bf16.msra.mxu2 %v7804_v9  ;;  %v10976_v9 = vld [vmem:[#allocation5 + $0x734] sm:$0xf0]  ;;  %v8371_v1 = vld [vmem:[#allocation5 + $0x970] sm:$0xf] }
  0x70   :  { %5816 = vmatpush.bf16.msra.mxu3 %v7868_v14  ;;  %5778 = vmatmul.bf16.vlgmr.msra.gmra.mxu0 %v11810_v25  ;;  %v8084_v14 = vor.u32 %v10976_v9, %v8083_v8  ;;  %v11048_v2 = vld [vmem:[#allocation5 + $0x974] sm:$0xf0]  ;;  %v8435_v8 = vld [vmem:[#allocation5 + $0x9f0] sm:$0xf] }
  0x71   :  { %5822 = vmatpush.bf16.msrb.mxu0 %v7988_v15  ;;  %5791 = vmatmul.bf16.vlgmr.msra.gmra.mxu1 %v11814_v30  ;;  %v7947_v15 = vld [vmem:[#allocation5 + $0x620] sm:$0xf]  ;;  %v11064_v9 = vld [vmem:[#allocation5 + $0x9f4] sm:$0xf0] }
  0x72   :  { %5835 = vmatpush.bf16.msrb.mxu1 %v8052_v17  ;;  %5804 = vmatmul.bf16.vlgmr.msra.gmra.mxu2 %v11812_v29  ;;  %v8011_v17 = vld [vmem:[#allocation5 + $0x6a0] sm:$0xf]  ;;  %v7948_v27 = vor.u32 %v10942_v16, %v7947_v15  ;;  %v8372_v16 = vor.u32 %v11048_v2, %v8371_v1  ;;  %v8436_v22 = vor.u32 %v11064_v9, %v8435_v8  ;;  %v11024_v9 = vld [vmem:[#allocation5 + $0x8b4] sm:$0xf0] }
  0x73   :  { %5848 = vmatpush.bf16.msrb.mxu2 %v8116_v18  ;;  %5817 = vmatmul.bf16.vlgmr.msra.gmra.mxu3 %v11816_v33  ;;  %v8148_v18 = vor.u32 %v10992_v11, %v8147_v10  ;;  %v8012_v28 = vor.u32 %v10958_v19, %v8011_v17  ;;  %v1032_v10 = vunpack.c.l.b16 %v73_v59  ;;  %v1031_v11 = vunpack.c.h.b16 %v72_v55  ;;  %v8235_v17 = vld [vmem:[#allocation5 + $0x860] sm:$0xf] }
  0x74   :  { %5861 = vmatpush.bf16.msrb.mxu3 %v8180_v24  ;;  %v8139_v24 = vld [vmem:[#allocation5 + $0x7a0] sm:$0xf] }
  0x75   :  { %5823 = vmatpush.bf16.msrb.mxu0 %v7980_v34  ;;  %v10940_v34 = vld [vmem:[#allocation5 + $0x614] sm:$0xf0]  ;;  %v8299_v19 = vld [vmem:[#allocation5 + $0x8e0] sm:$0xf] }
  0x76   :  { %5836 = vmatpush.bf16.msrb.mxu1 %v8044_v35  ;;  %v8003_v35 = vld [vmem:[#allocation5 + $0x690] sm:$0xf]  ;;  %v7940_v47 = vor.u32 %v10940_v34, %v7939_v32  ;;  %v8427_v32 = vld [vmem:[#allocation5 + $0x9e0] sm:$0xf]  ;;  %v11062_v34 = vld [vmem:[#allocation5 + $0x9e4] sm:$0xf0] }
  0x77   :  { %5849 = vmatpush.bf16.msrb.mxu2 %v8108_v36  ;;  %v8140_v36 = vor.u32 %v10990_v26, %v8139_v24  ;;  %v11030_v24 = vld [vmem:[#allocation5 + $0x8e4] sm:$0xf0]  ;;  %v8363_v26 = vld [vmem:[#allocation5 + $0x960] sm:$0xf] }
  0x78   :  { %5862 = vmatpush.bf16.msrb.mxu3 %v8172_v43  ;;  %v8131_v43 = vld [vmem:[#allocation5 + $0x790] sm:$0xf]  ;;  %v8219_v55 = vld [vmem:[#allocation5 + $0x840] sm:$0xf] }
  0x79   :  { %5824 = vmatpush.bf16.msrb.mxu0 %v7972_v50  ;;  %v10954_v50 = vld [vmem:[#allocation5 + $0x684] sm:$0xf0] }
  0x7a   :  { %5837 = vmatpush.bf16.msrb.mxu1 %v8036_v51  ;;  %v8004_v51 = vor.u32 %v10956_v37, %v8003_v35  ;;  %v8300_v37 = vor.u32 %v11030_v24, %v8299_v19  ;;  %v8267_v19 = vld [vmem:[#allocation5 + $0x8a0] sm:$0xf]  ;;  %v11022_v24 = vld [vmem:[#allocation5 + $0x8a4] sm:$0xf0] }
  0x7b   :  { %5850 = vmatpush.bf16.msrb.mxu2 %v8100_v52  ;;  %v8068_v52 = vor.u32 %v10972_v40, %v8067_v39  ;;  %v8227_v40 = vld [vmem:[#allocation5 + $0x850] sm:$0xf] }
  0x7c   :  { %5863 = vmatpush.bf16.msrb.mxu3 %v8164_v56  ;;  %v8132_v56 = vor.u32 %v10988_v45, %v8131_v43  ;;  %v11012_v43 = vld [vmem:[#allocation5 + $0x854] sm:$0xf0]  ;;  %v8291_v45 = vld [vmem:[#allocation5 + $0x8d0] sm:$0xf] }
  0x7d   :  { %5825 = vmatpush.bf16.msrb.mxu0 %v7964_v62  ;;  %v8307_v62 = vld [vmem:[#allocation5 + $0x8f0] sm:$0xf] }
  0x7e   :  { %5838 = vmatpush.bf16.msrb.mxu1 %v8028_v63  ;;  %v7932_v63 = vor.u32 %v10938_v48, %v7931_v46  ;;  %v8428_v46 = vor.u32 %v11062_v34, %v8427_v32  ;;  %v8355_v48 = vld [vmem:[#allocation5 + $0x950] sm:$0xf]  ;;  %v8395_v32 = vld [vmem:[#allocation5 + $0x9a0] sm:$0xf]  ;;  %v11054_v34 = vld [vmem:[#allocation5 + $0x9a4] sm:$0xf0] }
  0x7f   :  { %5851 = vmatpush.bf16.msrb.mxu2 %v8092_v0  ;;  %v11032_v0 = vld [vmem:[#allocation5 + $0x8f4] sm:$0xf0] }
  0x80   :  { %5864 = vmatpush.bf16.msrb.mxu3 %v8156_v5  ;;  %v7996_v5 = vor.u32 %v10954_v50, %v7995_v49  ;;  %v8308_v15 = vor.u32 %v11032_v0, %v8307_v62  ;;  %v11044_v49 = vld [vmem:[#allocation5 + $0x954] sm:$0xf0]  ;;  %v8419_v50 = vld [vmem:[#allocation5 + $0x9d0] sm:$0xf]  ;;  %v8411_v62 = vld [vmem:[#allocation5 + $0x9c0] sm:$0xf] }
  0x81   :  { %5826 = vmatpush.bf16.msrb.mxu0 %v7956_v12  ;;  %v8124_v12 = vor.u32 %v10986_v58, %v8123_v57  ;;  %v8356_v54 = vor.u32 %v11044_v49, %v8355_v48  ;;  %v8283_v57 = vld [vmem:[#allocation5 + $0x8c0] sm:$0xf]  ;;  %v8323_v48 = vld [vmem:[#allocation5 + $0x910] sm:$0xf]  ;;  %v11036_v49 = vld [vmem:[#allocation5 + $0x914] sm:$0xf0] }
  0x82   :  { %5839 = vmatpush.bf16.msrb.mxu1 %v8020_v13  ;;  %v8244_v13 = vor.u32 %v11016_v61, %v8243_v60  ;;  %v8347_v60 = vld [vmem:[#allocation5 + $0x940] sm:$0xf]  ;;  %v11042_v61 = vld [vmem:[#allocation5 + $0x944] sm:$0xf0] }
  0x83   :  { %5852 = vmatpush.bf16.msrb.mxu2 %v8084_v14  ;;  %v1033_v14 = vunpack.c.h.b16 %v73_v59  ;;  %v11026_v59 = vld [vmem:[#allocation5 + $0x8c4] sm:$0xf0]  ;;  %v8348_v2 = vor.u32 %v11042_v61, %v8347_v60  ;;  %v74_v61 = vld [vmem:[#allocation2 + $0x40] sm:$0xff] }
  0x84   :  { %5865 = vmatpush.bf16.msrb.mxu3 %v8148_v18  ;;  %v11014_v18 = vld [vmem:[#allocation5 + $0x864] sm:$0xf0]  ;;  %v8284_v1 = vor.u32 %v11026_v59, %v8283_v57  ;;  %v8315_v59 = vld [vmem:[#allocation5 + $0x900] sm:$0xf] }
  0x85   :  { %5827 = vmatpush.bf16.msrb.mxu0 %v7948_v27  ;;  %v11046_v27 = vld [vmem:[#allocation5 + $0x964] sm:$0xf0]  ;;  %v11828_v35 = vpack.c.b16 %v1033_v14, %v1033_v14 }
  0x86   :  { %5840 = vmatpush.bf16.msrb.mxu1 %v8012_v28  ;;  %v11824_v28 = vpack.c.b16 %v1032_v10, %v1032_v10  ;;  %v8364_v39 = vor.u32 %v11046_v27, %v8363_v26  ;;  %v8339_v10 = vld [vmem:[#allocation5 + $0x930] sm:$0xf]  ;;  %v8331_v26 = vld [vmem:[#allocation5 + $0x920] sm:$0xf]  ;;  %v11038_v27 = vld [vmem:[#allocation5 + $0x924] sm:$0xf0] }
  0x87   :  { %5853 = vmatpush.bf16.msrb.mxu2 %v8076_v31  ;;  %v11826_v31 = vpack.c.b16 %v1031_v11, %v1031_v11  ;;  %v11040_v11 = vld [vmem:[#allocation5 + $0x934] sm:$0xf0]  ;;  %v11034_v60 = vld [vmem:[#allocation5 + $0x904] sm:$0xf0] }
  0x88   :  { %5866 = vmatpush.bf16.msrb.mxu3 %v8140_v36  ;;  %v8236_v36 = vor.u32 %v11014_v18, %v8235_v17  ;;  %v8203_v17 = vld [vmem:[#allocation5 + $0x820] sm:$0xf]  ;;  %v11006_v18 = vld [vmem:[#allocation5 + $0x824] sm:$0xf0] }
  0x89   :  { %5828 = vmatpush.bf16.msrb.mxu0 %v7940_v47  ;;  %v11028_v47 = vld [vmem:[#allocation5 + $0x8d4] sm:$0xf0] }
  0x8a   :  { %5841 = vmatpush.bf16.msrb.mxu1 %v8004_v51  ;;  %v11060_v51 = vld [vmem:[#allocation5 + $0x9d4] sm:$0xf0]  ;;  %v8292_v53 = vor.u32 %v11028_v47, %v8291_v45  ;;  %v8259_v45 = vld [vmem:[#allocation5 + $0x890] sm:$0xf] }
  0x8b   :  { %5854 = vmatpush.bf16.msrb.mxu2 %v8068_v52  ;;  %v8228_v52 = vor.u32 %v11012_v43, %v8227_v40  ;;  %v8420_v58 = vor.u32 %v11060_v51, %v8419_v50  ;;  %v8195_v40 = vld [vmem:[#allocation5 + $0x810] sm:$0xf]  ;;  %v11004_v43 = vld [vmem:[#allocation5 + $0x814] sm:$0xf0] }
  0x8c   :  { %5867 = vmatpush.bf16.msrb.mxu3 %v8132_v56  ;;  %v11010_v56 = vld [vmem:[#allocation5 + $0x844] sm:$0xf0]  ;;  %v11020_v47 = vld [vmem:[#allocation5 + $0x894] sm:$0xf0]  ;;  %v8387_v50 = vld [vmem:[#allocation5 + $0x990] sm:$0xf] }
  0x8d   :  { %5829 = vmatpush.bf16.msrb.mxu0 %v7932_v63  ;;  %v11058_v63 = vld [vmem:[#allocation5 + $0x9c4] sm:$0xf0]  ;;  %v8220_v0 = vor.u32 %v11010_v56, %v8219_v55  ;;  %v11052_v51 = vld [vmem:[#allocation5 + $0x994] sm:$0xf0]  ;;  %v8251_v55 = vld [vmem:[#allocation5 + $0x880] sm:$0xf]  ;;  %v8260_v57 = vor.u32 %v11020_v47, %v8259_v45 }
  0x8e   :  { %5842 = vmatpush.bf16.msrb.mxu1 %v7996_v5  ;;  %v11008_v5 = vld [vmem:[#allocation5 + $0x834] sm:$0xf0]  ;;  %v8412_v8 = vor.u32 %v11058_v63, %v8411_v62  ;;  %v11018_v56 = vld [vmem:[#allocation5 + $0x884] sm:$0xf0]  ;;  %v8388_v62 = vor.u32 %v11052_v51, %v8387_v50  ;;  %v8379_v63 = vld [vmem:[#allocation5 + $0x980] sm:$0xf] }
  0x8f   :  { %5855 = vmatpush.bf16.msrb.mxu2 %v8060_v7  ;;  %v8275_v7 = vld [vmem:[#allocation5 + $0x8b0] sm:$0xf]  ;;  %v8212_v14 = vor.u32 %v11008_v5, %v8211_v3  ;;  %v11080_v3 = vld [vmem:[#allocation5 + $0xa74] sm:$0xf0]  ;;  %v8683_v47 = vld [vmem:[#allocation5 + $0xbe0] sm:$0xf] }
  0x90   :  { %5868 = vmatpush.bf16.msrb.mxu3 %v8124_v12  ;;  %5830 = vmatmul.bf16.vlgmr.msrb.gmra.mxu0 %v11822_v23  ;;  %v8403_v12 = vld [vmem:[#allocation5 + $0x9b0] sm:$0xf] }
  0x91   :  { %5874 = vmatpush.bf16.msra.mxu0 %v8244_v13  ;;  %5843 = vmatmul.bf16.vlgmr.msrb.gmra.mxu1 %v11826_v31  ;;  %v11056_v13 = vld [vmem:[#allocation5 + $0x9b4] sm:$0xf0]  ;;  %v8563_v5 = vld [vmem:[#allocation5 + $0xaf0] sm:$0xf] }
  0x92   :  { %5887 = vmatpush.bf16.msra.mxu1 %v8308_v15  ;;  %5856 = vmatmul.bf16.vlgmr.msrb.gmra.mxu2 %v11824_v28  ;;  %v8276_v15 = vor.u32 %v11024_v9, %v8275_v7  ;;  %v8627_v9 = vld [vmem:[#allocation5 + $0xb70] sm:$0xf] }
  0x93   :  { %5900 = vmatpush.bf16.msra.mxu2 %v8372_v16  ;;  %5869 = vmatmul.bf16.vlgmr.msrb.gmra.mxu3 %v11828_v35  ;;  %v8340_v16 = vor.u32 %v11040_v11, %v8339_v10  ;;  %v11112_v10 = vld [vmem:[#allocation5 + $0xb74] sm:$0xf0]  ;;  %v1034_v11 = vunpack.c.l.b16 %v74_v61 }
  0x94   :  { %5913 = vmatpush.bf16.msra.mxu3 %v8436_v22  ;;  %v8404_v22 = vor.u32 %v11056_v13, %v8403_v12  ;;  %v8252_v12 = vor.u32 %v11018_v56, %v8251_v55  ;;  %v8316_v13 = vor.u32 %v11034_v60, %v8315_v59  ;;  %v8547_v55 = vld [vmem:[#allocation5 + $0xad0] sm:$0xf]  ;;  %v11108_v59 = vld [vmem:[#allocation5 + $0xb54] sm:$0xf0] }
  0x95   :  { %5875 = vmatpush.bf16.msra.mxu0 %v8236_v36  ;;  %v8204_v36 = vor.u32 %v11006_v18, %v8203_v17  ;;  %v1035_v17 = vunpack.c.h.b16 %v74_v61  ;;  %v8675_v60 = vld [vmem:[#allocation5 + $0xbd0] sm:$0xf]  ;;  %v11124_v61 = vld [vmem:[#allocation5 + $0xbd4] sm:$0xf0] }
  0x96   :  { %5888 = vmatpush.bf16.msra.mxu1 %v8300_v37  ;;  %v8268_v37 = vor.u32 %v11022_v24, %v8267_v19 }
  0x97   :  { %5901 = vmatpush.bf16.msra.mxu2 %v8364_v39  ;;  %v8332_v39 = vor.u32 %v11038_v27, %v8331_v26  ;;  %v8628_v26 = vor.u32 %v11112_v10, %v8627_v9  ;;  %v8491_v27 = vld [vmem:[#allocation5 + $0xa60] sm:$0xf]  ;;  %v11106_v9 = vld [vmem:[#allocation5 + $0xb44] sm:$0xf0] }
  0x98   :  { %5914 = vmatpush.bf16.msra.mxu3 %v8428_v46  ;;  %v8396_v46 = vor.u32 %v11054_v34, %v8395_v32  ;;  %v11078_v32 = vld [vmem:[#allocation5 + $0xa64] sm:$0xf0]  ;;  %v8555_v34 = vld [vmem:[#allocation5 + $0xae0] sm:$0xf] }
  0x99   :  { %5876 = vmatpush.bf16.msra.mxu0 %v8228_v52  ;;  %v8187_v52 = vld [vmem:[#allocation5 + $0x800] sm:$0xf]  ;;  %v8492_v50 = vor.u32 %v11078_v32, %v8491_v27  ;;  %v11120_v27 = vld [vmem:[#allocation5 + $0xbb4] sm:$0xf0] }
  0x9a   :  { %5889 = vmatpush.bf16.msra.mxu1 %v8292_v53  ;;  %v8196_v53 = vor.u32 %v11004_v43, %v8195_v40  ;;  %v8619_v40 = vld [vmem:[#allocation5 + $0xb60] sm:$0xf]  ;;  %v11110_v43 = vld [vmem:[#allocation5 + $0xb64] sm:$0xf0] }
  0x9b   :  { %5902 = vmatpush.bf16.msra.mxu2 %v8356_v54  ;;  %v11002_v54 = vld [vmem:[#allocation5 + $0x804] sm:$0xf0]  ;;  %v8667_v10 = vld [vmem:[#allocation5 + $0xbc0] sm:$0xf] }
  0x9c   :  { %5915 = vmatpush.bf16.msra.mxu3 %v8420_v58  ;;  %v8324_v58 = vor.u32 %v11036_v49, %v8323_v48  ;;  %v8188_v7 = vor.u32 %v11002_v54, %v8187_v52  ;;  %v11126_v48 = vld [vmem:[#allocation5 + $0xbe4] sm:$0xf0]  ;;  %v8620_v52 = vor.u32 %v11110_v43, %v8619_v40  ;;  %v11076_v54 = vld [vmem:[#allocation5 + $0xa54] sm:$0xf0]  ;;  %v8523_v43 = vld [vmem:[#allocation5 + $0xaa0] sm:$0xf] }
  0x9d   :  { %5877 = vmatpush.bf16.msra.mxu0 %v8220_v0  ;;  %v11050_v0 = vld [vmem:[#allocation5 + $0x984] sm:$0xf0]  ;;  %v8684_v56 = vor.u32 %v11126_v48, %v8683_v47 }
  0x9e   :  { %5890 = vmatpush.bf16.msra.mxu1 %v8284_v1  ;;  %v75_v1 = vld [vmem:[#allocation2 + $0x48] sm:$0xff]  ;;  %v8380_v18 = vor.u32 %v11050_v0, %v8379_v63 }
  0x9f   :  { %5903 = vmatpush.bf16.msra.mxu2 %v8348_v2  ;;  %v8499_v2 = vld [vmem:[#allocation5 + $0xa70] sm:$0xf]  ;;  %v11070_v40 = vld [vmem:[#allocation5 + $0xa24] sm:$0xf0] }
  0xa0   :  { %5916 = vmatpush.bf16.msra.mxu3 %v8412_v8  ;;  %v11096_v8 = vld [vmem:[#allocation5 + $0xaf4] sm:$0xf0]  ;;  %v8500_v19 = vor.u32 %v11080_v3, %v8499_v2  ;;  %v11074_v2 = vld [vmem:[#allocation5 + $0xa44] sm:$0xf0]  ;;  %v8539_v3 = vld [vmem:[#allocation5 + $0xac0] sm:$0xf] }
  0xa1   :  { %5878 = vmatpush.bf16.msra.mxu0 %v8212_v14  ;;  %v8691_v14 = vld [vmem:[#allocation5 + $0xbf0] sm:$0xf]  ;;  %v8564_v24 = vor.u32 %v11096_v8, %v8563_v5  ;;  %v8676_v5 = vor.u32 %v11124_v61, %v8675_v60  ;;  %v8603_v8 = vld [vmem:[#allocation5 + $0xb40] sm:$0xf]  ;;  %v11086_v48 = vld [vmem:[#allocation5 + $0xaa4] sm:$0xf0] }
  0xa2   :  { %5891 = vmatpush.bf16.msra.mxu1 %v8276_v15  ;;  %v11128_v15 = vld [vmem:[#allocation5 + $0xbf4] sm:$0xf0]  ;;  %v8515_v61 = vld [vmem:[#allocation5 + $0xa90] sm:$0xf] }
  0xa3   :  { %5904 = vmatpush.bf16.msra.mxu2 %v8340_v16  ;;  %v1036_v16 = vunpack.c.l.b16 %v75_v1  ;;  %v11068_v60 = vld [vmem:[#allocation5 + $0xa14] sm:$0xf0] }
  0xa4   :  { %5917 = vmatpush.bf16.msra.mxu3 %v8404_v22  ;;  %v1037_v22 = vunpack.c.h.b16 %v75_v1  ;;  %v8475_v1 = vld [vmem:[#allocation5 + $0xa40] sm:$0xf] }
  0xa5   :  { %5879 = vmatpush.bf16.msra.mxu0 %v8204_v36  ;;  %v8692_v36 = vor.u32 %v11128_v15, %v8691_v14  ;;  %v11836_v45 = vpack.c.b16 %v1036_v16, %v1036_v16  ;;  %v8604_v14 = vor.u32 %v11106_v9, %v8603_v8  ;;  %v8467_v15 = vld [vmem:[#allocation5 + $0xa30] sm:$0xf]  ;;  %v11072_v16 = vld [vmem:[#allocation5 + $0xa34] sm:$0xf0]  ;;  %v8443_v9 = vld [vmem:[#allocation5 + $0xa00] sm:$0xf] }
  0xa6   :  { %5892 = vmatpush.bf16.msra.mxu1 %v8268_v37  ;;  %v11834_v37 = vpack.c.b16 %v1034_v11, %v1034_v11  ;;  %v11840_v49 = vpack.c.b16 %v1037_v22, %v1037_v22  ;;  %v11122_v11 = vld [vmem:[#allocation5 + $0xbc4] sm:$0xf0]  ;;  %v8595_v22 = vld [vmem:[#allocation5 + $0xb30] sm:$0xf]  ;;  %v8468_v32 = vor.u32 %v11072_v16, %v8467_v15  ;;  %v11116_v8 = vld [vmem:[#allocation5 + $0xb94] sm:$0xf0] }
  0xa7   :  { %5905 = vmatpush.bf16.msra.mxu2 %v8332_v39  ;;  %v11094_v39 = vld [vmem:[#allocation5 + $0xae4] sm:$0xf0] }
  0xa8   :  { %5918 = vmatpush.bf16.msra.mxu3 %v8396_v46  ;;  %v11838_v46 = vpack.c.b16 %v1035_v17, %v1035_v17  ;;  %v8556_v51 = vor.u32 %v11094_v39, %v8555_v34  ;;  %v8531_v17 = vld [vmem:[#allocation5 + $0xab0] sm:$0xf]  ;;  %v8459_v39 = vld [vmem:[#allocation5 + $0xa20] sm:$0xf] }
  0xa9   :  { %5880 = vmatpush.bf16.msra.mxu0 %v8196_v53  ;;  %v8483_v53 = vld [vmem:[#allocation5 + $0xa50] sm:$0xf] }
  0xaa   :  { %5893 = vmatpush.bf16.msra.mxu1 %v8260_v57  ;;  %v11092_v57 = vld [vmem:[#allocation5 + $0xad4] sm:$0xf0] }
  0xab   :  { %5906 = vmatpush.bf16.msra.mxu2 %v8324_v58  ;;  %v8611_v58 = vld [vmem:[#allocation5 + $0xb50] sm:$0xf]  ;;  %v8548_v63 = vor.u32 %v11092_v57, %v8547_v55  ;;  %v8460_v55 = vor.u32 %v11070_v40, %v8459_v39  ;;  %v8524_v57 = vor.u32 %v11086_v48, %v8523_v43 }
  0xac   :  { %5919 = vmatpush.bf16.msra.mxu3 %v8388_v62  ;;  %v8484_v62 = vor.u32 %v11076_v54, %v8483_v53  ;;  %v8612_v0 = vor.u32 %v11108_v59, %v8611_v58  ;;  %v11118_v53 = vld [vmem:[#allocation5 + $0xba4] sm:$0xf0]  ;;  %v8451_v59 = vld [vmem:[#allocation5 + $0xa10] sm:$0xf] }
  0xad   :  { %5881 = vmatpush.bf16.msra.mxu0 %v8188_v7  ;;  %v11090_v7 = vld [vmem:[#allocation5 + $0xac4] sm:$0xf0]  ;;  %v5675_v54 = vpop.f32.mrf.mxu0  ;;  %v8819_v39 = vld [vmem:[#allocation5 + $0xcf0] sm:$0xf] }
  0xae   :  { %5894 = vmatpush.bf16.msra.mxu1 %v8252_v12  ;;  %v8476_v12 = vor.u32 %v11074_v2, %v8475_v1  ;;  %v11084_v1 = vld [vmem:[#allocation5 + $0xa94] sm:$0xf0]  ;;  %v8579_v2 = vld [vmem:[#allocation5 + $0xb10] sm:$0xf] }
  0xaf   :  { %5907 = vmatpush.bf16.msra.mxu2 %v8316_v13  ;;  %v8540_v13 = vor.u32 %v11090_v7, %v8539_v3  ;;  %v11100_v3 = vld [vmem:[#allocation5 + $0xb14] sm:$0xf0]  ;;  %v8643_v7 = vld [vmem:[#allocation5 + $0xb90] sm:$0xf]  ;;  %v8516_v15 = vor.u32 %v11084_v1, %v8515_v61 }
  0xb0   :  { %5920 = vmatpush.bf16.msra.mxu3 %v8380_v18  ;;  %5882 = vmatmul.bf16.vlgmr.msra.gmra.mxu0 %v11834_v37  ;;  %v8668_v18 = vor.u32 %v11122_v11, %v8667_v10  ;;  %v8452_v11 = vor.u32 %v11068_v60, %v8451_v59  ;;  %v8580_v16 = vor.u32 %v11100_v3, %v8579_v2  ;;  %v8883_v48 = vld [vmem:[#allocation5 + $0xd70] sm:$0xf]  ;;  %v8747_v2 = vld [vmem:[#allocation5 + $0xc60] sm:$0xf]  ;;  %v11142_v3 = vld [vmem:[#allocation5 + $0xc64] sm:$0xf0] }
  0xb1   :  { %5926 = vmatpush.bf16.msrb.mxu0 %v8500_v19  ;;  %5895 = vmatmul.bf16.vlgmr.msra.gmra.mxu1 %v11838_v46  ;;  %v11088_v19 = vld [vmem:[#allocation5 + $0xab4] sm:$0xf0] }
  0xb2   :  { %5939 = vmatpush.bf16.msrb.mxu1 %v8564_v24  ;;  %5908 = vmatmul.bf16.vlgmr.msra.gmra.mxu2 %v11836_v45  ;;  %v11104_v24 = vld [vmem:[#allocation5 + $0xb34] sm:$0xf0]  ;;  %v8532_v34 = vor.u32 %v11088_v19, %v8531_v17  ;;  %v8571_v17 = vld [vmem:[#allocation5 + $0xb00] sm:$0xf]  ;;  %v76_v19 = vld [vmem:[#allocation2 + $0x50] sm:$0xff] }
  0xb3   :  { %5952 = vmatpush.bf16.msrb.mxu2 %v8628_v26  ;;  %5921 = vmatmul.bf16.vlgmr.msra.gmra.mxu3 %v11840_v49  ;;  %v8659_v26 = vld [vmem:[#allocation5 + $0xbb0] sm:$0xf] }
  0xb4   :  { %5965 = vmatpush.bf16.msrb.mxu3 %v8692_v36  ;;  %v8596_v36 = vor.u32 %v11104_v24, %v8595_v22  ;;  %v8660_v47 = vor.u32 %v11120_v27, %v8659_v26  ;;  %v8644_v24 = vor.u32 %v11116_v8, %v8643_v7  ;;  %v8635_v26 = vld [vmem:[#allocation5 + $0xb80] sm:$0xf]  ;;  %v11114_v27 = vld [vmem:[#allocation5 + $0xb84] sm:$0xf0] }
  0xb5   :  { %5927 = vmatpush.bf16.msrb.mxu0 %v8492_v50  ;;  %v8587_v50 = vld [vmem:[#allocation5 + $0xb20] sm:$0xf]  ;;  %v5677_v40 = vpop.f32.mrf.mxu0  ;;  %v8636_v60 = vor.u32 %v11114_v27, %v8635_v26  ;;  %v11140_v26 = vld [vmem:[#allocation5 + $0xc54] sm:$0xf0]  ;;  %v8803_v27 = vld [vmem:[#allocation5 + $0xcd0] sm:$0xf] }
  0xb6   :  { %5940 = vmatpush.bf16.msrb.mxu1 %v8556_v51  ;;  %v11102_v51 = vld [vmem:[#allocation5 + $0xb24] sm:$0xf0]  ;;  %v8931_v40 = vld [vmem:[#allocation5 + $0xdd0] sm:$0xf] }
  0xb7   :  { %5953 = vmatpush.bf16.msrb.mxu2 %v8620_v52  ;;  %v8651_v52 = vld [vmem:[#allocation5 + $0xba0] sm:$0xf]  ;;  %v8588_v58 = vor.u32 %v11102_v51, %v8587_v50  ;;  %v11176_v50 = vld [vmem:[#allocation5 + $0xd74] sm:$0xf0]  ;;  %v1038_v51 = vunpack.c.l.b16 %v76_v19 }
  0xb8   :  { %5966 = vmatpush.bf16.msrb.mxu3 %v8684_v56  ;;  %v5688_v56 = vpop.f32.mrf.mxu1  ;;  %v8884_v1 = vor.u32 %v11176_v50, %v8883_v48 }
  0xb9   :  { %5928 = vmatpush.bf16.msrb.mxu0 %v8484_v62  ;;  %v5689_v62 = vadd.f32 %v5688_v56, %v5675_v54  ;;  %v11192_v56 = vld [vmem:[#allocation5 + $0xdf4] sm:$0xf0]  ;;  %v11848_v8 = vpack.c.b16 %v1038_v51, %v1038_v51  ;;  %v8731_v51 = vld [vmem:[#allocation5 + $0xc40] sm:$0xf] }
  0xba   :  { %5941 = vmatpush.bf16.msrb.mxu1 %v8548_v63  ;;  %v5701_v63 = vpop.f32.mrf.mxu2 }
  0xbb   :  { %5954 = vmatpush.bf16.msrb.mxu2 %v8612_v0  ;;  %v8652_v0 = vor.u32 %v11118_v53, %v8651_v52  ;;  %v5702_v10 = vadd.f32 %v5701_v63, %v5689_v62 }
  0xbc   :  { %5967 = vmatpush.bf16.msrb.mxu3 %v8676_v5  ;;  %v5714_v5 = vpop.f32.mrf.mxu3 }
  0xbd   :  { %5929 = vmatpush.bf16.msrb.mxu0 %v8476_v12  ;;  %v11066_v12 = vld [vmem:[#allocation5 + $0xa04] sm:$0xf0]  ;;  %v11846_v22 = vadd.f32 %v5714_v5, %v5702_v10  ;;  %v8811_v5 = vld [vmem:[#allocation5 + $0xce0] sm:$0xf] }
  0xbe   :  { %5942 = vmatpush.bf16.msrb.mxu1 %v8540_v13  ;;  %v8507_v13 = vld [vmem:[#allocation5 + $0xa80] sm:$0xf]  ;;  %v8444_v43 = vor.u32 %v11066_v12, %v8443_v9  ;;  %v11158_v9 = vld [vmem:[#allocation5 + $0xce4] sm:$0xf0] }
  0xbf   :  { %5955 = vmatpush.bf16.msrb.mxu2 %v8604_v14  ;;  %v11082_v14 = vld [vmem:[#allocation5 + $0xa84] sm:$0xf0]  ;;  %v8875_v10 = vld [vmem:[#allocation5 + $0xd60] sm:$0xf] }
  0xc0   :  { %5968 = vmatpush.bf16.msrb.mxu3 %v8668_v18  ;;  %v11098_v18 = vld [vmem:[#allocation5 + $0xb04] sm:$0xf0]  ;;  %v5690_v52 = vpop.f32.mrf.mxu1  ;;  %v8508_v53 = vor.u32 %v11082_v14, %v8507_v13  ;;  %v8939_v14 = vld [vmem:[#allocation5 + $0xde0] sm:$0xf] }
  0xc1   :  { %5930 = vmatpush.bf16.msrb.mxu0 %v8468_v32  ;;  %v77_v32 = vld [vmem:[#allocation2 + $0x58] sm:$0xff]  ;;  %v8572_v54 = vor.u32 %v11098_v18, %v8571_v17  ;;  %v8748_v17 = vor.u32 %v11142_v3, %v8747_v2  ;;  %v8812_v18 = vor.u32 %v11158_v9, %v8811_v5  ;;  %v11138_v52 = vld [vmem:[#allocation5 + $0xc44] sm:$0xf0]  ;;  %v8787_v2 = vld [vmem:[#allocation5 + $0xcb0] sm:$0xf] }
  0xc2   :  { %5943 = vmatpush.bf16.msrb.mxu1 %v8532_v34  ;;  %v8755_v34 = vld [vmem:[#allocation5 + $0xc70] sm:$0xf]  ;;  %v5703_v59 = vpop.f32.mrf.mxu2  ;;  %v1041_v62 = vunpack.c.h.b16 %v77_v32  ;;  %v11152_v9 = vld [vmem:[#allocation5 + $0xcb4] sm:$0xf0] }
  0xc3   :  { %5956 = vmatpush.bf16.msrb.mxu2 %v8596_v36  ;;  %v11144_v36 = vld [vmem:[#allocation5 + $0xc74] sm:$0xf0]  ;;  %v11186_v59 = vld [vmem:[#allocation5 + $0xdc4] sm:$0xf0] }
  0xc4   :  { %5969 = vmatpush.bf16.msrb.mxu3 %v8660_v47  ;;  %v11160_v47 = vld [vmem:[#allocation5 + $0xcf4] sm:$0xf0]  ;;  %v8756_v61 = vor.u32 %v11144_v36, %v8755_v34  ;;  %v5716_v63 = vpop.f32.mrf.mxu3  ;;  %v8867_v36 = vld [vmem:[#allocation5 + $0xd50] sm:$0xf] }
  0xc5   :  { %5931 = vmatpush.bf16.msrb.mxu0 %v8460_v55  ;;  %v8947_v55 = vld [vmem:[#allocation5 + $0xdf0] sm:$0xf]  ;;  %v11156_v34 = vld [vmem:[#allocation5 + $0xcd4] sm:$0xf0] }
  0xc6   :  { %5944 = vmatpush.bf16.msrb.mxu1 %v8524_v57  ;;  %v1040_v57 = vunpack.c.l.b16 %v77_v32  ;;  %v8948_v7 = vor.u32 %v11192_v56, %v8947_v55  ;;  %v8804_v48 = vor.u32 %v11156_v34, %v8803_v27  ;;  %v11154_v55 = vld [vmem:[#allocation5 + $0xcc4] sm:$0xf0]  ;;  %v8859_v56 = vld [vmem:[#allocation5 + $0xd40] sm:$0xf] }
  0xc7   :  { %5957 = vmatpush.bf16.msrb.mxu2 %v8588_v58  ;;  %v1039_v58 = vunpack.c.h.b16 %v76_v19  ;;  %v11134_v27 = vld [vmem:[#allocation5 + $0xc24] sm:$0xf0] }
  0xc8   :  { %5970 = vmatpush.bf16.msrb.mxu3 %v8652_v0  ;;  %v8820_v0 = vor.u32 %v11160_v47, %v8819_v39  ;;  %v11850_v12 = vpack.c.b16 %v1040_v57, %v1040_v57  ;;  %v11172_v39 = vld [vmem:[#allocation5 + $0xd54] sm:$0xf0]  ;;  %v11170_v57 = vld [vmem:[#allocation5 + $0xd44] sm:$0xf0] }
  0xc9   :  { %5932 = vmatpush.bf16.msrb.mxu0 %v8452_v11  ;;  %v11174_v11 = vld [vmem:[#allocation5 + $0xd64] sm:$0xf0]  ;;  %v11852_v13 = vpack.c.b16 %v1039_v58, %v1039_v58  ;;  %v8868_v50 = vor.u32 %v11172_v39, %v8867_v36  ;;  %v8923_v58 = vld [vmem:[#allocation5 + $0xdc0] sm:$0xf]  ;;  %v8860_v63 = vor.u32 %v11170_v57, %v8859_v56  ;;  %v8707_v56 = vld [vmem:[#allocation5 + $0xc10] sm:$0xf] }
  0xca   :  { %5945 = vmatpush.bf16.msrb.mxu1 %v8516_v15  ;;  %v11190_v15 = vld [vmem:[#allocation5 + $0xde4] sm:$0xf0]  ;;  %v8876_v19 = vor.u32 %v11174_v11, %v8875_v10  ;;  %v8851_v10 = vld [vmem:[#allocation5 + $0xd30] sm:$0xf]  ;;  %v11168_v11 = vld [vmem:[#allocation5 + $0xd34] sm:$0xf0] }
  0xcb   :  { %5958 = vmatpush.bf16.msrb.mxu2 %v8580_v16  ;;  %v11854_v16 = vpack.c.b16 %v1041_v62, %v1041_v62  ;;  %v8940_v32 = vor.u32 %v11190_v15, %v8939_v14  ;;  %v8915_v14 = vld [vmem:[#allocation5 + $0xdb0] sm:$0xf]  ;;  %v11184_v15 = vld [vmem:[#allocation5 + $0xdb4] sm:$0xf0]  ;;  %v11150_v36 = vld [vmem:[#allocation5 + $0xca4] sm:$0xf0] }
  0xcc   :  { %5971 = vmatpush.bf16.msrb.mxu3 %v8644_v24  ;;  %v8739_v24 = vld [vmem:[#allocation5 + $0xc50] sm:$0xf]  ;;  %v8843_v39 = vld [vmem:[#allocation5 + $0xd20] sm:$0xf]  ;;  %v11132_v57 = vld [vmem:[#allocation5 + $0xc14] sm:$0xf0] }
  0xcd   :  { %5933 = vmatpush.bf16.msrb.mxu0 %v8444_v43  ;;  %v11188_v43 = vld [vmem:[#allocation5 + $0xdd4] sm:$0xf0]  ;;  %v8740_v47 = vor.u32 %v11140_v26, %v8739_v24  ;;  %v8852_v24 = vor.u32 %v11168_v11, %v8851_v10  ;;  %v8715_v26 = vld [vmem:[#allocation5 + $0xc20] sm:$0xf] }
  0xce   :  { %5946 = vmatpush.bf16.msrb.mxu1 %v8508_v53  ;;  %v8795_v53 = vld [vmem:[#allocation5 + $0xcc0] sm:$0xf]  ;;  %v5740_v5 = vpop.f32.mrf.mxu1 }
  0xcf   :  { %5959 = vmatpush.bf16.msrb.mxu2 %v8572_v54  ;;  %v8932_v54 = vor.u32 %v11188_v43, %v8931_v40  ;;  %v8796_v62 = vor.u32 %v11154_v55, %v8795_v53  ;;  %v11166_v40 = vld [vmem:[#allocation5 + $0xd24] sm:$0xf0] }
  0xd0   :  { %5972 = vmatpush.bf16.msrb.mxu3 %v8636_v60  ;;  %5934 = vmatmul.bf16.vlgmr.msrb.gmra.mxu0 %v11848_v8  ;;  %v8732_v60 = vor.u32 %v11138_v52, %v8731_v51  ;;  %v8716_v51 = vor.u32 %v11134_v27, %v8715_v26  ;;  %v8844_v55 = vor.u32 %v11166_v40, %v8843_v39  ;;  %v11178_v26 = vld [vmem:[#allocation5 + $0xd84] sm:$0xf0]  ;;  %v11224_v40 = vld [vmem:[#allocation5 + $0xef4] sm:$0xf0] }
  0xd1   :  { %5978 = vmatpush.bf16.msra.mxu0 %v8756_v61  ;;  %5947 = vmatmul.bf16.vlgmr.msrb.gmra.mxu1 %v11852_v13  ;;  %v5727_v61 = vpop.f32.mrf.mxu0  ;;  %v79_v27 = vld [vmem:[#allocation2 + $0x68] sm:$0xff] }
  0xd2   :  { %5991 = vmatpush.bf16.msra.mxu1 %v8820_v0  ;;  %5960 = vmatmul.bf16.vlgmr.msrb.gmra.mxu2 %v11850_v12  ;;  %v8723_v0 = vld [vmem:[#allocation5 + $0xc30] sm:$0xf]  ;;  %v5728_v3 = vadd.f32 %v5727_v61, %v11846_v22  ;;  %v8916_v22 = vor.u32 %v11184_v15, %v8915_v14  ;;  %v11148_v61 = vld [vmem:[#allocation5 + $0xc94] sm:$0xf0]  ;;  %v8827_v14 = vld [vmem:[#allocation5 + $0xd00] sm:$0xf] }
  0xd3   :  { %6004 = vmatpush.bf16.msra.mxu2 %v8884_v1  ;;  %5973 = vmatmul.bf16.vlgmr.msrb.gmra.mxu3 %v11854_v16  ;;  %v11136_v1 = vld [vmem:[#allocation5 + $0xc34] sm:$0xf0]  ;;  %v11162_v15 = vld [vmem:[#allocation5 + $0xd04] sm:$0xf0] }
  0xd4   :  { %6017 = vmatpush.bf16.msra.mxu3 %v8948_v7  ;;  %v8924_v7 = vor.u32 %v11186_v59, %v8923_v58  ;;  %v8771_v58 = vld [vmem:[#allocation5 + $0xc90] sm:$0xf] }
  0xd5   :  { %5979 = vmatpush.bf16.msra.mxu0 %v8748_v17  ;;  %v5741_v17 = vadd.f32 %v5740_v5, %v5728_v3  ;;  %v5753_v34 = vpop.f32.mrf.mxu2  ;;  %v8708_v3 = vor.u32 %v11132_v57, %v8707_v56  ;;  %v11130_v5 = vld [vmem:[#allocation5 + $0xc04] sm:$0xf0]  ;;  %v8772_v10 = vor.u32 %v11148_v61, %v8771_v58 }
  0xd6   :  { %5992 = vmatpush.bf16.msra.mxu1 %v8812_v18  ;;  %v8724_v18 = vor.u32 %v11136_v1, %v8723_v0  ;;  %v5742_v59 = vpop.f32.mrf.mxu1  ;;  %v8899_v0 = vld [vmem:[#allocation5 + $0xd90] sm:$0xf]  ;;  %v11180_v1 = vld [vmem:[#allocation5 + $0xd94] sm:$0xf0] }
  0xd7   :  { %6005 = vmatpush.bf16.msra.mxu2 %v8876_v19  ;;  %v8788_v19 = vor.u32 %v11152_v9, %v8787_v2  ;;  %v5754_v43 = vadd.f32 %v5753_v34, %v5741_v17  ;;  %v8699_v2 = vld [vmem:[#allocation5 + $0xc00] sm:$0xf]  ;;  %v11146_v9 = vld [vmem:[#allocation5 + $0xc84] sm:$0xf0]  ;;  %v9011_v34 = vld [vmem:[#allocation5 + $0xe70] sm:$0xf]  ;;  %v1045_v59 = vunpack.c.h.b16 %v79_v27 }
  0xd8   :  { %6018 = vmatpush.bf16.msra.mxu3 %v8940_v32  ;;  %v8779_v32 = vld [vmem:[#allocation5 + $0xca0] sm:$0xf]  ;;  %v8700_v39 = vor.u32 %v11130_v5, %v8699_v2 }
  0xd9   :  { %5980 = vmatpush.bf16.msra.mxu0 %v8740_v47  ;;  %v5766_v47 = vpop.f32.mrf.mxu3  ;;  %v5729_v53 = vpop.f32.mrf.mxu0  ;;  %v78_v17 = vld [vmem:[#allocation2 + $0x60] sm:$0xff] }
  0xda   :  { %5993 = vmatpush.bf16.msra.mxu1 %v8804_v48  ;;  %v8907_v48 = vld [vmem:[#allocation5 + $0xda0] sm:$0xf]  ;;  %v11861_v52 = vadd.f32 %v5766_v47, %v5754_v43  ;;  %v9139_v43 = vld [vmem:[#allocation5 + $0xf70] sm:$0xf]  ;;  %v11240_v47 = vld [vmem:[#allocation5 + $0xf74] sm:$0xf0]  ;;  %v1043_v56 = vunpack.c.h.b16 %v78_v17 }
  0xdb   :  { %6006 = vmatpush.bf16.msra.mxu2 %v8868_v50  ;;  %v11182_v50 = vld [vmem:[#allocation5 + $0xda4] sm:$0xf0]  ;;  %v9203_v53 = vld [vmem:[#allocation5 + $0xff0] sm:$0xf]  ;;  %v9140_v61 = vor.u32 %v11240_v47, %v9139_v43  ;;  %v9131_v5 = vld [vmem:[#allocation5 + $0xf60] sm:$0xf] }
  0xdc   :  { %6019 = vmatpush.bf16.msra.mxu3 %v8932_v54  ;;  %v8780_v54 = vor.u32 %v11150_v36, %v8779_v32  ;;  %v9075_v36 = vld [vmem:[#allocation5 + $0xef0] sm:$0xf] }
  0xdd   :  { %5981 = vmatpush.bf16.msra.mxu0 %v8732_v60  ;;  %v8908_v60 = vor.u32 %v11182_v50, %v8907_v48  ;;  %v1042_v48 = vunpack.c.l.b16 %v78_v17 }
  0xde   :  { %5994 = vmatpush.bf16.msra.mxu1 %v8796_v62  ;;  %v8835_v62 = vld [vmem:[#allocation5 + $0xd10] sm:$0xf] }
  0xdf   :  { %6007 = vmatpush.bf16.msra.mxu2 %v8860_v63  ;;  %v11164_v63 = vld [vmem:[#allocation5 + $0xd14] sm:$0xf0]  ;;  %v11863_v2 = vpack.c.b16 %v1042_v48, %v1042_v48 }
  0xe0   :  { %6020 = vmatpush.bf16.msra.mxu3 %v8924_v7  ;;  %v8763_v7 = vld [vmem:[#allocation5 + $0xc80] sm:$0xf]  ;;  %v8836_v11 = vor.u32 %v11164_v63, %v8835_v62  ;;  %v11206_v63 = vld [vmem:[#allocation5 + $0xe64] sm:$0xf0] }
  0xe1   :  { %5982 = vmatpush.bf16.msra.mxu0 %v8724_v18  ;;  %v5755_v18 = vpop.f32.mrf.mxu2  ;;  %v5768_v32 = vpop.f32.mrf.mxu3  ;;  %v8764_v50 = vor.u32 %v11146_v9, %v8763_v7  ;;  %v9003_v62 = vld [vmem:[#allocation5 + $0xe60] sm:$0xf]  ;;  %v11238_v7 = vld [vmem:[#allocation5 + $0xf64] sm:$0xf0] }
  0xe2   :  { %5995 = vmatpush.bf16.msra.mxu1 %v8788_v19  ;;  %v8900_v19 = vor.u32 %v11180_v1, %v8899_v0  ;;  %v9067_v0 = vld [vmem:[#allocation5 + $0xee0] sm:$0xf]  ;;  %v9004_v17 = vor.u32 %v11206_v63, %v9003_v62 }
  0xe3   :  { %6008 = vmatpush.bf16.msra.mxu2 %v8852_v24  ;;  %v8891_v24 = vld [vmem:[#allocation5 + $0xd80] sm:$0xf] }
  0xe4   :  { %6021 = vmatpush.bf16.msra.mxu3 %v8916_v22  ;;  %v11208_v22 = vld [vmem:[#allocation5 + $0xe74] sm:$0xf0]  ;;  %v8892_v57 = vor.u32 %v11178_v26, %v8891_v24  ;;  %v8995_v24 = vld [vmem:[#allocation5 + $0xe50] sm:$0xf] }
  0xe5   :  { %5983 = vmatpush.bf16.msra.mxu0 %v8716_v51  ;;  %v8828_v51 = vor.u32 %v11162_v15, %v8827_v14  ;;  %v9012_v58 = vor.u32 %v11208_v22, %v9011_v34  ;;  %v11254_v14 = vld [vmem:[#allocation5 + $0xfe4] sm:$0xf0]  ;;  %v11869_v15 = vpack.c.b16 %v1045_v59, %v1045_v59  ;;  %v11204_v26 = vld [vmem:[#allocation5 + $0xe54] sm:$0xf0]  ;;  %v9123_v22 = vld [vmem:[#allocation5 + $0xf50] sm:$0xf] }
  0xe6   :  { %5996 = vmatpush.bf16.msra.mxu1 %v8780_v54  ;;  %v11256_v54 = vld [vmem:[#allocation5 + $0xff4] sm:$0xf0]  ;;  %v8996_v43 = vor.u32 %v11204_v26, %v8995_v24  ;;  %v9179_v59 = vld [vmem:[#allocation5 + $0xfc0] sm:$0xf]  ;;  %v9171_v24 = vld [vmem:[#allocation5 + $0xfb0] sm:$0xf] }
  0xe7   :  { %6009 = vmatpush.bf16.msra.mxu2 %v8844_v55  ;;  %v1044_v55 = vunpack.c.l.b16 %v79_v27  ;;  %v9204_v1 = vor.u32 %v11256_v54, %v9203_v53  ;;  %v9059_v27 = vld [vmem:[#allocation5 + $0xed0] sm:$0xf]  ;;  %v11220_v34 = vld [vmem:[#allocation5 + $0xed4] sm:$0xf0]  ;;  %v9051_v53 = vld [vmem:[#allocation5 + $0xec0] sm:$0xf] }
  0xe8   :  { %6022 = vmatpush.bf16.msra.mxu3 %v8908_v60  ;;  %v9076_v60 = vor.u32 %v11224_v40, %v9075_v36  ;;  %v11236_v36 = vld [vmem:[#allocation5 + $0xf54] sm:$0xf0]  ;;  %v9060_v47 = vor.u32 %v11220_v34, %v9059_v27  ;;  %v8971_v34 = vld [vmem:[#allocation5 + $0xe20] sm:$0xf] }
  0xe9   :  { %5984 = vmatpush.bf16.msra.mxu0 %v8708_v3  ;;  %v11222_v3 = vld [vmem:[#allocation5 + $0xee4] sm:$0xf0]  ;;  %v11865_v9 = vpack.c.b16 %v1044_v55, %v1044_v55  ;;  %v11252_v40 = vld [vmem:[#allocation5 + $0xfd4] sm:$0xf0]  ;;  %v9124_v48 = vor.u32 %v11236_v36, %v9123_v22  ;;  %v9035_v36 = vld [vmem:[#allocation5 + $0xea0] sm:$0xf] }
  0xea   :  { %5997 = vmatpush.bf16.msra.mxu1 %v8772_v10  ;;  %v11867_v10 = vpack.c.b16 %v1043_v56, %v1043_v56  ;;  %v9068_v18 = vor.u32 %v11222_v3, %v9067_v0  ;;  %v11218_v55 = vld [vmem:[#allocation5 + $0xec4] sm:$0xf0]  ;;  %v9115_v56 = vld [vmem:[#allocation5 + $0xf40] sm:$0xf]  ;;  %v8979_v3 = vld [vmem:[#allocation5 + $0xe30] sm:$0xf] }
  0xeb   :  { %6010 = vmatpush.bf16.msra.mxu2 %v8836_v11  ;;  %v9195_v11 = vld [vmem:[#allocation5 + $0xfe0] sm:$0xf]  ;;  %v9052_v0 = vor.u32 %v11218_v55, %v9051_v53  ;;  %v11248_v26 = vld [vmem:[#allocation5 + $0xfb4] sm:$0xf0]  ;;  %v11198_v22 = vld [vmem:[#allocation5 + $0xe24] sm:$0xf0] }
  0xec   :  { %6023 = vmatpush.bf16.msra.mxu3 %v8900_v19  ;;  %v9132_v19 = vor.u32 %v11238_v7, %v9131_v5  ;;  %v9196_v32 = vor.u32 %v11254_v14, %v9195_v11  ;;  %v11200_v5 = vld [vmem:[#allocation5 + $0xe34] sm:$0xf0]  ;;  %v9043_v7 = vld [vmem:[#allocation5 + $0xeb0] sm:$0xf]  ;;  %v9163_v53 = vld [vmem:[#allocation5 + $0xfa0] sm:$0xf] }
  0xed   :  { %5985 = vmatpush.bf16.msra.mxu0 %v8700_v39  ;;  %v9187_v39 = vld [vmem:[#allocation5 + $0xfd0] sm:$0xf]  ;;  %v8980_v27 = vor.u32 %v11200_v5, %v8979_v3  ;;  %v11228_v5 = vld [vmem:[#allocation5 + $0xf14] sm:$0xf0] }
  0xee   :  { %5998 = vmatpush.bf16.msra.mxu1 %v8764_v50  ;;  %v8987_v50 = vld [vmem:[#allocation5 + $0xe40] sm:$0xf]  ;;  %v9188_v54 = vor.u32 %v11252_v40, %v9187_v39  ;;  %v5792_v63 = vpop.f32.mrf.mxu1  ;;  %v9172_v39 = vor.u32 %v11248_v26, %v9171_v24  ;;  %v9091_v3 = vld [vmem:[#allocation5 + $0xf10] sm:$0xf]  ;;  %v11210_v24 = vld [vmem:[#allocation5 + $0xe84] sm:$0xf0] }
  0xef   :  { %6011 = vmatpush.bf16.msra.mxu2 %v8828_v51  ;;  %v11202_v51 = vld [vmem:[#allocation5 + $0xe44] sm:$0xf0] }
  0xf0   :  { %6024 = vmatpush.bf16.msra.mxu3 %v8892_v57  ;;  %5986 = vmatmul.bf16.vlgmr.msra.gmra.mxu0 %v11863_v2  ;;  %v11234_v57 = vld [vmem:[#allocation5 + $0xf44] sm:$0xf0]  ;;  %v8988_v62 = vor.u32 %v11202_v51, %v8987_v50 }
  0xf1   :  { %6030 = vmatpush.bf16.msrb.mxu0 %v9012_v58  ;;  %5999 = vmatmul.bf16.vlgmr.msra.gmra.mxu1 %v11867_v10  ;;  %v5779_v58 = vpop.f32.mrf.mxu0 }
  0xf2   :  { %6043 = vmatpush.bf16.msrb.mxu1 %v9076_v60  ;;  %6012 = vmatmul.bf16.vlgmr.msra.gmra.mxu2 %v11865_v9  ;;  %v11250_v60 = vld [vmem:[#allocation5 + $0xfc4] sm:$0xf0] }
  0xf3   :  { %6056 = vmatpush.bf16.msrb.mxu2 %v9140_v61  ;;  %6025 = vmatmul.bf16.vlgmr.msra.gmra.mxu3 %v11869_v15  ;;  %v5780_v61 = vadd.f32 %v5779_v58, %v11861_v52  ;;  %v9180_v11 = vor.u32 %v11250_v60, %v9179_v59 }
  0xf4   :  { %6069 = vmatpush.bf16.msrb.mxu3 %v9204_v1  ;;  %v9116_v1 = vor.u32 %v11234_v57, %v9115_v56  ;;  %v8972_v56 = vor.u32 %v11198_v22, %v8971_v34  ;;  %v80_v34 = vld [vmem:[#allocation2 + $0x70] sm:$0xff] }
  0xf5   :  { %6031 = vmatpush.bf16.msrb.mxu0 %v9004_v17  ;;  %v5793_v14 = vadd.f32 %v5792_v63, %v5780_v61  ;;  %v11216_v17 = vld [vmem:[#allocation5 + $0xeb4] sm:$0xf0]  ;;  %v5805_v40 = vpop.f32.mrf.mxu2  ;;  %v8963_v61 = vld [vmem:[#allocation5 + $0xe10] sm:$0xf] }
  0xf6   :  { %6044 = vmatpush.bf16.msrb.mxu1 %v9068_v18  ;;  %v9107_v18 = vld [vmem:[#allocation5 + $0xf30] sm:$0xf]  ;;  %v9044_v52 = vor.u32 %v11216_v17, %v9043_v7  ;;  %v5818_v51 = vpop.f32.mrf.mxu3  ;;  %v5794_v57 = vpop.f32.mrf.mxu1 }
  0xf7   :  { %6057 = vmatpush.bf16.msrb.mxu2 %v9132_v19  ;;  %v11232_v19 = vld [vmem:[#allocation5 + $0xf34] sm:$0xf0]  ;;  %v5806_v50 = vadd.f32 %v5805_v40, %v5793_v14  ;;  %v9027_v63 = vld [vmem:[#allocation5 + $0xe90] sm:$0xf]  ;;  %v8955_v14 = vld [vmem:[#allocation5 + $0xe00] sm:$0xf]  ;;  %v1046_v57 = vunpack.c.l.b16 %v80_v34 }
  0xf8   :  { %6070 = vmatpush.bf16.msrb.mxu3 %v9196_v32  ;;  %v9108_v32 = vor.u32 %v11232_v19, %v9107_v18  ;;  %v9155_v7 = vld [vmem:[#allocation5 + $0xf90] sm:$0xf]  ;;  %v11194_v18 = vld [vmem:[#allocation5 + $0xe04] sm:$0xf0]  ;;  %v9019_v19 = vld [vmem:[#allocation5 + $0xe80] sm:$0xf] }
  0xf9   :  { %6032 = vmatpush.bf16.msrb.mxu0 %v8996_v43  ;;  %v11214_v43 = vld [vmem:[#allocation5 + $0xea4] sm:$0xf0]  ;;  %v5781_v55 = vpop.f32.mrf.mxu0  ;;  %v11876_v58 = vadd.f32 %v5818_v51, %v5806_v50  ;;  %v81_v40 = vld [vmem:[#allocation2 + $0x78] sm:$0xff]  ;;  %v9331_v50 = vld [vmem:[#allocation5 + $0x10f0] sm:$0xf] }
  0xfa   :  { %6045 = vmatpush.bf16.msrb.mxu1 %v9060_v47  ;;  %v9099_v47 = vld [vmem:[#allocation5 + $0xf20] sm:$0xf]  ;;  %v9036_v59 = vor.u32 %v11214_v43, %v9035_v36  ;;  %v9395_v55 = vld [vmem:[#allocation5 + $0x1170] sm:$0xf] }
  0xfb   :  { %6058 = vmatpush.bf16.msrb.mxu2 %v9124_v48  ;;  %v11230_v48 = vld [vmem:[#allocation5 + $0xf24] sm:$0xf0]  ;;  %v9147_v36 = vld [vmem:[#allocation5 + $0xf80] sm:$0xf] }
  0xfc   :  { %6071 = vmatpush.bf16.msrb.mxu3 %v9188_v54  ;;  %v11246_v54 = vld [vmem:[#allocation5 + $0xfa4] sm:$0xf0]  ;;  %v9100_v60 = vor.u32 %v11230_v48, %v9099_v47  ;;  %v9267_v47 = vld [vmem:[#allocation5 + $0x1070] sm:$0xf]  ;;  %v11272_v48 = vld [vmem:[#allocation5 + $0x1074] sm:$0xf0] }
  0xfd   :  { %6033 = vmatpush.bf16.msrb.mxu0 %v8988_v62  ;;  %v11196_v62 = vld [vmem:[#allocation5 + $0xe14] sm:$0xf0]  ;;  %v5807_v43 = vpop.f32.mrf.mxu2 }
  0xfe   :  { %6046 = vmatpush.bf16.msrb.mxu1 %v9052_v0  ;;  %v9164_v0 = vor.u32 %v11246_v54, %v9163_v53  ;;  %v8964_v17 = vor.u32 %v11196_v62, %v8963_v61  ;;  %v5820_v51 = vpop.f32.mrf.mxu3  ;;  %v8956_v53 = vor.u32 %v11194_v18, %v8955_v14  ;;  %v11288_v54 = vld [vmem:[#allocation5 + $0x10f4] sm:$0xf0]  ;;  %v9459_v61 = vld [vmem:[#allocation5 + $0x11f0] sm:$0xf]  ;;  %v11270_v14 = vld [vmem:[#allocation5 + $0x1064] sm:$0xf0] }
  0xff   :  { %6059 = vmatpush.bf16.msrb.mxu2 %v9116_v1  ;;  %v11212_v1 = vld [vmem:[#allocation5 + $0xe94] sm:$0xf0]  ;;  %v9323_v18 = vld [vmem:[#allocation5 + $0x10e0] sm:$0xf]  ;;  %v11878_v51 = vpack.c.b16 %v1046_v57, %v1046_v57  ;;  %v9443_v57 = vld [vmem:[#allocation5 + $0x11d0] sm:$0xf] }
 0x100   :  { %6072 = vmatpush.bf16.msrb.mxu3 %v9180_v11  ;;  %v11244_v11 = vld [vmem:[#allocation5 + $0xf94] sm:$0xf0]  ;;  %v9028_v26 = vor.u32 %v11212_v1, %v9027_v63  ;;  %v1048_v63 = vunpack.c.l.b16 %v81_v40 }
 0x101   :  { %6034 = vmatpush.bf16.msrb.mxu0 %v8980_v27  ;;  %v9092_v27 = vor.u32 %v11228_v5, %v9091_v3  ;;  %v9156_v22 = vor.u32 %v11244_v11, %v9155_v7  ;;  %v11320_v62 = vld [vmem:[#allocation5 + $0x11f4] sm:$0xf0]  ;;  %v9268_v3 = vor.u32 %v11272_v48, %v9267_v47  ;;  %v1049_v5 = vunpack.c.h.b16 %v81_v40  ;;  %12122 = vst [vmem:[#allocation12_spill] sm:$0xff] %v11878_v51  ;;  %v9251_v47 = vld [vmem:[#allocation5 + $0x1050] sm:$0xf] }
 0x102   :  { %6047 = vmatpush.bf16.msrb.mxu1 %v9044_v52  ;;  %v9083_v52 = vld [vmem:[#allocation5 + $0xf00] sm:$0xf]  ;;  %v9332_v7 = vor.u32 %v11288_v54, %v9331_v50  ;;  %v9460_v43 = vor.u32 %v11320_v62, %v9459_v61  ;;  %v11268_v48 = vld [vmem:[#allocation5 + $0x1054] sm:$0xf0]  ;;  %v9315_v50 = vld [vmem:[#allocation5 + $0x10d0] sm:$0xf] }
 0x103   :  { %6060 = vmatpush.bf16.msrb.mxu2 %v9108_v32  ;;  %v11226_v32 = vld [vmem:[#allocation5 + $0xf04] sm:$0xf0]  ;;  %v11284_v54 = vld [vmem:[#allocation5 + $0x10d4] sm:$0xf0] }
 0x104   :  { %6073 = vmatpush.bf16.msrb.mxu3 %v9172_v39  ;;  %v11242_v39 = vld [vmem:[#allocation5 + $0xf84] sm:$0xf0]  ;;  %v9316_v61 = vor.u32 %v11284_v54, %v9315_v50  ;;  %v9363_v50 = vld [vmem:[#allocation5 + $0x1130] sm:$0xf] }
 0x105   :  { %6035 = vmatpush.bf16.msrb.mxu0 %v8972_v56  ;;  %v11304_v56 = vld [vmem:[#allocation5 + $0x1174] sm:$0xf0]  ;;  %v9148_v1 = vor.u32 %v11242_v39, %v9147_v36  ;;  %v9427_v54 = vld [vmem:[#allocation5 + $0x11b0] sm:$0xf] }
 0x106   :  { %6048 = vmatpush.bf16.msrb.mxu1 %v9036_v59  ;;  %v9020_v59 = vor.u32 %v11210_v24, %v9019_v19  ;;  %v9396_v11 = vor.u32 %v11304_v56, %v9395_v55  ;;  %v9387_v19 = vld [vmem:[#allocation5 + $0x1160] sm:$0xf]  ;;  %v11302_v24 = vld [vmem:[#allocation5 + $0x1164] sm:$0xf0]  ;;  %v9379_v55 = vld [vmem:[#allocation5 + $0x1150] sm:$0xf] }
 0x107   :  { %6061 = vmatpush.bf16.msrb.mxu2 %v9100_v60  ;;  %v9084_v60 = vor.u32 %v11226_v32, %v9083_v52  ;;  %v9451_v32 = vld [vmem:[#allocation5 + $0x11e0] sm:$0xf]  ;;  %v9388_v40 = vor.u32 %v11302_v24, %v9387_v19  ;;  %v11300_v56 = vld [vmem:[#allocation5 + $0x1154] sm:$0xf0] }
 0x108   :  { %6074 = vmatpush.bf16.msrb.mxu3 %v9164_v0  ;;  %v1047_v0 = vunpack.c.h.b16 %v80_v34  ;;  %v11318_v34 = vld [vmem:[#allocation5 + $0x11e4] sm:$0xf0]  ;;  %v9380_v62 = vor.u32 %v11300_v56, %v9379_v55  ;;  %v11312_v55 = vld [vmem:[#allocation5 + $0x11b4] sm:$0xf0] }
 0x109   :  { %6036 = vmatpush.bf16.msrb.mxu0 %v8964_v17  ;;  %v9259_v17 = vld [vmem:[#allocation5 + $0x1060] sm:$0xf] }
 0x10a   :  { %6049 = vmatpush.bf16.msrb.mxu1 %v9028_v26  ;;  %v11286_v26 = vld [vmem:[#allocation5 + $0x10e4] sm:$0xf0]  ;;  %v11882_v52 = vpack.c.b16 %v1047_v0, %v1047_v0  ;;  %v9260_v36 = vor.u32 %v11270_v14, %v9259_v17  ;;  %v9435_v14 = vld [vmem:[#allocation5 + $0x11c0] sm:$0xf] }
 0x10b   :  { %6062 = vmatpush.bf16.msrb.mxu2 %v9092_v27  ;;  %v11880_v27 = vpack.c.b16 %v1048_v63, %v1048_v63  ;;  %v9324_v39 = vor.u32 %v11286_v26, %v9323_v18  ;;  %v9243_v63 = vld [vmem:[#allocation5 + $0x1040] sm:$0xf]  ;;  %v11266_v0 = vld [vmem:[#allocation5 + $0x1044] sm:$0xf0] }
 0x10c   :  { %6075 = vmatpush.bf16.msrb.mxu3 %v9156_v22  ;;  %12124 = vst [vmem:[#allocation14_spill] sm:$0xff] %v11882_v52  ;;  %v11884_v22 = vpack.c.b16 %v1049_v5, %v1049_v5  ;;  %v11282_v5 = vld [vmem:[#allocation5 + $0x10c4] sm:$0xf0]  ;;  %v9244_v26 = vor.u32 %v11266_v0, %v9243_v63 }
 0x10d   :  { %6037 = vmatpush.bf16.msrb.mxu0 %v8956_v53  ;;  %12123 = vst [vmem:[#allocation13_spill] sm:$0xff] %v11880_v27  ;;  %v9452_v53 = vor.u32 %v11318_v34, %v9451_v32  ;;  %v5831_v17 = vpop.f32.mrf.mxu0  ;;  %v11314_v18 = vld [vmem:[#allocation5 + $0x11c4] sm:$0xf0]  ;;  %v9235_v34 = vld [vmem:[#allocation5 + $0x1030] sm:$0xf] }
 0x10e   :  { %6050 = vmatpush.bf16.msrb.mxu1 %v9020_v59  ;;  %12125 = vst [vmem:[#allocation15_spill] sm:$0xff] %v11884_v22  ;;  %v11316_v59 = vld [vmem:[#allocation5 + $0x11d4] sm:$0xf0]  ;;  %v5844_v19 = vpop.f32.mrf.mxu1  ;;  %v11278_v0 = vld [vmem:[#allocation5 + $0x10a4] sm:$0xf0] }
 0x10f   :  { %6063 = vmatpush.bf16.msrb.mxu2 %v9084_v60  ;;  %v9252_v60 = vor.u32 %v11268_v48, %v9251_v47  ;;  %v11280_v48 = vld [vmem:[#allocation5 + $0x10b4] sm:$0xf0] }
 0x110   :  { %6076 = vmatpush.bf16.msrb.mxu3 %v9148_v1  ;;  %6038 = vmatmul.bf16.vlgmr.msrb.gmra.mxu0 %v11878_v51  ;;  %v9307_v1 = vld [vmem:[#allocation5 + $0x10c0] sm:$0xf] }
 0x111   :  { %6082 = vmatpush.bf16.msra.mxu0 %v9268_v3  ;;  %6051 = vmatmul.bf16.vlgmr.msrb.gmra.mxu1 %v11882_v52  ;;  %v9444_v3 = vor.u32 %v11316_v59, %v9443_v57  ;;  %v9308_v24 = vor.u32 %v11282_v5, %v9307_v1  ;;  %v9227_v59 = vld [vmem:[#allocation5 + $0x1020] sm:$0xf] }
 0x112   :  { %6095 = vmatpush.bf16.msra.mxu1 %v9332_v7  ;;  %6064 = vmatmul.bf16.vlgmr.msrb.gmra.mxu2 %v11880_v27  ;;  %v9371_v7 = vld [vmem:[#allocation5 + $0x1140] sm:$0xf] }
 0x113   :  { %6108 = vmatpush.bf16.msra.mxu2 %v9396_v11  ;;  %6077 = vmatmul.bf16.vlgmr.msrb.gmra.mxu3 %v11884_v22  ;;  %v11298_v11 = vld [vmem:[#allocation5 + $0x1144] sm:$0xf0]  ;;  %v9355_v1 = vld [vmem:[#allocation5 + $0x1120] sm:$0xf] }
 0x114   :  { %6121 = vmatpush.bf16.msra.mxu3 %v9460_v43  ;;  %v5832_v43 = vadd.f32 %v5831_v17, %v11876_v58  ;;  %v9372_v32 = vor.u32 %v11298_v11, %v9371_v7  ;;  %v9419_v11 = vld [vmem:[#allocation5 + $0x11a0] sm:$0xf]  ;;  %v11310_v17 = vld [vmem:[#allocation5 + $0x11a4] sm:$0xf0] }
 0x115   :  { %6083 = vmatpush.bf16.msra.mxu0 %v9260_v36  ;;  %v11264_v36 = vld [vmem:[#allocation5 + $0x1034] sm:$0xf0]  ;;  %v5857_v63 = vpop.f32.mrf.mxu2 }
 0x116   :  { %6096 = vmatpush.bf16.msra.mxu1 %v9324_v39  ;;  %v9299_v39 = vld [vmem:[#allocation5 + $0x10b0] sm:$0xf]  ;;  %v5845_v47 = vadd.f32 %v5844_v19, %v5832_v43  ;;  %v9236_v56 = vor.u32 %v11264_v36, %v9235_v34  ;;  %v5870_v7 = vpop.f32.mrf.mxu3  ;;  %v5846_v43 = vpop.f32.mrf.mxu1  ;;  %v11260_v34 = vld [vmem:[#allocation5 + $0x1014] sm:$0xf0] }
 0x117   :  { %6109 = vmatpush.bf16.msra.mxu2 %v9388_v40  ;;  %v9436_v40 = vor.u32 %v11314_v18, %v9435_v14  ;;  %v9300_v58 = vor.u32 %v11280_v48, %v9299_v39  ;;  %v5833_v14 = vpop.f32.mrf.mxu0  ;;  %v9283_v36 = vld [vmem:[#allocation5 + $0x1090] sm:$0xf]  ;;  %v9420_v39 = vor.u32 %v11310_v17, %v9419_v11  ;;  %v11292_v48 = vld [vmem:[#allocation5 + $0x1114] sm:$0xf0] }
 0x118   :  { %6122 = vmatpush.bf16.msra.mxu3 %v9452_v53  ;;  %v11296_v53 = vld [vmem:[#allocation5 + $0x1134] sm:$0xf0]  ;;  %v5858_v5 = vadd.f32 %v5857_v63, %v5845_v47  ;;  %v9347_v47 = vld [vmem:[#allocation5 + $0x1110] sm:$0xf]  ;;  %v11290_v63 = vld [vmem:[#allocation5 + $0x1104] sm:$0xf0] }
 0x119   :  { %6084 = vmatpush.bf16.msra.mxu0 %v9252_v60  ;;  %v9364_v57 = vor.u32 %v11296_v53, %v9363_v50  ;;  %v11262_v60 = vld [vmem:[#allocation5 + $0x1024] sm:$0xf0]  ;;  %v9411_v50 = vld [vmem:[#allocation5 + $0x1190] sm:$0xf]  ;;  %v11308_v53 = vld [vmem:[#allocation5 + $0x1194] sm:$0xf0] }
 0x11a   :  { %6097 = vmatpush.bf16.msra.mxu1 %v9316_v61  ;;  %v9291_v61 = vld [vmem:[#allocation5 + $0x10a0] sm:$0xf]  ;;  %v9228_v18 = vor.u32 %v11262_v60, %v9227_v59  ;;  %v9348_v60 = vor.u32 %v11292_v48, %v9347_v47  ;;  %v9523_v11 = vld [vmem:[#allocation5 + $0x1270] sm:$0xf]  ;;  %v11336_v17 = vld [vmem:[#allocation5 + $0x1274] sm:$0xf0] }
 0x11b   :  { %6110 = vmatpush.bf16.msra.mxu2 %v9380_v62  ;;  %v9428_v62 = vor.u32 %v11312_v55, %v9427_v54  ;;  %v9292_v19 = vor.u32 %v11278_v0, %v9291_v61  ;;  %v9211_v54 = vld [vmem:[#allocation5 + $0x1000] sm:$0xf]  ;;  %v9587_v14 = vld [vmem:[#allocation5 + $0x12f0] sm:$0xf]  ;;  %v11384_v47 = vld [vmem:[#allocation5 + $0x13f4] sm:$0xf0] }
 0x11c   :  { %6123 = vmatpush.bf16.msra.mxu3 %v9444_v3  ;;  %v11294_v3 = vld [vmem:[#allocation5 + $0x1124] sm:$0xf0]  ;;  %v9339_v61 = vld [vmem:[#allocation5 + $0x1100] sm:$0xf] }
 0x11d   :  { %6085 = vmatpush.bf16.msra.mxu0 %v9244_v26  ;;  %v11891_v26 = vadd.f32 %v5870_v7, %v5858_v5  ;;  %v82_v0 = vld [vmem:[#allocation2 + $0x80] sm:$0xff]  ;;  %v83_v5 = vld [vmem:[#allocation2 + $0x88] sm:$0xff]  ;;  %v5859_v7 = vpop.f32.mrf.mxu2 }
 0x11e   :  { %6098 = vmatpush.bf16.msra.mxu1 %v9308_v24  ;;  %v9356_v24 = vor.u32 %v11294_v3, %v9355_v1  ;;  %v9403_v1 = vld [vmem:[#allocation5 + $0x1180] sm:$0xf]  ;;  %v11306_v3 = vld [vmem:[#allocation5 + $0x1184] sm:$0xf0]  ;;  %v1052_v48 = vunpack.c.l.b16 %v83_v5  ;;  %v9524_v7 = vor.u32 %v11336_v17, %v9523_v11  ;;  %v1053_v22 = vunpack.c.h.b16 %v83_v5  ;;  %v9507_v11 = vld [vmem:[#allocation5 + $0x1250] sm:$0xf] }
 0x11f   :  { %6111 = vmatpush.bf16.msra.mxu2 %v9372_v32  ;;  %v9219_v32 = vld [vmem:[#allocation5 + $0x1010] sm:$0xf]  ;;  %v11332_v17 = vld [vmem:[#allocation5 + $0x1254] sm:$0xf0] }
 0x120   :  { %6124 = vmatpush.bf16.msra.mxu3 %v9436_v40  ;;  %v11276_v40 = vld [vmem:[#allocation5 + $0x1094] sm:$0xf0]  ;;  %v9220_v55 = vor.u32 %v11260_v34, %v9219_v32  ;;  %v1050_v34 = vunpack.c.l.b16 %v82_v0 }
 0x121   :  { %6086 = vmatpush.bf16.msra.mxu0 %v9236_v56  ;;  %v11258_v56 = vld [vmem:[#allocation5 + $0x1004] sm:$0xf0]  ;;  %v9284_v59 = vor.u32 %v11276_v40, %v9283_v36  ;;  %v11352_v32 = vld [vmem:[#allocation5 + $0x12f4] sm:$0xf0]  ;;  %v9340_v40 = vor.u32 %v11290_v63, %v9339_v61  ;;  %v9707_v63 = vld [vmem:[#allocation5 + $0x13e0] sm:$0xf] }
 0x122   :  { %6099 = vmatpush.bf16.msra.mxu1 %v9300_v58  ;;  %v9275_v58 = vld [vmem:[#allocation5 + $0x1080] sm:$0xf]  ;;  %v9212_v43 = vor.u32 %v11258_v56, %v9211_v54  ;;  %v9588_v52 = vor.u32 %v11352_v32, %v9587_v14  ;;  %v11334_v54 = vld [vmem:[#allocation5 + $0x1264] sm:$0xf0]  ;;  %v11893_v51 = vpack.c.b16 %v1050_v34, %v1050_v34  ;;  %v9571_v14 = vld [vmem:[#allocation5 + $0x12d0] sm:$0xf] }
 0x123   :  { %6112 = vmatpush.bf16.msra.mxu2 %v9364_v57  ;;  %v11274_v57 = vld [vmem:[#allocation5 + $0x1084] sm:$0xf0]  ;;  %v9579_v56 = vld [vmem:[#allocation5 + $0x12e0] sm:$0xf]  ;;  %v11348_v32 = vld [vmem:[#allocation5 + $0x12d4] sm:$0xf0] }
 0x124   :  { %6125 = vmatpush.bf16.msra.mxu3 %v9428_v62  ;;  %v9412_v62 = vor.u32 %v11308_v53, %v9411_v50  ;;  %v9276_v36 = vor.u32 %v11274_v57, %v9275_v58  ;;  %v1051_v50 = vunpack.c.h.b16 %v82_v0  ;;  %v9404_v53 = vor.u32 %v11306_v3, %v9403_v1  ;;  %12126 = vst [vmem:[#allocation16_spill] sm:$0xff] %v11893_v51  ;;  %v9643_v58 = vld [vmem:[#allocation5 + $0x1360] sm:$0xf]  ;;  %v11366_v57 = vld [vmem:[#allocation5 + $0x1364] sm:$0xf0] }
 0x125   :  { %6087 = vmatpush.bf16.msra.mxu0 %v9228_v18  ;;  %v5872_v18 = vpop.f32.mrf.mxu3  ;;  %v11382_v0 = vld [vmem:[#allocation5 + $0x13e4] sm:$0xf0]  ;;  %v9644_v5 = vor.u32 %v11366_v57, %v9643_v58  ;;  %v11380_v34 = vld [vmem:[#allocation5 + $0x13d4] sm:$0xf0] }
 0x126   :  { %6100 = vmatpush.bf16.msra.mxu1 %v9292_v19  ;;  %v9651_v19 = vld [vmem:[#allocation5 + $0x1370] sm:$0xf]  ;;  %v11897_v61 = vpack.c.b16 %v1051_v50, %v1051_v50  ;;  %v11346_v50 = vld [vmem:[#allocation5 + $0x12c4] sm:$0xf0] }
 0x127   :  { %6113 = vmatpush.bf16.msra.mxu2 %v9356_v24  ;;  %v11368_v24 = vld [vmem:[#allocation5 + $0x1374] sm:$0xf0] }
 0x128   :  { %6126 = vmatpush.bf16.msra.mxu3 %v9420_v39  ;;  %v9715_v39 = vld [vmem:[#allocation5 + $0x13f0] sm:$0xf]  ;;  %v9652_v18 = vor.u32 %v11368_v24, %v9651_v19  ;;  %12128 = vst [vmem:[#allocation18_spill] sm:$0xff] %v11897_v61  ;;  %v11364_v24 = vld [vmem:[#allocation5 + $0x1354] sm:$0xf0] }
 0x129   :  { %6088 = vmatpush.bf16.msra.mxu0 %v9220_v55  ;;  %v9515_v55 = vld [vmem:[#allocation5 + $0x1260] sm:$0xf]  ;;  %v9716_v27 = vor.u32 %v11384_v47, %v9715_v39  ;;  %v9635_v19 = vld [vmem:[#allocation5 + $0x1350] sm:$0xf]  ;;  %v11330_v39 = vld [vmem:[#allocation5 + $0x1244] sm:$0xf0] }
 0x12a   :  { %6101 = vmatpush.bf16.msra.mxu1 %v9284_v59  ;;  %v11350_v59 = vld [vmem:[#allocation5 + $0x12e4] sm:$0xf0]  ;;  %v9516_v1 = vor.u32 %v11334_v54, %v9515_v55  ;;  %v9563_v47 = vld [vmem:[#allocation5 + $0x12c0] sm:$0xf] }
 0x12b   :  { %6114 = vmatpush.bf16.msra.mxu2 %v9348_v60  ;;  %v11895_v60 = vpack.c.b16 %v1052_v48, %v1052_v48  ;;  %v9580_v3 = vor.u32 %v11350_v59, %v9579_v56  ;;  %v9691_v55 = vld [vmem:[#allocation5 + $0x13c0] sm:$0xf]  ;;  %v11378_v54 = vld [vmem:[#allocation5 + $0x13c4] sm:$0xf0]  ;;  %v9564_v57 = vor.u32 %v11346_v50, %v9563_v47 }
 0x12c   :  { %6127 = vmatpush.bf16.msra.mxu3 %v9412_v62  ;;  %v11899_v62 = vpack.c.b16 %v1053_v22, %v1053_v22  ;;  %v9699_v22 = vld [vmem:[#allocation5 + $0x13d0] sm:$0xf]  ;;  %v9611_v47 = vld [vmem:[#allocation5 + $0x1320] sm:$0xf] }
 0x12d   :  { %6089 = vmatpush.bf16.msra.mxu0 %v9212_v43  ;;  %12127 = vst [vmem:[#allocation17_spill] sm:$0xff] %v11895_v60  ;;  %v9708_v43 = vor.u32 %v11382_v0, %v9707_v63  ;;  %v9700_v48 = vor.u32 %v11380_v34, %v9699_v22  ;;  %v9491_v0 = vld [vmem:[#allocation5 + $0x1230] sm:$0xf]  ;;  %v9483_v34 = vld [vmem:[#allocation5 + $0x1220] sm:$0xf] }
 0x12e   :  { %6102 = vmatpush.bf16.msra.mxu1 %v9276_v36  ;;  %12129 = vst [vmem:[#allocation19_spill] sm:$0xff] %v11899_v62  ;;  %v9572_v36 = vor.u32 %v11348_v32, %v9571_v14  ;;  %v5896_v58 = vpop.f32.mrf.mxu1  ;;  %v9619_v14 = vld [vmem:[#allocation5 + $0x1330] sm:$0xf] }
 0x12f   :  { %6115 = vmatpush.bf16.msra.mxu2 %v9340_v40  ;;  %v9499_v40 = vld [vmem:[#allocation5 + $0x1240] sm:$0xf]  ;;  %v9683_v32 = vld [vmem:[#allocation5 + $0x13b0] sm:$0xf] }
 0x130   :  { %6128 = vmatpush.bf16.msra.mxu3 %v9404_v53  ;;  %6090 = vmatmul.bf16.vlgmr.msra.gmra.mxu0 %v11893_v51  ;;  %v9627_v53 = vld [vmem:[#allocation5 + $0x1340] sm:$0xf]  ;;  %v9500_v59 = vor.u32 %v11330_v39, %v9499_v40  ;;  %v11342_v39 = vld [vmem:[#allocation5 + $0x12a4] sm:$0xf0] }
 0x131   :  { %6134 = vmatpush.bf16.msrb.mxu0 %v9524_v7  ;;  %6103 = vmatmul.bf16.vlgmr.msra.gmra.mxu1 %v11897_v61  ;;  %v11362_v7 = vld [vmem:[#allocation5 + $0x1344] sm:$0xf0] }
 0x132   :  { %6147 = vmatpush.bf16.msrb.mxu1 %v9588_v52  ;;  %6116 = vmatmul.bf16.vlgmr.msra.gmra.mxu2 %v11895_v60  ;;  %v9508_v52 = vor.u32 %v11332_v17, %v9507_v11  ;;  %v9628_v63 = vor.u32 %v11362_v7, %v9627_v53  ;;  %v11344_v17 = vld [vmem:[#allocation5 + $0x12b4] sm:$0xf0]  ;;  %v9675_v7 = vld [vmem:[#allocation5 + $0x13a0] sm:$0xf] }
 0x133   :  { %6160 = vmatpush.bf16.msrb.mxu2 %v9652_v18  ;;  %6129 = vmatmul.bf16.vlgmr.msra.gmra.mxu3 %v11899_v62  ;;  %v5883_v18 = vpop.f32.mrf.mxu0 }
 0x134   :  { %6173 = vmatpush.bf16.msrb.mxu3 %v9716_v27  ;;  %v9636_v27 = vor.u32 %v11364_v24, %v9635_v19  ;;  %v5884_v56 = vadd.f32 %v5883_v18, %v11891_v26  ;;  %v11376_v19 = vld [vmem:[#allocation5 + $0x13b4] sm:$0xf0]  ;;  %v11374_v18 = vld [vmem:[#allocation5 + $0x13a4] sm:$0xf0] }
 0x135   :  { %6135 = vmatpush.bf16.msrb.mxu0 %v9516_v1  ;;  %v11328_v1 = vld [vmem:[#allocation5 + $0x1234] sm:$0xf0]  ;;  %v5909_v40 = vpop.f32.mrf.mxu2 }
 0x136   :  { %6148 = vmatpush.bf16.msrb.mxu1 %v9580_v3  ;;  %v9555_v3 = vld [vmem:[#allocation5 + $0x12b0] sm:$0xf]  ;;  %v5897_v11 = vadd.f32 %v5896_v58, %v5884_v56  ;;  %v9492_v24 = vor.u32 %v11328_v1, %v9491_v0  ;;  %v5922_v53 = vpop.f32.mrf.mxu3  ;;  %v5898_v56 = vpop.f32.mrf.mxu1  ;;  %v11324_v0 = vld [vmem:[#allocation5 + $0x1214] sm:$0xf0] }
 0x137   :  { %6161 = vmatpush.bf16.msrb.mxu2 %v9644_v5  ;;  %v9692_v5 = vor.u32 %v11378_v54, %v9691_v55  ;;  %v9556_v26 = vor.u32 %v11344_v17, %v9555_v3  ;;  %v9539_v1 = vld [vmem:[#allocation5 + $0x1290] sm:$0xf]  ;;  %v9676_v3 = vor.u32 %v11374_v18, %v9675_v7  ;;  %v11356_v17 = vld [vmem:[#allocation5 + $0x1314] sm:$0xf0] }
 0x138   :  { %6174 = vmatpush.bf16.msrb.mxu3 %v9708_v43  ;;  %v11360_v43 = vld [vmem:[#allocation5 + $0x1334] sm:$0xf0]  ;;  %v5910_v50 = vadd.f32 %v5909_v40, %v5897_v11  ;;  %v9603_v11 = vld [vmem:[#allocation5 + $0x1310] sm:$0xf]  ;;  %v11354_v40 = vld [vmem:[#allocation5 + $0x1304] sm:$0xf0] }
 0x139   :  { %6136 = vmatpush.bf16.msrb.mxu0 %v9508_v52  ;;  %v9620_v22 = vor.u32 %v11360_v43, %v9619_v14  ;;  %v11326_v52 = vld [vmem:[#allocation5 + $0x1224] sm:$0xf0]  ;;  %v9667_v14 = vld [vmem:[#allocation5 + $0x1390] sm:$0xf]  ;;  %v11372_v43 = vld [vmem:[#allocation5 + $0x1394] sm:$0xf0] }
 0x13a   :  { %6149 = vmatpush.bf16.msrb.mxu1 %v9572_v36  ;;  %v9547_v36 = vld [vmem:[#allocation5 + $0x12a0] sm:$0xf]  ;;  %v9484_v54 = vor.u32 %v11326_v52, %v9483_v34  ;;  %v9604_v52 = vor.u32 %v11356_v17, %v9603_v11  ;;  %v9779_v7 = vld [vmem:[#allocation5 + $0x1470] sm:$0xf]  ;;  %v11400_v18 = vld [vmem:[#allocation5 + $0x1474] sm:$0xf0] }
 0x13b   :  { %6162 = vmatpush.bf16.msrb.mxu2 %v9636_v27  ;;  %v9684_v27 = vor.u32 %v11376_v19, %v9683_v32  ;;  %v5885_v55 = vpop.f32.mrf.mxu0  ;;  %v9548_v58 = vor.u32 %v11342_v39, %v9547_v36  ;;  %v9467_v32 = vld [vmem:[#allocation5 + $0x1200] sm:$0xf]  ;;  %v84_v39 = vld [vmem:[#allocation2 + $0x90] sm:$0xff]  ;;  %v11448_v11 = vld [vmem:[#allocation5 + $0x15f4] sm:$0xf0] }
 0x13c   :  { %6175 = vmatpush.bf16.msrb.mxu3 %v9700_v48  ;;  %v11358_v48 = vld [vmem:[#allocation5 + $0x1324] sm:$0xf0]  ;;  %v9595_v36 = vld [vmem:[#allocation5 + $0x1300] sm:$0xf]  ;;  %v9843_v55 = vld [vmem:[#allocation5 + $0x14f0] sm:$0xf] }
 0x13d   :  { %6137 = vmatpush.bf16.msrb.mxu0 %v9500_v59  ;;  %v11906_v59 = vadd.f32 %v5922_v53, %v5910_v50  ;;  %v85_v50 = vld [vmem:[#allocation2 + $0x98] sm:$0xff]  ;;  %v5911_v53 = vpop.f32.mrf.mxu2 }
 0x13e   :  { %6150 = vmatpush.bf16.msrb.mxu1 %v9564_v57  ;;  %v9612_v57 = vor.u32 %v11358_v48, %v9611_v47  ;;  %v9659_v47 = vld [vmem:[#allocation5 + $0x1380] sm:$0xf]  ;;  %v11370_v48 = vld [vmem:[#allocation5 + $0x1384] sm:$0xf0]  ;;  %v1056_v17 = vunpack.c.l.b16 %v85_v50  ;;  %v9780_v53 = vor.u32 %v11400_v18, %v9779_v7  ;;  %v1057_v62 = vunpack.c.h.b16 %v85_v50  ;;  %v9763_v7 = vld [vmem:[#allocation5 + $0x1450] sm:$0xf] }
 0x13f   :  { %6163 = vmatpush.bf16.msrb.mxu2 %v9628_v63  ;;  %v9475_v63 = vld [vmem:[#allocation5 + $0x1210] sm:$0xf]  ;;  %v11396_v18 = vld [vmem:[#allocation5 + $0x1454] sm:$0xf0] }
 0x140   :  { %6176 = vmatpush.bf16.msrb.mxu3 %v9692_v5  ;;  %v11340_v5 = vld [vmem:[#allocation5 + $0x1294] sm:$0xf0]  ;;  %v9476_v19 = vor.u32 %v11324_v0, %v9475_v63  ;;  %v1054_v0 = vunpack.c.l.b16 %v84_v39 }
 0x141   :  { %6138 = vmatpush.bf16.msrb.mxu0 %v9492_v24  ;;  %v11322_v24 = vld [vmem:[#allocation5 + $0x1204] sm:$0xf0]  ;;  %v9540_v34 = vor.u32 %v11340_v5, %v9539_v1  ;;  %v11416_v63 = vld [vmem:[#allocation5 + $0x14f4] sm:$0xf0]  ;;  %v9596_v5 = vor.u32 %v11354_v40, %v9595_v36  ;;  %v9963_v40 = vld [vmem:[#allocation5 + $0x15e0] sm:$0xf] }
 0x142   :  { %6151 = vmatpush.bf16.msrb.mxu1 %v9556_v26  ;;  %v9531_v26 = vld [vmem:[#allocation5 + $0x1280] sm:$0xf]  ;;  %v9468_v56 = vor.u32 %v11322_v24, %v9467_v32  ;;  %v9844_v61 = vor.u32 %v11416_v63, %v9843_v55  ;;  %v11398_v32 = vld [vmem:[#allocation5 + $0x1464] sm:$0xf0]  ;;  %v11908_v51 = vpack.c.b16 %v1054_v0, %v1054_v0  ;;  %v9827_v55 = vld [vmem:[#allocation5 + $0x14d0] sm:$0xf] }
 0x143   :  { %6164 = vmatpush.bf16.msrb.mxu2 %v9620_v22  ;;  %v11338_v22 = vld [vmem:[#allocation5 + $0x1284] sm:$0xf0]  ;;  %v9835_v24 = vld [vmem:[#allocation5 + $0x14e0] sm:$0xf]  ;;  %v11412_v63 = vld [vmem:[#allocation5 + $0x14d4] sm:$0xf0] }
 0x144   :  { %6177 = vmatpush.bf16.msrb.mxu3 %v9684_v27  ;;  %v9668_v27 = vor.u32 %v11372_v43, %v9667_v14  ;;  %v9532_v1 = vor.u32 %v11338_v22, %v9531_v26  ;;  %v1055_v14 = vunpack.c.h.b16 %v84_v39  ;;  %v9660_v43 = vor.u32 %v11370_v48, %v9659_v47  ;;  %12130 = vst [vmem:[#allocation20_spill] sm:$0xff] %v11908_v51  ;;  %v9899_v26 = vld [vmem:[#allocation5 + $0x1560] sm:$0xf]  ;;  %v11430_v22 = vld [vmem:[#allocation5 + $0x1564] sm:$0xf0] }
 0x145   :  { %6139 = vmatpush.bf16.msrb.mxu0 %v9484_v54  ;;  %v5924_v54 = vpop.f32.mrf.mxu3  ;;  %v11446_v39 = vld [vmem:[#allocation5 + $0x15e4] sm:$0xf0]  ;;  %v9900_v50 = vor.u32 %v11430_v22, %v9899_v26  ;;  %v11444_v0 = vld [vmem:[#allocation5 + $0x15d4] sm:$0xf0] }
 0x146   :  { %6152 = vmatpush.bf16.msrb.mxu1 %v9548_v58  ;;  %v9907_v58 = vld [vmem:[#allocation5 + $0x1570] sm:$0xf]  ;;  %v11912_v36 = vpack.c.b16 %v1055_v14, %v1055_v14  ;;  %v11410_v14 = vld [vmem:[#allocation5 + $0x14c4] sm:$0xf0] }
 0x147   :  { %6165 = vmatpush.bf16.msrb.mxu2 %v9612_v57  ;;  %v11432_v57 = vld [vmem:[#allocation5 + $0x1574] sm:$0xf0] }
 0x148   :  { %6178 = vmatpush.bf16.msrb.mxu3 %v9676_v3  ;;  %v9971_v3 = vld [vmem:[#allocation5 + $0x15f0] sm:$0xf]  ;;  %v9908_v54 = vor.u32 %v11432_v57, %v9907_v58  ;;  %12132 = vst [vmem:[#allocation22_spill] sm:$0xff] %v11912_v36  ;;  %v11428_v57 = vld [vmem:[#allocation5 + $0x1554] sm:$0xf0] }
 0x149   :  { %6140 = vmatpush.bf16.msrb.mxu0 %v9476_v19  ;;  %v9771_v19 = vld [vmem:[#allocation5 + $0x1460] sm:$0xf]  ;;  %v9972_v60 = vor.u32 %v11448_v11, %v9971_v3  ;;  %v9891_v58 = vld [vmem:[#allocation5 + $0x1550] sm:$0xf]  ;;  %v11394_v3 = vld [vmem:[#allocation5 + $0x1444] sm:$0xf0] }
 0x14a   :  { %6153 = vmatpush.bf16.msrb.mxu1 %v9540_v34  ;;  %v11414_v34 = vld [vmem:[#allocation5 + $0x14e4] sm:$0xf0]  ;;  %v9772_v47 = vor.u32 %v11398_v32, %v9771_v19  ;;  %v9819_v11 = vld [vmem:[#allocation5 + $0x14c0] sm:$0xf] }
 0x14b   :  { %6166 = vmatpush.bf16.msrb.mxu2 %v9604_v52  ;;  %v11910_v52 = vpack.c.b16 %v1056_v17, %v1056_v17  ;;  %v9836_v48 = vor.u32 %v11414_v34, %v9835_v24  ;;  %v9947_v19 = vld [vmem:[#allocation5 + $0x15c0] sm:$0xf]  ;;  %v11442_v32 = vld [vmem:[#allocation5 + $0x15c4] sm:$0xf0]  ;;  %v9820_v22 = vor.u32 %v11410_v14, %v9819_v11 }
 0x14c   :  { %6179 = vmatpush.bf16.msrb.mxu3 %v9668_v27  ;;  %v11914_v27 = vpack.c.b16 %v1057_v62, %v1057_v62  ;;  %v9955_v62 = vld [vmem:[#allocation5 + $0x15d0] sm:$0xf]  ;;  %v9867_v11 = vld [vmem:[#allocation5 + $0x1520] sm:$0xf] }
 0x14d   :  { %6141 = vmatpush.bf16.msrb.mxu0 %v9468_v56  ;;  %12131 = vst [vmem:[#allocation21_spill] sm:$0xff] %v11910_v52  ;;  %v9964_v56 = vor.u32 %v11446_v39, %v9963_v40  ;;  %v9956_v17 = vor.u32 %v11444_v0, %v9955_v62  ;;  %v9747_v39 = vld [vmem:[#allocation5 + $0x1430] sm:$0xf]  ;;  %v9739_v0 = vld [vmem:[#allocation5 + $0x1420] sm:$0xf] }
 0x14e   :  { %6154 = vmatpush.bf16.msrb.mxu1 %v9532_v1  ;;  %12133 = vst [vmem:[#allocation23_spill] sm:$0xff] %v11914_v27  ;;  %v9828_v1 = vor.u32 %v11412_v63, %v9827_v55  ;;  %v5948_v26 = vpop.f32.mrf.mxu1  ;;  %v9875_v55 = vld [vmem:[#allocation5 + $0x1530] sm:$0xf] }
 0x14f   :  { %6167 = vmatpush.bf16.msrb.mxu2 %v9596_v5  ;;  %v9755_v5 = vld [vmem:[#allocation5 + $0x1440] sm:$0xf]  ;;  %v9939_v63 = vld [vmem:[#allocation5 + $0x15b0] sm:$0xf] }
 0x150   :  { %6180 = vmatpush.bf16.msrb.mxu3 %v9660_v43  ;;  %6142 = vmatmul.bf16.vlgmr.msrb.gmra.mxu0 %v11908_v51  ;;  %v9883_v43 = vld [vmem:[#allocation5 + $0x1540] sm:$0xf]  ;;  %v9756_v34 = vor.u32 %v11394_v3, %v9755_v5  ;;  %v11406_v3 = vld [vmem:[#allocation5 + $0x14a4] sm:$0xf0] }
 0x151   :  { %6186 = vmatpush.bf16.msra.mxu0 %v9780_v53  ;;  %6155 = vmatmul.bf16.vlgmr.msrb.gmra.mxu1 %v11912_v36  ;;  %v11426_v53 = vld [vmem:[#allocation5 + $0x1544] sm:$0xf0] }
 0x152   :  { %6199 = vmatpush.bf16.msra.mxu1 %v9844_v61  ;;  %6168 = vmatmul.bf16.vlgmr.msrb.gmra.mxu2 %v11910_v52  ;;  %v9764_v61 = vor.u32 %v11396_v18, %v9763_v7  ;;  %v9884_v40 = vor.u32 %v11426_v53, %v9883_v43  ;;  %v11408_v18 = vld [vmem:[#allocation5 + $0x14b4] sm:$0xf0]  ;;  %v9931_v53 = vld [vmem:[#allocation5 + $0x15a0] sm:$0xf] }
 0x153   :  { %6212 = vmatpush.bf16.msra.mxu2 %v9908_v54  ;;  %6181 = vmatmul.bf16.vlgmr.msrb.gmra.mxu3 %v11914_v27  ;;  %v5935_v54 = vpop.f32.mrf.mxu0 }
 0x154   :  { %6225 = vmatpush.bf16.msra.mxu3 %v9972_v60  ;;  %v9892_v60 = vor.u32 %v11428_v57, %v9891_v58  ;;  %v5936_v24 = vadd.f32 %v5935_v54, %v11906_v59  ;;  %v11440_v58 = vld [vmem:[#allocation5 + $0x15b4] sm:$0xf0]  ;;  %v11438_v54 = vld [vmem:[#allocation5 + $0x15a4] sm:$0xf0] }
 0x155   :  { %6187 = vmatpush.bf16.msra.mxu0 %v9772_v47  ;;  %v11392_v47 = vld [vmem:[#allocation5 + $0x1434] sm:$0xf0]  ;;  %v5961_v5 = vpop.f32.mrf.mxu2 }
 0x156   :  { %6200 = vmatpush.bf16.msra.mxu1 %v9836_v48  ;;  %v9811_v48 = vld [vmem:[#allocation5 + $0x14b0] sm:$0xf]  ;;  %v5949_v7 = vadd.f32 %v5948_v26, %v5936_v24  ;;  %v9748_v57 = vor.u32 %v11392_v47, %v9747_v39  ;;  %v5974_v43 = vpop.f32.mrf.mxu3  ;;  %v5950_v24 = vpop.f32.mrf.mxu1  ;;  %v11388_v39 = vld [vmem:[#allocation5 + $0x1414] sm:$0xf0] }
 0x157   :  { %6213 = vmatpush.bf16.msra.mxu2 %v9900_v50  ;;  %v9948_v50 = vor.u32 %v11442_v32, %v9947_v19  ;;  %v9812_v59 = vor.u32 %v11408_v18, %v9811_v48  ;;  %v9795_v47 = vld [vmem:[#allocation5 + $0x1490] sm:$0xf]  ;;  %v9932_v48 = vor.u32 %v11438_v54, %v9931_v53  ;;  %v11420_v18 = vld [vmem:[#allocation5 + $0x1514] sm:$0xf0] }
 0x158   :  { %6226 = vmatpush.bf16.msra.mxu3 %v9964_v56  ;;  %v11424_v56 = vld [vmem:[#allocation5 + $0x1534] sm:$0xf0]  ;;  %v5962_v14 = vadd.f32 %v5961_v5, %v5949_v7  ;;  %v9859_v7 = vld [vmem:[#allocation5 + $0x1510] sm:$0xf]  ;;  %v11418_v5 = vld [vmem:[#allocation5 + $0x1504] sm:$0xf0] }
 0x159   :  { %6188 = vmatpush.bf16.msra.mxu0 %v9764_v61  ;;  %v9876_v62 = vor.u32 %v11424_v56, %v9875_v55  ;;  %v11390_v61 = vld [vmem:[#allocation5 + $0x1424] sm:$0xf0]  ;;  %v9923_v55 = vld [vmem:[#allocation5 + $0x1590] sm:$0xf]  ;;  %v11436_v56 = vld [vmem:[#allocation5 + $0x1594] sm:$0xf0] }
 0x15a   :  { %6201 = vmatpush.bf16.msra.mxu1 %v9828_v1  ;;  %v9803_v1 = vld [vmem:[#allocation5 + $0x14a0] sm:$0xf]  ;;  %v9740_v32 = vor.u32 %v11390_v61, %v9739_v0  ;;  %v9860_v61 = vor.u32 %v11420_v18, %v9859_v7  ;;  %v10035_v53 = vld [vmem:[#allocation5 + $0x1670] sm:$0xf]  ;;  %v11464_v54 = vld [vmem:[#allocation5 + $0x1674] sm:$0xf0] }
 0x15b   :  { %6214 = vmatpush.bf16.msra.mxu2 %v9892_v60  ;;  %v9940_v60 = vor.u32 %v11440_v58, %v9939_v63  ;;  %v5937_v19 = vpop.f32.mrf.mxu0  ;;  %v9804_v26 = vor.u32 %v11406_v3, %v9803_v1  ;;  %v9723_v63 = vld [vmem:[#allocation5 + $0x1400] sm:$0xf]  ;;  %v11512_v7 = vld [vmem:[#allocation5 + $0x17f4] sm:$0xf0] }
 0x15c   :  { %6227 = vmatpush.bf16.msra.mxu3 %v9956_v17  ;;  %v11422_v17 = vld [vmem:[#allocation5 + $0x1524] sm:$0xf0]  ;;  %v9851_v1 = vld [vmem:[#allocation5 + $0x1500] sm:$0xf]  ;;  %v10099_v19 = vld [vmem:[#allocation5 + $0x16f0] sm:$0xf] }
 0x15d   :  { %6189 = vmatpush.bf16.msra.mxu0 %v9756_v34  ;;  %v11921_v34 = vadd.f32 %v5974_v43, %v5962_v14  ;;  %v86_v3 = vld [vmem:[#allocation2 + $0xa0] sm:$0xff]  ;;  %v87_v14 = vld [vmem:[#allocation2 + $0xa8] sm:$0xff]  ;;  %v5963_v43 = vpop.f32.mrf.mxu2 }
 0x15e   :  { %6202 = vmatpush.bf16.msra.mxu1 %v9820_v22  ;;  %v9868_v22 = vor.u32 %v11422_v17, %v9867_v11  ;;  %v9915_v11 = vld [vmem:[#allocation5 + $0x1580] sm:$0xf]  ;;  %v11434_v17 = vld [vmem:[#allocation5 + $0x1584] sm:$0xf0]  ;;  %v1060_v18 = vunpack.c.l.b16 %v87_v14  ;;  %v10036_v43 = vor.u32 %v11464_v54, %v10035_v53  ;;  %v1061_v27 = vunpack.c.h.b16 %v87_v14  ;;  %v10019_v53 = vld [vmem:[#allocation5 + $0x1650] sm:$0xf] }
 0x15f   :  { %6215 = vmatpush.bf16.msra.mxu2 %v9884_v40  ;;  %v9731_v40 = vld [vmem:[#allocation5 + $0x1410] sm:$0xf]  ;;  %v11460_v54 = vld [vmem:[#allocation5 + $0x1654] sm:$0xf0] }
 0x160   :  { %6228 = vmatpush.bf16.msra.mxu3 %v9948_v50  ;;  %v11404_v50 = vld [vmem:[#allocation5 + $0x1494] sm:$0xf0]  ;;  %v9732_v58 = vor.u32 %v11388_v39, %v9731_v40  ;;  %v1058_v39 = vunpack.c.l.b16 %v86_v3 }
 0x161   :  { %6190 = vmatpush.bf16.msra.mxu0 %v9748_v57  ;;  %v11386_v57 = vld [vmem:[#allocation5 + $0x1404] sm:$0xf0]  ;;  %v9796_v0 = vor.u32 %v11404_v50, %v9795_v47  ;;  %v11480_v40 = vld [vmem:[#allocation5 + $0x16f4] sm:$0xf0]  ;;  %v9852_v50 = vor.u32 %v11418_v5, %v9851_v1  ;;  %v10219_v5 = vld [vmem:[#allocation5 + $0x17e0] sm:$0xf] }
 0x162   :  { %6203 = vmatpush.bf16.msra.mxu1 %v9812_v59  ;;  %v9787_v59 = vld [vmem:[#allocation5 + $0x1480] sm:$0xf]  ;;  %v9724_v24 = vor.u32 %v11386_v57, %v9723_v63  ;;  %v10100_v36 = vor.u32 %v11480_v40, %v10099_v19  ;;  %v11462_v63 = vld [vmem:[#allocation5 + $0x1664] sm:$0xf0]  ;;  %v11923_v51 = vpack.c.b16 %v1058_v39, %v1058_v39  ;;  %v10083_v19 = vld [vmem:[#allocation5 + $0x16d0] sm:$0xf] }
 0x163   :  { %6216 = vmatpush.bf16.msra.mxu2 %v9876_v62  ;;  %v11402_v62 = vld [vmem:[#allocation5 + $0x1484] sm:$0xf0]  ;;  %v10091_v57 = vld [vmem:[#allocation5 + $0x16e0] sm:$0xf]  ;;  %v11476_v40 = vld [vmem:[#allocation5 + $0x16d4] sm:$0xf0] }
 0x164   :  { %6229 = vmatpush.bf16.msra.mxu3 %v9940_v60  ;;  %v9924_v60 = vor.u32 %v11436_v56, %v9923_v55  ;;  %v9788_v47 = vor.u32 %v11402_v62, %v9787_v59  ;;  %v1059_v55 = vunpack.c.h.b16 %v86_v3  ;;  %v9916_v56 = vor.u32 %v11434_v17, %v9915_v11  ;;  %12134 = vst [vmem:[#allocation24_spill] sm:$0xff] %v11923_v51  ;;  %v10155_v59 = vld [vmem:[#allocation5 + $0x1760] sm:$0xf]  ;;  %v11494_v62 = vld [vmem:[#allocation5 + $0x1764] sm:$0xf0] }
 0x165   :  { %6191 = vmatpush.bf16.msra.mxu0 %v9740_v32  ;;  %v5976_v32 = vpop.f32.mrf.mxu3  ;;  %v11510_v3 = vld [vmem:[#allocation5 + $0x17e4] sm:$0xf0]  ;;  %v10156_v14 = vor.u32 %v11494_v62, %v10155_v59  ;;  %v11508_v39 = vld [vmem:[#allocation5 + $0x17d4] sm:$0xf0] }
 0x166   :  { %6204 = vmatpush.bf16.msra.mxu1 %v9804_v26  ;;  %v10163_v26 = vld [vmem:[#allocation5 + $0x1770] sm:$0xf]  ;;  %v11927_v1 = vpack.c.b16 %v1059_v55, %v1059_v55  ;;  %v11474_v55 = vld [vmem:[#allocation5 + $0x16c4] sm:$0xf0] }
 0x167   :  { %6217 = vmatpush.bf16.msra.mxu2 %v9868_v22  ;;  %v11496_v22 = vld [vmem:[#allocation5 + $0x1774] sm:$0xf0] }
 0x168   :  { %6230 = vmatpush.bf16.msra.mxu3 %v9932_v48  ;;  %v10227_v48 = vld [vmem:[#allocation5 + $0x17f0] sm:$0xf]  ;;  %v10164_v32 = vor.u32 %v11496_v22, %v10163_v26  ;;  %12136 = vst [vmem:[#allocation26_spill] sm:$0xff] %v11927_v1  ;;  %v11492_v22 = vld [vmem:[#allocation5 + $0x1754] sm:$0xf0] }
 0x169   :  { %6192 = vmatpush.bf16.msra.mxu0 %v9732_v58  ;;  %v10027_v58 = vld [vmem:[#allocation5 + $0x1660] sm:$0xf]  ;;  %v10228_v52 = vor.u32 %v11512_v7, %v10227_v48  ;;  %v10147_v26 = vld [vmem:[#allocation5 + $0x1750] sm:$0xf]  ;;  %v11458_v48 = vld [vmem:[#allocation5 + $0x1644] sm:$0xf0] }
 0x16a   :  { %6205 = vmatpush.bf16.msra.mxu1 %v9796_v0  ;;  %v11478_v0 = vld [vmem:[#allocation5 + $0x16e4] sm:$0xf0]  ;;  %v10028_v11 = vor.u32 %v11462_v63, %v10027_v58  ;;  %v10075_v7 = vld [vmem:[#allocation5 + $0x16c0] sm:$0xf] }
 0x16b   :  { %6218 = vmatpush.bf16.msra.mxu2 %v9860_v61  ;;  %v11925_v61 = vpack.c.b16 %v1060_v18, %v1060_v18  ;;  %v10092_v17 = vor.u32 %v11478_v0, %v10091_v57  ;;  %v10203_v58 = vld [vmem:[#allocation5 + $0x17c0] sm:$0xf]  ;;  %v11506_v63 = vld [vmem:[#allocation5 + $0x17c4] sm:$0xf0]  ;;  %v10076_v62 = vor.u32 %v11474_v55, %v10075_v7 }
 0x16c   :  { %6231 = vmatpush.bf16.msra.mxu3 %v9924_v60  ;;  %v11929_v60 = vpack.c.b16 %v1061_v27, %v1061_v27  ;;  %v10211_v27 = vld [vmem:[#allocation5 + $0x17d0] sm:$0xf]  ;;  %v10123_v7 = vld [vmem:[#allocation5 + $0x1720] sm:$0xf] }
 0x16d   :  { %6193 = vmatpush.bf16.msra.mxu0 %v9724_v24  ;;  %12135 = vst [vmem:[#allocation25_spill] sm:$0xff] %v11925_v61  ;;  %v10220_v24 = vor.u32 %v11510_v3, %v10219_v5  ;;  %v10212_v18 = vor.u32 %v11508_v39, %v10211_v27  ;;  %v10003_v3 = vld [vmem:[#allocation5 + $0x1630] sm:$0xf]  ;;  %v9995_v39 = vld [vmem:[#allocation5 + $0x1620] sm:$0xf] }
 0x16e   :  { %6206 = vmatpush.bf16.msra.mxu1 %v9788_v47  ;;  %12137 = vst [vmem:[#allocation27_spill] sm:$0xff] %v11929_v60  ;;  %v10084_v47 = vor.u32 %v11476_v40, %v10083_v19  ;;  %v6000_v59 = vpop.f32.mrf.mxu1  ;;  %v10131_v19 = vld [vmem:[#allocation5 + $0x1730] sm:$0xf] }
 0x16f   :  { %6219 = vmatpush.bf16.msra.mxu2 %v9852_v50  ;;  %v10011_v50 = vld [vmem:[#allocation5 + $0x1640] sm:$0xf]  ;;  %v10195_v40 = vld [vmem:[#allocation5 + $0x17b0] sm:$0xf] }
 0x170   :  { %6232 = vmatpush.bf16.msra.mxu3 %v9916_v56  ;;  %6194 = vmatmul.bf16.vlgmr.msra.gmra.mxu0 %v11923_v51  ;;  %v10139_v56 = vld [vmem:[#allocation5 + $0x1740] sm:$0xf]  ;;  %v10012_v0 = vor.u32 %v11458_v48, %v10011_v50  ;;  %v11470_v48 = vld [vmem:[#allocation5 + $0x16a4] sm:$0xf0] }
 0x171   :  { %6238 = vmatpush.bf16.msrb.mxu0 %v10036_v43  ;;  %6207 = vmatmul.bf16.vlgmr.msra.gmra.mxu1 %v11927_v1  ;;  %v11490_v43 = vld [vmem:[#allocation5 + $0x1744] sm:$0xf0] }
 0x172   :  { %6251 = vmatpush.bf16.msrb.mxu1 %v10100_v36  ;;  %6220 = vmatmul.bf16.vlgmr.msra.gmra.mxu2 %v11925_v61  ;;  %v10020_v36 = vor.u32 %v11460_v54, %v10019_v53  ;;  %v10140_v5 = vor.u32 %v11490_v43, %v10139_v56  ;;  %v11472_v54 = vld [vmem:[#allocation5 + $0x16b4] sm:$0xf0]  ;;  %v10187_v43 = vld [vmem:[#allocation5 + $0x17a0] sm:$0xf] }
 0x173   :  { %6264 = vmatpush.bf16.msrb.mxu2 %v10164_v32  ;;  %6233 = vmatmul.bf16.vlgmr.msra.gmra.mxu3 %v11929_v60  ;;  %v5987_v32 = vpop.f32.mrf.mxu0 }
 0x174   :  { %6277 = vmatpush.bf16.msrb.mxu3 %v10228_v52  ;;  %v10148_v52 = vor.u32 %v11492_v22, %v10147_v26  ;;  %v5988_v57 = vadd.f32 %v5987_v32, %v11921_v34  ;;  %v11504_v26 = vld [vmem:[#allocation5 + $0x17b4] sm:$0xf0]  ;;  %v11502_v32 = vld [vmem:[#allocation5 + $0x17a4] sm:$0xf0] }
 0x175   :  { %6239 = vmatpush.bf16.msrb.mxu0 %v10028_v11  ;;  %v11456_v11 = vld [vmem:[#allocation5 + $0x1634] sm:$0xf0]  ;;  %v6013_v50 = vpop.f32.mrf.mxu2 }
 0x176   :  { %6252 = vmatpush.bf16.msrb.mxu1 %v10092_v17  ;;  %v10067_v17 = vld [vmem:[#allocation5 + $0x16b0] sm:$0xf]  ;;  %v6001_v53 = vadd.f32 %v6000_v59, %v5988_v57  ;;  %v10004_v22 = vor.u32 %v11456_v11, %v10003_v3  ;;  %v6026_v56 = vpop.f32.mrf.mxu3  ;;  %v6002_v57 = vpop.f32.mrf.mxu1  ;;  %v11452_v3 = vld [vmem:[#allocation5 + $0x1614] sm:$0xf0] }
 0x177   :  { %6265 = vmatpush.bf16.msrb.mxu2 %v10156_v14  ;;  %v10204_v14 = vor.u32 %v11506_v63, %v10203_v58  ;;  %v10068_v34 = vor.u32 %v11472_v54, %v10067_v17  ;;  %v10051_v11 = vld [vmem:[#allocation5 + $0x1690] sm:$0xf]  ;;  %v10188_v17 = vor.u32 %v11502_v32, %v10187_v43  ;;  %v11484_v54 = vld [vmem:[#allocation5 + $0x1714] sm:$0xf0] }
 0x178   :  { %6278 = vmatpush.bf16.msrb.mxu3 %v10220_v24  ;;  %v11488_v24 = vld [vmem:[#allocation5 + $0x1734] sm:$0xf0]  ;;  %v6014_v55 = vadd.f32 %v6013_v50, %v6001_v53  ;;  %v10115_v53 = vld [vmem:[#allocation5 + $0x1710] sm:$0xf]  ;;  %v11482_v50 = vld [vmem:[#allocation5 + $0x1704] sm:$0xf0] }
 0x179   :  { %6240 = vmatpush.bf16.msrb.mxu0 %v10020_v36  ;;  %v10132_v27 = vor.u32 %v11488_v24, %v10131_v19  ;;  %v11454_v36 = vld [vmem:[#allocation5 + $0x1624] sm:$0xf0]  ;;  %v10179_v19 = vld [vmem:[#allocation5 + $0x1790] sm:$0xf]  ;;  %v11500_v24 = vld [vmem:[#allocation5 + $0x1794] sm:$0xf0] }
 0x17a   :  { %6253 = vmatpush.bf16.msrb.mxu1 %v10084_v47  ;;  %v10059_v47 = vld [vmem:[#allocation5 + $0x16a0] sm:$0xf]  ;;  %v9996_v63 = vor.u32 %v11454_v36, %v9995_v39  ;;  %v10116_v36 = vor.u32 %v11484_v54, %v10115_v53  ;;  %v10291_v43 = vld [vmem:[#allocation5 + $0x1870] sm:$0xf]  ;;  %v11528_v32 = vld [vmem:[#allocation5 + $0x1874] sm:$0xf0] }
 0x17b   :  { %6266 = vmatpush.bf16.msrb.mxu2 %v10148_v52  ;;  %v10196_v52 = vor.u32 %v11504_v26, %v10195_v40  ;;  %v5989_v58 = vpop.f32.mrf.mxu0  ;;  %v10060_v59 = vor.u32 %v11470_v48, %v10059_v47  ;;  %v9979_v40 = vld [vmem:[#allocation5 + $0x1600] sm:$0xf]  ;;  %v88_v48 = vld [vmem:[#allocation2 + $0xb0] sm:$0xff]  ;;  %v11576_v53 = vld [vmem:[#allocation5 + $0x19f4] sm:$0xf0] }
 0x17c   :  { %6279 = vmatpush.bf16.msrb.mxu3 %v10212_v18  ;;  %v11486_v18 = vld [vmem:[#allocation5 + $0x1724] sm:$0xf0]  ;;  %v10107_v47 = vld [vmem:[#allocation5 + $0x1700] sm:$0xf]  ;;  %v10355_v58 = vld [vmem:[#allocation5 + $0x18f0] sm:$0xf] }
 0x17d   :  { %6241 = vmatpush.bf16.msrb.mxu0 %v10012_v0  ;;  %v11936_v0 = vadd.f32 %v6026_v56, %v6014_v55  ;;  %v89_v55 = vld [vmem:[#allocation2 + $0xb8] sm:$0xff]  ;;  %v6015_v56 = vpop.f32.mrf.mxu2 }
 0x17e   :  { %6254 = vmatpush.bf16.msrb.mxu1 %v10076_v62  ;;  %v10124_v62 = vor.u32 %v11486_v18, %v10123_v7  ;;  %v10171_v7 = vld [vmem:[#allocation5 + $0x1780] sm:$0xf]  ;;  %v11498_v18 = vld [vmem:[#allocation5 + $0x1784] sm:$0xf0]  ;;  %v1064_v54 = vunpack.c.l.b16 %v89_v55  ;;  %v10292_v56 = vor.u32 %v11528_v32, %v10291_v43  ;;  %v1065_v60 = vunpack.c.h.b16 %v89_v55  ;;  %v10275_v43 = vld [vmem:[#allocation5 + $0x1850] sm:$0xf] }
 0x17f   :  { %6267 = vmatpush.bf16.msrb.mxu2 %v10140_v5  ;;  %v9987_v5 = vld [vmem:[#allocation5 + $0x1610] sm:$0xf]  ;;  %v11524_v32 = vld [vmem:[#allocation5 + $0x1854] sm:$0xf0] }
 0x180   :  { %6280 = vmatpush.bf16.msrb.mxu3 %v10204_v14  ;;  %v11468_v14 = vld [vmem:[#allocation5 + $0x1694] sm:$0xf0]  ;;  %v9988_v26 = vor.u32 %v11452_v3, %v9987_v5  ;;  %v1062_v3 = vunpack.c.l.b16 %v88_v48 }
 0x181   :  { %6242 = vmatpush.bf16.msrb.mxu0 %v10004_v22  ;;  %v11450_v22 = vld [vmem:[#allocation5 + $0x1604] sm:$0xf0]  ;;  %v10052_v39 = vor.u32 %v11468_v14, %v10051_v11  ;;  %v11544_v5 = vld [vmem:[#allocation5 + $0x18f4] sm:$0xf0]  ;;  %v10108_v14 = vor.u32 %v11482_v50, %v10107_v47  ;;  %v10475_v50 = vld [vmem:[#allocation5 + $0x19e0] sm:$0xf] }
 0x182   :  { %6255 = vmatpush.bf16.msrb.mxu1 %v10068_v34  ;;  %v10043_v34 = vld [vmem:[#allocation5 + $0x1680] sm:$0xf]  ;;  %v9980_v57 = vor.u32 %v11450_v22, %v9979_v40  ;;  %v10356_v1 = vor.u32 %v11544_v5, %v10355_v58  ;;  %v11526_v40 = vld [vmem:[#allocation5 + $0x1864] sm:$0xf0]  ;;  %v11938_v51 = vpack.c.b16 %v1062_v3, %v1062_v3  ;;  %v10339_v58 = vld [vmem:[#allocation5 + $0x18d0] sm:$0xf] }
 0x183   :  { %6268 = vmatpush.bf16.msrb.mxu2 %v10132_v27  ;;  %v11466_v27 = vld [vmem:[#allocation5 + $0x1684] sm:$0xf0]  ;;  %v10347_v22 = vld [vmem:[#allocation5 + $0x18e0] sm:$0xf]  ;;  %v11540_v5 = vld [vmem:[#allocation5 + $0x18d4] sm:$0xf0] }
 0x184   :  { %6281 = vmatpush.bf16.msrb.mxu3 %v10196_v52  ;;  %v10180_v52 = vor.u32 %v11500_v24, %v10179_v19  ;;  %v10044_v11 = vor.u32 %v11466_v27, %v10043_v34  ;;  %v1063_v19 = vunpack.c.h.b16 %v88_v48  ;;  %v10172_v24 = vor.u32 %v11498_v18, %v10171_v7  ;;  %12138 = vst [vmem:[#allocation28_spill] sm:$0xff] %v11938_v51  ;;  %v10411_v34 = vld [vmem:[#allocation5 + $0x1960] sm:$0xf]  ;;  %v11558_v27 = vld [vmem:[#allocation5 + $0x1964] sm:$0xf0] }
 0x185   :  { %6243 = vmatpush.bf16.msrb.mxu0 %v9996_v63  ;;  %v6028_v63 = vpop.f32.mrf.mxu3  ;;  %v11574_v48 = vld [vmem:[#allocation5 + $0x19e4] sm:$0xf0]  ;;  %v10412_v55 = vor.u32 %v11558_v27, %v10411_v34  ;;  %v11572_v3 = vld [vmem:[#allocation5 + $0x19d4] sm:$0xf0] }
 0x186   :  { %6256 = vmatpush.bf16.msrb.mxu1 %v10060_v59  ;;  %v10419_v59 = vld [vmem:[#allocation5 + $0x1970] sm:$0xf]  ;;  %v11942_v47 = vpack.c.b16 %v1063_v19, %v1063_v19  ;;  %v11538_v19 = vld [vmem:[#allocation5 + $0x18c4] sm:$0xf0] }
 0x187   :  { %6269 = vmatpush.bf16.msrb.mxu2 %v10124_v62  ;;  %v11560_v62 = vld [vmem:[#allocation5 + $0x1974] sm:$0xf0] }
 0x188   :  { %6282 = vmatpush.bf16.msrb.mxu3 %v10188_v17  ;;  %v10483_v17 = vld [vmem:[#allocation5 + $0x19f0] sm:$0xf]  ;;  %v10420_v63 = vor.u32 %v11560_v62, %v10419_v59  ;;  %12140 = vst [vmem:[#allocation30_spill] sm:$0xff] %v11942_v47  ;;  %v11556_v62 = vld [vmem:[#allocation5 + $0x1954] sm:$0xf0] }
 0x189   :  { %6244 = vmatpush.bf16.msrb.mxu0 %v9988_v26  ;;  %v10283_v26 = vld [vmem:[#allocation5 + $0x1860] sm:$0xf]  ;;  %v10484_v61 = vor.u32 %v11576_v53, %v10483_v17  ;;  %v10403_v59 = vld [vmem:[#allocation5 + $0x1950] sm:$0xf]  ;;  %v11522_v17 = vld [vmem:[#allocation5 + $0x1844] sm:$0xf0] }
 0x18a   :  { %6257 = vmatpush.bf16.msrb.mxu1 %v10052_v39  ;;  %v11542_v39 = vld [vmem:[#allocation5 + $0x18e4] sm:$0xf0]  ;;  %v10284_v7 = vor.u32 %v11526_v40, %v10283_v26  ;;  %v10331_v53 = vld [vmem:[#allocation5 + $0x18c0] sm:$0xf] }
 0x18b   :  { %6270 = vmatpush.bf16.msrb.mxu2 %v10116_v36  ;;  %v11940_v36 = vpack.c.b16 %v1064_v54, %v1064_v54  ;;  %v10348_v18 = vor.u32 %v11542_v39, %v10347_v22  ;;  %v10459_v26 = vld [vmem:[#allocation5 + $0x19c0] sm:$0xf]  ;;  %v11570_v40 = vld [vmem:[#allocation5 + $0x19c4] sm:$0xf0]  ;;  %v10332_v27 = vor.u32 %v11538_v19, %v10331_v53 }
 0x18c   :  { %6283 = vmatpush.bf16.msrb.mxu3 %v10180_v52  ;;  %v11944_v52 = vpack.c.b16 %v1065_v60, %v1065_v60  ;;  %v10467_v60 = vld [vmem:[#allocation5 + $0x19d0] sm:$0xf]  ;;  %v10379_v53 = vld [vmem:[#allocation5 + $0x1920] sm:$0xf] }
 0x18d   :  { %6245 = vmatpush.bf16.msrb.mxu0 %v9980_v57  ;;  %12139 = vst [vmem:[#allocation29_spill] sm:$0xff] %v11940_v36  ;;  %v10476_v57 = vor.u32 %v11574_v48, %v10475_v50  ;;  %v10468_v54 = vor.u32 %v11572_v3, %v10467_v60  ;;  %v10259_v48 = vld [vmem:[#allocation5 + $0x1830] sm:$0xf]  ;;  %v10251_v3 = vld [vmem:[#allocation5 + $0x1820] sm:$0xf] }
 0x18e   :  { %6258 = vmatpush.bf16.msrb.mxu1 %v10044_v11  ;;  %12141 = vst [vmem:[#allocation31_spill] sm:$0xff] %v11944_v52  ;;  %v10340_v11 = vor.u32 %v11540_v5, %v10339_v58  ;;  %v6052_v34 = vpop.f32.mrf.mxu1  ;;  %v10387_v58 = vld [vmem:[#allocation5 + $0x1930] sm:$0xf] }
 0x18f   :  { %6271 = vmatpush.bf16.msrb.mxu2 %v10108_v14  ;;  %v10267_v14 = vld [vmem:[#allocation5 + $0x1840] sm:$0xf]  ;;  %v10451_v5 = vld [vmem:[#allocation5 + $0x19b0] sm:$0xf] }
 0x190   :  { %6284 = vmatpush.bf16.msrb.mxu3 %v10172_v24  ;;  %6246 = vmatmul.bf16.vlgmr.msrb.gmra.mxu0 %v11938_v51  ;;  %v10395_v24 = vld [vmem:[#allocation5 + $0x1940] sm:$0xf]  ;;  %v10268_v39 = vor.u32 %v11522_v17, %v10267_v14  ;;  %v11534_v17 = vld [vmem:[#allocation5 + $0x18a4] sm:$0xf0] }
 0x191   :  { %6290 = vmatpush.bf16.msra.mxu0 %v10292_v56  ;;  %6259 = vmatmul.bf16.vlgmr.msrb.gmra.mxu1 %v11942_v47  ;;  %v11554_v56 = vld [vmem:[#allocation5 + $0x1944] sm:$0xf0] }
 0x192   :  { %6303 = vmatpush.bf16.msra.mxu1 %v10356_v1  ;;  %6272 = vmatmul.bf16.vlgmr.msrb.gmra.mxu2 %v11940_v36  ;;  %v10276_v1 = vor.u32 %v11524_v32, %v10275_v43  ;;  %v10396_v50 = vor.u32 %v11554_v56, %v10395_v24  ;;  %v11536_v32 = vld [vmem:[#allocation5 + $0x18b4] sm:$0xf0]  ;;  %v10443_v56 = vld [vmem:[#allocation5 + $0x19a0] sm:$0xf] }
 0x193   :  { %6316 = vmatpush.bf16.msra.mxu2 %v10420_v63  ;;  %6285 = vmatmul.bf16.vlgmr.msrb.gmra.mxu3 %v11944_v52  ;;  %v6039_v63 = vpop.f32.mrf.mxu0 }
 0x194   :  { %6329 = vmatpush.bf16.msra.mxu3 %v10484_v61  ;;  %v10404_v61 = vor.u32 %v11556_v62, %v10403_v59  ;;  %v6040_v22 = vadd.f32 %v6039_v63, %v11936_v0  ;;  %v11568_v59 = vld [vmem:[#allocation5 + $0x19b4] sm:$0xf0]  ;;  %v11566_v63 = vld [vmem:[#allocation5 + $0x19a4] sm:$0xf0] }
 0x195   :  { %6291 = vmatpush.bf16.msra.mxu0 %v10284_v7  ;;  %v11520_v7 = vld [vmem:[#allocation5 + $0x1834] sm:$0xf0]  ;;  %v6065_v14 = vpop.f32.mrf.mxu2 }
 0x196   :  { %6304 = vmatpush.bf16.msra.mxu1 %v10348_v18  ;;  %v10323_v18 = vld [vmem:[#allocation5 + $0x18b0] sm:$0xf]  ;;  %v6053_v43 = vadd.f32 %v6052_v34, %v6040_v22  ;;  %v10260_v62 = vor.u32 %v11520_v7, %v10259_v48  ;;  %v6078_v24 = vpop.f32.mrf.mxu3  ;;  %v6054_v22 = vpop.f32.mrf.mxu1  ;;  %v11516_v48 = vld [vmem:[#allocation5 + $0x1814] sm:$0xf0] }
 0x197   :  { %6317 = vmatpush.bf16.msra.mxu2 %v10412_v55  ;;  %v10460_v55 = vor.u32 %v11570_v40, %v10459_v26  ;;  %v10324_v0 = vor.u32 %v11536_v32, %v10323_v18  ;;  %v10307_v7 = vld [vmem:[#allocation5 + $0x1890] sm:$0xf]  ;;  %v10444_v18 = vor.u32 %v11566_v63, %v10443_v56  ;;  %v11548_v32 = vld [vmem:[#allocation5 + $0x1914] sm:$0xf0] }
 0x198   :  { %6330 = vmatpush.bf16.msra.mxu3 %v10476_v57  ;;  %v11552_v57 = vld [vmem:[#allocation5 + $0x1934] sm:$0xf0]  ;;  %v6066_v19 = vadd.f32 %v6065_v14, %v6053_v43  ;;  %v10371_v43 = vld [vmem:[#allocation5 + $0x1910] sm:$0xf]  ;;  %v11546_v14 = vld [vmem:[#allocation5 + $0x1904] sm:$0xf0] }
 0x199   :  { %6292 = vmatpush.bf16.msra.mxu0 %v10276_v1  ;;  %v10388_v60 = vor.u32 %v11552_v57, %v10387_v58  ;;  %v11518_v1 = vld [vmem:[#allocation5 + $0x1824] sm:$0xf0]  ;;  %v10435_v58 = vld [vmem:[#allocation5 + $0x1990] sm:$0xf]  ;;  %v11564_v57 = vld [vmem:[#allocation5 + $0x1994] sm:$0xf0] }
 0x19a   :  { %6305 = vmatpush.bf16.msra.mxu1 %v10340_v11  ;;  %v10315_v11 = vld [vmem:[#allocation5 + $0x18a0] sm:$0xf]  ;;  %v10252_v40 = vor.u32 %v11518_v1, %v10251_v3  ;;  %v10372_v1 = vor.u32 %v11548_v32, %v10371_v43  ;;  %v10547_v56 = vld [vmem:[#allocation5 + $0x1a70] sm:$0xf]  ;;  %v11592_v63 = vld [vmem:[#allocation5 + $0x1a74] sm:$0xf0] }
 0x19b   :  { %6318 = vmatpush.bf16.msra.mxu2 %v10404_v61  ;;  %v10452_v61 = vor.u32 %v11568_v59, %v10451_v5  ;;  %v6041_v26 = vpop.f32.mrf.mxu0  ;;  %v10316_v34 = vor.u32 %v11534_v17, %v10315_v11  ;;  %v10235_v5 = vld [vmem:[#allocation5 + $0x1800] sm:$0xf]  ;;  %v11640_v43 = vld [vmem:[#allocation5 + $0x1bf4] sm:$0xf0] }
 0x19c   :  { %6331 = vmatpush.bf16.msra.mxu3 %v10468_v54  ;;  %v11550_v54 = vld [vmem:[#allocation5 + $0x1924] sm:$0xf0]  ;;  %v10363_v11 = vld [vmem:[#allocation5 + $0x1900] sm:$0xf]  ;;  %v10611_v26 = vld [vmem:[#allocation5 + $0x1af0] sm:$0xf] }
 0x19d   :  { %6293 = vmatpush.bf16.msra.mxu0 %v10268_v39  ;;  %v11951_v39 = vadd.f32 %v6078_v24, %v6066_v19  ;;  %v90_v17 = vld [vmem:[#allocation2 + $0xc0] sm:$0xff]  ;;  %v91_v19 = vld [vmem:[#allocation2 + $0xc8] sm:$0xff]  ;;  %v6067_v24 = vpop.f32.mrf.mxu2 }
 0x19e   :  { %6306 = vmatpush.bf16.msra.mxu1 %v10332_v27  ;;  %v10380_v27 = vor.u32 %v11550_v54, %v10379_v53  ;;  %v10427_v53 = vld [vmem:[#allocation5 + $0x1980] sm:$0xf]  ;;  %v11562_v54 = vld [vmem:[#allocation5 + $0x1984] sm:$0xf0]  ;;  %v1068_v32 = vunpack.c.l.b16 %v91_v19  ;;  %v10548_v24 = vor.u32 %v11592_v63, %v10547_v56  ;;  %v1069_v52 = vunpack.c.h.b16 %v91_v19  ;;  %v10531_v56 = vld [vmem:[#allocation5 + $0x1a50] sm:$0xf] }
 0x19f   :  { %6319 = vmatpush.bf16.msra.mxu2 %v10396_v50  ;;  %v10243_v50 = vld [vmem:[#allocation5 + $0x1810] sm:$0xf]  ;;  %v11588_v63 = vld [vmem:[#allocation5 + $0x1a54] sm:$0xf0] }
 0x1a0   :  { %6332 = vmatpush.bf16.msra.mxu3 %v10460_v55  ;;  %v11532_v55 = vld [vmem:[#allocation5 + $0x1894] sm:$0xf0]  ;;  %v10244_v59 = vor.u32 %v11516_v48, %v10243_v50  ;;  %v1066_v48 = vunpack.c.l.b16 %v90_v17 }
 0x1a1   :  { %6294 = vmatpush.bf16.msra.mxu0 %v10260_v62  ;;  %v11514_v62 = vld [vmem:[#allocation5 + $0x1804] sm:$0xf0]  ;;  %v10308_v3 = vor.u32 %v11532_v55, %v10307_v7  ;;  %v11608_v50 = vld [vmem:[#allocation5 + $0x1af4] sm:$0xf0]  ;;  %v10364_v55 = vor.u32 %v11546_v14, %v10363_v11  ;;  %v10731_v14 = vld [vmem:[#allocation5 + $0x1be0] sm:$0xf] }
 0x1a2   :  { %6307 = vmatpush.bf16.msra.mxu1 %v10324_v0  ;;  %v10299_v0 = vld [vmem:[#allocation5 + $0x1880] sm:$0xf]  ;;  %v10236_v22 = vor.u32 %v11514_v62, %v10235_v5  ;;  %v10612_v47 = vor.u32 %v11608_v50, %v10611_v26  ;;  %v11590_v5 = vld [vmem:[#allocation5 + $0x1a64] sm:$0xf0]  ;;  %v11953_v51 = vpack.c.b16 %v1066_v48, %v1066_v48  ;;  %v10595_v26 = vld [vmem:[#allocation5 + $0x1ad0] sm:$0xf] }
 0x1a3   :  { %6320 = vmatpush.bf16.msra.mxu2 %v10388_v60  ;;  %v11530_v60 = vld [vmem:[#allocation5 + $0x1884] sm:$0xf0]  ;;  %v10603_v62 = vld [vmem:[#allocation5 + $0x1ae0] sm:$0xf]  ;;  %v11604_v50 = vld [vmem:[#allocation5 + $0x1ad4] sm:$0xf0] }
 0x1a4   :  { %6333 = vmatpush.bf16.msra.mxu3 %v10452_v61  ;;  %v10436_v61 = vor.u32 %v11564_v57, %v10435_v58  ;;  %v10300_v7 = vor.u32 %v11530_v60, %v10299_v0  ;;  %v1067_v58 = vunpack.c.h.b16 %v90_v17  ;;  %v10428_v57 = vor.u32 %v11562_v54, %v10427_v53  ;;  %12142 = vst [vmem:[#allocation32_spill] sm:$0xff] %v11953_v51  ;;  %v10667_v0 = vld [vmem:[#allocation5 + $0x1b60] sm:$0xf]  ;;  %v11622_v60 = vld [vmem:[#allocation5 + $0x1b64] sm:$0xf0] }
 0x1a5   :  { %6295 = vmatpush.bf16.msra.mxu0 %v10252_v40  ;;  %v6080_v40 = vpop.f32.mrf.mxu3  ;;  %v11638_v17 = vld [vmem:[#allocation5 + $0x1be4] sm:$0xf0]  ;;  %v10668_v19 = vor.u32 %v11622_v60, %v10667_v0  ;;  %v11636_v48 = vld [vmem:[#allocation5 + $0x1bd4] sm:$0xf0] }
 0x1a6   :  { %6308 = vmatpush.bf16.msra.mxu1 %v10316_v34  ;;  %v10675_v34 = vld [vmem:[#allocation5 + $0x1b70] sm:$0xf]  ;;  %v11957_v11 = vpack.c.b16 %v1067_v58, %v1067_v58  ;;  %v11602_v58 = vld [vmem:[#allocation5 + $0x1ac4] sm:$0xf0] }
 0x1a7   :  { %6321 = vmatpush.bf16.msra.mxu2 %v10380_v27  ;;  %v11624_v27 = vld [vmem:[#allocation5 + $0x1b74] sm:$0xf0] }
 0x1a8   :  { %6334 = vmatpush.bf16.msra.mxu3 %v10444_v18  ;;  %v10739_v18 = vld [vmem:[#allocation5 + $0x1bf0] sm:$0xf]  ;;  %v10676_v40 = vor.u32 %v11624_v27, %v10675_v34  ;;  %12144 = vst [vmem:[#allocation34_spill] sm:$0xff] %v11957_v11  ;;  %v11620_v27 = vld [vmem:[#allocation5 + $0x1b54] sm:$0xf0] }
 0x1a9   :  { %6296 = vmatpush.bf16.msra.mxu0 %v10244_v59  ;;  %v10539_v59 = vld [vmem:[#allocation5 + $0x1a60] sm:$0xf]  ;;  %v10740_v36 = vor.u32 %v11640_v43, %v10739_v18  ;;  %v10659_v34 = vld [vmem:[#allocation5 + $0x1b50] sm:$0xf]  ;;  %v11586_v18 = vld [vmem:[#allocation5 + $0x1a44] sm:$0xf0] }
 0x1aa   :  { %6309 = vmatpush.bf16.msra.mxu1 %v10308_v3  ;;  %v11606_v3 = vld [vmem:[#allocation5 + $0x1ae4] sm:$0xf0]  ;;  %v10540_v53 = vor.u32 %v11590_v5, %v10539_v59  ;;  %v10587_v43 = vld [vmem:[#allocation5 + $0x1ac0] sm:$0xf] }
 0x1ab   :  { %6322 = vmatpush.bf16.msra.mxu2 %v10372_v1  ;;  %v11955_v1 = vpack.c.b16 %v1068_v32, %v1068_v32  ;;  %v10604_v54 = vor.u32 %v11606_v3, %v10603_v62  ;;  %v10715_v59 = vld [vmem:[#allocation5 + $0x1bc0] sm:$0xf]  ;;  %v11634_v5 = vld [vmem:[#allocation5 + $0x1bc4] sm:$0xf0]  ;;  %v10588_v60 = vor.u32 %v11602_v58, %v10587_v43 }
 0x1ac   :  { %6335 = vmatpush.bf16.msra.mxu3 %v10436_v61  ;;  %v11959_v61 = vpack.c.b16 %v1069_v52, %v1069_v52  ;;  %v10723_v52 = vld [vmem:[#allocation5 + $0x1bd0] sm:$0xf]  ;;  %v10635_v43 = vld [vmem:[#allocation5 + $0x1b20] sm:$0xf] }
 0x1ad   :  { %6297 = vmatpush.bf16.msra.mxu0 %v10236_v22  ;;  %12143 = vst [vmem:[#allocation33_spill] sm:$0xff] %v11955_v1  ;;  %v10732_v22 = vor.u32 %v11638_v17, %v10731_v14  ;;  %v10724_v32 = vor.u32 %v11636_v48, %v10723_v52  ;;  %v10515_v17 = vld [vmem:[#allocation5 + $0x1a30] sm:$0xf]  ;;  %v10507_v48 = vld [vmem:[#allocation5 + $0x1a20] sm:$0xf] }
 0x1ae   :  { %6310 = vmatpush.bf16.msra.mxu1 %v10300_v7  ;;  %12145 = vst [vmem:[#allocation35_spill] sm:$0xff] %v11959_v61  ;;  %v10596_v7 = vor.u32 %v11604_v50, %v10595_v26  ;;  %v6104_v0 = vpop.f32.mrf.mxu1  ;;  %v10643_v26 = vld [vmem:[#allocation5 + $0x1b30] sm:$0xf] }
 0x1af   :  { %6323 = vmatpush.bf16.msra.mxu2 %v10364_v55  ;;  %v10523_v55 = vld [vmem:[#allocation5 + $0x1a40] sm:$0xf]  ;;  %v10707_v50 = vld [vmem:[#allocation5 + $0x1bb0] sm:$0xf] }
 0x1b0   :  { %6336 = vmatpush.bf16.msra.mxu3 %v10428_v57  ;;  %6298 = vmatmul.bf16.vlgmr.msra.gmra.mxu0 %v11953_v51  ;;  %v10651_v57 = vld [vmem:[#allocation5 + $0x1b40] sm:$0xf]  ;;  %v10524_v3 = vor.u32 %v11586_v18, %v10523_v55  ;;  %v11598_v18 = vld [vmem:[#allocation5 + $0x1aa4] sm:$0xf0] }
 0x1b1   :  { %6342 = vmatpush.bf16.msrb.mxu0 %v10548_v24  ;;  %6311 = vmatmul.bf16.vlgmr.msra.gmra.mxu1 %v11957_v11  ;;  %v11618_v24 = vld [vmem:[#allocation5 + $0x1b44] sm:$0xf0] }
 0x1b2   :  { %6355 = vmatpush.bf16.msrb.mxu1 %v10612_v47  ;;  %6324 = vmatmul.bf16.vlgmr.msra.gmra.mxu2 %v11955_v1  ;;  %v10532_v47 = vor.u32 %v11588_v63, %v10531_v56  ;;  %v10652_v14 = vor.u32 %v11618_v24, %v10651_v57  ;;  %v11600_v63 = vld [vmem:[#allocation5 + $0x1ab4] sm:$0xf0]  ;;  %v10699_v24 = vld [vmem:[#allocation5 + $0x1ba0] sm:$0xf] }
 0x1b3   :  { %6368 = vmatpush.bf16.msrb.mxu2 %v10676_v40  ;;  %6337 = vmatmul.bf16.vlgmr.msra.gmra.mxu3 %v11959_v61  ;;  %v6091_v40 = vpop.f32.mrf.mxu0 }
 0x1b4   :  { %6381 = vmatpush.bf16.msrb.mxu3 %v10740_v36  ;;  %v10660_v36 = vor.u32 %v11620_v27, %v10659_v34  ;;  %v6092_v62 = vadd.f32 %v6091_v40, %v11951_v39  ;;  %v11632_v34 = vld [vmem:[#allocation5 + $0x1bb4] sm:$0xf0]  ;;  %v11630_v40 = vld [vmem:[#allocation5 + $0x1ba4] sm:$0xf0] }
 0x1b5   :  { %6343 = vmatpush.bf16.msrb.mxu0 %v10540_v53  ;;  %v11584_v53 = vld [vmem:[#allocation5 + $0x1a34] sm:$0xf0]  ;;  %v6117_v55 = vpop.f32.mrf.mxu2 }
 0x1b6   :  { %6356 = vmatpush.bf16.msrb.mxu1 %v10604_v54  ;;  %v10579_v54 = vld [vmem:[#allocation5 + $0x1ab0] sm:$0xf]  ;;  %v6105_v56 = vadd.f32 %v6104_v0, %v6092_v62  ;;  %v10516_v27 = vor.u32 %v11584_v53, %v10515_v17  ;;  %v6130_v57 = vpop.f32.mrf.mxu3  ;;  %v6106_v62 = vpop.f32.mrf.mxu1  ;;  %v11580_v17 = vld [vmem:[#allocation5 + $0x1a14] sm:$0xf0] }
 0x1b7   :  { %6369 = vmatpush.bf16.msrb.mxu2 %v10668_v19  ;;  %v10716_v19 = vor.u32 %v11634_v5, %v10715_v59  ;;  %v10580_v39 = vor.u32 %v11600_v63, %v10579_v54  ;;  %v10563_v53 = vld [vmem:[#allocation5 + $0x1a90] sm:$0xf]  ;;  %v10700_v54 = vor.u32 %v11630_v40, %v10699_v24  ;;  %v11612_v63 = vld [vmem:[#allocation5 + $0x1b14] sm:$0xf0]  ;;  %v10759_v24 = vld [vmem:[#allocation5 + $0x74] sm:$0xf] }
 0x1b8   :  { %6382 = vmatpush.bf16.msrb.mxu3 %v10732_v22  ;;  %v11616_v22 = vld [vmem:[#allocation5 + $0x1b34] sm:$0xf0]  ;;  %v6118_v58 = vadd.f32 %v6117_v55, %v6105_v56  ;;  %v10627_v56 = vld [vmem:[#allocation5 + $0x1b10] sm:$0xf]  ;;  %v11610_v55 = vld [vmem:[#allocation5 + $0x1b04] sm:$0xf0] }
 0x1b9   :  { %6344 = vmatpush.bf16.msrb.mxu0 %v10532_v47  ;;  %v10644_v52 = vor.u32 %v11616_v22, %v10643_v26  ;;  %v11582_v47 = vld [vmem:[#allocation5 + $0x1a24] sm:$0xf0]  ;;  %v10691_v26 = vld [vmem:[#allocation5 + $0x1b90] sm:$0xf]  ;;  %v11628_v22 = vld [vmem:[#allocation5 + $0x1b94] sm:$0xf0] }
 0x1ba   :  { %6357 = vmatpush.bf16.msrb.mxu1 %v10596_v7  ;;  %v10571_v7 = vld [vmem:[#allocation5 + $0x1aa0] sm:$0xf]  ;;  %v10508_v5 = vor.u32 %v11582_v47, %v10507_v48  ;;  %v10628_v47 = vor.u32 %v11612_v63, %v10627_v56  ;;  %v7221_v40 = vld [vmem:[#allocation5 + $0x78] sm:$0xf0] }
 0x1bb   :  { %6370 = vmatpush.bf16.msrb.mxu2 %v10660_v36  ;;  %v10708_v36 = vor.u32 %v11632_v34, %v10707_v50  ;;  %v6093_v59 = vpop.f32.mrf.mxu0  ;;  %v10572_v0 = vor.u32 %v11598_v18, %v10571_v7  ;;  %v10491_v50 = vld [vmem:[#allocation5 + $0x1a00] sm:$0xf]  ;;  %v92_v18 = vld [vmem:[#allocation2 + $0xd0] sm:$0xff]  ;;  %v7413_v56 = vld [vmem:[#allocation5 + $0x1f8] sm:$0xf0] }
 0x1bc   :  { %6383 = vmatpush.bf16.msrb.mxu3 %v10724_v32  ;;  %v11614_v32 = vld [vmem:[#allocation5 + $0x1b24] sm:$0xf0]  ;;  %v10619_v7 = vld [vmem:[#allocation5 + $0x1b00] sm:$0xf]  ;;  %v10775_v59 = vld [vmem:[#allocation5 + $0xf4] sm:$0xf] }
 0x1bd   :  { %6345 = vmatpush.bf16.msrb.mxu0 %v10524_v3  ;;  %v11966_v3 = vadd.f32 %v6130_v57, %v6118_v58  ;;  %v93_v58 = vld [vmem:[#allocation2 + $0xd8] sm:$0xff]  ;;  %v6119_v57 = vpop.f32.mrf.mxu2 }
 0x1be   :  { %6358 = vmatpush.bf16.msrb.mxu1 %v10588_v60  ;;  %v10636_v60 = vor.u32 %v11614_v32, %v10635_v43  ;;  %v10683_v43 = vld [vmem:[#allocation5 + $0x1b80] sm:$0xf]  ;;  %v11626_v32 = vld [vmem:[#allocation5 + $0x1b84] sm:$0xf0]  ;;  %v1072_v63 = vunpack.c.l.b16 %v93_v58  ;;  %v7224_v57 = vor.u32 %v10759_v24, %v7221_v40  ;;  %v1073_v61 = vunpack.c.h.b16 %v93_v58  ;;  %v10755_v24 = vld [vmem:[#allocation5 + $0x54] sm:$0xf] }
 0x1bf   :  { %6371 = vmatpush.bf16.msrb.mxu2 %v10652_v14  ;;  %v10499_v14 = vld [vmem:[#allocation5 + $0x1a10] sm:$0xf]  ;;  %v7205_v40 = vld [vmem:[#allocation5 + $0x58] sm:$0xf0] }
 0x1c0   :  { %6384 = vmatpush.bf16.msrb.mxu3 %v10716_v19  ;;  %v11596_v19 = vld [vmem:[#allocation5 + $0x1a94] sm:$0xf0]  ;;  %v10500_v34 = vor.u32 %v11580_v17, %v10499_v14  ;;  %v7285_v14 = vld [vmem:[#allocation5 + $0xf8] sm:$0xf0]  ;;  %v1070_v17 = vunpack.c.l.b16 %v92_v18 }
 0x1c1   :  { %6346 = vmatpush.bf16.msrb.mxu0 %v10516_v27  ;;  %v11578_v27 = vld [vmem:[#allocation5 + $0x1a04] sm:$0xf0]  ;;  %v10564_v48 = vor.u32 %v11596_v19, %v10563_v53  ;;  %v10620_v19 = vor.u32 %v11610_v55, %v10619_v7  ;;  %v7288_v11 = vor.u32 %v10775_v59, %v7285_v14  ;;  %v10805_v55 = vld [vmem:[#allocation5 + $0x1e4] sm:$0xf]  ;;  %v10771_v59 = vld [vmem:[#allocation5 + $0xd4] sm:$0xf] }
 0x1c2   :  { %6359 = vmatpush.bf16.msrb.mxu1 %v10580_v39  ;;  %v10555_v39 = vld [vmem:[#allocation5 + $0x1a80] sm:$0xf]  ;;  %v10492_v62 = vor.u32 %v11578_v27, %v10491_v50  ;;  %v7213_v50 = vld [vmem:[#allocation5 + $0x68] sm:$0xf0]  ;;  %v10773_v27 = vld [vmem:[#allocation5 + $0xe4] sm:$0xf]  ;;  %v11968_v51 = vpack.c.b16 %v1070_v17, %v1070_v17 }
 0x1c3   :  { %6372 = vmatpush.bf16.msrb.mxu2 %v10644_v52  ;;  %v11594_v52 = vld [vmem:[#allocation5 + $0x1a84] sm:$0xf0]  ;;  %v7269_v14 = vld [vmem:[#allocation5 + $0xd8] sm:$0xf0] }
 0x1c4   :  { %6385 = vmatpush.bf16.msrb.mxu3 %v10708_v36  ;;  %v10692_v36 = vor.u32 %v11628_v22, %v10691_v26  ;;  %v10556_v53 = vor.u32 %v11594_v52, %v10555_v39  ;;  %v1071_v26 = vunpack.c.h.b16 %v92_v18  ;;  %v10684_v22 = vor.u32 %v11626_v32, %v10683_v43  ;;  %v10789_v39 = vld [vmem:[#allocation5 + $0x164] sm:$0xf]  ;;  %v7341_v52 = vld [vmem:[#allocation5 + $0x168] sm:$0xf0]  ;;  %v7397_v17 = vld [vmem:[#allocation5 + $0x1d8] sm:$0xf0] }
 0x1c5   :  { %6347 = vmatpush.bf16.msrb.mxu0 %v10508_v5  ;;  %v6132_v5 = vpop.f32.mrf.mxu3  ;;  %v7405_v18 = vld [vmem:[#allocation5 + $0x1e8] sm:$0xf0]  ;;  %v7344_v58 = vor.u32 %v10789_v39, %v7341_v52 }
 0x1c6   :  { %6360 = vmatpush.bf16.msrb.mxu1 %v10572_v0  ;;  %v10791_v0 = vld [vmem:[#allocation5 + $0x174] sm:$0xf]  ;;  %v11972_v7 = vpack.c.b16 %v1071_v26, %v1071_v26  ;;  %v7261_v26 = vld [vmem:[#allocation5 + $0xc8] sm:$0xf0] }
 0x1c7   :  { %6373 = vmatpush.bf16.msrb.mxu2 %v10636_v60  ;;  %v7349_v60 = vld [vmem:[#allocation5 + $0x178] sm:$0xf0] }
 0x1c8   :  { %6386 = vmatpush.bf16.msrb.mxu3 %v10700_v54  ;;  %v10807_v54 = vld [vmem:[#allocation5 + $0x1f4] sm:$0xf]  ;;  %v7352_v5 = vor.u32 %v10791_v0, %v7349_v60  ;;  %v7333_v60 = vld [vmem:[#allocation5 + $0x158] sm:$0xf0] }
 0x1c9   :  { %6348 = vmatpush.bf16.msrb.mxu0 %v10500_v34  ;;  %v10757_v34 = vld [vmem:[#allocation5 + $0x64] sm:$0xf]  ;;  %v7416_v1 = vor.u32 %v10807_v54, %v7413_v56  ;;  %v10787_v0 = vld [vmem:[#allocation5 + $0x154] sm:$0xf]  ;;  %v7197_v54 = vld [vmem:[#allocation5 + $0x48] sm:$0xf0] }
 0x1ca   :  { %6361 = vmatpush.bf16.msrb.mxu1 %v10564_v48  ;;  %v7277_v48 = vld [vmem:[#allocation5 + $0xe8] sm:$0xf0]  ;;  %v7216_v43 = vor.u32 %v10757_v34, %v7213_v50  ;;  %v10769_v56 = vld [vmem:[#allocation5 + $0xc4] sm:$0xf] }
 0x1cb   :  { %6374 = vmatpush.bf16.msrb.mxu2 %v10628_v47  ;;  %v11970_v47 = vpack.c.b16 %v1072_v63, %v1072_v63  ;;  %v7280_v32 = vor.u32 %v10773_v27, %v7277_v48  ;;  %v10801_v34 = vld [vmem:[#allocation5 + $0x1c4] sm:$0xf]  ;;  %v7389_v50 = vld [vmem:[#allocation5 + $0x1c8] sm:$0xf0]  ;;  %v7264_v52 = vor.u32 %v10769_v56, %v7261_v26 }
 0x1cc   :  { %6387 = vmatpush.bf16.msrb.mxu3 %v10692_v36  ;;  %v11974_v36 = vpack.c.b16 %v1073_v61, %v1073_v61  ;;  %v10803_v61 = vld [vmem:[#allocation5 + $0x1d4] sm:$0xf]  ;;  %v10781_v56 = vld [vmem:[#allocation5 + $0x124] sm:$0xf] }
 0x1cd   :  { %6349 = vmatpush.bf16.msrb.mxu0 %v10492_v62  ;;  %v7408_v62 = vor.u32 %v10805_v55, %v7405_v18  ;;  %v7400_v63 = vor.u32 %v10803_v61, %v7397_v17  ;;  %v10751_v18 = vld [vmem:[#allocation5 + $0x34] sm:$0xf]  ;;  %v10749_v17 = vld [vmem:[#allocation5 + $0x24] sm:$0xf] }
 0x1ce   :  { %6362 = vmatpush.bf16.msrb.mxu1 %v10556_v53  ;;  %v7272_v53 = vor.u32 %v10771_v59, %v7269_v14  ;;  %v6156_v39 = vpop.f32.mrf.mxu1  ;;  %v10783_v59 = vld [vmem:[#allocation5 + $0x134] sm:$0xf] }
 0x1cf   :  { %6375 = vmatpush.bf16.msrb.mxu2 %v10620_v19  ;;  %v10753_v19 = vld [vmem:[#allocation5 + $0x44] sm:$0xf]  ;;  %v10799_v14 = vld [vmem:[#allocation5 + $0x1b4] sm:$0xf] }
 0x1d0   :  { %6388 = vmatpush.bf16.msrb.mxu3 %v10684_v22  ;;  %6350 = vmatmul.bf16.vlgmr.msrb.gmra.mxu0 %v11968_v51  ;;  %v10785_v22 = vld [vmem:[#allocation5 + $0x144] sm:$0xf]  ;;  %v7200_v48 = vor.u32 %v10753_v19, %v7197_v54  ;;  %v7245_v54 = vld [vmem:[#allocation5 + $0xa8] sm:$0xf0] }
 0x1d1   :  { %6394 = vmatpush.bf16.msra.mxu0 %v7224_v57  ;;  %6363 = vmatmul.bf16.vlgmr.msrb.gmra.mxu1 %v11972_v7  ;;  %v7325_v57 = vld [vmem:[#allocation5 + $0x148] sm:$0xf0] }
 0x1d2   :  { %6407 = vmatpush.bf16.msra.mxu1 %v7288_v11  ;;  %6376 = vmatmul.bf16.vlgmr.msrb.gmra.mxu2 %v11970_v47  ;;  %v7208_v11 = vor.u32 %v10755_v24, %v7205_v40  ;;  %v7328_v55 = vor.u32 %v10785_v22, %v7325_v57  ;;  %v7253_v40 = vld [vmem:[#allocation5 + $0xb8] sm:$0xf0]  ;;  %v10797_v57 = vld [vmem:[#allocation5 + $0x1a4] sm:$0xf] }
 0x1d3   :  { %6420 = vmatpush.bf16.msra.mxu2 %v7352_v5  ;;  %6389 = vmatmul.bf16.vlgmr.msrb.gmra.mxu3 %v11974_v36  ;;  %v6143_v5 = vpop.f32.mrf.mxu0 }
 0x1d4   :  { %6433 = vmatpush.bf16.msra.mxu3 %v7416_v1  ;;  %v7336_v1 = vor.u32 %v10787_v0, %v7333_v60  ;;  %v6144_v27 = vadd.f32 %v6143_v5, %v11966_v3  ;;  %v7381_v0 = vld [vmem:[#allocation5 + $0x1b8] sm:$0xf0]  ;;  %v7373_v5 = vld [vmem:[#allocation5 + $0x1a8] sm:$0xf0] }
 0x1d5   :  { %6395 = vmatpush.bf16.msra.mxu0 %v7216_v43  ;;  %v7189_v43 = vld [vmem:[#allocation5 + $0x38] sm:$0xf0]  ;;  %v6169_v19 = vpop.f32.mrf.mxu2 }
 0x1d6   :  { %6408 = vmatpush.bf16.msra.mxu1 %v7280_v32  ;;  %v10767_v32 = vld [vmem:[#allocation5 + $0xb4] sm:$0xf]  ;;  %v6157_v24 = vadd.f32 %v6156_v39, %v6144_v27  ;;  %v7192_v60 = vor.u32 %v10751_v18, %v7189_v43  ;;  %v6182_v22 = vpop.f32.mrf.mxu3  ;;  %v6158_v27 = vpop.f32.mrf.mxu1  ;;  %v7173_v18 = vld [vmem:[#allocation5 + $0x18] sm:$0xf0] }
 0x1d7   :  { %6421 = vmatpush.bf16.msra.mxu2 %v7344_v58  ;;  %v7392_v58 = vor.u32 %v10801_v34, %v7389_v50  ;;  %v7256_v3 = vor.u32 %v10767_v32, %v7253_v40  ;;  %v10763_v43 = vld [vmem:[#allocation5 + $0x94] sm:$0xf]  ;;  %v7376_v32 = vor.u32 %v10797_v57, %v7373_v5  ;;  %v7301_v40 = vld [vmem:[#allocation5 + $0x118] sm:$0xf0] }
 0x1d8   :  { %6434 = vmatpush.bf16.msra.mxu3 %v7408_v62  ;;  %v7317_v62 = vld [vmem:[#allocation5 + $0x138] sm:$0xf0]  ;;  %v6170_v26 = vadd.f32 %v6169_v19, %v6157_v24  ;;  %v10779_v24 = vld [vmem:[#allocation5 + $0x114] sm:$0xf] }
 0x1d9   :  { %6396 = vmatpush.bf16.msra.mxu0 %v7208_v11  ;;  %v7320_v61 = vor.u32 %v10783_v59, %v7317_v62  ;;  %v7181_v11 = vld [vmem:[#allocation5 + $0x28] sm:$0xf0]  ;;  %v10795_v59 = vld [vmem:[#allocation5 + $0x194] sm:$0xf]  ;;  %v7365_v62 = vld [vmem:[#allocation5 + $0x198] sm:$0xf0] }
 0x1da   :  { %6409 = vmatpush.bf16.msra.mxu1 %v7272_v53  ;;  %v10765_v53 = vld [vmem:[#allocation5 + $0xa4] sm:$0xf]  ;;  %v7184_v50 = vor.u32 %v10749_v17, %v7181_v11  ;;  %v7229_v11 = vld [vmem:[#allocation5 + $0x88] sm:$0xf0]  ;;  %v7368_v19 = vor.u32 %v10795_v59, %v7365_v62  ;;  %v10839_v57 = vld [vmem:[#allocation5 + $0x2f4] sm:$0xf] }
 0x1db   :  { %6422 = vmatpush.bf16.msra.mxu2 %v7336_v1  ;;  %v7384_v1 = vor.u32 %v10799_v14, %v7381_v0  ;;  %v6145_v34 = vpop.f32.mrf.mxu0  ;;  %v7248_v39 = vor.u32 %v10765_v53, %v7245_v54  ;;  %v10745_v0 = vld [vmem:[#allocation5 + $0x4] sm:$0xf]  ;;  %v10855_v27 = vld [vmem:[#allocation5 + $0x374] sm:$0xf]  ;;  %v7469_v62 = vld [vmem:[#allocation5 + $0x268] sm:$0xf0] }
 0x1dc   :  { %6435 = vmatpush.bf16.msra.mxu3 %v7400_v63  ;;  %v7309_v63 = vld [vmem:[#allocation5 + $0x128] sm:$0xf0]  ;;  %v10761_v17 = vld [vmem:[#allocation5 + $0x84] sm:$0xf] }
 0x1dd   :  { %6397 = vmatpush.bf16.msra.mxu0 %v7200_v48  ;;  %v11981_v48 = vadd.f32 %v6182_v22, %v6170_v26  ;;  %v10777_v53 = vld [vmem:[#allocation5 + $0x104] sm:$0xf]  ;;  %v10823_v26 = vld [vmem:[#allocation5 + $0x274] sm:$0xf]  ;;  %v7477_v22 = vld [vmem:[#allocation5 + $0x278] sm:$0xf0] }
 0x1de   :  { %6410 = vmatpush.bf16.msra.mxu1 %v7264_v52  ;;  %v7312_v52 = vor.u32 %v10781_v56, %v7309_v63  ;;  %v10793_v54 = vld [vmem:[#allocation5 + $0x184] sm:$0xf]  ;;  %v7357_v56 = vld [vmem:[#allocation5 + $0x188] sm:$0xf0]  ;;  %v6171_v63 = vpop.f32.mrf.mxu2  ;;  %v6184_v5 = vpop.f32.mrf.mxu3 }
 0x1df   :  { %6423 = vmatpush.bf16.msra.mxu2 %v7328_v55  ;;  %v10747_v55 = vld [vmem:[#allocation5 + $0x14] sm:$0xf]  ;;  %v10821_v59 = vld [vmem:[#allocation5 + $0x264] sm:$0xf]  ;;  %v7597_v5 = vld [vmem:[#allocation5 + $0x368] sm:$0xf0] }
 0x1e0   :  { %6436 = vmatpush.bf16.msra.mxu3 %v7392_v58  ;;  %v7237_v58 = vld [vmem:[#allocation5 + $0x98] sm:$0xf0]  ;;  %v7176_v14 = vor.u32 %v10747_v55, %v7173_v18  ;;  %v10871_v18 = vld [vmem:[#allocation5 + $0x3f4] sm:$0xf]  ;;  %v10837_v63 = vld [vmem:[#allocation5 + $0x2e4] sm:$0xf] }
 0x1e1   :  { %6398 = vmatpush.bf16.msra.mxu0 %v7192_v60  ;;  %v7165_v60 = vld [vmem:[#allocation5 + $0x8] sm:$0xf0] }
 0x1e2   :  { %6411 = vmatpush.bf16.msra.mxu1 %v7256_v3  ;;  %v7240_v3 = vor.u32 %v10763_v43, %v7237_v58  ;;  %v7168_v34 = vor.u32 %v10745_v0, %v7165_v60  ;;  %v7669_v43 = vld [vmem:[#allocation5 + $0x3f8] sm:$0xf0]  ;;  %v7480_v58 = vor.u32 %v10823_v26, %v7477_v22  ;;  %v7533_v0 = vld [vmem:[#allocation5 + $0x2e8] sm:$0xf0]  ;;  %v10853_v60 = vld [vmem:[#allocation5 + $0x364] sm:$0xf] }
 0x1e3   :  { %6424 = vmatpush.bf16.msra.mxu2 %v7320_v61  ;;  %v7304_v61 = vor.u32 %v10779_v24, %v7301_v40  ;;  %v7525_v26 = vld [vmem:[#allocation5 + $0x2d8] sm:$0xf0]  ;;  %v10851_v22 = vld [vmem:[#allocation5 + $0x354] sm:$0xf] }
 0x1e4   :  { %6437 = vmatpush.bf16.msra.mxu3 %v7384_v1  ;;  %v7293_v1 = vld [vmem:[#allocation5 + $0x108] sm:$0xf0] }
 0x1e5   :  { %6399 = vmatpush.bf16.msra.mxu0 %v7184_v50  ;;  %v7541_v50 = vld [vmem:[#allocation5 + $0x2f8] sm:$0xf0]  ;;  %v7296_v55 = vor.u32 %v10777_v53, %v7293_v1  ;;  %v7600_v53 = vor.u32 %v10853_v60, %v7597_v5  ;;  %v10831_v5 = vld [vmem:[#allocation5 + $0x2b4] sm:$0xf] }
 0x1e6   :  { %6412 = vmatpush.bf16.msra.mxu1 %v7248_v39  ;;  %v7605_v39 = vld [vmem:[#allocation5 + $0x378] sm:$0xf0]  ;;  %v7544_v24 = vor.u32 %v10839_v57, %v7541_v50 }
 0x1e7   :  { %6425 = vmatpush.bf16.msra.mxu2 %v7312_v52  ;;  %v7232_v52 = vor.u32 %v10761_v17, %v7229_v11  ;;  %v7608_v40 = vor.u32 %v10855_v27, %v7605_v39  ;;  %v7472_v17 = vor.u32 %v10821_v59, %v7469_v62  ;;  %v7536_v11 = vor.u32 %v10837_v63, %v7533_v0  ;;  %v7461_v1 = vld [vmem:[#allocation5 + $0x258] sm:$0xf0]  ;;  %v7645_v59 = vld [vmem:[#allocation5 + $0x3c8] sm:$0xf0]  ;;  %v10815_v0 = vld [vmem:[#allocation5 + $0x234] sm:$0xf] }
 0x1e8   :  { %6438 = vmatpush.bf16.msra.mxu3 %v7376_v32  ;;  %v7360_v32 = vor.u32 %v10793_v54, %v7357_v56  ;;  %v10835_v54 = vld [vmem:[#allocation5 + $0x2d4] sm:$0xf]  ;;  %v7589_v57 = vld [vmem:[#allocation5 + $0x358] sm:$0xf0] }
 0x1e9   :  { %6400 = vmatpush.bf16.msra.mxu0 %v7176_v14  ;;  %v7672_v14 = vor.u32 %v10871_v18, %v7669_v43  ;;  %v7653_v50 = vld [vmem:[#allocation5 + $0x3d8] sm:$0xf0]  ;;  %v7528_v39 = vor.u32 %v10835_v54, %v7525_v26  ;;  %v7453_v18 = vld [vmem:[#allocation5 + $0x248] sm:$0xf0]  ;;  %v10833_v43 = vld [vmem:[#allocation5 + $0x2c4] sm:$0xf] }
 0x1ea   :  { %6413 = vmatpush.bf16.msra.mxu1 %v7240_v3  ;;  %v10869_v3 = vld [vmem:[#allocation5 + $0x3e4] sm:$0xf]  ;;  %v7445_v60 = vld [vmem:[#allocation5 + $0x238] sm:$0xf0] }
 0x1eb   :  { %6426 = vmatpush.bf16.msra.mxu2 %v7304_v61  ;;  %v7661_v61 = vld [vmem:[#allocation5 + $0x3e8] sm:$0xf0]  ;;  %v7448_v54 = vor.u32 %v10815_v0, %v7445_v60  ;;  %v10813_v26 = vld [vmem:[#allocation5 + $0x224] sm:$0xf]  ;;  %v10843_v0 = vld [vmem:[#allocation5 + $0x314] sm:$0xf] }
 0x1ec   :  { %6439 = vmatpush.bf16.msra.mxu3 %v7368_v19  ;;  %v10819_v19 = vld [vmem:[#allocation5 + $0x254] sm:$0xf]  ;;  %v7664_v56 = vor.u32 %v10869_v3, %v7661_v61  ;;  %v7557_v60 = vld [vmem:[#allocation5 + $0x318] sm:$0xf0] }
 0x1ed   :  { %6401 = vmatpush.bf16.msra.mxu0 %v7168_v34  ;;  %v10867_v34 = vld [vmem:[#allocation5 + $0x3d4] sm:$0xf]  ;;  %v7464_v27 = vor.u32 %v10819_v19, %v7461_v1  ;;  %v7637_v1 = vld [vmem:[#allocation5 + $0x3b8] sm:$0xf0] }
 0x1ee   :  { %6414 = vmatpush.bf16.msra.mxu1 %v7232_v52  ;;  %v7592_v52 = vor.u32 %v10851_v22, %v7589_v57  ;;  %v10863_v19 = vld [vmem:[#allocation5 + $0x3b4] sm:$0xf]  ;;  %v7437_v22 = vld [vmem:[#allocation5 + $0x228] sm:$0xf0]  ;;  %v10829_v57 = vld [vmem:[#allocation5 + $0x2a4] sm:$0xf] }
 0x1ef   :  { %6427 = vmatpush.bf16.msra.mxu2 %v7296_v55  ;;  %v10817_v55 = vld [vmem:[#allocation5 + $0x244] sm:$0xf] }
 0x1f0   :  { %6440 = vmatpush.bf16.msra.mxu3 %v7360_v32  ;;  %6402 = vmatmul.bf16.vlgmr.msra.gmra.mxu0 %v11791_v20  ;;  %v7656_v32 = vor.u32 %v10867_v34, %v7653_v50  ;;  %v10865_v20 = vld [vmem:[#allocation5 + $0x3c4] sm:$0xf]  ;;  %v7456_v62 = vor.u32 %v10817_v55, %v7453_v18  ;;  %v7640_v34 = vor.u32 %v10863_v19, %v7637_v1 }
 0x1f1   :  { %6446 = vmatpush.bf16.msrb.mxu0 %v7480_v58  ;;  %6415 = vmatmul.bf16.vlgmr.msra.gmra.mxu1 %v11794_v21  ;;  %v10849_v58 = vld [vmem:[#allocation5 + $0x344] sm:$0xf]  ;;  %v6208_v21 = vpop.f32.mrf.mxu1  ;;  %v7648_v3 = vor.u32 %v10865_v20, %v7645_v59  ;;  %v7560_v19 = vor.u32 %v10843_v0, %v7557_v60 }
 0x1f2   :  { %6459 = vmatpush.bf16.msrb.mxu1 %v7544_v24  ;;  %6428 = vmatmul.bf16.vlgmr.msra.gmra.mxu2 %v11786_v4  ;;  %v7517_v4 = vld [vmem:[#allocation5 + $0x2c8] sm:$0xf0]  ;;  %v10825_v1 = vld [vmem:[#allocation5 + $0x284] sm:$0xf] }
 0x1f3   :  { %6472 = vmatpush.bf16.msrb.mxu2 %v7608_v40  ;;  %6441 = vmatmul.bf16.vlgmr.msra.gmra.mxu3 %v11788_v6  ;;  %v7581_v24 = vld [vmem:[#allocation5 + $0x348] sm:$0xf0]  ;;  %v6195_v40 = vpop.f32.mrf.mxu0  ;;  %v7520_v63 = vor.u32 %v10833_v43, %v7517_v4  ;;  %v10861_v43 = vld [vmem:[#allocation5 + $0x3a4] sm:$0xf] }
 0x1f4   :  { %6485 = vmatpush.bf16.msrb.mxu3 %v7672_v14  ;;  %v6196_v6 = vadd.f32 %v6195_v40, %v11981_v48  ;;  %v7584_v14 = vor.u32 %v10849_v58, %v7581_v24  ;;  %v7440_v58 = vor.u32 %v10813_v26, %v7437_v22  ;;  %v7549_v26 = vld [vmem:[#allocation5 + $0x308] sm:$0xf0]  ;;  %v10857_v22 = vld [vmem:[#allocation5 + $0x384] sm:$0xf] }
 0x1f5   :  { %6447 = vmatpush.bf16.msrb.mxu0 %v7472_v17  ;;  %v7509_v17 = vld [vmem:[#allocation5 + $0x2b8] sm:$0xf0]  ;;  %v6221_v50 = vpop.f32.mrf.mxu2  ;;  %v10901_v0 = vld [vmem:[#allocation5 + $0x4e4] sm:$0xf] }
 0x1f6   :  { %6460 = vmatpush.bf16.msrb.mxu1 %v7536_v11  ;;  %v6209_v61 = vadd.f32 %v6208_v21, %v6196_v6  ;;  %v10847_v11 = vld [vmem:[#allocation5 + $0x334] sm:$0xf]  ;;  %v7512_v48 = vor.u32 %v10831_v5, %v7509_v17  ;;  %v6234_v18 = vpop.f32.mrf.mxu3  ;;  %v10809_v17 = vld [vmem:[#allocation5 + $0x204] sm:$0xf] }
 0x1f7   :  { %6473 = vmatpush.bf16.msrb.mxu2 %v7600_v53  ;;  %v7573_v53 = vld [vmem:[#allocation5 + $0x338] sm:$0xf0]  ;;  %v10811_v6 = vld [vmem:[#allocation5 + $0x214] sm:$0xf] }
 0x1f8   :  { %6486 = vmatpush.bf16.msrb.mxu3 %v7664_v56  ;;  %v7576_v56 = vor.u32 %v10847_v11, %v7573_v53  ;;  %v6222_v55 = vadd.f32 %v6221_v50, %v6209_v61  ;;  %v10827_v21 = vld [vmem:[#allocation5 + $0x294] sm:$0xf]  ;;  %v7421_v11 = vld [vmem:[#allocation5 + $0x208] sm:$0xf0] }
 0x1f9   :  { %6448 = vmatpush.bf16.msrb.mxu0 %v7464_v27  ;;  %v7501_v27 = vld [vmem:[#allocation5 + $0x2a8] sm:$0xf0]  ;;  %v6210_v24 = vpop.f32.mrf.mxu1  ;;  %v10859_v5 = vld [vmem:[#allocation5 + $0x394] sm:$0xf] }
 0x1fa   :  { %6461 = vmatpush.bf16.msrb.mxu1 %v7528_v39  ;;  %v10845_v39 = vld [vmem:[#allocation5 + $0x324] sm:$0xf]  ;;  %v11988_v40 = vadd.f32 %v6234_v18, %v6222_v55  ;;  %v7504_v20 = vor.u32 %v10829_v57, %v7501_v27  ;;  %v7613_v57 = vld [vmem:[#allocation5 + $0x388] sm:$0xf0]  ;;  %v10887_v50 = vld [vmem:[#allocation5 + $0x474] sm:$0xf]  ;;  %v7424_v55 = vor.u32 %v10809_v17, %v7421_v11 }
 0x1fb   :  { %6474 = vmatpush.bf16.msrb.mxu2 %v7592_v52  ;;  %v7565_v52 = vld [vmem:[#allocation5 + $0x328] sm:$0xf0]  ;;  %v6197_v4 = vpop.f32.mrf.mxu0  ;;  %v7733_v27 = vld [vmem:[#allocation5 + $0x478] sm:$0xf0]  ;;  %v10935_v24 = vld [vmem:[#allocation5 + $0x5f4] sm:$0xf] }
 0x1fc   :  { %6487 = vmatpush.bf16.msrb.mxu3 %v7656_v32  ;;  %v7629_v32 = vld [vmem:[#allocation5 + $0x3a8] sm:$0xf0]  ;;  %v7568_v59 = vor.u32 %v10845_v39, %v7565_v52  ;;  %v10903_v39 = vld [vmem:[#allocation5 + $0x4f4] sm:$0xf]  ;;  %v7797_v18 = vld [vmem:[#allocation5 + $0x4f8] sm:$0xf0] }
 0x1fd   :  { %6449 = vmatpush.bf16.msrb.mxu0 %v7456_v62  ;;  %v7429_v62 = vld [vmem:[#allocation5 + $0x218] sm:$0xf0]  ;;  %v10933_v17 = vld [vmem:[#allocation5 + $0x5e4] sm:$0xf]  ;;  %v7917_v11 = vld [vmem:[#allocation5 + $0x5e8] sm:$0xf0] }
 0x1fe   :  { %6462 = vmatpush.bf16.msrb.mxu1 %v7520_v63  ;;  %v7632_v63 = vor.u32 %v10861_v43, %v7629_v32  ;;  %v7432_v61 = vor.u32 %v10811_v6, %v7429_v62  ;;  %v6236_v52 = vpop.f32.mrf.mxu3  ;;  %v10919_v43 = vld [vmem:[#allocation5 + $0x574] sm:$0xf]  ;;  %v7861_v32 = vld [vmem:[#allocation5 + $0x578] sm:$0xf0]  ;;  %v7736_v6 = vor.u32 %v10887_v50, %v7733_v27  ;;  %v7800_v62 = vor.u32 %v10903_v39, %v7797_v18  ;;  %v10881_v18 = vld [vmem:[#allocation5 + $0x444] sm:$0xf] }
 0x1ff   :  { %6475 = vmatpush.bf16.msrb.mxu2 %v7584_v14  ;;  %v7493_v14 = vld [vmem:[#allocation5 + $0x298] sm:$0xf0]  ;;  %v10931_v50 = vld [vmem:[#allocation5 + $0x5d4] sm:$0xf] }
 0x200   :  { %6488 = vmatpush.bf16.msrb.mxu3 %v7648_v3  ;;  %v7621_v3 = vld [vmem:[#allocation5 + $0x398] sm:$0xf0]  ;;  %v7496_v53 = vor.u32 %v10827_v21, %v7493_v14  ;;  %v7864_v21 = vor.u32 %v10919_v43, %v7861_v32  ;;  %v7725_v14 = vld [vmem:[#allocation5 + $0x468] sm:$0xf0] }
 0x201   :  { %6450 = vmatpush.bf16.msrb.mxu0 %v7448_v54  ;;  %v7485_v54 = vld [vmem:[#allocation5 + $0x288] sm:$0xf0]  ;;  %v7909_v27 = vld [vmem:[#allocation5 + $0x5d8] sm:$0xf0] }
 0x202   :  { %6463 = vmatpush.bf16.msrb.mxu1 %v7512_v48  ;;  %v10841_v48 = vld [vmem:[#allocation5 + $0x304] sm:$0xf]  ;;  %v7488_v4 = vor.u32 %v10825_v1, %v7485_v54  ;;  %v10883_v54 = vld [vmem:[#allocation5 + $0x454] sm:$0xf]  ;;  %v7709_v43 = vld [vmem:[#allocation5 + $0x448] sm:$0xf0]  ;;  %v7912_v32 = vor.u32 %v10931_v50, %v7909_v27 }
 0x203   :  { %6476 = vmatpush.bf16.msrb.mxu2 %v7576_v56  ;;  %v7624_v56 = vor.u32 %v10859_v5, %v7621_v3  ;;  %v7789_v5 = vld [vmem:[#allocation5 + $0x4e8] sm:$0xf0]  ;;  %v10917_v3 = vld [vmem:[#allocation5 + $0x564] sm:$0xf] }
 0x204   :  { %6489 = vmatpush.bf16.msrb.mxu3 %v7640_v34  ;;  %v6223_v34 = vpop.f32.mrf.mxu2  ;;  %v10925_v27 = vld [vmem:[#allocation5 + $0x5a4] sm:$0xf] }
 0x205   :  { %6451 = vmatpush.bf16.msrb.mxu0 %v7440_v58  ;;  %v7552_v58 = vor.u32 %v10841_v48, %v7549_v26  ;;  %v7717_v48 = vld [vmem:[#allocation5 + $0x458] sm:$0xf0]  ;;  %v7920_v26 = vor.u32 %v10933_v17, %v7917_v11 }
 0x206   :  { %6464 = vmatpush.bf16.msrb.mxu1 %v7504_v20  ;;  %v7925_v20 = vld [vmem:[#allocation5 + $0x5f8] sm:$0xf0]  ;;  %v7720_v39 = vor.u32 %v10883_v54, %v7717_v48  ;;  %v7693_v54 = vld [vmem:[#allocation5 + $0x428] sm:$0xf0]  ;;  %v10893_v48 = vld [vmem:[#allocation5 + $0x4a4] sm:$0xf] }
 0x207   :  { %6477 = vmatpush.bf16.msrb.mxu2 %v7568_v59  ;;  %v7616_v59 = vor.u32 %v10857_v22, %v7613_v57  ;;  %v7928_v60 = vor.u32 %v10935_v24, %v7925_v20  ;;  %v7781_v22 = vld [vmem:[#allocation5 + $0x4d8] sm:$0xf0]  ;;  %v10915_v57 = vld [vmem:[#allocation5 + $0x554] sm:$0xf]  ;;  %v7901_v20 = vld [vmem:[#allocation5 + $0x5c8] sm:$0xf0] }
 0x208   :  { %6490 = vmatpush.bf16.msrb.mxu3 %v7632_v63  ;;  %v10885_v63 = vld [vmem:[#allocation5 + $0x464] sm:$0xf]  ;;  %v7845_v34 = vld [vmem:[#allocation5 + $0x558] sm:$0xf0] }
 0x209   :  { %6452 = vmatpush.bf16.msrb.mxu0 %v7432_v61  ;;  %v7853_v61 = vld [vmem:[#allocation5 + $0x568] sm:$0xf0]  ;;  %v7893_v17 = vld [vmem:[#allocation5 + $0x5b8] sm:$0xf0] }
 0x20a   :  { %6465 = vmatpush.bf16.msrb.mxu1 %v7496_v53  ;;  %v7728_v53 = vor.u32 %v10885_v63, %v7725_v14  ;;  %v7856_v1 = vor.u32 %v10917_v3, %v7853_v61  ;;  %v7701_v63 = vld [vmem:[#allocation5 + $0x438] sm:$0xf0]  ;;  %v10895_v14 = vld [vmem:[#allocation5 + $0x4b4] sm:$0xf] }
 0x20b   :  { %6478 = vmatpush.bf16.msrb.mxu2 %v7560_v19  ;;  %v7792_v19 = vor.u32 %v10901_v0, %v7789_v5  ;;  %v10911_v5 = vld [vmem:[#allocation5 + $0x534] sm:$0xf]  ;;  %v7829_v3 = vld [vmem:[#allocation5 + $0x538] sm:$0xf0] }
 0x20c   :  { %6491 = vmatpush.bf16.msrb.mxu3 %v7624_v56  ;;  %v10899_v56 = vld [vmem:[#allocation5 + $0x4d4] sm:$0xf] }
 0x20d   :  { %6453 = vmatpush.bf16.msrb.mxu0 %v7424_v55  ;;  %v7784_v52 = vor.u32 %v10899_v56, %v7781_v22  ;;  %v7848_v55 = vor.u32 %v10915_v57, %v7845_v34  ;;  %v11994_v24 = vpop.f32.mrf.mxu0  ;;  %v10927_v61 = vld [vmem:[#allocation5 + $0x5b4] sm:$0xf]  ;;  %v7757_v22 = vld [vmem:[#allocation5 + $0x4a8] sm:$0xf0]  ;;  %v10909_v57 = vld [vmem:[#allocation5 + $0x524] sm:$0xf] }
 0x20e   :  { %6466 = vmatpush.bf16.msrb.mxu1 %v7488_v4  ;;  %v7773_v4 = vld [vmem:[#allocation5 + $0x4c8] sm:$0xf0]  ;;  %v7896_v56 = vor.u32 %v10927_v61, %v7893_v17  ;;  %v10905_v61 = vld [vmem:[#allocation5 + $0x504] sm:$0xf] }
 0x20f   :  { %6479 = vmatpush.bf16.msrb.mxu2 %v7552_v58  ;;  %v10913_v58 = vld [vmem:[#allocation5 + $0x544] sm:$0xf]  ;;  %v7821_v34 = vld [vmem:[#allocation5 + $0x528] sm:$0xf0] }
 0x210   :  { %6492 = vmatpush.bf16.msrb.mxu3 %v7616_v59  ;;  %6454 = vmatmul.bf16.vlgmr.msrb.gmra.mxu0 %v11800_v41  ;;  %v7837_v41 = vld [vmem:[#allocation5 + $0x548] sm:$0xf0]  ;;  %v7712_v59 = vor.u32 %v10881_v18, %v7709_v43  ;;  %v7760_v43 = vor.u32 %v10893_v48, %v7757_v22  ;;  %v7989_v48 = vld [vmem:[#allocation5 + $0x678] sm:$0xf0] }
 0x211   :  { %6498 = vmatpush.bf16.msra.mxu0 %v7736_v6  ;;  %6467 = vmatmul.bf16.vlgmr.msrb.gmra.mxu1 %v11804_v44  ;;  %v11996_v6 = vpop.f32.mrf.mxu1 }
 0x212   :  { %6511 = vmatpush.bf16.msra.mxu1 %v7800_v62  ;;  %6480 = vmatmul.bf16.vlgmr.msrb.gmra.mxu2 %v11798_v38  ;;  %v10897_v38 = vld [vmem:[#allocation5 + $0x4c4] sm:$0xf]  ;;  %v7840_v62 = vor.u32 %v10913_v58, %v7837_v41  ;;  %v10891_v58 = vld [vmem:[#allocation5 + $0x494] sm:$0xf] }
 0x213   :  { %6524 = vmatpush.bf16.msra.mxu2 %v7864_v21  ;;  %6493 = vmatmul.bf16.vlgmr.msrb.gmra.mxu3 %v11802_v42  ;;  %v10929_v42 = vld [vmem:[#allocation5 + $0x5c4] sm:$0xf]  ;;  %v7776_v44 = vor.u32 %v10897_v38, %v7773_v4  ;;  %v10879_v21 = vld [vmem:[#allocation5 + $0x434] sm:$0xf]  ;;  %v7824_v38 = vor.u32 %v10909_v57, %v7821_v34  ;;  %v7685_v4 = vld [vmem:[#allocation5 + $0x418] sm:$0xf0] }
 0x214   :  { %6537 = vmatpush.bf16.msra.mxu3 %v7928_v60  ;;  %v7904_v0 = vor.u32 %v10929_v42, %v7901_v20  ;;  %v7765_v60 = vld [vmem:[#allocation5 + $0x4b8] sm:$0xf0]  ;;  %v7704_v11 = vor.u32 %v10879_v21, %v7701_v63  ;;  %v10907_v20 = vld [vmem:[#allocation5 + $0x514] sm:$0xf]  ;;  %v10873_v63 = vld [vmem:[#allocation5 + $0x404] sm:$0xf] }
 0x215   :  { %6499 = vmatpush.bf16.msra.mxu0 %v7728_v53  ;;  %v7768_v53 = vor.u32 %v10895_v14, %v7765_v60  ;;  %v7749_v42 = vld [vmem:[#allocation5 + $0x498] sm:$0xf0]  ;;  %v7677_v14 = vld [vmem:[#allocation5 + $0x408] sm:$0xf0] }
 0x216   :  { %6512 = vmatpush.bf16.msra.mxu1 %v7792_v19  ;;  %v7832_v19 = vor.u32 %v10911_v5, %v7829_v3  ;;  %v12000_v50 = vpop.f32.mrf.mxu3  ;;  %v10889_v5 = vld [vmem:[#allocation5 + $0x484] sm:$0xf]  ;;  %v7741_v3 = vld [vmem:[#allocation5 + $0x488] sm:$0xf0]  ;;  %v7680_v57 = vor.u32 %v10873_v63, %v7677_v14  ;;  %v8053_v34 = vld [vmem:[#allocation5 + $0x6f8] sm:$0xf0] }
 0x217   :  { %6525 = vmatpush.bf16.msra.mxu2 %v7856_v1  ;;  %v10877_v1 = vld [vmem:[#allocation5 + $0x424] sm:$0xf]  ;;  %v8173_v14 = vld [vmem:[#allocation5 + $0x7e8] sm:$0xf0] }
 0x218   :  { %6538 = vmatpush.bf16.msra.mxu3 %v7920_v26  ;;  %v11998_v26 = vpop.f32.mrf.mxu2  ;;  %v10997_v63 = vld [vmem:[#allocation5 + $0x7e4] sm:$0xf] }
 0x219   :  { %6500 = vmatpush.bf16.msra.mxu0 %v7720_v39  ;;  %v7885_v39 = vld [vmem:[#allocation5 + $0x5a8] sm:$0xf0]  ;;  %v6262_v18 = vpop.f32.mrf.mxu1 }
 0x21a   :  { %6513 = vmatpush.bf16.msra.mxu1 %v7784_v52  ;;  %v6249_v52 = vpop.f32.mrf.mxu0  ;;  %v7888_v41 = vor.u32 %v10925_v27, %v7885_v39  ;;  %v10983_v27 = vld [vmem:[#allocation5 + $0x774] sm:$0xf]  ;;  %v8117_v39 = vld [vmem:[#allocation5 + $0x778] sm:$0xf0] }
 0x21b   :  { %6526 = vmatpush.bf16.msra.mxu2 %v7848_v55  ;;  %v7696_v55 = vor.u32 %v10877_v1, %v7693_v54  ;;  %v10951_v54 = vld [vmem:[#allocation5 + $0x674] sm:$0xf]  ;;  %v7744_v52 = vor.u32 %v10889_v5, %v7741_v3 }
 0x21c   :  { %6539 = vmatpush.bf16.msra.mxu3 %v7912_v32  ;;  %v10875_v32 = vld [vmem:[#allocation5 + $0x414] sm:$0xf] }
 0x21d   :  { %6501 = vmatpush.bf16.msra.mxu0 %v7712_v59  ;;  %v7813_v59 = vld [vmem:[#allocation5 + $0x518] sm:$0xf0]  ;;  %v7688_v21 = vor.u32 %v10875_v32, %v7685_v4  ;;  %v10999_v18 = vld [vmem:[#allocation5 + $0x7f4] sm:$0xf]  ;;  %v7992_v32 = vor.u32 %v10951_v54, %v7989_v48 }
 0x21e   :  { %6514 = vmatpush.bf16.msra.mxu1 %v7776_v44  ;;  %v10923_v44 = vld [vmem:[#allocation5 + $0x594] sm:$0xf]  ;;  %v7816_v60 = vor.u32 %v10907_v20, %v7813_v59  ;;  %v6288_v22 = vpop.f32.mrf.mxu3  ;;  %v10965_v20 = vld [vmem:[#allocation5 + $0x6e4] sm:$0xf]  ;;  %v8165_v48 = vld [vmem:[#allocation5 + $0x7d8] sm:$0xf0] }
 0x21f   :  { %6527 = vmatpush.bf16.msra.mxu2 %v7840_v62  ;;  %v7877_v62 = vld [vmem:[#allocation5 + $0x598] sm:$0xf0]  ;;  %v10947_v3 = vld [vmem:[#allocation5 + $0x654] sm:$0xf] }
 0x220   :  { %6540 = vmatpush.bf16.msra.mxu3 %v7904_v0  ;;  %v7752_v0 = vor.u32 %v10891_v58, %v7749_v42  ;;  %v7880_v17 = vor.u32 %v10923_v44, %v7877_v62  ;;  %v6275_v1 = vpop.f32.mrf.mxu2  ;;  %v8120_v58 = vor.u32 %v10983_v27, %v8117_v39  ;;  %v7981_v42 = vld [vmem:[#allocation5 + $0x668] sm:$0xf0]  ;;  %v10981_v62 = vld [vmem:[#allocation5 + $0x764] sm:$0xf]  ;;  %v10995_v54 = vld [vmem:[#allocation5 + $0x7d4] sm:$0xf] }
 0x221   :  { %6502 = vmatpush.bf16.msra.mxu0 %v7704_v11  ;;  %v7805_v11 = vld [vmem:[#allocation5 + $0x508] sm:$0xf0]  ;;  %v8101_v1 = vld [vmem:[#allocation5 + $0x758] sm:$0xf0]  ;;  %v10961_v27 = vld [vmem:[#allocation5 + $0x6c4] sm:$0xf]  ;;  %v8168_v39 = vor.u32 %v10995_v54, %v8165_v48  ;;  %v6248_v54 = vadd.f32 %v11994_v24, %v11988_v40 }
 0x222   :  { %6515 = vmatpush.bf16.msra.mxu1 %v7768_v53  ;;  %v10921_v53 = vld [vmem:[#allocation5 + $0x584] sm:$0xf]  ;;  %v8045_v44 = vld [vmem:[#allocation5 + $0x6e8] sm:$0xf0]  ;;  %v8069_v40 = vld [vmem:[#allocation5 + $0x718] sm:$0xf0] }
 0x223   :  { %6528 = vmatpush.bf16.msra.mxu2 %v7832_v19  ;;  %v7869_v19 = vld [vmem:[#allocation5 + $0x588] sm:$0xf0]  ;;  %v6261_v24 = vadd.f32 %v11996_v6, %v6248_v54  ;;  %v8373_v54 = vld [vmem:[#allocation5 + $0x978] sm:$0xf0] }
 0x224   :  { %6541 = vmatpush.bf16.msra.mxu3 %v7896_v56  ;;  %v10967_v56 = vld [vmem:[#allocation5 + $0x6f4] sm:$0xf]  ;;  %v8125_v6 = vld [vmem:[#allocation5 + $0x788] sm:$0xf0] }
 0x225   :  { %6503 = vmatpush.bf16.msra.mxu0 %v7696_v55  ;;  %v7808_v55 = vor.u32 %v10905_v61, %v7805_v11  ;;  %v8056_v4 = vor.u32 %v10967_v56, %v8053_v34  ;;  %v7973_v61 = vld [vmem:[#allocation5 + $0x658] sm:$0xf0]  ;;  %v8176_v11 = vor.u32 %v10997_v63, %v8173_v14  ;;  %v10945_v34 = vld [vmem:[#allocation5 + $0x644] sm:$0xf] }
 0x226   :  { %6516 = vmatpush.bf16.msra.mxu1 %v7760_v43  ;;  %v8181_v43 = vld [vmem:[#allocation5 + $0x7f8] sm:$0xf0]  ;;  %v7976_v56 = vor.u32 %v10947_v3, %v7973_v61  ;;  %v7949_v3 = vld [vmem:[#allocation5 + $0x628] sm:$0xf0]  ;;  %v10957_v61 = vld [vmem:[#allocation5 + $0x6a4] sm:$0xf] }
 0x227   :  { %6529 = vmatpush.bf16.msra.mxu2 %v7824_v38  ;;  %v7872_v38 = vor.u32 %v10921_v53, %v7869_v19  ;;  %v8184_v59 = vor.u32 %v10999_v18, %v8181_v43  ;;  %v8037_v53 = vld [vmem:[#allocation5 + $0x6d8] sm:$0xf0]  ;;  %v10979_v19 = vld [vmem:[#allocation5 + $0x754] sm:$0xf]  ;;  %v8157_v43 = vld [vmem:[#allocation5 + $0x7c8] sm:$0xf0] }
 0x228   :  { %6542 = vmatpush.bf16.msra.mxu3 %v7888_v41  ;;  %v10949_v41 = vld [vmem:[#allocation5 + $0x664] sm:$0xf]  ;;  %v8149_v63 = vld [vmem:[#allocation5 + $0x7b8] sm:$0xf0] }
 0x229   :  { %6504 = vmatpush.bf16.msra.mxu0 %v7688_v21  ;;  %v8109_v21 = vld [vmem:[#allocation5 + $0x768] sm:$0xf0] }
 0x22a   :  { %6517 = vmatpush.bf16.msra.mxu1 %v7752_v0  ;;  %v7984_v0 = vor.u32 %v10949_v41, %v7981_v42  ;;  %v8112_v5 = vor.u32 %v10981_v62, %v8109_v21  ;;  %v7957_v41 = vld [vmem:[#allocation5 + $0x638] sm:$0xf0]  ;;  %v10959_v42 = vld [vmem:[#allocation5 + $0x6b4] sm:$0xf] }
 0x22b   :  { %6530 = vmatpush.bf16.msra.mxu2 %v7816_v60  ;;  %v8048_v60 = vor.u32 %v10965_v20, %v8045_v44  ;;  %v10975_v44 = vld [vmem:[#allocation5 + $0x734] sm:$0xf]  ;;  %v8085_v62 = vld [vmem:[#allocation5 + $0x738] sm:$0xf0] }
 0x22c   :  { %6543 = vmatpush.bf16.msra.mxu3 %v7880_v17  ;;  %v10963_v17 = vld [vmem:[#allocation5 + $0x6d4] sm:$0xf] }
 0x22d   :  { %6505 = vmatpush.bf16.msra.mxu0 %v7680_v57  ;;  %v8040_v22 = vor.u32 %v10963_v17, %v8037_v53  ;;  %v8104_v57 = vor.u32 %v10979_v19, %v8101_v1  ;;  %v12006_v18 = vpop.f32.mrf.mxu0  ;;  %v10991_v21 = vld [vmem:[#allocation5 + $0x7b4] sm:$0xf]  ;;  %v8013_v53 = vld [vmem:[#allocation5 + $0x6a8] sm:$0xf0]  ;;  %v10973_v19 = vld [vmem:[#allocation5 + $0x724] sm:$0xf] }
 0x22e   :  { %6518 = vmatpush.bf16.msra.mxu1 %v7744_v52  ;;  %v8029_v52 = vld [vmem:[#allocation5 + $0x6c8] sm:$0xf0]  ;;  %v8152_v17 = vor.u32 %v10991_v21, %v8149_v63  ;;  %v10969_v63 = vld [vmem:[#allocation5 + $0x704] sm:$0xf] }
 0x22f   :  { %6531 = vmatpush.bf16.msra.mxu2 %v7808_v55  ;;  %v10977_v55 = vld [vmem:[#allocation5 + $0x744] sm:$0xf]  ;;  %v8077_v1 = vld [vmem:[#allocation5 + $0x728] sm:$0xf0] }
 0x230   :  { %6544 = vmatpush.bf16.msra.mxu3 %v7872_v38  ;;  %6506 = vmatmul.bf16.vlgmr.msra.gmra.mxu0 %v11810_v25  ;;  %v7965_v25 = vld [vmem:[#allocation5 + $0x648] sm:$0xf0]  ;;  %v12008_v38 = vpop.f32.mrf.mxu1 }
 0x231   :  { %6550 = vmatpush.bf16.msrb.mxu0 %v7992_v32  ;;  %6519 = vmatmul.bf16.vlgmr.msra.gmra.mxu1 %v11814_v30  ;;  %v10993_v30 = vld [vmem:[#allocation5 + $0x7c4] sm:$0xf]  ;;  %v8032_v32 = vor.u32 %v10961_v27, %v8029_v52  ;;  %v8016_v27 = vor.u32 %v10957_v61, %v8013_v53  ;;  %v10939_v52 = vld [vmem:[#allocation5 + $0x614] sm:$0xf]  ;;  %v7997_v21 = vld [vmem:[#allocation5 + $0x688] sm:$0xf0] }
 0x232   :  { %6563 = vmatpush.bf16.msrb.mxu1 %v8056_v4  ;;  %6532 = vmatmul.bf16.vlgmr.msra.gmra.mxu2 %v11812_v29  ;;  %v8093_v29 = vld [vmem:[#allocation5 + $0x748] sm:$0xf0]  ;;  %v8160_v20 = vor.u32 %v10993_v30, %v8157_v43  ;;  %v8005_v43 = vld [vmem:[#allocation5 + $0x698] sm:$0xf0] }
 0x233   :  { %6576 = vmatpush.bf16.msrb.mxu2 %v8120_v58  ;;  %6545 = vmatmul.bf16.vlgmr.msra.gmra.mxu3 %v11816_v33  ;;  %v7968_v33 = vor.u32 %v10945_v34, %v7965_v25  ;;  %v8096_v4 = vor.u32 %v10977_v55, %v8093_v29  ;;  %v10943_v58 = vld [vmem:[#allocation5 + $0x634] sm:$0xf]  ;;  %v7941_v55 = vld [vmem:[#allocation5 + $0x618] sm:$0xf0] }
 0x234   :  { %6589 = vmatpush.bf16.msrb.mxu3 %v8184_v59  ;;  %v8021_v59 = vld [vmem:[#allocation5 + $0x6b8] sm:$0xf0]  ;;  %v7960_v14 = vor.u32 %v10943_v58, %v7957_v41  ;;  %v10955_v29 = vld [vmem:[#allocation5 + $0x694] sm:$0xf]  ;;  %v7944_v58 = vor.u32 %v10939_v52, %v7941_v55  ;;  %v10937_v41 = vld [vmem:[#allocation5 + $0x604] sm:$0xf] }
 0x235   :  { %6551 = vmatpush.bf16.msrb.mxu0 %v7984_v0  ;;  %v8024_v0 = vor.u32 %v10959_v42, %v8021_v59  ;;  %v7933_v42 = vld [vmem:[#allocation5 + $0x608] sm:$0xf0]  ;;  %v8008_v59 = vor.u32 %v10955_v29, %v8005_v43  ;;  %v8245_v61 = vld [vmem:[#allocation5 + $0x878] sm:$0xf0] }
 0x236   :  { %6564 = vmatpush.bf16.msrb.mxu1 %v8048_v60  ;;  %v8088_v60 = vor.u32 %v10975_v44, %v8085_v62  ;;  %v12014_v48 = vpop.f32.mrf.mxu3  ;;  %v10953_v62 = vld [vmem:[#allocation5 + $0x684] sm:$0xf]  ;;  %v8237_v43 = vld [vmem:[#allocation5 + $0x868] sm:$0xf0] }
 0x237   :  { %6577 = vmatpush.bf16.msrb.mxu2 %v8112_v5  ;;  %v10941_v5 = vld [vmem:[#allocation5 + $0x624] sm:$0xf] }
 0x238   :  { %6590 = vmatpush.bf16.msrb.mxu3 %v8176_v11  ;;  %v12010_v11 = vpop.f32.mrf.mxu2  ;;  %v7952_v34 = vor.u32 %v10941_v5, %v7949_v3  ;;  %v6314_v25 = vpop.f32.mrf.mxu1  ;;  %v11015_v3 = vld [vmem:[#allocation5 + $0x874] sm:$0xf] }
 0x239   :  { %6552 = vmatpush.bf16.msrb.mxu0 %v7976_v56  ;;  %v10989_v56 = vld [vmem:[#allocation5 + $0x7a4] sm:$0xf]  ;;  %v8437_v25 = vld [vmem:[#allocation5 + $0x9f8] sm:$0xf0] }
 0x23a   :  { %6565 = vmatpush.bf16.msrb.mxu1 %v8040_v22  ;;  %v8141_v22 = vld [vmem:[#allocation5 + $0x7a8] sm:$0xf0] }
 0x23b   :  { %6578 = vmatpush.bf16.msrb.mxu2 %v8104_v57  ;;  %v6301_v57 = vpop.f32.mrf.mxu0  ;;  %v8144_v30 = vor.u32 %v10989_v56, %v8141_v22  ;;  %v8000_v22 = vor.u32 %v10953_v62, %v7997_v21  ;;  %v11027_v62 = vld [vmem:[#allocation5 + $0x8d4] sm:$0xf] }
 0x23c   :  { %6591 = vmatpush.bf16.msrb.mxu3 %v8168_v39  ;;  %v8080_v39 = vor.u32 %v10973_v19, %v8077_v1  ;;  %v7936_v19 = vor.u32 %v10937_v41, %v7933_v42  ;;  %v11047_v1 = vld [vmem:[#allocation5 + $0x974] sm:$0xf] }
 0x23d   :  { %6553 = vmatpush.bf16.msrb.mxu0 %v7968_v33  ;;  %v10971_v33 = vld [vmem:[#allocation5 + $0x714] sm:$0xf]  ;;  %v8376_v29 = vor.u32 %v11047_v1, %v8373_v54  ;;  %v11057_v54 = vld [vmem:[#allocation5 + $0x9c4] sm:$0xf] }
 0x23e   :  { %6566 = vmatpush.bf16.msrb.mxu1 %v8032_v32  ;;  %v10987_v32 = vld [vmem:[#allocation5 + $0x794] sm:$0xf]  ;;  %v8072_v44 = vor.u32 %v10971_v33, %v8069_v40  ;;  %v6340_v53 = vpop.f32.mrf.mxu3  ;;  %v11029_v33 = vld [vmem:[#allocation5 + $0x8e4] sm:$0xf] }
 0x23f   :  { %6579 = vmatpush.bf16.msrb.mxu2 %v8096_v4  ;;  %v8133_v4 = vld [vmem:[#allocation5 + $0x798] sm:$0xf0]  ;;  %v11025_v53 = vld [vmem:[#allocation5 + $0x8c4] sm:$0xf] }
 0x240   :  { %6592 = vmatpush.bf16.msrb.mxu3 %v8160_v20  ;;  %v6274_v20 = vadd.f32 %v11998_v26, %v6261_v24  ;;  %v6327_v5 = vpop.f32.mrf.mxu2  ;;  %v8309_v26 = vld [vmem:[#allocation5 + $0x8f8] sm:$0xf0]  ;;  %v8301_v24 = vld [vmem:[#allocation5 + $0x8e8] sm:$0xf0] }
 0x241   :  { %6554 = vmatpush.bf16.msrb.mxu0 %v7960_v14  ;;  %v8136_v14 = vor.u32 %v10987_v32, %v8133_v4  ;;  %v8365_v32 = vld [vmem:[#allocation5 + $0x968] sm:$0xf0]  ;;  %v11061_v4 = vld [vmem:[#allocation5 + $0x9e4] sm:$0xf] }
 0x242   :  { %6567 = vmatpush.bf16.msrb.mxu1 %v8024_v0  ;;  %v8061_v0 = vld [vmem:[#allocation5 + $0x708] sm:$0xf0]  ;;  %v6287_v56 = vadd.f32 %v12000_v50, %v6274_v20  ;;  %v11045_v50 = vld [vmem:[#allocation5 + $0x964] sm:$0xf] }
 0x243   :  { %6580 = vmatpush.bf16.msrb.mxu2 %v8088_v60  ;;  %v10985_v60 = vld [vmem:[#allocation5 + $0x784] sm:$0xf]  ;;  %v8064_v57 = vor.u32 %v10969_v63, %v8061_v0  ;;  %v8368_v20 = vor.u32 %v11045_v50, %v8365_v32  ;;  %v8293_v63 = vld [vmem:[#allocation5 + $0x8d8] sm:$0xf0] }
 0x244   :  { %6593 = vmatpush.bf16.msrb.mxu3 %v8152_v17  ;;  %v11031_v17 = vld [vmem:[#allocation5 + $0x8f4] sm:$0xf]  ;;  %v6300_v52 = vadd.f32 %v12006_v18, %v6287_v56  ;;  %v8304_v18 = vor.u32 %v11029_v33, %v8301_v24  ;;  %v8357_v0 = vld [vmem:[#allocation5 + $0x958] sm:$0xf0]  ;;  %v8413_v56 = vld [vmem:[#allocation5 + $0x9c8] sm:$0xf0] }
 0x245   :  { %6555 = vmatpush.bf16.msrb.mxu0 %v7952_v34  ;;  %v11063_v34 = vld [vmem:[#allocation5 + $0x9f4] sm:$0xf]  ;;  %v8312_v55 = vor.u32 %v11031_v17, %v8309_v26  ;;  %v8221_v17 = vld [vmem:[#allocation5 + $0x848] sm:$0xf0]  ;;  %v11041_v26 = vld [vmem:[#allocation5 + $0x944] sm:$0xf] }
 0x246   :  { %6568 = vmatpush.bf16.msrb.mxu1 %v8016_v27  ;;  %v8128_v27 = vor.u32 %v10985_v60, %v8125_v6  ;;  %v8440_v40 = vor.u32 %v11063_v34, %v8437_v25  ;;  %v6313_v42 = vadd.f32 %v12008_v38, %v6300_v52  ;;  %v11059_v38 = vld [vmem:[#allocation5 + $0x9d4] sm:$0xf]  ;;  %v8421_v6 = vld [vmem:[#allocation5 + $0x9d8] sm:$0xf0] }
 0x247   :  { %6581 = vmatpush.bf16.msrb.mxu2 %v8080_v39  ;;  %v8248_v39 = vor.u32 %v11015_v3, %v8245_v61  ;;  %v8296_v3 = vor.u32 %v11027_v62, %v8293_v63  ;;  %v11009_v61 = vld [vmem:[#allocation5 + $0x844] sm:$0xf]  ;;  %v11023_v52 = vld [vmem:[#allocation5 + $0x8b4] sm:$0xf]  ;;  %v8405_v33 = vld [vmem:[#allocation5 + $0x9b8] sm:$0xf0] }
 0x248   :  { %6594 = vmatpush.bf16.msrb.mxu3 %v8144_v30  ;;  %v11013_v30 = vld [vmem:[#allocation5 + $0x864] sm:$0xf]  ;;  %v6326_v60 = vadd.f32 %v12010_v11, %v6313_v42  ;;  %v8285_v11 = vld [vmem:[#allocation5 + $0x8c8] sm:$0xf0] }
 0x249   :  { %6556 = vmatpush.bf16.msrb.mxu0 %v7944_v58  ;;  %v8429_v58 = vld [vmem:[#allocation5 + $0x9e8] sm:$0xf0]  ;;  %v8240_v41 = vor.u32 %v11013_v30, %v8237_v43  ;;  %v8288_v34 = vor.u32 %v11025_v53, %v8285_v11  ;;  %v11039_v30 = vld [vmem:[#allocation5 + $0x934] sm:$0xf]  ;;  %v8341_v43 = vld [vmem:[#allocation5 + $0x938] sm:$0xf0] }
 0x24a   :  { %6569 = vmatpush.bf16.msrb.mxu1 %v8008_v59  ;;  %v11011_v59 = vld [vmem:[#allocation5 + $0x854] sm:$0xf]  ;;  %v8432_v21 = vor.u32 %v11061_v4, %v8429_v58  ;;  %v8344_v32 = vor.u32 %v11039_v30, %v8341_v43  ;;  %v11005_v4 = vld [vmem:[#allocation5 + $0x824] sm:$0xf]  ;;  %v8205_v58 = vld [vmem:[#allocation5 + $0x828] sm:$0xf0] }
 0x24b   :  { %6582 = vmatpush.bf16.msrb.mxu2 %v8072_v44  ;;  %v8229_v44 = vld [vmem:[#allocation5 + $0x858] sm:$0xf0]  ;;  %v11053_v63 = vld [vmem:[#allocation5 + $0x9a4] sm:$0xf]  ;;  %v11035_v11 = vld [vmem:[#allocation5 + $0x914] sm:$0xf] }
 0x24c   :  { %6595 = vmatpush.bf16.msrb.mxu3 %v8136_v14  ;;  %v11043_v14 = vld [vmem:[#allocation5 + $0x954] sm:$0xf]  ;;  %v8232_v5 = vor.u32 %v11011_v59, %v8229_v44  ;;  %v11037_v59 = vld [vmem:[#allocation5 + $0x924] sm:$0xf]  ;;  %v8333_v44 = vld [vmem:[#allocation5 + $0x928] sm:$0xf0] }
 0x24d   :  { %6557 = vmatpush.bf16.msrb.mxu0 %v7936_v19  ;;  %v8424_v19 = vor.u32 %v11059_v38, %v8421_v6  ;;  %v6351_v1 = vpop.f32.mrf.mxu0  ;;  %v8501_v43 = vld [vmem:[#allocation5 + $0xa78] sm:$0xf0] }
 0x24e   :  { %6570 = vmatpush.bf16.msrb.mxu1 %v8000_v22  ;;  %v6364_v22 = vpop.f32.mrf.mxu1 }
 0x24f   :  { %6583 = vmatpush.bf16.msrb.mxu2 %v8064_v57 }
 0x250   :  { %6596 = vmatpush.bf16.msrb.mxu3 %v8128_v27  ;;  %6558 = vmatmul.bf16.vlgmr.msrb.gmra.mxu0 %v11822_v23  ;;  %v8360_v23 = vor.u32 %v11043_v14, %v8357_v0  ;;  %v11007_v27 = vld [vmem:[#allocation5 + $0x834] sm:$0xf]  ;;  %v8397_v14 = vld [vmem:[#allocation5 + $0x9a8] sm:$0xf0] }
 0x251   :  { %6602 = vmatpush.bf16.msra.mxu0 %v8248_v39  ;;  %6571 = vmatmul.bf16.vlgmr.msrb.gmra.mxu1 %v11826_v31  ;;  %v6339_v31 = vadd.f32 %v12014_v48, %v6326_v60  ;;  %v8213_v39 = vld [vmem:[#allocation5 + $0x838] sm:$0xf0]  ;;  %v11055_v48 = vld [vmem:[#allocation5 + $0x9b4] sm:$0xf]  ;;  %v8208_v60 = vor.u32 %v11005_v4, %v8205_v58  ;;  %v8400_v53 = vor.u32 %v11053_v63, %v8397_v14  ;;  %v11077_v63 = vld [vmem:[#allocation5 + $0xa64] sm:$0xf] }
 0x252   :  { %6615 = vmatpush.bf16.msra.mxu1 %v8312_v55  ;;  %6584 = vmatmul.bf16.vlgmr.msrb.gmra.mxu2 %v11824_v28  ;;  %v8349_v28 = vld [vmem:[#allocation5 + $0x948] sm:$0xf0]  ;;  %v8416_v55 = vor.u32 %v11057_v54, %v8413_v56  ;;  %v8408_v42 = vor.u32 %v11055_v48, %v8405_v33  ;;  %v11095_v48 = vld [vmem:[#allocation5 + $0xaf4] sm:$0xf]  ;;  %v8629_v4 = vld [vmem:[#allocation5 + $0xb78] sm:$0xf0] }
 0x253   :  { %6628 = vmatpush.bf16.msra.mxu2 %v8376_v29  ;;  %6597 = vmatmul.bf16.vlgmr.msrb.gmra.mxu3 %v11828_v35  ;;  %v8224_v35 = vor.u32 %v11009_v61, %v8221_v17  ;;  %v6352_v57 = vadd.f32 %v6351_v1, %v6339_v31  ;;  %v8352_v25 = vor.u32 %v11041_v26, %v8349_v28  ;;  %v8277_v29 = vld [vmem:[#allocation5 + $0x8b8] sm:$0xf0]  ;;  %v11019_v17 = vld [vmem:[#allocation5 + $0x894] sm:$0xf]  ;;  %v11001_v1 = vld [vmem:[#allocation5 + $0x804] sm:$0xf] }
 0x254   :  { %6641 = vmatpush.bf16.msra.mxu3 %v8440_v40  ;;  %v8216_v40 = vor.u32 %v11007_v27, %v8213_v39  ;;  %v8280_v50 = vor.u32 %v11023_v52, %v8277_v29  ;;  %v8197_v61 = vld [vmem:[#allocation5 + $0x818] sm:$0xf0]  ;;  %v11051_v28 = vld [vmem:[#allocation5 + $0x994] sm:$0xf]  ;;  %v8189_v56 = vld [vmem:[#allocation5 + $0x808] sm:$0xf0] }
 0x255   :  { %6603 = vmatpush.bf16.msra.mxu0 %v8240_v41  ;;  %v6365_v24 = vadd.f32 %v6364_v22, %v6352_v57  ;;  %v11021_v41 = vld [vmem:[#allocation5 + $0x8a4] sm:$0xf]  ;;  %v6353_v0 = vpop.f32.mrf.mxu0  ;;  %v8325_v26 = vld [vmem:[#allocation5 + $0x918] sm:$0xf0]  ;;  %v8253_v22 = vld [vmem:[#allocation5 + $0x888] sm:$0xf0] }
 0x256   :  { %6616 = vmatpush.bf16.msra.mxu1 %v8304_v18  ;;  %v6377_v18 = vpop.f32.mrf.mxu2  ;;  %v6366_v38 = vpop.f32.mrf.mxu1  ;;  %v8389_v31 = vld [vmem:[#allocation5 + $0x998] sm:$0xf0]  ;;  %v8317_v27 = vld [vmem:[#allocation5 + $0x908] sm:$0xf0]  ;;  %v11049_v52 = vld [vmem:[#allocation5 + $0x984] sm:$0xf] }
 0x257   :  { %6629 = vmatpush.bf16.msra.mxu2 %v8368_v20  ;;  %v8269_v20 = vld [vmem:[#allocation5 + $0x8a8] sm:$0xf0]  ;;  %v6378_v62 = vadd.f32 %v6377_v18, %v6365_v24  ;;  %v8392_v39 = vor.u32 %v11051_v28, %v8389_v31  ;;  %v11079_v29 = vld [vmem:[#allocation5 + $0xa74] sm:$0xf]  ;;  %v8192_v24 = vor.u32 %v11001_v1, %v8189_v56  ;;  %v8693_v18 = vld [vmem:[#allocation5 + $0xbf8] sm:$0xf0] }
 0x258   :  { %6642 = vmatpush.bf16.msra.mxu3 %v8432_v21  ;;  %v6390_v21 = vpop.f32.mrf.mxu3  ;;  %v8493_v14 = vld [vmem:[#allocation5 + $0xa68] sm:$0xf0]  ;;  %v11093_v0 = vld [vmem:[#allocation5 + $0xae4] sm:$0xf]  ;;  %v8485_v28 = vld [vmem:[#allocation5 + $0xa58] sm:$0xf0] }
 0x259   :  { %6604 = vmatpush.bf16.msra.mxu0 %v8232_v5  ;;  %v6391_v6 = vadd.f32 %v6390_v21, %v6378_v62  ;;  %v8272_v5 = vor.u32 %v11021_v41, %v8269_v20  ;;  %v8557_v38 = vld [vmem:[#allocation5 + $0xae8] sm:$0xf0]  ;;  %v11091_v31 = vld [vmem:[#allocation5 + $0xad4] sm:$0xf] }
 0x25a   :  { %6617 = vmatpush.bf16.msra.mxu1 %v8296_v3  ;;  %v8336_v3 = vor.u32 %v11037_v59, %v8333_v44  ;;  %v8504_v59 = vor.u32 %v11079_v29, %v8501_v43  ;;  %v11107_v56 = vld [vmem:[#allocation5 + $0xb54] sm:$0xf]  ;;  %v8605_v43 = vld [vmem:[#allocation5 + $0xb48] sm:$0xf0] }
 0x25b   :  { %6630 = vmatpush.bf16.msra.mxu2 %v8360_v23  ;;  %v11003_v23 = vld [vmem:[#allocation5 + $0x814] sm:$0xf]  ;;  %7124 = vst [vmem:[#allocation8] sm:$0xff] %v6391_v6  ;;  %v11109_v6 = vld [vmem:[#allocation5 + $0xb64] sm:$0xf] }
 0x25c   :  { %6643 = vmatpush.bf16.msra.mxu3 %v8424_v19  ;;  %v8261_v19 = vld [vmem:[#allocation5 + $0x898] sm:$0xf0]  ;;  %v8200_v54 = vor.u32 %v11003_v23, %v8197_v61  ;;  %v8685_v23 = vld [vmem:[#allocation5 + $0xbe8] sm:$0xf0] }
 0x25d   :  { %6605 = vmatpush.bf16.msra.mxu0 %v8224_v35  ;;  %v11017_v35 = vld [vmem:[#allocation5 + $0x884] sm:$0xf]  ;;  %v8264_v57 = vor.u32 %v11019_v17, %v8261_v19  ;;  %v8496_v17 = vor.u32 %v11077_v63, %v8493_v14  ;;  %v8560_v19 = vor.u32 %v11093_v0, %v8557_v38 }
 0x25e   :  { %6618 = vmatpush.bf16.msra.mxu1 %v8288_v34  ;;  %v8328_v34 = vor.u32 %v11035_v11, %v8325_v26  ;;  %v6379_v30 = vpop.f32.mrf.mxu2  ;;  %v8256_v58 = vor.u32 %v11017_v35, %v8253_v22  ;;  %v11075_v26 = vld [vmem:[#allocation5 + $0xa54] sm:$0xf]  ;;  %v8613_v35 = vld [vmem:[#allocation5 + $0xb58] sm:$0xf0]  ;;  %v11069_v0 = vld [vmem:[#allocation5 + $0xa24] sm:$0xf] }
 0x25f   :  { %6631 = vmatpush.bf16.msra.mxu2 %v8352_v25  ;;  %v11033_v25 = vld [vmem:[#allocation5 + $0x904] sm:$0xf]  ;;  %v11123_v22 = vld [vmem:[#allocation5 + $0xbd4] sm:$0xf]  ;;  %v8541_v30 = vld [vmem:[#allocation5 + $0xac8] sm:$0xf0] }
 0x260   :  { %6644 = vmatpush.bf16.msra.mxu3 %v8416_v55  ;;  %v8381_v55 = vld [vmem:[#allocation5 + $0x988] sm:$0xf0]  ;;  %v6392_v33 = vpop.f32.mrf.mxu3  ;;  %v8320_v41 = vor.u32 %v11033_v25, %v8317_v27  ;;  %v8488_v25 = vor.u32 %v11075_v26, %v8485_v28  ;;  %v11085_v38 = vld [vmem:[#allocation5 + $0xaa4] sm:$0xf] }
 0x261   :  { %6606 = vmatpush.bf16.msra.mxu0 %v8216_v40  ;;  %v7131_v40 = vld [vmem:[#allocation7] sm:$0x3]  ;;  %v8384_v20 = vor.u32 %v11049_v52, %v8381_v55  ;;  %v8477_v52 = vld [vmem:[#allocation5 + $0xa48] sm:$0xf0]  ;;  %v11089_v55 = vld [vmem:[#allocation5 + $0xac4] sm:$0xf] }
 0x262   :  { %6619 = vmatpush.bf16.msra.mxu1 %v8280_v50  ;;  %v8565_v50 = vld [vmem:[#allocation5 + $0xaf8] sm:$0xf0]  ;;  %v7133_v44 = vperm.slane %v7131_v40, 0  ;;  %v7129_v61 = vld [vmem:[#allocation8] sm:$0xff]  ;;  %v8544_v40 = vor.u32 %v11089_v55, %v8541_v30  ;;  %v8445_v30 = vld [vmem:[#allocation5 + $0xa08] sm:$0xf0] }
 0x263   :  { %6632 = vmatpush.bf16.msra.mxu2 %v8344_v32  ;;  %v11111_v32 = vld [vmem:[#allocation5 + $0xb74] sm:$0xf]  ;;  %v8568_v62 = vor.u32 %v11095_v48, %v8565_v50  ;;  %v8669_v48 = vld [vmem:[#allocation5 + $0xbc8] sm:$0xf0] }
 0x264   :  { %6645 = vmatpush.bf16.msra.mxu3 %v8408_v42  ;;  %v11127_v42 = vld [vmem:[#allocation5 + $0xbf4] sm:$0xf]  ;;  %v8632_v21 = vor.u32 %v11111_v32, %v8629_v4  ;;  %v8469_v32 = vld [vmem:[#allocation5 + $0xa38] sm:$0xf0] }
 0x265   :  { %6607 = vmatpush.bf16.msra.mxu0 %v8208_v60  ;;  %v8696_v60 = vor.u32 %v11127_v42, %v8693_v18  ;;  %v11071_v50 = vld [vmem:[#allocation5 + $0xa34] sm:$0xf]  ;;  %v8533_v42 = vld [vmem:[#allocation5 + $0xab8] sm:$0xf0] }
 0x266   :  { %6620 = vmatpush.bf16.msra.mxu1 %v8272_v5  ;;  %v8621_v5 = vld [vmem:[#allocation5 + $0xb68] sm:$0xf0]  ;;  %v11087_v4 = vld [vmem:[#allocation5 + $0xab4] sm:$0xf] }
 0x267   :  { %6633 = vmatpush.bf16.msra.mxu2 %v8336_v3  ;;  %v11125_v3 = vld [vmem:[#allocation5 + $0xbe4] sm:$0xf]  ;;  %v8624_v11 = vor.u32 %v11109_v6, %v8621_v5  ;;  %v11103_v18 = vld [vmem:[#allocation5 + $0xb34] sm:$0xf]  ;;  %v8536_v63 = vor.u32 %v11087_v4, %v8533_v42 }
 0x268   :  { %6646 = vmatpush.bf16.msra.mxu3 %v8400_v53  ;;  %v7137_v53 = vadd.f32 %v7133_v44, %v7129_v61  ;;  %v8688_v1 = vor.u32 %v11125_v3, %v8685_v23  ;;  %v11119_v44 = vld [vmem:[#allocation5 + $0xbb4] sm:$0xf]  ;;  %v8525_v3 = vld [vmem:[#allocation5 + $0xaa8] sm:$0xf0]  ;;  %v11101_v23 = vld [vmem:[#allocation5 + $0xb24] sm:$0xf] }
 0x269   :  { %6608 = vmatpush.bf16.msra.mxu0 %v8200_v54  ;;  %v8549_v54 = vld [vmem:[#allocation5 + $0xad8] sm:$0xf0]  ;;  %v8589_v61 = vld [vmem:[#allocation5 + $0xb28] sm:$0xf0]  ;;  %v11159_v42 = vld [vmem:[#allocation5 + $0xcf4] sm:$0xf] }
 0x26a   :  { %6621 = vmatpush.bf16.msra.mxu1 %v8264_v57  ;;  %v8677_v57 = vld [vmem:[#allocation5 + $0xbd8] sm:$0xf0]  ;;  %v8552_v27 = vor.u32 %v11091_v31, %v8549_v54  ;;  %v8592_v54 = vor.u32 %v11101_v23, %v8589_v61  ;;  %v11157_v23 = vld [vmem:[#allocation5 + $0xce4] sm:$0xf] }
 0x26b   :  { %6634 = vmatpush.bf16.msra.mxu2 %v8328_v34  ;;  %v7139_v34 = vmax.f32 %v7137_v53, 0.0  ;;  %v8680_v29 = vor.u32 %v11123_v22, %v8677_v57  ;;  %v11083_v22 = vld [vmem:[#allocation5 + $0xa94] sm:$0xf] }
 0x26c   :  { %6647 = vmatpush.bf16.msra.mxu3 %v8392_v39  ;;  %v8616_v39 = vor.u32 %v11107_v56, %v8613_v35  ;;  %v11067_v56 = vld [vmem:[#allocation5 + $0xa14] sm:$0xf]  ;;  %v8453_v35 = vld [vmem:[#allocation5 + $0xa18] sm:$0xf0] }
 0x26d   :  { %6609 = vmatpush.bf16.msra.mxu0 %v8192_v24  ;;  %7141 = vst [vmem:[#allocation8] sm:$0xff] %v7139_v34  ;;  %v8456_v55 = vor.u32 %v11067_v56, %v8453_v35  ;;  %v11139_v56 = vld [vmem:[#allocation5 + $0xc54] sm:$0xf]  ;;  %v8741_v35 = vld [vmem:[#allocation5 + $0xc58] sm:$0xf0] }
 0x26e   :  { %6622 = vmatpush.bf16.msra.mxu1 %v8256_v58  ;;  %v6416_v58 = vpop.f32.mrf.mxu1 }
 0x26f   :  { %6635 = vmatpush.bf16.msra.mxu2 %v8320_v41 }
 0x270   :  { %6648 = vmatpush.bf16.msra.mxu3 %v8384_v20  ;;  %6610 = vmatmul.bf16.vlgmr.msra.gmra.mxu0 %v11834_v37  ;;  %v11073_v37 = vld [vmem:[#allocation5 + $0xa44] sm:$0xf]  ;;  %v8597_v20 = vld [vmem:[#allocation5 + $0xb38] sm:$0xf0] }
 0x271   :  { %6654 = vmatpush.bf16.msrb.mxu0 %v8504_v59  ;;  %6623 = vmatmul.bf16.vlgmr.msra.gmra.mxu1 %v11838_v46  ;;  %v11121_v46 = vld [vmem:[#allocation5 + $0xbc4] sm:$0xf]  ;;  %v8480_v33 = vor.u32 %v11073_v37, %v8477_v52  ;;  %v8600_v14 = vor.u32 %v11103_v18, %v8597_v20  ;;  %v11115_v37 = vld [vmem:[#allocation5 + $0xb94] sm:$0xf]  ;;  %v8645_v52 = vld [vmem:[#allocation5 + $0xb98] sm:$0xf0] }
 0x272   :  { %6667 = vmatpush.bf16.msrb.mxu1 %v8568_v62  ;;  %6636 = vmatmul.bf16.vlgmr.msra.gmra.mxu2 %v11836_v45  ;;  %v11105_v45 = vld [vmem:[#allocation5 + $0xb44] sm:$0xf]  ;;  %v8672_v41 = vor.u32 %v11121_v46, %v8669_v48  ;;  %v8661_v62 = vld [vmem:[#allocation5 + $0xbb8] sm:$0xf0]  ;;  %v8509_v48 = vld [vmem:[#allocation5 + $0xa88] sm:$0xf0] }
 0x273   :  { %6680 = vmatpush.bf16.msrb.mxu2 %v8632_v21  ;;  %6649 = vmatmul.bf16.vlgmr.msra.gmra.mxu3 %v11840_v49  ;;  %v6403_v49 = vpop.f32.mrf.mxu0  ;;  %v8608_v24 = vor.u32 %v11105_v45, %v8605_v43  ;;  %v8472_v21 = vor.u32 %v11071_v50, %v8469_v32  ;;  %v8664_v5 = vor.u32 %v11119_v44, %v8661_v62  ;;  %v11081_v46 = vld [vmem:[#allocation5 + $0xa84] sm:$0xf]  ;;  %v8637_v32 = vld [vmem:[#allocation5 + $0xb88] sm:$0xf0]  ;;  %v8821_v20 = vld [vmem:[#allocation5 + $0xcf8] sm:$0xf0] }
 0x274   :  { %6693 = vmatpush.bf16.msrb.mxu3 %v8696_v60  ;;  %v6417_v59 = vadd.f32 %v6416_v58, %v6403_v49  ;;  %v8461_v60 = vld [vmem:[#allocation5 + $0xa28] sm:$0xf0]  ;;  %v11113_v50 = vld [vmem:[#allocation5 + $0xb84] sm:$0xf]  ;;  %v11143_v58 = vld [vmem:[#allocation5 + $0xc74] sm:$0xf]  ;;  %v8512_v62 = vor.u32 %v11081_v46, %v8509_v48 }
 0x275   :  { %6655 = vmatpush.bf16.msrb.mxu0 %v8496_v17  ;;  %v6429_v6 = vpop.f32.mrf.mxu2  ;;  %v8464_v26 = vor.u32 %v11069_v0, %v8461_v60  ;;  %v8885_v44 = vld [vmem:[#allocation5 + $0xd78] sm:$0xf0]  ;;  %v8640_v0 = vor.u32 %v11113_v50, %v8637_v32  ;;  %v8797_v46 = vld [vmem:[#allocation5 + $0xcc8] sm:$0xf0]  ;;  %v11169_v48 = vld [vmem:[#allocation5 + $0xd44] sm:$0xf] }
 0x276   :  { %6668 = vmatpush.bf16.msrb.mxu1 %v8560_v19  ;;  %v6430_v17 = vadd.f32 %v6429_v6, %v6417_v59  ;;  %v6442_v53 = vpop.f32.mrf.mxu3  ;;  %v11117_v19 = vld [vmem:[#allocation5 + $0xba4] sm:$0xf]  ;;  %v6418_v57 = vpop.f32.mrf.mxu1  ;;  %v11175_v59 = vld [vmem:[#allocation5 + $0xd74] sm:$0xf]  ;;  %v8725_v32 = vld [vmem:[#allocation5 + $0xc38] sm:$0xf0] }
 0x277   :  { %6681 = vmatpush.bf16.msrb.mxu2 %v8624_v11  ;;  %v8653_v11 = vld [vmem:[#allocation5 + $0xba8] sm:$0xf0]  ;;  %v8888_v6 = vor.u32 %v11175_v59, %v8885_v44  ;;  %v11135_v50 = vld [vmem:[#allocation5 + $0xc34] sm:$0xf]  ;;  %v8853_v59 = vld [vmem:[#allocation5 + $0xd38] sm:$0xf0] }
 0x278   :  { %6694 = vmatpush.bf16.msrb.mxu3 %v8688_v1  ;;  %v12031_v28 = vadd.f32 %v6442_v53, %v6430_v17  ;;  %v8528_v1 = vor.u32 %v11085_v38, %v8525_v3  ;;  %v8656_v34 = vor.u32 %v11117_v19, %v8653_v11  ;;  %v8824_v38 = vor.u32 %v11159_v42, %v8821_v20  ;;  %v8749_v3 = vld [vmem:[#allocation5 + $0xc68] sm:$0xf0]  ;;  %v11173_v53 = vld [vmem:[#allocation5 + $0xd64] sm:$0xf]  ;;  %v11167_v20 = vld [vmem:[#allocation5 + $0xd34] sm:$0xf] }
 0x279   :  { %6656 = vmatpush.bf16.msrb.mxu0 %v8488_v25  ;;  %v8517_v25 = vld [vmem:[#allocation5 + $0xa98] sm:$0xf0]  ;;  %v8813_v17 = vld [vmem:[#allocation5 + $0xce8] sm:$0xf0]  ;;  %v11189_v11 = vld [vmem:[#allocation5 + $0xde4] sm:$0xf] }
 0x27a   :  { %6669 = vmatpush.bf16.msrb.mxu1 %v8552_v27  ;;  %v11099_v27 = vld [vmem:[#allocation5 + $0xb14] sm:$0xf]  ;;  %v8520_v45 = vor.u32 %v11083_v22, %v8517_v25  ;;  %v8877_v19 = vld [vmem:[#allocation5 + $0xd68] sm:$0xf0] }
 0x27b   :  { %6682 = vmatpush.bf16.msrb.mxu2 %v8616_v39  ;;  %v6405_v31 = vpop.f32.mrf.mxu0  ;;  %v8581_v39 = vld [vmem:[#allocation5 + $0xb18] sm:$0xf0]  ;;  %v11155_v22 = vld [vmem:[#allocation5 + $0xcd4] sm:$0xf] }
 0x27c   :  { %6695 = vmatpush.bf16.msrb.mxu3 %v8680_v29  ;;  %v11065_v29 = vld [vmem:[#allocation5 + $0xa04] sm:$0xf]  ;;  %v8584_v43 = vor.u32 %v11099_v27, %v8581_v39  ;;  %v11171_v25 = vld [vmem:[#allocation5 + $0xd54] sm:$0xf]  ;;  %v8869_v27 = vld [vmem:[#allocation5 + $0xd58] sm:$0xf0] }
 0x27d   :  { %6657 = vmatpush.bf16.msrb.mxu0 %v8480_v33  ;;  %v11097_v33 = vld [vmem:[#allocation5 + $0xb04] sm:$0xf]  ;;  %v6431_v49 = vpop.f32.mrf.mxu2  ;;  %v8448_v18 = vor.u32 %v11065_v29, %v8445_v30  ;;  %v11187_v39 = vld [vmem:[#allocation5 + $0xdd4] sm:$0xf]  ;;  %v8872_v29 = vor.u32 %v11171_v25, %v8869_v27  ;;  %v8773_v27 = vld [vmem:[#allocation5 + $0xc98] sm:$0xf0] }
 0x27e   :  { %6670 = vmatpush.bf16.msrb.mxu1 %v8544_v40  ;;  %v8648_v40 = vor.u32 %v11115_v37, %v8645_v52  ;;  %v6444_v4 = vpop.f32.mrf.mxu3  ;;  %v8933_v37 = vld [vmem:[#allocation5 + $0xdd8] sm:$0xf0]  ;;  %v8744_v52 = vor.u32 %v11139_v56, %v8741_v35  ;;  %v11137_v30 = vld [vmem:[#allocation5 + $0xc44] sm:$0xf]  ;;  %v11183_v44 = vld [vmem:[#allocation5 + $0xdb4] sm:$0xf] }
 0x27f   :  { %6683 = vmatpush.bf16.msrb.mxu2 %v8608_v24  ;;  %v8573_v24 = vld [vmem:[#allocation5 + $0xb08] sm:$0xf0]  ;;  %v11151_v4 = vld [vmem:[#allocation5 + $0xcb4] sm:$0xf] }
 0x280   :  { %6696 = vmatpush.bf16.msrb.mxu3 %v8672_v41  ;;  %v8757_v41 = vld [vmem:[#allocation5 + $0xc78] sm:$0xf0]  ;;  %v11131_v35 = vld [vmem:[#allocation5 + $0xc14] sm:$0xf] }
 0x281   :  { %6658 = vmatpush.bf16.msrb.mxu0 %v8472_v21  ;;  %v8576_v21 = vor.u32 %v11097_v33, %v8573_v24  ;;  %v8760_v60 = vor.u32 %v11143_v58, %v8757_v41  ;;  %v11185_v33 = vld [vmem:[#allocation5 + $0xdc4] sm:$0xf] }
 0x282   :  { %6671 = vmatpush.bf16.msrb.mxu1 %v8536_v63  ;;  %v11191_v63 = vld [vmem:[#allocation5 + $0xdf4] sm:$0xf] }
 0x283   :  { %6684 = vmatpush.bf16.msrb.mxu2 %v8600_v14  ;;  %v8949_v14 = vld [vmem:[#allocation5 + $0xdf8] sm:$0xf0] }
 0x284   :  { %6697 = vmatpush.bf16.msrb.mxu3 %v8664_v5  ;;  %v11141_v5 = vld [vmem:[#allocation5 + $0xc64] sm:$0xf]  ;;  %v8952_v61 = vor.u32 %v11191_v63, %v8949_v14  ;;  %v8728_v63 = vor.u32 %v11135_v50, %v8725_v32  ;;  %v11207_v50 = vld [vmem:[#allocation5 + $0xe74] sm:$0xf]  ;;  %v9013_v32 = vld [vmem:[#allocation5 + $0xe78] sm:$0xf0] }
 0x285   :  { %6659 = vmatpush.bf16.msrb.mxu0 %v8464_v26  ;;  %v8941_v26 = vld [vmem:[#allocation5 + $0xde8] sm:$0xf0]  ;;  %v8752_v31 = vor.u32 %v11141_v5, %v8749_v3 }
 0x286   :  { %6672 = vmatpush.bf16.msrb.mxu1 %v8528_v1  ;;  %v8816_v1 = vor.u32 %v11157_v23, %v8813_v17  ;;  %v8944_v57 = vor.u32 %v11189_v11, %v8941_v26  ;;  %v8781_v3 = vld [vmem:[#allocation5 + $0xca8] sm:$0xf0]  ;;  %v11165_v23 = vld [vmem:[#allocation5 + $0xd24] sm:$0xf] }
 0x287   :  { %6685 = vmatpush.bf16.msrb.mxu2 %v8592_v54  ;;  %v8880_v54 = vor.u32 %v11173_v53, %v8877_v19  ;;  %v11181_v19 = vld [vmem:[#allocation5 + $0xda4] sm:$0xf]  ;;  %v8909_v11 = vld [vmem:[#allocation5 + $0xda8] sm:$0xf0] }
 0x288   :  { %6698 = vmatpush.bf16.msrb.mxu3 %v8656_v34  ;;  %v8805_v34 = vld [vmem:[#allocation5 + $0xcd8] sm:$0xf0]  ;;  %v8912_v25 = vor.u32 %v11181_v19, %v8909_v11 }
 0x289   :  { %6660 = vmatpush.bf16.msrb.mxu0 %v8456_v55  ;;  %v8808_v55 = vor.u32 %v11155_v22, %v8805_v34  ;;  %v8709_v22 = vld [vmem:[#allocation5 + $0xc18] sm:$0xf0] }
 0x28a   :  { %6673 = vmatpush.bf16.msrb.mxu1 %v8520_v45  ;;  %v11153_v45 = vld [vmem:[#allocation5 + $0xcc4] sm:$0xf] }
 0x28b   :  { %6686 = vmatpush.bf16.msrb.mxu2 %v8584_v43  ;;  %v8936_v43 = vor.u32 %v11187_v39, %v8933_v37  ;;  %v11163_v39 = vld [vmem:[#allocation5 + $0xd14] sm:$0xf]  ;;  %v8837_v37 = vld [vmem:[#allocation5 + $0xd18] sm:$0xf0] }
 0x28c   :  { %6699 = vmatpush.bf16.msrb.mxu3 %v8648_v40 }
 0x28d   :  { %6661 = vmatpush.bf16.msrb.mxu0 %v8448_v18  ;;  %v6455_v40 = vpop.f32.mrf.mxu0  ;;  %v8789_v18 = vld [vmem:[#allocation5 + $0xcb8] sm:$0xf0] }
 0x28e   :  { %6674 = vmatpush.bf16.msrb.mxu1 %v8512_v62  ;;  %v6456_v58 = vadd.f32 %v6455_v40, %v12031_v28  ;;  %v6468_v41 = vpop.f32.mrf.mxu1  ;;  %v8917_v62 = vld [vmem:[#allocation5 + $0xdb8] sm:$0xf0]  ;;  %v8792_v14 = vor.u32 %v11151_v4, %v8789_v18  ;;  %v11177_v40 = vld [vmem:[#allocation5 + $0xd84] sm:$0xf]  ;;  %v11223_v4 = vld [vmem:[#allocation5 + $0xef4] sm:$0xf] }
 0x28f   :  { %6687 = vmatpush.bf16.msrb.mxu2 %v8576_v21  ;;  %v8920_v28 = vor.u32 %v11183_v44, %v8917_v62  ;;  %v9141_v18 = vld [vmem:[#allocation5 + $0xf78] sm:$0xf0]  ;;  %v11255_v44 = vld [vmem:[#allocation5 + $0xff4] sm:$0xf] }
 0x290   :  { %6700 = vmatpush.bf16.msrb.mxu3 %v8640_v0  ;;  %6662 = vmatmul.bf16.vlgmr.msrb.gmra.mxu0 %v11848_v8  ;;  %v8733_v8 = vld [vmem:[#allocation5 + $0xc48] sm:$0xf0]  ;;  %v6469_v21 = vadd.f32 %v6468_v41, %v6456_v58  ;;  %v8856_v0 = vor.u32 %v11167_v20, %v8853_v59  ;;  %v9077_v41 = vld [vmem:[#allocation5 + $0xef8] sm:$0xf0] }
 0x291   :  { %6706 = vmatpush.bf16.msra.mxu0 %v8760_v60  ;;  %6675 = vmatmul.bf16.vlgmr.msrb.gmra.mxu1 %v11852_v13  ;;  %v8925_v13 = vld [vmem:[#allocation5 + $0xdc8] sm:$0xf0]  ;;  %v8736_v49 = vor.u32 %v11137_v30, %v8733_v8  ;;  %v11133_v60 = vld [vmem:[#allocation5 + $0xc24] sm:$0xf]  ;;  %v9205_v62 = vld [vmem:[#allocation5 + $0xff8] sm:$0xf0] }
 0x292   :  { %6719 = vmatpush.bf16.msra.mxu1 %v8824_v38  ;;  %6688 = vmatmul.bf16.vlgmr.msrb.gmra.mxu2 %v11850_v12  ;;  %v8861_v12 = vld [vmem:[#allocation5 + $0xd48] sm:$0xf0]  ;;  %v8928_v42 = vor.u32 %v11185_v33, %v8925_v13  ;;  %v11129_v30 = vld [vmem:[#allocation5 + $0xc04] sm:$0xf] }
 0x293   :  { %6732 = vmatpush.bf16.msra.mxu2 %v8888_v6  ;;  %6701 = vmatmul.bf16.vlgmr.msrb.gmra.mxu3 %v11854_v16  ;;  %v8800_v16 = vor.u32 %v11153_v45, %v8797_v46  ;;  %v8864_v24 = vor.u32 %v11169_v48, %v8861_v12  ;;  %v8717_v38 = vld [vmem:[#allocation5 + $0xc28] sm:$0xf0]  ;;  %v11149_v6 = vld [vmem:[#allocation5 + $0xca4] sm:$0xf] }
 0x294   :  { %6745 = vmatpush.bf16.msra.mxu3 %v8952_v61  ;;  %v8845_v61 = vld [vmem:[#allocation5 + $0xd28] sm:$0xf0]  ;;  %v8720_v26 = vor.u32 %v11133_v60, %v8717_v38  ;;  %v11145_v46 = vld [vmem:[#allocation5 + $0xc84] sm:$0xf] }
 0x295   :  { %6707 = vmatpush.bf16.msra.mxu0 %v8752_v31  ;;  %v6481_v5 = vpop.f32.mrf.mxu2  ;;  %v8848_v56 = vor.u32 %v11165_v23, %v8845_v61  ;;  %v8701_v8 = vld [vmem:[#allocation5 + $0xc08] sm:$0xf0]  ;;  %v11161_v12 = vld [vmem:[#allocation5 + $0xd04] sm:$0xf] }
 0x296   :  { %6720 = vmatpush.bf16.msra.mxu1 %v8816_v1  ;;  %v6482_v17 = vadd.f32 %v6481_v5, %v6469_v21  ;;  %v6494_v53 = vpop.f32.mrf.mxu3  ;;  %v6457_v1 = vpop.f32.mrf.mxu0  ;;  %v8765_v48 = vld [vmem:[#allocation5 + $0xc88] sm:$0xf0]  ;;  %v8704_v58 = vor.u32 %v11129_v30, %v8701_v8  ;;  %v11205_v60 = vld [vmem:[#allocation5 + $0xe64] sm:$0xf]  ;;  %v9208_v5 = vor.u32 %v11255_v44, %v9205_v62 }
 0x297   :  { %6733 = vmatpush.bf16.msra.mxu2 %v8880_v54  ;;  %v8784_v54 = vor.u32 %v11149_v6, %v8781_v3  ;;  %v6470_v34 = vpop.f32.mrf.mxu1  ;;  %v8768_v20 = vor.u32 %v11145_v46, %v8765_v48  ;;  %v9005_v38 = vld [vmem:[#allocation5 + $0xe68] sm:$0xf0]  ;;  %v11221_v6 = vld [vmem:[#allocation5 + $0xee4] sm:$0xf]  ;;  %v8997_v1 = vld [vmem:[#allocation5 + $0xe58] sm:$0xf0] }
 0x298   :  { %6746 = vmatpush.bf16.msra.mxu3 %v8944_v57  ;;  %v12038_v31 = vadd.f32 %v6494_v53, %v6482_v17  ;;  %v11147_v57 = vld [vmem:[#allocation5 + $0xc94] sm:$0xf]  ;;  %v11237_v3 = vld [vmem:[#allocation5 + $0xf64] sm:$0xf]  ;;  %v9133_v23 = vld [vmem:[#allocation5 + $0xf68] sm:$0xf0]  ;;  %v9008_v53 = vor.u32 %v11205_v60, %v9005_v38 }
 0x299   :  { %6708 = vmatpush.bf16.msra.mxu0 %v8744_v52  ;;  %v11179_v52 = vld [vmem:[#allocation5 + $0xd94] sm:$0xf]  ;;  %v8776_v45 = vor.u32 %v11147_v57, %v8773_v27  ;;  %v11253_v61 = vld [vmem:[#allocation5 + $0xfe4] sm:$0xf]  ;;  %v9197_v17 = vld [vmem:[#allocation5 + $0xfe8] sm:$0xf0]  ;;  %v9136_v11 = vor.u32 %v11237_v3, %v9133_v23 }
 0x29a   :  { %6721 = vmatpush.bf16.msra.mxu1 %v8808_v55  ;;  %v8901_v55 = vld [vmem:[#allocation5 + $0xd98] sm:$0xf0]  ;;  %v11251_v34 = vld [vmem:[#allocation5 + $0xfd4] sm:$0xf]  ;;  %v9053_v30 = vld [vmem:[#allocation5 + $0xec8] sm:$0xf0] }
 0x29b   :  { %6734 = vmatpush.bf16.msra.mxu2 %v8872_v29  ;;  %v8712_v29 = vor.u32 %v11131_v35, %v8709_v22  ;;  %v8904_v13 = vor.u32 %v11179_v52, %v8901_v55  ;;  %v9061_v35 = vld [vmem:[#allocation5 + $0xed8] sm:$0xf0]  ;;  %v11235_v22 = vld [vmem:[#allocation5 + $0xf54] sm:$0xf]  ;;  %v11201_v52 = vld [vmem:[#allocation5 + $0xe44] sm:$0xf] }
 0x29c   :  { %6747 = vmatpush.bf16.msra.mxu3 %v8936_v43  ;;  %v8840_v43 = vor.u32 %v11163_v39, %v8837_v37  ;;  %v9125_v57 = vld [vmem:[#allocation5 + $0xf58] sm:$0xf0]  ;;  %v11217_v55 = vld [vmem:[#allocation5 + $0xec4] sm:$0xf] }
 0x29d   :  { %6709 = vmatpush.bf16.msra.mxu0 %v8736_v49  ;;  %v6483_v33 = vpop.f32.mrf.mxu2  ;;  %v8829_v49 = vld [vmem:[#allocation5 + $0xd08] sm:$0xf0]  ;;  %v9128_v37 = vor.u32 %v11235_v22, %v9125_v57  ;;  %v11233_v8 = vld [vmem:[#allocation5 + $0xf44] sm:$0xf]  ;;  %v11243_v22 = vld [vmem:[#allocation5 + $0xf94] sm:$0xf] }
 0x29e   :  { %6722 = vmatpush.bf16.msra.mxu1 %v8800_v16  ;;  %v8893_v16 = vld [vmem:[#allocation5 + $0xd88] sm:$0xf0]  ;;  %v8832_v59 = vor.u32 %v11161_v12, %v8829_v49  ;;  %v9056_v12 = vor.u32 %v11217_v55, %v9053_v30  ;;  %v8981_v49 = vld [vmem:[#allocation5 + $0xe38] sm:$0xf0]  ;;  %v11213_v44 = vld [vmem:[#allocation5 + $0xea4] sm:$0xf] }
 0x29f   :  { %6735 = vmatpush.bf16.msra.mxu2 %v8864_v24  ;;  %v6496_v24 = vpop.f32.mrf.mxu3  ;;  %v8896_v21 = vor.u32 %v11177_v40, %v8893_v16  ;;  %v11215_v40 = vld [vmem:[#allocation5 + $0xeb4] sm:$0xf]  ;;  %v9157_v57 = vld [vmem:[#allocation5 + $0xf98] sm:$0xf0]  ;;  %v11225_v55 = vld [vmem:[#allocation5 + $0xf04] sm:$0xf] }
 0x2a0   :  { %6748 = vmatpush.bf16.msra.mxu3 %v8928_v42  ;;  %v11239_v42 = vld [vmem:[#allocation5 + $0xf74] sm:$0xf]  ;;  %v9085_v30 = vld [vmem:[#allocation5 + $0xf08] sm:$0xf0] }
 0x2a1   :  { %6710 = vmatpush.bf16.msra.mxu0 %v8728_v63  ;;  %v9016_v63 = vor.u32 %v11207_v50, %v9013_v32  ;;  %v9045_v50 = vld [vmem:[#allocation5 + $0xeb8] sm:$0xf0]  ;;  %v11231_v32 = vld [vmem:[#allocation5 + $0xf34] sm:$0xf] }
 0x2a2   :  { %6723 = vmatpush.bf16.msra.mxu1 %v8792_v14  ;;  %v9080_v14 = vor.u32 %v11223_v4, %v9077_v41  ;;  %v9109_v4 = vld [vmem:[#allocation5 + $0xf38] sm:$0xf0] }
 0x2a3   :  { %6736 = vmatpush.bf16.msra.mxu2 %v8856_v0  ;;  %v9144_v0 = vor.u32 %v11239_v42, %v9141_v18  ;;  %v9173_v41 = vld [vmem:[#allocation5 + $0xfb8] sm:$0xf0]  ;;  %v9112_v18 = vor.u32 %v11231_v32, %v9109_v4 }
 0x2a4   :  { %6749 = vmatpush.bf16.msra.mxu3 %v8920_v28  ;;  %v9069_v28 = vld [vmem:[#allocation5 + $0xee8] sm:$0xf0] }
 0x2a5   :  { %6711 = vmatpush.bf16.msra.mxu0 %v8720_v26  ;;  %v9072_v19 = vor.u32 %v11221_v6, %v9069_v28  ;;  %v11203_v26 = vld [vmem:[#allocation5 + $0xe54] sm:$0xf]  ;;  %v11245_v6 = vld [vmem:[#allocation5 + $0xfa4] sm:$0xf] }
 0x2a6   :  { %6724 = vmatpush.bf16.msra.mxu1 %v8784_v54  ;;  %v11219_v54 = vld [vmem:[#allocation5 + $0xed4] sm:$0xf]  ;;  %v9000_v27 = vor.u32 %v11203_v26, %v8997_v1 }
 0x2a7   :  { %6737 = vmatpush.bf16.msra.mxu2 %v8848_v56  ;;  %v9200_v56 = vor.u32 %v11253_v61, %v9197_v17  ;;  %v9064_v39 = vor.u32 %v11219_v54, %v9061_v35  ;;  %v11211_v26 = vld [vmem:[#allocation5 + $0xe94] sm:$0xf]  ;;  %v9029_v54 = vld [vmem:[#allocation5 + $0xe98] sm:$0xf0] }
 0x2a8   :  { %6750 = vmatpush.bf16.msra.mxu3 %v8912_v25  ;;  %v9189_v25 = vld [vmem:[#allocation5 + $0xfd8] sm:$0xf0] }
 0x2a9   :  { %6712 = vmatpush.bf16.msra.mxu0 %v8712_v29  ;;  %v9192_v29 = vor.u32 %v11251_v34, %v9189_v25  ;;  %v9093_v35 = vld [vmem:[#allocation5 + $0xf18] sm:$0xf0]  ;;  %v11193_v25 = vld [vmem:[#allocation5 + $0xe04] sm:$0xf] }
 0x2aa   :  { %6725 = vmatpush.bf16.msra.mxu1 %v8776_v45 }
 0x2ab   :  { %6738 = vmatpush.bf16.msra.mxu2 %v8840_v43  ;;  %v9181_v43 = vld [vmem:[#allocation5 + $0xfc8] sm:$0xf0] }
 0x2ac   :  { %6751 = vmatpush.bf16.msra.mxu3 %v8904_v13  ;;  %v11199_v13 = vld [vmem:[#allocation5 + $0xe34] sm:$0xf] }
 0x2ad   :  { %6713 = vmatpush.bf16.msra.mxu0 %v8704_v58  ;;  %v6507_v45 = vpop.f32.mrf.mxu0  ;;  %v11247_v58 = vld [vmem:[#allocation5 + $0xfb4] sm:$0xf]  ;;  %v8984_v42 = vor.u32 %v11199_v13, %v8981_v49  ;;  %v9397_v13 = vld [vmem:[#allocation5 + $0x1178] sm:$0xf0] }
 0x2ae   :  { %6726 = vmatpush.bf16.msra.mxu1 %v8768_v20  ;;  %v6520_v48 = vpop.f32.mrf.mxu1  ;;  %v11197_v20 = vld [vmem:[#allocation5 + $0xe24] sm:$0xf]  ;;  %v9176_v62 = vor.u32 %v11247_v58, %v9173_v41 }
 0x2af   :  { %6739 = vmatpush.bf16.msra.mxu2 %v8832_v59  ;;  %v8973_v59 = vld [vmem:[#allocation5 + $0xe28] sm:$0xf0]  ;;  %v11269_v41 = vld [vmem:[#allocation5 + $0x1064] sm:$0xf] }
 0x2b0   :  { %6752 = vmatpush.bf16.msra.mxu3 %v8896_v21  ;;  %6714 = vmatmul.bf16.vlgmr.msra.gmra.mxu0 %v11863_v2  ;;  %v8989_v2 = vld [vmem:[#allocation5 + $0xe48] sm:$0xf0]  ;;  %v8976_v3 = vor.u32 %v11197_v20, %v8973_v59  ;;  %v11301_v59 = vld [vmem:[#allocation5 + $0x1164] sm:$0xf] }
 0x2b1   :  { %6758 = vmatpush.bf16.msrb.mxu0 %v9016_v63  ;;  %6727 = vmatmul.bf16.vlgmr.msra.gmra.mxu1 %v11867_v10  ;;  %v11249_v10 = vld [vmem:[#allocation5 + $0xfc4] sm:$0xf]  ;;  %v8992_v46 = vor.u32 %v11201_v52, %v8989_v2  ;;  %v9037_v63 = vld [vmem:[#allocation5 + $0xea8] sm:$0xf0] }
 0x2b2   :  { %6771 = vmatpush.bf16.msrb.mxu1 %v9080_v14  ;;  %6740 = vmatmul.bf16.vlgmr.msra.gmra.mxu2 %v11865_v9  ;;  %v9117_v9 = vld [vmem:[#allocation5 + $0xf48] sm:$0xf0]  ;;  %v9184_v16 = vor.u32 %v11249_v10, %v9181_v43  ;;  %v11229_v14 = vld [vmem:[#allocation5 + $0xf24] sm:$0xf]  ;;  %v9040_v17 = vor.u32 %v11213_v44, %v9037_v63  ;;  %v11271_v10 = vld [vmem:[#allocation5 + $0x1074] sm:$0xf] }
 0x2b3   :  { %6784 = vmatpush.bf16.msrb.mxu2 %v9144_v0  ;;  %6753 = vmatmul.bf16.vlgmr.msra.gmra.mxu3 %v11869_v15  ;;  %v6508_v15 = vadd.f32 %v6507_v45, %v12038_v31  ;;  %v9120_v33 = vor.u32 %v11233_v8, %v9117_v9  ;;  %v9048_v31 = vor.u32 %v11215_v40, %v9045_v50  ;;  %v9101_v0 = vld [vmem:[#allocation5 + $0xf28] sm:$0xf0]  ;;  %v11209_v52 = vld [vmem:[#allocation5 + $0xe84] sm:$0xf]  ;;  %v9269_v43 = vld [vmem:[#allocation5 + $0x1078] sm:$0xf0] }
 0x2b4   :  { %6797 = vmatpush.bf16.msrb.mxu3 %v9208_v5  ;;  %v9165_v5 = vld [vmem:[#allocation5 + $0xfa8] sm:$0xf0]  ;;  %v11241_v8 = vld [vmem:[#allocation5 + $0xf84] sm:$0xf]  ;;  %v9088_v40 = vor.u32 %v11225_v55, %v9085_v30  ;;  %v9272_v32 = vor.u32 %v11271_v10, %v9269_v43  ;;  %v11263_v10 = vld [vmem:[#allocation5 + $0x1034] sm:$0xf] }
 0x2b5   :  { %6759 = vmatpush.bf16.msrb.mxu0 %v9008_v53  ;;  %v6521_v24 = vadd.f32 %v6520_v48, %v6508_v15  ;;  %v6533_v21 = vpop.f32.mrf.mxu2  ;;  %v6509_v28 = vpop.f32.mrf.mxu0  ;;  %v9104_v53 = vor.u32 %v11229_v14, %v9101_v0  ;;  %v9168_v1 = vor.u32 %v11245_v6, %v9165_v5  ;;  %v9021_v2 = vld [vmem:[#allocation5 + $0xe88] sm:$0xf0]  ;;  %v11287_v15 = vld [vmem:[#allocation5 + $0x10f4] sm:$0xf]  ;;  %v9237_v43 = vld [vmem:[#allocation5 + $0x1038] sm:$0xf0] }
 0x2b6   :  { %6772 = vmatpush.bf16.msrb.mxu1 %v9072_v19  ;;  %v6546_v38 = vpop.f32.mrf.mxu3  ;;  %v6522_v23 = vpop.f32.mrf.mxu1  ;;  %v11195_v19 = vld [vmem:[#allocation5 + $0xe14] sm:$0xf]  ;;  %v9149_v9 = vld [vmem:[#allocation5 + $0xf88] sm:$0xf0]  ;;  %v9024_v49 = vor.u32 %v11209_v52, %v9021_v2  ;;  %v11313_v2 = vld [vmem:[#allocation5 + $0x11c4] sm:$0xf] }
 0x2b7   :  { %6785 = vmatpush.bf16.msrb.mxu2 %v9136_v11  ;;  %v6534_v60 = vadd.f32 %v6533_v21, %v6521_v24  ;;  %v8965_v11 = vld [vmem:[#allocation5 + $0xe18] sm:$0xf0]  ;;  %v9152_v50 = vor.u32 %v11241_v8, %v9149_v9  ;;  %v9325_v20 = vld [vmem:[#allocation5 + $0x10e8] sm:$0xf0]  ;;  %v11283_v6 = vld [vmem:[#allocation5 + $0x10d4] sm:$0xf] }
 0x2b8   :  { %6798 = vmatpush.bf16.msrb.mxu3 %v9200_v56  ;;  %v11227_v56 = vld [vmem:[#allocation5 + $0xf14] sm:$0xf]  ;;  %v8968_v34 = vor.u32 %v11195_v19, %v8965_v11  ;;  %v9461_v24 = vld [vmem:[#allocation5 + $0x11f8] sm:$0xf0]  ;;  %v9389_v44 = vld [vmem:[#allocation5 + $0x1168] sm:$0xf0] }
 0x2b9   :  { %6760 = vmatpush.bf16.msrb.mxu0 %v9000_v27  ;;  %v12045_v61 = vadd.f32 %v6546_v38, %v6534_v60  ;;  %v8957_v27 = vld [vmem:[#allocation5 + $0xe08] sm:$0xf0]  ;;  %v9392_v0 = vor.u32 %v11301_v59, %v9389_v44  ;;  %v11267_v60 = vld [vmem:[#allocation5 + $0x1054] sm:$0xf]  ;;  %v9253_v38 = vld [vmem:[#allocation5 + $0x1058] sm:$0xf0] }
 0x2ba   :  { %6773 = vmatpush.bf16.msrb.mxu1 %v9064_v39  ;;  %v9032_v39 = vor.u32 %v11211_v26, %v9029_v54  ;;  %v8960_v48 = vor.u32 %v11193_v25, %v8957_v27  ;;  %v9453_v21 = vld [vmem:[#allocation5 + $0x11e8] sm:$0xf0]  ;;  %v12146_v5 = vld [vmem:[#allocation12_spill] sm:$0xff]  ;;  %v12148_v19 = vld [vmem:[#allocation14_spill] sm:$0xff]  ;;  %v9256_v54 = vor.u32 %v11267_v60, %v9253_v38 }
 0x2bb   :  { %6786 = vmatpush.bf16.msrb.mxu2 %v9128_v37  ;;  %v9096_v37 = vor.u32 %v11227_v56, %v9093_v35  ;;  %v11299_v23 = vld [vmem:[#allocation5 + $0x1154] sm:$0xf]  ;;  %v9445_v26 = vld [vmem:[#allocation5 + $0x11d8] sm:$0xf0]  ;;  %v9309_v27 = vld [vmem:[#allocation5 + $0x10c8] sm:$0xf0] }
 0x2bc   :  { %6799 = vmatpush.bf16.msrb.mxu3 %v9192_v29  ;;  %v9160_v29 = vor.u32 %v11243_v22, %v9157_v57  ;;  %v11315_v11 = vld [vmem:[#allocation5 + $0x11d4] sm:$0xf]  ;;  %v11265_v22 = vld [vmem:[#allocation5 + $0x1044] sm:$0xf]  ;;  %v9245_v57 = vld [vmem:[#allocation5 + $0x1048] sm:$0xf0] }
 0x2bd   :  { %6761 = vmatpush.bf16.msrb.mxu0 %v8992_v46  ;;  %v6535_v45 = vpop.f32.mrf.mxu2  ;;  %v9448_v25 = vor.u32 %v11315_v11, %v9445_v26  ;;  %v9437_v55 = vld [vmem:[#allocation5 + $0x11c8] sm:$0xf0]  ;;  %v9248_v30 = vor.u32 %v11265_v22, %v9245_v57  ;;  %v11309_v44 = vld [vmem:[#allocation5 + $0x11a4] sm:$0xf]  ;;  %v9413_v11 = vld [vmem:[#allocation5 + $0x1198] sm:$0xf0] }
 0x2be   :  { %6774 = vmatpush.bf16.msrb.mxu1 %v9056_v12  ;;  %v6548_v46 = vpop.f32.mrf.mxu3  ;;  %v9333_v12 = vld [vmem:[#allocation5 + $0x10f8] sm:$0xf0]  ;;  %v11273_v22 = vld [vmem:[#allocation5 + $0x1084] sm:$0xf]  ;;  %v9277_v57 = vld [vmem:[#allocation5 + $0x1088] sm:$0xf0] }
 0x2bf   :  { %6787 = vmatpush.bf16.msrb.mxu2 %v9120_v33  ;;  %v11303_v33 = vld [vmem:[#allocation5 + $0x1174] sm:$0xf]  ;;  %v9336_v4 = vor.u32 %v11287_v15, %v9333_v12  ;;  %v9440_v46 = vor.u32 %v11313_v2, %v9437_v55  ;;  %v9301_v12 = vld [vmem:[#allocation5 + $0x10b8] sm:$0xf0] }
 0x2c0   :  { %6800 = vmatpush.bf16.msrb.mxu3 %v9184_v16  ;;  %v11319_v16 = vld [vmem:[#allocation5 + $0x11f4] sm:$0xf]  ;;  %v9400_v58 = vor.u32 %v11303_v33, %v9397_v13  ;;  %v9365_v13 = vld [vmem:[#allocation5 + $0x1138] sm:$0xf0] }
 0x2c1   :  { %6762 = vmatpush.bf16.msrb.mxu0 %v8984_v42  ;;  %v9261_v42 = vld [vmem:[#allocation5 + $0x1068] sm:$0xf0]  ;;  %v11279_v15 = vld [vmem:[#allocation5 + $0x10b4] sm:$0xf]  ;;  %v9525_v55 = vld [vmem:[#allocation5 + $0x1278] sm:$0xf0] }
 0x2c2   :  { %6775 = vmatpush.bf16.msrb.mxu1 %v9048_v31  ;;  %v11285_v31 = vld [vmem:[#allocation5 + $0x10e4] sm:$0xf]  ;;  %v9264_v63 = vor.u32 %v11269_v41, %v9261_v42  ;;  %v11295_v33 = vld [vmem:[#allocation5 + $0x1134] sm:$0xf]  ;;  %v9293_v42 = vld [vmem:[#allocation5 + $0x10a8] sm:$0xf0] }
 0x2c3   :  { %6788 = vmatpush.bf16.msrb.mxu2 %v9112_v18  ;;  %v9464_v18 = vor.u32 %v11319_v16, %v9461_v24  ;;  %v9328_v14 = vor.u32 %v11285_v31, %v9325_v20  ;;  %v9240_v16 = vor.u32 %v11263_v10, %v9237_v43  ;;  %v9368_v24 = vor.u32 %v11295_v33, %v9365_v13  ;;  %v11293_v31 = vld [vmem:[#allocation5 + $0x1124] sm:$0xf]  ;;  %v11335_v2 = vld [vmem:[#allocation5 + $0x1274] sm:$0xf]  ;;  %v9653_v10 = vld [vmem:[#allocation5 + $0x1378] sm:$0xf0] }
 0x2c4   :  { %6801 = vmatpush.bf16.msrb.mxu3 %v9176_v62  ;;  %v11317_v62 = vld [vmem:[#allocation5 + $0x11e4] sm:$0xf]  ;;  %v9280_v43 = vor.u32 %v11273_v22, %v9277_v57  ;;  %v9528_v33 = vor.u32 %v11335_v2, %v9525_v55  ;;  %v11327_v2 = vld [vmem:[#allocation5 + $0x1234] sm:$0xf]  ;;  %v9493_v55 = vld [vmem:[#allocation5 + $0x1238] sm:$0xf0] }
 0x2c5   :  { %6763 = vmatpush.bf16.msrb.mxu0 %v8976_v3  ;;  %v9456_v28 = vor.u32 %v11317_v62, %v9453_v21  ;;  %v9317_v3 = vld [vmem:[#allocation5 + $0x10d8] sm:$0xf0]  ;;  %v9421_v62 = vld [vmem:[#allocation5 + $0x11a8] sm:$0xf0]  ;;  %v11377_v57 = vld [vmem:[#allocation5 + $0x13c4] sm:$0xf] }
 0x2c6   :  { %6776 = vmatpush.bf16.msrb.mxu1 %v9040_v17  ;;  %v9381_v17 = vld [vmem:[#allocation5 + $0x1158] sm:$0xf0]  ;;  %v9320_v56 = vor.u32 %v11283_v6, %v9317_v3  ;;  %v11259_v6 = vld [vmem:[#allocation5 + $0x1014] sm:$0xf]  ;;  %v9424_v3 = vor.u32 %v11309_v44, %v9421_v62 }
 0x2c7   :  { %6789 = vmatpush.bf16.msrb.mxu2 %v9104_v53  ;;  %v12147_v53 = vld [vmem:[#allocation13_spill] sm:$0xff]  ;;  %v9384_v35 = vor.u32 %v11299_v23, %v9381_v17  ;;  %v11291_v17 = vld [vmem:[#allocation5 + $0x1114] sm:$0xf] }
 0x2c8   :  { %6802 = vmatpush.bf16.msrb.mxu3 %v9168_v1  ;;  %v12149_v1 = vld [vmem:[#allocation15_spill] sm:$0xff]  ;;  %v9285_v23 = vld [vmem:[#allocation5 + $0x1098] sm:$0xf0]  ;;  %v11347_v44 = vld [vmem:[#allocation5 + $0x12d4] sm:$0xf] }
 0x2c9   :  { %6764 = vmatpush.bf16.msrb.mxu0 %v8968_v34  ;;  %v11281_v34 = vld [vmem:[#allocation5 + $0x10c4] sm:$0xf]  ;;  %v12150_v62 = vld [vmem:[#allocation16_spill] sm:$0xff] }
 0x2ca   :  { %6777 = vmatpush.bf16.msrb.mxu1 %v9032_v39  ;;  %v11297_v39 = vld [vmem:[#allocation5 + $0x1144] sm:$0xf]  ;;  %v9312_v9 = vor.u32 %v11281_v34, %v9309_v27  ;;  %v9341_v27 = vld [vmem:[#allocation5 + $0x1108] sm:$0xf0] }
 0x2cb   :  { %6790 = vmatpush.bf16.msrb.mxu2 %v9096_v37  ;;  %v9373_v37 = vld [vmem:[#allocation5 + $0x1148] sm:$0xf0]  ;;  %v11289_v34 = vld [vmem:[#allocation5 + $0x1104] sm:$0xf] }
 0x2cc   :  { %6803 = vmatpush.bf16.msrb.mxu3 %v9160_v29  ;;  %v9376_v45 = vor.u32 %v11297_v39, %v9373_v37  ;;  %v11305_v39 = vld [vmem:[#allocation5 + $0x1184] sm:$0xf]  ;;  %v9405_v37 = vld [vmem:[#allocation5 + $0x1188] sm:$0xf0] }
 0x2cd   :  { %6765 = vmatpush.bf16.msrb.mxu0 %v8960_v48  ;;  %v6559_v52 = vpop.f32.mrf.mxu0 }
 0x2ce   :  { %6778 = vmatpush.bf16.msrb.mxu1 %v9024_v49  ;;  %v6560_v29 = vadd.f32 %v6559_v52, %v12045_v61  ;;  %v6572_v8 = vpop.f32.mrf.mxu1  ;;  %v11311_v49 = vld [vmem:[#allocation5 + $0x11b4] sm:$0xf]  ;;  %v9304_v61 = vor.u32 %v11279_v15, %v9301_v12  ;;  %v9344_v15 = vor.u32 %v11289_v34, %v9341_v27  ;;  %v9408_v12 = vor.u32 %v11305_v39, %v9405_v37  ;;  %v9693_v34 = vld [vmem:[#allocation5 + $0x13c8] sm:$0xf0] }
 0x2cf   :  { %6791 = vmatpush.bf16.msrb.mxu2 %v9088_v40  ;;  %v9429_v40 = vld [vmem:[#allocation5 + $0x11b8] sm:$0xf0] }
 0x2d0   :  { %6804 = vmatpush.bf16.msrb.mxu3 %v9152_v50  ;;  %6766 = vmatmul.bf16.vlgmr.msrb.gmra.mxu0 %v12146_v5  ;;  %v6573_v48 = vadd.f32 %v6572_v8, %v6560_v29  ;;  %v11261_v50 = vld [vmem:[#allocation5 + $0x1024] sm:$0xf]  ;;  %v9221_v5 = vld [vmem:[#allocation5 + $0x1018] sm:$0xf0]  ;;  %v11351_v29 = vld [vmem:[#allocation5 + $0x12f4] sm:$0xf] }
 0x2d1   :  { %6810 = vmatpush.bf16.msra.mxu0 %v9272_v32  ;;  %6779 = vmatmul.bf16.vlgmr.msrb.gmra.mxu1 %v12148_v19  ;;  %v9229_v32 = vld [vmem:[#allocation5 + $0x1028] sm:$0xf0]  ;;  %v11307_v19 = vld [vmem:[#allocation5 + $0x1194] sm:$0xf]  ;;  %v9224_v26 = vor.u32 %v11259_v6, %v9221_v5  ;;  %v12152_v6 = vld [vmem:[#allocation18_spill] sm:$0xff] }
 0x2d2   :  { %6823 = vmatpush.bf16.msra.mxu1 %v9336_v4  ;;  %6792 = vmatmul.bf16.vlgmr.msrb.gmra.mxu2 %v12147_v53  ;;  %v11277_v4 = vld [vmem:[#allocation5 + $0x10a4] sm:$0xf]  ;;  %v9349_v53 = vld [vmem:[#allocation5 + $0x1118] sm:$0xf0]  ;;  %v11379_v5 = vld [vmem:[#allocation5 + $0x13d4] sm:$0xf] }
 0x2d3   :  { %6836 = vmatpush.bf16.msra.mxu2 %v9400_v58  ;;  %6805 = vmatmul.bf16.vlgmr.msrb.gmra.mxu3 %v12149_v1  ;;  %v9432_v58 = vor.u32 %v11311_v49, %v9429_v40  ;;  %v9296_v60 = vor.u32 %v11277_v4, %v9293_v42  ;;  %v11257_v1 = vld [vmem:[#allocation5 + $0x1004] sm:$0xf]  ;;  %v9645_v4 = vld [vmem:[#allocation5 + $0x1368] sm:$0xf0] }
 0x2d4   :  { %6849 = vmatpush.bf16.msra.mxu3 %v9464_v18  ;;  %v9357_v18 = vld [vmem:[#allocation5 + $0x1128] sm:$0xf0]  ;;  %v11333_v40 = vld [vmem:[#allocation5 + $0x1264] sm:$0xf] }
 0x2d5   :  { %6811 = vmatpush.bf16.msra.mxu0 %v9264_v63  ;;  %v6585_v41 = vpop.f32.mrf.mxu2  ;;  %v6561_v21 = vpop.f32.mrf.mxu0  ;;  %v9232_v63 = vor.u32 %v11261_v50, %v9229_v32  ;;  %v9360_v38 = vor.u32 %v11293_v31, %v9357_v18  ;;  %v9581_v50 = vld [vmem:[#allocation5 + $0x12e8] sm:$0xf0]  ;;  %v11365_v32 = vld [vmem:[#allocation5 + $0x1364] sm:$0xf] }
 0x2d6   :  { %6824 = vmatpush.bf16.msra.mxu1 %v9328_v14  ;;  %v6586_v20 = vadd.f32 %v6585_v41, %v6573_v48  ;;  %v6598_v59 = vpop.f32.mrf.mxu3  ;;  %v6574_v14 = vpop.f32.mrf.mxu1  ;;  %v9717_v48 = vld [vmem:[#allocation5 + $0x13f8] sm:$0xf0]  ;;  %v9709_v41 = vld [vmem:[#allocation5 + $0x13e8] sm:$0xf0]  ;;  %v9648_v18 = vor.u32 %v11365_v32, %v9645_v4  ;;  %v11373_v4 = vld [vmem:[#allocation5 + $0x13a4] sm:$0xf] }
 0x2d7   :  { %6837 = vmatpush.bf16.msra.mxu2 %v9392_v0  ;;  %v11363_v14 = vld [vmem:[#allocation5 + $0x1354] sm:$0xf] }
 0x2d8   :  { %6850 = vmatpush.bf16.msra.mxu3 %v9456_v28  ;;  %v12052_v0 = vadd.f32 %v6598_v59, %v6586_v20  ;;  %v11275_v28 = vld [vmem:[#allocation5 + $0x1094] sm:$0xf]  ;;  %v9509_v59 = vld [vmem:[#allocation5 + $0x1258] sm:$0xf0] }
 0x2d9   :  { %6812 = vmatpush.bf16.msra.mxu0 %v9256_v54  ;;  %v9213_v54 = vld [vmem:[#allocation5 + $0x1008] sm:$0xf0]  ;;  %v11331_v20 = vld [vmem:[#allocation5 + $0x1254] sm:$0xf] }
 0x2da   :  { %6825 = vmatpush.bf16.msra.mxu1 %v9320_v56  ;;  %v9288_v56 = vor.u32 %v11275_v28, %v9285_v23  ;;  %v9216_v8 = vor.u32 %v11257_v1, %v9213_v54  ;;  %v9701_v28 = vld [vmem:[#allocation5 + $0x13d8] sm:$0xf0]  ;;  %v9512_v23 = vor.u32 %v11331_v20, %v9509_v59  ;;  %v9565_v54 = vld [vmem:[#allocation5 + $0x12c8] sm:$0xf0] }
 0x2db   :  { %6838 = vmatpush.bf16.msra.mxu2 %v9384_v35  ;;  %v9352_v35 = vor.u32 %v11291_v17, %v9349_v53  ;;  %v9704_v1 = vor.u32 %v11379_v5, %v9701_v28  ;;  %v9669_v5 = vld [vmem:[#allocation5 + $0x1398] sm:$0xf0] }
 0x2dc   :  { %6851 = vmatpush.bf16.msra.mxu3 %v9448_v25  ;;  %v9416_v25 = vor.u32 %v11307_v19, %v9413_v11  ;;  %v11329_v19 = vld [vmem:[#allocation5 + $0x1244] sm:$0xf]  ;;  %v9501_v11 = vld [vmem:[#allocation5 + $0x1248] sm:$0xf0] }
 0x2dd   :  { %6813 = vmatpush.bf16.msra.mxu0 %v9248_v30  ;;  %v6587_v52 = vpop.f32.mrf.mxu2  ;;  %v9504_v27 = vor.u32 %v11329_v19, %v9501_v11  ;;  %v11337_v19 = vld [vmem:[#allocation5 + $0x1284] sm:$0xf]  ;;  %v9533_v11 = vld [vmem:[#allocation5 + $0x1288] sm:$0xf0] }
 0x2de   :  { %6826 = vmatpush.bf16.msra.mxu1 %v9312_v9  ;;  %v6600_v30 = vpop.f32.mrf.mxu3  ;;  %v9589_v9 = vld [vmem:[#allocation5 + $0x12f8] sm:$0xf0] }
 0x2df   :  { %6839 = vmatpush.bf16.msra.mxu2 %v9376_v45  ;;  %v11367_v45 = vld [vmem:[#allocation5 + $0x1374] sm:$0xf]  ;;  %v9592_v13 = vor.u32 %v11351_v29, %v9589_v9  ;;  %v9696_v30 = vor.u32 %v11377_v57, %v9693_v34  ;;  %v9557_v9 = vld [vmem:[#allocation5 + $0x12b8] sm:$0xf0] }
 0x2e0   :  { %6852 = vmatpush.bf16.msra.mxu3 %v9440_v46  ;;  %v11383_v46 = vld [vmem:[#allocation5 + $0x13f4] sm:$0xf]  ;;  %v9656_v49 = vor.u32 %v11367_v45, %v9653_v10  ;;  %v9621_v10 = vld [vmem:[#allocation5 + $0x1338] sm:$0xf0] }
 0x2e1   :  { %6814 = vmatpush.bf16.msra.mxu0 %v9240_v16  ;;  %v9517_v16 = vld [vmem:[#allocation5 + $0x1268] sm:$0xf0]  ;;  %v11343_v29 = vld [vmem:[#allocation5 + $0x12b4] sm:$0xf]  ;;  %v9781_v34 = vld [vmem:[#allocation5 + $0x1478] sm:$0xf0] }
 0x2e2   :  { %6827 = vmatpush.bf16.msra.mxu1 %v9304_v61  ;;  %v11349_v61 = vld [vmem:[#allocation5 + $0x12e4] sm:$0xf]  ;;  %v9520_v42 = vor.u32 %v11333_v40, %v9517_v16  ;;  %v11359_v45 = vld [vmem:[#allocation5 + $0x1334] sm:$0xf]  ;;  %v9549_v16 = vld [vmem:[#allocation5 + $0x12a8] sm:$0xf0] }
 0x2e3   :  { %6840 = vmatpush.bf16.msra.mxu2 %v9368_v24  ;;  %v9720_v24 = vor.u32 %v11383_v46, %v9717_v48  ;;  %v9584_v31 = vor.u32 %v11349_v61, %v9581_v50  ;;  %v9496_v46 = vor.u32 %v11327_v2, %v9493_v55  ;;  %v9624_v48 = vor.u32 %v11359_v45, %v9621_v10  ;;  %v11357_v61 = vld [vmem:[#allocation5 + $0x1324] sm:$0xf]  ;;  %v11399_v57 = vld [vmem:[#allocation5 + $0x1474] sm:$0xf]  ;;  %v9909_v2 = vld [vmem:[#allocation5 + $0x1578] sm:$0xf0] }
 0x2e4   :  { %6853 = vmatpush.bf16.msra.mxu3 %v9432_v58  ;;  %v11381_v58 = vld [vmem:[#allocation5 + $0x13e4] sm:$0xf]  ;;  %v9536_v55 = vor.u32 %v11337_v19, %v9533_v11  ;;  %v9784_v45 = vor.u32 %v11399_v57, %v9781_v34  ;;  %v11391_v57 = vld [vmem:[#allocation5 + $0x1434] sm:$0xf]  ;;  %v9749_v34 = vld [vmem:[#allocation5 + $0x1438] sm:$0xf0] }
 0x2e5   :  { %6815 = vmatpush.bf16.msra.mxu0 %v9232_v63  ;;  %v9712_v21 = vor.u32 %v11381_v58, %v9709_v41  ;;  %v9573_v63 = vld [vmem:[#allocation5 + $0x12d8] sm:$0xf0]  ;;  %v9677_v58 = vld [vmem:[#allocation5 + $0x13a8] sm:$0xf0]  ;;  %v11441_v11 = vld [vmem:[#allocation5 + $0x15c4] sm:$0xf] }
 0x2e6   :  { %6828 = vmatpush.bf16.msra.mxu1 %v9296_v60  ;;  %v9637_v60 = vld [vmem:[#allocation5 + $0x1358] sm:$0xf0]  ;;  %v9576_v17 = vor.u32 %v11347_v44, %v9573_v63  ;;  %v11323_v44 = vld [vmem:[#allocation5 + $0x1214] sm:$0xf]  ;;  %v9680_v63 = vor.u32 %v11373_v4, %v9677_v58 }
 0x2e7   :  { %6841 = vmatpush.bf16.msra.mxu2 %v9360_v38  ;;  %v12151_v38 = vld [vmem:[#allocation17_spill] sm:$0xff]  ;;  %v9640_v53 = vor.u32 %v11363_v14, %v9637_v60  ;;  %v11355_v60 = vld [vmem:[#allocation5 + $0x1314] sm:$0xf] }
 0x2e8   :  { %6854 = vmatpush.bf16.msra.mxu3 %v9424_v3  ;;  %v12153_v3 = vld [vmem:[#allocation19_spill] sm:$0xff]  ;;  %v9541_v14 = vld [vmem:[#allocation5 + $0x1298] sm:$0xf0]  ;;  %v11411_v4 = vld [vmem:[#allocation5 + $0x14d4] sm:$0xf] }
 0x2e9   :  { %6816 = vmatpush.bf16.msra.mxu0 %v9224_v26  ;;  %v11345_v26 = vld [vmem:[#allocation5 + $0x12c4] sm:$0xf]  ;;  %v12154_v58 = vld [vmem:[#allocation20_spill] sm:$0xff] }
 0x2ea   :  { %6829 = vmatpush.bf16.msra.mxu1 %v9288_v56  ;;  %v11361_v56 = vld [vmem:[#allocation5 + $0x1344] sm:$0xf]  ;;  %v9568_v37 = vor.u32 %v11345_v26, %v9565_v54  ;;  %v9597_v54 = vld [vmem:[#allocation5 + $0x1308] sm:$0xf0] }
 0x2eb   :  { %6842 = vmatpush.bf16.msra.mxu2 %v9352_v35  ;;  %v9629_v35 = vld [vmem:[#allocation5 + $0x1348] sm:$0xf0]  ;;  %v11353_v26 = vld [vmem:[#allocation5 + $0x1304] sm:$0xf] }
 0x2ec   :  { %6855 = vmatpush.bf16.msra.mxu3 %v9416_v25  ;;  %v9632_v52 = vor.u32 %v11361_v56, %v9629_v35  ;;  %v11369_v56 = vld [vmem:[#allocation5 + $0x1384] sm:$0xf]  ;;  %v9661_v35 = vld [vmem:[#allocation5 + $0x1388] sm:$0xf0] }
 0x2ed   :  { %6817 = vmatpush.bf16.msra.mxu0 %v9216_v8  ;;  %v6611_v22 = vpop.f32.mrf.mxu0 }
 0x2ee   :  { %6830 = vmatpush.bf16.msra.mxu1 %v9280_v43  ;;  %v6612_v25 = vadd.f32 %v6611_v22, %v12052_v0  ;;  %v6624_v39 = vpop.f32.mrf.mxu1  ;;  %v11375_v43 = vld [vmem:[#allocation5 + $0x13b4] sm:$0xf]  ;;  %v9560_v0 = vor.u32 %v11343_v29, %v9557_v9  ;;  %v9600_v29 = vor.u32 %v11353_v26, %v9597_v54  ;;  %v9664_v9 = vor.u32 %v11369_v56, %v9661_v35  ;;  %v9949_v26 = vld [vmem:[#allocation5 + $0x15c8] sm:$0xf0] }
 0x2ef   :  { %6843 = vmatpush.bf16.msra.mxu2 %v9344_v15  ;;  %v9685_v15 = vld [vmem:[#allocation5 + $0x13b8] sm:$0xf0] }
 0x2f0   :  { %6856 = vmatpush.bf16.msra.mxu3 %v9408_v12  ;;  %6818 = vmatmul.bf16.vlgmr.msra.gmra.mxu0 %v12150_v62  ;;  %v6625_v8 = vadd.f32 %v6624_v39, %v6612_v25  ;;  %v11325_v12 = vld [vmem:[#allocation5 + $0x1224] sm:$0xf]  ;;  %v9477_v62 = vld [vmem:[#allocation5 + $0x1218] sm:$0xf0]  ;;  %v11415_v25 = vld [vmem:[#allocation5 + $0x14f4] sm:$0xf] }
 0x2f1   :  { %6862 = vmatpush.bf16.msrb.mxu0 %v9528_v33  ;;  %6831 = vmatmul.bf16.vlgmr.msra.gmra.mxu1 %v12152_v6  ;;  %v9485_v33 = vld [vmem:[#allocation5 + $0x1228] sm:$0xf0]  ;;  %v11371_v6 = vld [vmem:[#allocation5 + $0x1394] sm:$0xf]  ;;  %v9480_v28 = vor.u32 %v11323_v44, %v9477_v62  ;;  %v12156_v44 = vld [vmem:[#allocation22_spill] sm:$0xff] }
 0x2f2   :  { %6875 = vmatpush.bf16.msrb.mxu1 %v9592_v13  ;;  %6844 = vmatmul.bf16.vlgmr.msra.gmra.mxu2 %v12151_v38  ;;  %v11341_v13 = vld [vmem:[#allocation5 + $0x12a4] sm:$0xf]  ;;  %v9605_v38 = vld [vmem:[#allocation5 + $0x1318] sm:$0xf0]  ;;  %v11443_v62 = vld [vmem:[#allocation5 + $0x15d4] sm:$0xf] }
 0x2f3   :  { %6888 = vmatpush.bf16.msrb.mxu2 %v9656_v49  ;;  %6857 = vmatmul.bf16.vlgmr.msra.gmra.mxu3 %v12153_v3  ;;  %v9688_v49 = vor.u32 %v11375_v43, %v9685_v15  ;;  %v9552_v20 = vor.u32 %v11341_v13, %v9549_v16  ;;  %v11321_v3 = vld [vmem:[#allocation5 + $0x1204] sm:$0xf]  ;;  %v9901_v13 = vld [vmem:[#allocation5 + $0x1568] sm:$0xf0] }
 0x2f4   :  { %6901 = vmatpush.bf16.msrb.mxu3 %v9720_v24  ;;  %v9613_v24 = vld [vmem:[#allocation5 + $0x1328] sm:$0xf0]  ;;  %v11397_v15 = vld [vmem:[#allocation5 + $0x1464] sm:$0xf] }
 0x2f5   :  { %6863 = vmatpush.bf16.msrb.mxu0 %v9520_v42  ;;  %v6637_v40 = vpop.f32.mrf.mxu2  ;;  %v6613_v41 = vpop.f32.mrf.mxu0  ;;  %v9488_v42 = vor.u32 %v11325_v12, %v9485_v33  ;;  %v9616_v59 = vor.u32 %v11357_v61, %v9613_v24  ;;  %v9837_v12 = vld [vmem:[#allocation5 + $0x14e8] sm:$0xf0]  ;;  %v11429_v33 = vld [vmem:[#allocation5 + $0x1564] sm:$0xf] }
 0x2f6   :  { %6876 = vmatpush.bf16.msrb.mxu1 %v9584_v31  ;;  %v6638_v50 = vadd.f32 %v6637_v40, %v6625_v8  ;;  %v6650_v32 = vpop.f32.mrf.mxu3  ;;  %v6626_v31 = vpop.f32.mrf.mxu1  ;;  %v9973_v8 = vld [vmem:[#allocation5 + $0x15f8] sm:$0xf0]  ;;  %v9965_v40 = vld [vmem:[#allocation5 + $0x15e8] sm:$0xf0]  ;;  %v9904_v24 = vor.u32 %v11429_v33, %v9901_v13  ;;  %v11437_v13 = vld [vmem:[#allocation5 + $0x15a4] sm:$0xf] }
 0x2f7   :  { %6889 = vmatpush.bf16.msrb.mxu2 %v9648_v18  ;;  %v11427_v31 = vld [vmem:[#allocation5 + $0x1554] sm:$0xf] }
 0x2f8   :  { %6902 = vmatpush.bf16.msrb.mxu3 %v9712_v21  ;;  %v12059_v18 = vadd.f32 %v6650_v32, %v6638_v50  ;;  %v11339_v21 = vld [vmem:[#allocation5 + $0x1294] sm:$0xf]  ;;  %v9765_v32 = vld [vmem:[#allocation5 + $0x1458] sm:$0xf0] }
 0x2f9   :  { %6864 = vmatpush.bf16.msrb.mxu0 %v9512_v23  ;;  %v9469_v23 = vld [vmem:[#allocation5 + $0x1208] sm:$0xf0]  ;;  %v11395_v50 = vld [vmem:[#allocation5 + $0x1454] sm:$0xf] }
 0x2fa   :  { %6877 = vmatpush.bf16.msrb.mxu1 %v9576_v17  ;;  %v9544_v17 = vor.u32 %v11339_v21, %v9541_v14  ;;  %v9472_v39 = vor.u32 %v11321_v3, %v9469_v23  ;;  %v9957_v21 = vld [vmem:[#allocation5 + $0x15d8] sm:$0xf0]  ;;  %v9768_v14 = vor.u32 %v11395_v50, %v9765_v32  ;;  %v9821_v23 = vld [vmem:[#allocation5 + $0x14c8] sm:$0xf0] }
 0x2fb   :  { %6890 = vmatpush.bf16.msrb.mxu2 %v9640_v53  ;;  %v9608_v53 = vor.u32 %v11355_v60, %v9605_v38  ;;  %v9960_v3 = vor.u32 %v11443_v62, %v9957_v21  ;;  %v9925_v62 = vld [vmem:[#allocation5 + $0x1598] sm:$0xf0] }
 0x2fc   :  { %6903 = vmatpush.bf16.msrb.mxu3 %v9704_v1  ;;  %v9672_v1 = vor.u32 %v11371_v6, %v9669_v5  ;;  %v11393_v6 = vld [vmem:[#allocation5 + $0x1444] sm:$0xf]  ;;  %v9757_v5 = vld [vmem:[#allocation5 + $0x1448] sm:$0xf0] }
 0x2fd   :  { %6865 = vmatpush.bf16.msrb.mxu0 %v9504_v27  ;;  %v6639_v22 = vpop.f32.mrf.mxu2  ;;  %v9760_v54 = vor.u32 %v11393_v6, %v9757_v5  ;;  %v11401_v6 = vld [vmem:[#allocation5 + $0x1484] sm:$0xf]  ;;  %v9789_v5 = vld [vmem:[#allocation5 + $0x1488] sm:$0xf0] }
 0x2fe   :  { %6878 = vmatpush.bf16.msrb.mxu1 %v9568_v37  ;;  %v6652_v27 = vpop.f32.mrf.mxu3  ;;  %v9845_v37 = vld [vmem:[#allocation5 + $0x14f8] sm:$0xf0] }
 0x2ff   :  { %6891 = vmatpush.bf16.msrb.mxu2 %v9632_v52  ;;  %v11431_v52 = vld [vmem:[#allocation5 + $0x1574] sm:$0xf]  ;;  %v9848_v10 = vor.u32 %v11415_v25, %v9845_v37  ;;  %v9952_v27 = vor.u32 %v11441_v11, %v9949_v26  ;;  %v9813_v37 = vld [vmem:[#allocation5 + $0x14b8] sm:$0xf0] }
 0x300   :  { %6904 = vmatpush.bf16.msrb.mxu3 %v9696_v30  ;;  %v11447_v30 = vld [vmem:[#allocation5 + $0x15f4] sm:$0xf]  ;;  %v9912_v43 = vor.u32 %v11431_v52, %v9909_v2  ;;  %v9877_v2 = vld [vmem:[#allocation5 + $0x1538] sm:$0xf0] }
 0x301   :  { %6866 = vmatpush.bf16.msrb.mxu0 %v9496_v46  ;;  %v9773_v46 = vld [vmem:[#allocation5 + $0x1468] sm:$0xf0]  ;;  %v11407_v25 = vld [vmem:[#allocation5 + $0x14b4] sm:$0xf]  ;;  %v10037_v26 = vld [vmem:[#allocation5 + $0x1678] sm:$0xf0] }
 0x302   :  { %6879 = vmatpush.bf16.msrb.mxu1 %v9560_v0  ;;  %v11413_v0 = vld [vmem:[#allocation5 + $0x14e4] sm:$0xf]  ;;  %v9776_v16 = vor.u32 %v11397_v15, %v9773_v46  ;;  %v11423_v52 = vld [vmem:[#allocation5 + $0x1534] sm:$0xf]  ;;  %v9805_v46 = vld [vmem:[#allocation5 + $0x14a8] sm:$0xf0] }
 0x303   :  { %6892 = vmatpush.bf16.msrb.mxu2 %v9624_v48  ;;  %v9976_v48 = vor.u32 %v11447_v30, %v9973_v8  ;;  %v9840_v61 = vor.u32 %v11413_v0, %v9837_v12  ;;  %v9752_v30 = vor.u32 %v11391_v57, %v9749_v34  ;;  %v9880_v8 = vor.u32 %v11423_v52, %v9877_v2  ;;  %v11421_v0 = vld [vmem:[#allocation5 + $0x1524] sm:$0xf]  ;;  %v11463_v11 = vld [vmem:[#allocation5 + $0x1674] sm:$0xf]  ;;  %v10165_v57 = vld [vmem:[#allocation5 + $0x1778] sm:$0xf0] }
 0x304   :  { %6905 = vmatpush.bf16.msrb.mxu3 %v9688_v49  ;;  %v11445_v49 = vld [vmem:[#allocation5 + $0x15e4] sm:$0xf]  ;;  %v9792_v34 = vor.u32 %v11401_v6, %v9789_v5  ;;  %v10040_v52 = vor.u32 %v11463_v11, %v10037_v26  ;;  %v11455_v11 = vld [vmem:[#allocation5 + $0x1634] sm:$0xf]  ;;  %v10005_v26 = vld [vmem:[#allocation5 + $0x1638] sm:$0xf0] }
 0x305   :  { %6867 = vmatpush.bf16.msrb.mxu0 %v9488_v42  ;;  %v9968_v41 = vor.u32 %v11445_v49, %v9965_v40  ;;  %v9829_v42 = vld [vmem:[#allocation5 + $0x14d8] sm:$0xf0]  ;;  %v9933_v49 = vld [vmem:[#allocation5 + $0x15a8] sm:$0xf0]  ;;  %v11505_v5 = vld [vmem:[#allocation5 + $0x17c4] sm:$0xf] }
 0x306   :  { %6880 = vmatpush.bf16.msrb.mxu1 %v9552_v20  ;;  %v9893_v20 = vld [vmem:[#allocation5 + $0x1558] sm:$0xf0]  ;;  %v9832_v60 = vor.u32 %v11411_v4, %v9829_v42  ;;  %v11387_v4 = vld [vmem:[#allocation5 + $0x1414] sm:$0xf]  ;;  %v9936_v42 = vor.u32 %v11437_v13, %v9933_v49 }
 0x307   :  { %6893 = vmatpush.bf16.msrb.mxu2 %v9616_v59  ;;  %v12155_v59 = vld [vmem:[#allocation21_spill] sm:$0xff]  ;;  %v9896_v38 = vor.u32 %v11427_v31, %v9893_v20  ;;  %v11419_v20 = vld [vmem:[#allocation5 + $0x1514] sm:$0xf] }
 0x308   :  { %6906 = vmatpush.bf16.msrb.mxu3 %v9680_v63  ;;  %v12157_v63 = vld [vmem:[#allocation23_spill] sm:$0xff]  ;;  %v9797_v31 = vld [vmem:[#allocation5 + $0x1498] sm:$0xf0]  ;;  %v11475_v13 = vld [vmem:[#allocation5 + $0x16d4] sm:$0xf] }
 0x309   :  { %6868 = vmatpush.bf16.msrb.mxu0 %v9480_v28  ;;  %v11409_v28 = vld [vmem:[#allocation5 + $0x14c4] sm:$0xf]  ;;  %v12158_v49 = vld [vmem:[#allocation24_spill] sm:$0xff] }
 0x30a   :  { %6881 = vmatpush.bf16.msrb.mxu1 %v9544_v17  ;;  %v11425_v17 = vld [vmem:[#allocation5 + $0x1544] sm:$0xf]  ;;  %v9824_v35 = vor.u32 %v11409_v28, %v9821_v23  ;;  %v9853_v23 = vld [vmem:[#allocation5 + $0x1508] sm:$0xf0] }
 0x30b   :  { %6894 = vmatpush.bf16.msrb.mxu2 %v9608_v53  ;;  %v9885_v53 = vld [vmem:[#allocation5 + $0x1548] sm:$0xf0]  ;;  %v11417_v28 = vld [vmem:[#allocation5 + $0x1504] sm:$0xf] }
 0x30c   :  { %6907 = vmatpush.bf16.msrb.mxu3 %v9672_v1  ;;  %v9888_v22 = vor.u32 %v11425_v17, %v9885_v53  ;;  %v11433_v17 = vld [vmem:[#allocation5 + $0x1584] sm:$0xf]  ;;  %v9917_v53 = vld [vmem:[#allocation5 + $0x1588] sm:$0xf0] }
 0x30d   :  { %6869 = vmatpush.bf16.msrb.mxu0 %v9472_v39  ;;  %v6663_v19 = vpop.f32.mrf.mxu0 }
 0x30e   :  { %6882 = vmatpush.bf16.msrb.mxu1 %v9536_v55  ;;  %v6664_v1 = vadd.f32 %v6663_v19, %v12059_v18  ;;  %v6676_v56 = vpop.f32.mrf.mxu1  ;;  %v11439_v55 = vld [vmem:[#allocation5 + $0x15b4] sm:$0xf]  ;;  %v9816_v18 = vor.u32 %v11407_v25, %v9813_v37  ;;  %v9856_v25 = vor.u32 %v11417_v28, %v9853_v23  ;;  %v9920_v37 = vor.u32 %v11433_v17, %v9917_v53  ;;  %v10205_v28 = vld [vmem:[#allocation5 + $0x17c8] sm:$0xf0] }
 0x30f   :  { %6895 = vmatpush.bf16.msrb.mxu2 %v9600_v29  ;;  %v9941_v29 = vld [vmem:[#allocation5 + $0x15b8] sm:$0xf0] }
 0x310   :  { %6908 = vmatpush.bf16.msrb.mxu3 %v9664_v9  ;;  %6870 = vmatmul.bf16.vlgmr.msrb.gmra.mxu0 %v12154_v58  ;;  %v6677_v39 = vadd.f32 %v6676_v56, %v6664_v1  ;;  %v11389_v9 = vld [vmem:[#allocation5 + $0x1424] sm:$0xf]  ;;  %v9733_v58 = vld [vmem:[#allocation5 + $0x1418] sm:$0xf0]  ;;  %v11479_v1 = vld [vmem:[#allocation5 + $0x16f4] sm:$0xf] }
 0x311   :  { %6914 = vmatpush.bf16.msra.mxu0 %v9784_v45  ;;  %6883 = vmatmul.bf16.vlgmr.msrb.gmra.mxu1 %v12156_v44  ;;  %v9741_v45 = vld [vmem:[#allocation5 + $0x1428] sm:$0xf0]  ;;  %v11435_v44 = vld [vmem:[#allocation5 + $0x1594] sm:$0xf]  ;;  %v9736_v21 = vor.u32 %v11387_v4, %v9733_v58  ;;  %v12160_v4 = vld [vmem:[#allocation26_spill] sm:$0xff] }
 0x312   :  { %6927 = vmatpush.bf16.msra.mxu1 %v9848_v10  ;;  %6896 = vmatmul.bf16.vlgmr.msrb.gmra.mxu2 %v12155_v59  ;;  %v11405_v10 = vld [vmem:[#allocation5 + $0x14a4] sm:$0xf]  ;;  %v9861_v59 = vld [vmem:[#allocation5 + $0x1518] sm:$0xf0]  ;;  %v11507_v58 = vld [vmem:[#allocation5 + $0x17d4] sm:$0xf] }
 0x313   :  { %6940 = vmatpush.bf16.msra.mxu2 %v9912_v43  ;;  %6909 = vmatmul.bf16.vlgmr.msrb.gmra.mxu3 %v12157_v63  ;;  %v9944_v43 = vor.u32 %v11439_v55, %v9941_v29  ;;  %v9808_v50 = vor.u32 %v11405_v10, %v9805_v46  ;;  %v11385_v63 = vld [vmem:[#allocation5 + $0x1404] sm:$0xf]  ;;  %v10157_v10 = vld [vmem:[#allocation5 + $0x1768] sm:$0xf0] }
 0x314   :  { %6953 = vmatpush.bf16.msra.mxu3 %v9976_v48  ;;  %v9869_v48 = vld [vmem:[#allocation5 + $0x1528] sm:$0xf0]  ;;  %v11461_v29 = vld [vmem:[#allocation5 + $0x1664] sm:$0xf] }
 0x315   :  { %6915 = vmatpush.bf16.msra.mxu0 %v9776_v16  ;;  %v6689_v15 = vpop.f32.mrf.mxu2  ;;  %v6665_v40 = vpop.f32.mrf.mxu0  ;;  %v9744_v16 = vor.u32 %v11389_v9, %v9741_v45  ;;  %v9872_v32 = vor.u32 %v11421_v0, %v9869_v48  ;;  %v10093_v9 = vld [vmem:[#allocation5 + $0x16e8] sm:$0xf0]  ;;  %v11493_v45 = vld [vmem:[#allocation5 + $0x1764] sm:$0xf] }
 0x316   :  { %6928 = vmatpush.bf16.msra.mxu1 %v9840_v61  ;;  %v6690_v12 = vadd.f32 %v6689_v15, %v6677_v39  ;;  %v6702_v33 = vpop.f32.mrf.mxu3  ;;  %v6678_v61 = vpop.f32.mrf.mxu1  ;;  %v10229_v39 = vld [vmem:[#allocation5 + $0x17f8] sm:$0xf0]  ;;  %v10221_v15 = vld [vmem:[#allocation5 + $0x17e8] sm:$0xf0]  ;;  %v10160_v48 = vor.u32 %v11493_v45, %v10157_v10  ;;  %v11501_v10 = vld [vmem:[#allocation5 + $0x17a4] sm:$0xf] }
 0x317   :  { %6941 = vmatpush.bf16.msra.mxu2 %v9904_v24  ;;  %v11491_v61 = vld [vmem:[#allocation5 + $0x1754] sm:$0xf] }
 0x318   :  { %6954 = vmatpush.bf16.msra.mxu3 %v9968_v41  ;;  %v12066_v24 = vadd.f32 %v6702_v33, %v6690_v12  ;;  %v11403_v41 = vld [vmem:[#allocation5 + $0x1494] sm:$0xf]  ;;  %v10021_v33 = vld [vmem:[#allocation5 + $0x1658] sm:$0xf0] }
 0x319   :  { %6916 = vmatpush.bf16.msra.mxu0 %v9768_v14  ;;  %v9725_v14 = vld [vmem:[#allocation5 + $0x1408] sm:$0xf0]  ;;  %v11459_v12 = vld [vmem:[#allocation5 + $0x1654] sm:$0xf] }
 0x31a   :  { %6929 = vmatpush.bf16.msra.mxu1 %v9832_v60  ;;  %v9800_v60 = vor.u32 %v11403_v41, %v9797_v31  ;;  %v9728_v56 = vor.u32 %v11385_v63, %v9725_v14  ;;  %v10213_v41 = vld [vmem:[#allocation5 + $0x17d8] sm:$0xf0]  ;;  %v10024_v31 = vor.u32 %v11459_v12, %v10021_v33  ;;  %v10077_v14 = vld [vmem:[#allocation5 + $0x16c8] sm:$0xf0] }
 0x31b   :  { %6942 = vmatpush.bf16.msra.mxu2 %v9896_v38  ;;  %v9864_v38 = vor.u32 %v11419_v20, %v9861_v59  ;;  %v10216_v63 = vor.u32 %v11507_v58, %v10213_v41  ;;  %v10181_v58 = vld [vmem:[#allocation5 + $0x1798] sm:$0xf0] }
 0x31c   :  { %6955 = vmatpush.bf16.msra.mxu3 %v9960_v3  ;;  %v9928_v3 = vor.u32 %v11435_v44, %v9925_v62  ;;  %v11457_v44 = vld [vmem:[#allocation5 + $0x1644] sm:$0xf]  ;;  %v10013_v62 = vld [vmem:[#allocation5 + $0x1648] sm:$0xf0] }
 0x31d   :  { %6917 = vmatpush.bf16.msra.mxu0 %v9760_v54  ;;  %v6691_v19 = vpop.f32.mrf.mxu2  ;;  %v10016_v23 = vor.u32 %v11457_v44, %v10013_v62  ;;  %v11465_v44 = vld [vmem:[#allocation5 + $0x1684] sm:$0xf]  ;;  %v10045_v62 = vld [vmem:[#allocation5 + $0x1688] sm:$0xf0] }
 0x31e   :  { %6930 = vmatpush.bf16.msra.mxu1 %v9824_v35  ;;  %v6704_v54 = vpop.f32.mrf.mxu3  ;;  %v10101_v35 = vld [vmem:[#allocation5 + $0x16f8] sm:$0xf0] }
 0x31f   :  { %6943 = vmatpush.bf16.msra.mxu2 %v9888_v22  ;;  %v11495_v22 = vld [vmem:[#allocation5 + $0x1774] sm:$0xf]  ;;  %v10104_v2 = vor.u32 %v11479_v1, %v10101_v35  ;;  %v10208_v54 = vor.u32 %v11505_v5, %v10205_v28  ;;  %v10069_v35 = vld [vmem:[#allocation5 + $0x16b8] sm:$0xf0] }
 0x320   :  { %6956 = vmatpush.bf16.msra.mxu3 %v9952_v27  ;;  %v11511_v27 = vld [vmem:[#allocation5 + $0x17f4] sm:$0xf]  ;;  %v10168_v55 = vor.u32 %v11495_v22, %v10165_v57  ;;  %v10133_v57 = vld [vmem:[#allocation5 + $0x1738] sm:$0xf0] }
 0x321   :  { %6918 = vmatpush.bf16.msra.mxu0 %v9752_v30  ;;  %v10029_v30 = vld [vmem:[#allocation5 + $0x1668] sm:$0xf0]  ;;  %v11471_v1 = vld [vmem:[#allocation5 + $0x16b4] sm:$0xf]  ;;  %v10293_v28 = vld [vmem:[#allocation5 + $0x1878] sm:$0xf0] }
 0x322   :  { %6931 = vmatpush.bf16.msra.mxu1 %v9816_v18  ;;  %v11477_v18 = vld [vmem:[#allocation5 + $0x16e4] sm:$0xf]  ;;  %v10032_v46 = vor.u32 %v11461_v29, %v10029_v30  ;;  %v11487_v22 = vld [vmem:[#allocation5 + $0x1734] sm:$0xf]  ;;  %v10061_v30 = vld [vmem:[#allocation5 + $0x16a8] sm:$0xf0] }
 0x323   :  { %6944 = vmatpush.bf16.msra.mxu2 %v9880_v8  ;;  %v10232_v8 = vor.u32 %v11511_v27, %v10229_v39  ;;  %v10096_v0 = vor.u32 %v11477_v18, %v10093_v9  ;;  %v10008_v27 = vor.u32 %v11455_v11, %v10005_v26  ;;  %v10136_v39 = vor.u32 %v11487_v22, %v10133_v57  ;;  %v11485_v18 = vld [vmem:[#allocation5 + $0x1724] sm:$0xf]  ;;  %v11527_v5 = vld [vmem:[#allocation5 + $0x1874] sm:$0xf]  ;;  %v10421_v11 = vld [vmem:[#allocation5 + $0x1978] sm:$0xf0] }
 0x324   :  { %6957 = vmatpush.bf16.msra.mxu3 %v9944_v43  ;;  %v11509_v43 = vld [vmem:[#allocation5 + $0x17e4] sm:$0xf]  ;;  %v10048_v26 = vor.u32 %v11465_v44, %v10045_v62  ;;  %v10296_v22 = vor.u32 %v11527_v5, %v10293_v28  ;;  %v11519_v5 = vld [vmem:[#allocation5 + $0x1834] sm:$0xf]  ;;  %v10261_v28 = vld [vmem:[#allocation5 + $0x1838] sm:$0xf0] }
 0x325   :  { %6919 = vmatpush.bf16.msra.mxu0 %v9744_v16  ;;  %v10224_v40 = vor.u32 %v11509_v43, %v10221_v15  ;;  %v10085_v16 = vld [vmem:[#allocation5 + $0x16d8] sm:$0xf0]  ;;  %v10189_v43 = vld [vmem:[#allocation5 + $0x17a8] sm:$0xf0]  ;;  %v11569_v62 = vld [vmem:[#allocation5 + $0x19c4] sm:$0xf] }
 0x326   :  { %6932 = vmatpush.bf16.msra.mxu1 %v9808_v50  ;;  %v10149_v50 = vld [vmem:[#allocation5 + $0x1758] sm:$0xf0]  ;;  %v10088_v20 = vor.u32 %v11475_v13, %v10085_v16  ;;  %v11451_v13 = vld [vmem:[#allocation5 + $0x1614] sm:$0xf]  ;;  %v10192_v16 = vor.u32 %v11501_v10, %v10189_v43 }
 0x327   :  { %6945 = vmatpush.bf16.msra.mxu2 %v9872_v32  ;;  %v12159_v32 = vld [vmem:[#allocation25_spill] sm:$0xff]  ;;  %v10152_v59 = vor.u32 %v11491_v61, %v10149_v50  ;;  %v11483_v50 = vld [vmem:[#allocation5 + $0x1714] sm:$0xf] }
 0x328   :  { %6958 = vmatpush.bf16.msra.mxu3 %v9936_v42  ;;  %v12161_v42 = vld [vmem:[#allocation27_spill] sm:$0xff]  ;;  %v10053_v61 = vld [vmem:[#allocation5 + $0x1698] sm:$0xf0]  ;;  %v11539_v10 = vld [vmem:[#allocation5 + $0x18d4] sm:$0xf] }
 0x329   :  { %6920 = vmatpush.bf16.msra.mxu0 %v9736_v21  ;;  %v11473_v21 = vld [vmem:[#allocation5 + $0x16c4] sm:$0xf]  ;;  %v12162_v43 = vld [vmem:[#allocation28_spill] sm:$0xff] }
 0x32a   :  { %6933 = vmatpush.bf16.msra.mxu1 %v9800_v60  ;;  %v11489_v60 = vld [vmem:[#allocation5 + $0x1744] sm:$0xf]  ;;  %v10080_v53 = vor.u32 %v11473_v21, %v10077_v14  ;;  %v10109_v14 = vld [vmem:[#allocation5 + $0x1708] sm:$0xf0] }
 0x32b   :  { %6946 = vmatpush.bf16.msra.mxu2 %v9864_v38  ;;  %v10141_v38 = vld [vmem:[#allocation5 + $0x1748] sm:$0xf0]  ;;  %v11481_v21 = vld [vmem:[#allocation5 + $0x1704] sm:$0xf] }
 0x32c   :  { %6959 = vmatpush.bf16.msra.mxu3 %v9928_v3  ;;  %v10144_v19 = vor.u32 %v11489_v60, %v10141_v38  ;;  %v11497_v60 = vld [vmem:[#allocation5 + $0x1784] sm:$0xf]  ;;  %v10173_v38 = vld [vmem:[#allocation5 + $0x1788] sm:$0xf0] }
 0x32d   :  { %6921 = vmatpush.bf16.msra.mxu0 %v9728_v56  ;;  %v6715_v6 = vpop.f32.mrf.mxu0 }
 0x32e   :  { %6934 = vmatpush.bf16.msra.mxu1 %v9792_v34  ;;  %v6716_v3 = vadd.f32 %v6715_v6, %v12066_v24  ;;  %v6728_v17 = vpop.f32.mrf.mxu1  ;;  %v11503_v34 = vld [vmem:[#allocation5 + $0x17b4] sm:$0xf]  ;;  %v10072_v24 = vor.u32 %v11471_v1, %v10069_v35  ;;  %v10112_v1 = vor.u32 %v11481_v21, %v10109_v14  ;;  %v10176_v35 = vor.u32 %v11497_v60, %v10173_v38  ;;  %v10461_v21 = vld [vmem:[#allocation5 + $0x19c8] sm:$0xf0] }
 0x32f   :  { %6947 = vmatpush.bf16.msra.mxu2 %v9856_v25  ;;  %v10197_v25 = vld [vmem:[#allocation5 + $0x17b8] sm:$0xf0] }
 0x330   :  { %6960 = vmatpush.bf16.msra.mxu3 %v9920_v37  ;;  %6922 = vmatmul.bf16.vlgmr.msra.gmra.mxu0 %v12158_v49  ;;  %v6729_v56 = vadd.f32 %v6728_v17, %v6716_v3  ;;  %v11453_v37 = vld [vmem:[#allocation5 + $0x1624] sm:$0xf]  ;;  %v9989_v49 = vld [vmem:[#allocation5 + $0x1618] sm:$0xf0]  ;;  %v11543_v3 = vld [vmem:[#allocation5 + $0x18f4] sm:$0xf] }
 0x331   :  { %6966 = vmatpush.bf16.msrb.mxu0 %v10040_v52  ;;  %6935 = vmatmul.bf16.vlgmr.msra.gmra.mxu1 %v12160_v4  ;;  %v9997_v52 = vld [vmem:[#allocation5 + $0x1628] sm:$0xf0]  ;;  %v11499_v4 = vld [vmem:[#allocation5 + $0x1794] sm:$0xf]  ;;  %v9992_v41 = vor.u32 %v11451_v13, %v9989_v49  ;;  %v12164_v13 = vld [vmem:[#allocation30_spill] sm:$0xff] }
 0x332   :  { %6979 = vmatpush.bf16.msrb.mxu1 %v10104_v2  ;;  %6948 = vmatmul.bf16.vlgmr.msra.gmra.mxu2 %v12159_v32  ;;  %v11469_v2 = vld [vmem:[#allocation5 + $0x16a4] sm:$0xf]  ;;  %v10117_v32 = vld [vmem:[#allocation5 + $0x1718] sm:$0xf0]  ;;  %v11571_v49 = vld [vmem:[#allocation5 + $0x19d4] sm:$0xf] }
 0x333   :  { %6992 = vmatpush.bf16.msrb.mxu2 %v10168_v55  ;;  %6961 = vmatmul.bf16.vlgmr.msra.gmra.mxu3 %v12161_v42  ;;  %v10200_v55 = vor.u32 %v11503_v34, %v10197_v25  ;;  %v10064_v12 = vor.u32 %v11469_v2, %v10061_v30  ;;  %v11449_v42 = vld [vmem:[#allocation5 + $0x1604] sm:$0xf]  ;;  %v10413_v2 = vld [vmem:[#allocation5 + $0x1968] sm:$0xf0] }
 0x334   :  { %7005 = vmatpush.bf16.msrb.mxu3 %v10232_v8  ;;  %v10125_v8 = vld [vmem:[#allocation5 + $0x1728] sm:$0xf0]  ;;  %v11525_v25 = vld [vmem:[#allocation5 + $0x1864] sm:$0xf] }
 0x335   :  { %6967 = vmatpush.bf16.msrb.mxu0 %v10032_v46  ;;  %v6741_v29 = vpop.f32.mrf.mxu2  ;;  %v6717_v15 = vpop.f32.mrf.mxu0  ;;  %v10000_v46 = vor.u32 %v11453_v37, %v9997_v52  ;;  %v10128_v33 = vor.u32 %v11485_v18, %v10125_v8  ;;  %v10349_v37 = vld [vmem:[#allocation5 + $0x18e8] sm:$0xf0]  ;;  %v11557_v52 = vld [vmem:[#allocation5 + $0x1964] sm:$0xf] }
 0x336   :  { %6980 = vmatpush.bf16.msrb.mxu1 %v10096_v0  ;;  %v6742_v9 = vadd.f32 %v6741_v29, %v6729_v56  ;;  %v6754_v45 = vpop.f32.mrf.mxu3  ;;  %v6730_v0 = vpop.f32.mrf.mxu1  ;;  %v10485_v56 = vld [vmem:[#allocation5 + $0x19f8] sm:$0xf0]  ;;  %v10477_v29 = vld [vmem:[#allocation5 + $0x19e8] sm:$0xf0]  ;;  %v10416_v8 = vor.u32 %v11557_v52, %v10413_v2  ;;  %v11565_v2 = vld [vmem:[#allocation5 + $0x19a4] sm:$0xf] }
 0x337   :  { %6993 = vmatpush.bf16.msrb.mxu2 %v10160_v48  ;;  %v11555_v0 = vld [vmem:[#allocation5 + $0x1954] sm:$0xf] }
 0x338   :  { %7006 = vmatpush.bf16.msrb.mxu3 %v10224_v40  ;;  %v12073_v48 = vadd.f32 %v6754_v45, %v6742_v9  ;;  %v11467_v40 = vld [vmem:[#allocation5 + $0x1694] sm:$0xf]  ;;  %v10277_v45 = vld [vmem:[#allocation5 + $0x1858] sm:$0xf0] }
 0x339   :  { %6968 = vmatpush.bf16.msrb.mxu0 %v10024_v31  ;;  %v9981_v31 = vld [vmem:[#allocation5 + $0x1608] sm:$0xf0]  ;;  %v11523_v9 = vld [vmem:[#allocation5 + $0x1854] sm:$0xf] }
 0x33a   :  { %6981 = vmatpush.bf16.msrb.mxu1 %v10088_v20  ;;  %v10056_v20 = vor.u32 %v11467_v40, %v10053_v61  ;;  %v9984_v17 = vor.u32 %v11449_v42, %v9981_v31  ;;  %v10469_v40 = vld [vmem:[#allocation5 + $0x19d8] sm:$0xf0]  ;;  %v10280_v61 = vor.u32 %v11523_v9, %v10277_v45  ;;  %v10333_v31 = vld [vmem:[#allocation5 + $0x18c8] sm:$0xf0] }
 0x33b   :  { %6994 = vmatpush.bf16.msrb.mxu2 %v10152_v59  ;;  %v10120_v59 = vor.u32 %v11483_v50, %v10117_v32  ;;  %v10472_v42 = vor.u32 %v11571_v49, %v10469_v40  ;;  %v10437_v49 = vld [vmem:[#allocation5 + $0x1998] sm:$0xf0] }
 0x33c   :  { %7007 = vmatpush.bf16.msrb.mxu3 %v10216_v63  ;;  %v10184_v63 = vor.u32 %v11499_v4, %v10181_v58  ;;  %v11521_v4 = vld [vmem:[#allocation5 + $0x1844] sm:$0xf]  ;;  %v10269_v58 = vld [vmem:[#allocation5 + $0x1848] sm:$0xf0] }
 0x33d   :  { %6969 = vmatpush.bf16.msrb.mxu0 %v10016_v23  ;;  %v6743_v6 = vpop.f32.mrf.mxu2  ;;  %v10272_v14 = vor.u32 %v11521_v4, %v10269_v58  ;;  %v11529_v4 = vld [vmem:[#allocation5 + $0x1884] sm:$0xf]  ;;  %v10301_v58 = vld [vmem:[#allocation5 + $0x1888] sm:$0xf0] }
 0x33e   :  { %6982 = vmatpush.bf16.msrb.mxu1 %v10080_v53  ;;  %v6756_v23 = vpop.f32.mrf.mxu3  ;;  %v10357_v53 = vld [vmem:[#allocation5 + $0x18f8] sm:$0xf0] }
 0x33f   :  { %6995 = vmatpush.bf16.msrb.mxu2 %v10144_v19  ;;  %v11559_v19 = vld [vmem:[#allocation5 + $0x1974] sm:$0xf]  ;;  %v10360_v57 = vor.u32 %v11543_v3, %v10357_v53  ;;  %v10464_v23 = vor.u32 %v11569_v62, %v10461_v21  ;;  %v10325_v53 = vld [vmem:[#allocation5 + $0x18b8] sm:$0xf0] }
 0x340   :  { %7008 = vmatpush.bf16.msrb.mxu3 %v10208_v54  ;;  %v11575_v54 = vld [vmem:[#allocation5 + $0x19f4] sm:$0xf]  ;;  %v10424_v34 = vor.u32 %v11559_v19, %v10421_v11  ;;  %v10389_v11 = vld [vmem:[#allocation5 + $0x1938] sm:$0xf0] }
 0x341   :  { %6970 = vmatpush.bf16.msrb.mxu0 %v10008_v27  ;;  %v10285_v27 = vld [vmem:[#allocation5 + $0x1868] sm:$0xf0]  ;;  %v11535_v3 = vld [vmem:[#allocation5 + $0x18b4] sm:$0xf]  ;;  %v10549_v21 = vld [vmem:[#allocation5 + $0x1a78] sm:$0xf0] }
 0x342   :  { %6983 = vmatpush.bf16.msrb.mxu1 %v10072_v24  ;;  %v11541_v24 = vld [vmem:[#allocation5 + $0x18e4] sm:$0xf]  ;;  %v10288_v30 = vor.u32 %v11525_v25, %v10285_v27  ;;  %v11551_v19 = vld [vmem:[#allocation5 + $0x1934] sm:$0xf]  ;;  %v10317_v27 = vld [vmem:[#allocation5 + $0x18a8] sm:$0xf0] }
 0x343   :  { %6996 = vmatpush.bf16.msrb.mxu2 %v10136_v39  ;;  %v10488_v39 = vor.u32 %v11575_v54, %v10485_v56  ;;  %v10352_v18 = vor.u32 %v11541_v24, %v10349_v37  ;;  %v10264_v54 = vor.u32 %v11519_v5, %v10261_v28  ;;  %v10392_v56 = vor.u32 %v11551_v19, %v10389_v11  ;;  %v11549_v24 = vld [vmem:[#allocation5 + $0x1924] sm:$0xf]  ;;  %v11591_v62 = vld [vmem:[#allocation5 + $0x1a74] sm:$0xf]  ;;  %v10677_v5 = vld [vmem:[#allocation5 + $0x1b78] sm:$0xf0] }
 0x344   :  { %7009 = vmatpush.bf16.msrb.mxu3 %v10200_v55  ;;  %v11573_v55 = vld [vmem:[#allocation5 + $0x19e4] sm:$0xf]  ;;  %v10304_v28 = vor.u32 %v11529_v4, %v10301_v58  ;;  %v10552_v19 = vor.u32 %v11591_v62, %v10549_v21  ;;  %v11583_v62 = vld [vmem:[#allocation5 + $0x1a34] sm:$0xf]  ;;  %v10517_v21 = vld [vmem:[#allocation5 + $0x1a38] sm:$0xf0] }
 0x345   :  { %6971 = vmatpush.bf16.msrb.mxu0 %v10000_v46  ;;  %v10480_v15 = vor.u32 %v11573_v55, %v10477_v29  ;;  %v10341_v46 = vld [vmem:[#allocation5 + $0x18d8] sm:$0xf0]  ;;  %v10445_v55 = vld [vmem:[#allocation5 + $0x19a8] sm:$0xf0]  ;;  %v11633_v58 = vld [vmem:[#allocation5 + $0x1bc4] sm:$0xf] }
 0x346   :  { %6984 = vmatpush.bf16.msrb.mxu1 %v10064_v12  ;;  %v10405_v12 = vld [vmem:[#allocation5 + $0x1958] sm:$0xf0]  ;;  %v10344_v50 = vor.u32 %v11539_v10, %v10341_v46  ;;  %v11515_v10 = vld [vmem:[#allocation5 + $0x1814] sm:$0xf]  ;;  %v10448_v46 = vor.u32 %v11565_v2, %v10445_v55 }
 0x347   :  { %6997 = vmatpush.bf16.msrb.mxu2 %v10128_v33  ;;  %v12163_v33 = vld [vmem:[#allocation29_spill] sm:$0xff]  ;;  %v10408_v32 = vor.u32 %v11555_v0, %v10405_v12  ;;  %v11547_v12 = vld [vmem:[#allocation5 + $0x1914] sm:$0xf] }
 0x348   :  { %7010 = vmatpush.bf16.msrb.mxu3 %v10192_v16  ;;  %v12165_v16 = vld [vmem:[#allocation31_spill] sm:$0xff]  ;;  %v10309_v0 = vld [vmem:[#allocation5 + $0x1898] sm:$0xf0]  ;;  %v11603_v2 = vld [vmem:[#allocation5 + $0x1ad4] sm:$0xf] }
 0x349   :  { %6972 = vmatpush.bf16.msrb.mxu0 %v9992_v41  ;;  %v11537_v41 = vld [vmem:[#allocation5 + $0x18c4] sm:$0xf]  ;;  %v12166_v55 = vld [vmem:[#allocation32_spill] sm:$0xff] }
 0x34a   :  { %6985 = vmatpush.bf16.msrb.mxu1 %v10056_v20  ;;  %v11553_v20 = vld [vmem:[#allocation5 + $0x1944] sm:$0xf]  ;;  %v10336_v38 = vor.u32 %v11537_v41, %v10333_v31  ;;  %v10365_v31 = vld [vmem:[#allocation5 + $0x1908] sm:$0xf0] }
 0x34b   :  { %6998 = vmatpush.bf16.msrb.mxu2 %v10120_v59  ;;  %v10397_v59 = vld [vmem:[#allocation5 + $0x1948] sm:$0xf0]  ;;  %v11545_v41 = vld [vmem:[#allocation5 + $0x1904] sm:$0xf] }
 0x34c   :  { %7011 = vmatpush.bf16.msrb.mxu3 %v10184_v63  ;;  %v10400_v6 = vor.u32 %v11553_v20, %v10397_v59  ;;  %v11561_v20 = vld [vmem:[#allocation5 + $0x1984] sm:$0xf]  ;;  %v10429_v59 = vld [vmem:[#allocation5 + $0x1988] sm:$0xf0] }
 0x34d   :  { %6973 = vmatpush.bf16.msrb.mxu0 %v9984_v17  ;;  %v6767_v44 = vpop.f32.mrf.mxu0 }
 0x34e   :  { %6986 = vmatpush.bf16.msrb.mxu1 %v10048_v26  ;;  %v6768_v63 = vadd.f32 %v6767_v44, %v12073_v48  ;;  %v6780_v60 = vpop.f32.mrf.mxu1  ;;  %v11567_v26 = vld [vmem:[#allocation5 + $0x19b4] sm:$0xf]  ;;  %v10328_v48 = vor.u32 %v11535_v3, %v10325_v53  ;;  %v10368_v3 = vor.u32 %v11545_v41, %v10365_v31  ;;  %v10432_v53 = vor.u32 %v11561_v20, %v10429_v59  ;;  %v10717_v41 = vld [vmem:[#allocation5 + $0x1bc8] sm:$0xf0] }
 0x34f   :  { %6999 = vmatpush.bf16.msrb.mxu2 %v10112_v1  ;;  %v10453_v1 = vld [vmem:[#allocation5 + $0x19b8] sm:$0xf0] }
 0x350   :  { %7012 = vmatpush.bf16.msrb.mxu3 %v10176_v35  ;;  %6974 = vmatmul.bf16.vlgmr.msrb.gmra.mxu0 %v12162_v43  ;;  %v6781_v17 = vadd.f32 %v6780_v60, %v6768_v63  ;;  %v11517_v35 = vld [vmem:[#allocation5 + $0x1824] sm:$0xf]  ;;  %v10245_v43 = vld [vmem:[#allocation5 + $0x1818] sm:$0xf0]  ;;  %v11607_v63 = vld [vmem:[#allocation5 + $0x1af4] sm:$0xf] }
 0x351   :  { %7018 = vmatpush.bf16.msra.mxu0 %v10296_v22  ;;  %6987 = vmatmul.bf16.vlgmr.msrb.gmra.mxu1 %v12164_v13  ;;  %v10253_v22 = vld [vmem:[#allocation5 + $0x1828] sm:$0xf0]  ;;  %v11563_v13 = vld [vmem:[#allocation5 + $0x1994] sm:$0xf]  ;;  %v10248_v40 = vor.u32 %v11515_v10, %v10245_v43  ;;  %v12168_v10 = vld [vmem:[#allocation34_spill] sm:$0xff] }
 0x352   :  { %7031 = vmatpush.bf16.msra.mxu1 %v10360_v57  ;;  %7000 = vmatmul.bf16.vlgmr.msrb.gmra.mxu2 %v12163_v33  ;;  %v11533_v57 = vld [vmem:[#allocation5 + $0x18a4] sm:$0xf]  ;;  %v10373_v33 = vld [vmem:[#allocation5 + $0x1918] sm:$0xf0]  ;;  %v11635_v43 = vld [vmem:[#allocation5 + $0x1bd4] sm:$0xf] }
 0x353   :  { %7044 = vmatpush.bf16.msra.mxu2 %v10424_v34  ;;  %7013 = vmatmul.bf16.vlgmr.msrb.gmra.mxu3 %v12165_v16  ;;  %v10456_v34 = vor.u32 %v11567_v26, %v10453_v1  ;;  %v10320_v9 = vor.u32 %v11533_v57, %v10317_v27  ;;  %v11513_v16 = vld [vmem:[#allocation5 + $0x1804] sm:$0xf]  ;;  %v10669_v57 = vld [vmem:[#allocation5 + $0x1b68] sm:$0xf0] }
 0x354   :  { %7057 = vmatpush.bf16.msra.mxu3 %v10488_v39  ;;  %v10381_v39 = vld [vmem:[#allocation5 + $0x1928] sm:$0xf0]  ;;  %v11589_v1 = vld [vmem:[#allocation5 + $0x1a64] sm:$0xf] }
 0x355   :  { %7019 = vmatpush.bf16.msra.mxu0 %v10288_v30  ;;  %v6793_v25 = vpop.f32.mrf.mxu2  ;;  %v6769_v29 = vpop.f32.mrf.mxu0  ;;  %v10256_v30 = vor.u32 %v11517_v35, %v10253_v22  ;;  %v10384_v45 = vor.u32 %v11549_v24, %v10381_v39  ;;  %v10605_v35 = vld [vmem:[#allocation5 + $0x1ae8] sm:$0xf0]  ;;  %v11621_v22 = vld [vmem:[#allocation5 + $0x1b64] sm:$0xf] }
 0x356   :  { %7032 = vmatpush.bf16.msra.mxu1 %v10352_v18  ;;  %v6794_v37 = vadd.f32 %v6793_v25, %v6781_v17  ;;  %v6806_v52 = vpop.f32.mrf.mxu3  ;;  %v6782_v18 = vpop.f32.mrf.mxu1  ;;  %v10741_v17 = vld [vmem:[#allocation5 + $0x1bf8] sm:$0xf0]  ;;  %v10733_v25 = vld [vmem:[#allocation5 + $0x1be8] sm:$0xf0]  ;;  %v10672_v39 = vor.u32 %v11621_v22, %v10669_v57  ;;  %v11629_v57 = vld [vmem:[#allocation5 + $0x1ba4] sm:$0xf] }
 0x357   :  { %7045 = vmatpush.bf16.msra.mxu2 %v10416_v8  ;;  %v11619_v18 = vld [vmem:[#allocation5 + $0x1b54] sm:$0xf] }
 0x358   :  { %7058 = vmatpush.bf16.msra.mxu3 %v10480_v15  ;;  %v12080_v8 = vadd.f32 %v6806_v52, %v6794_v37  ;;  %v11531_v15 = vld [vmem:[#allocation5 + $0x1894] sm:$0xf]  ;;  %v10533_v52 = vld [vmem:[#allocation5 + $0x1a58] sm:$0xf0] }
 0x359   :  { %7020 = vmatpush.bf16.msra.mxu0 %v10280_v61  ;;  %v10237_v61 = vld [vmem:[#allocation5 + $0x1808] sm:$0xf0]  ;;  %v11587_v37 = vld [vmem:[#allocation5 + $0x1a54] sm:$0xf] }
 0x35a   :  { %7033 = vmatpush.bf16.msra.mxu1 %v10344_v50  ;;  %v10312_v50 = vor.u32 %v11531_v15, %v10309_v0  ;;  %v10240_v60 = vor.u32 %v11513_v16, %v10237_v61  ;;  %v10725_v15 = vld [vmem:[#allocation5 + $0x1bd8] sm:$0xf0]  ;;  %v10536_v0 = vor.u32 %v11587_v37, %v10533_v52  ;;  %v10589_v61 = vld [vmem:[#allocation5 + $0x1ac8] sm:$0xf0] }
 0x35b   :  { %7046 = vmatpush.bf16.msra.mxu2 %v10408_v32  ;;  %v10376_v32 = vor.u32 %v11547_v12, %v10373_v33  ;;  %v10728_v16 = vor.u32 %v11635_v43, %v10725_v15  ;;  %v10693_v43 = vld [vmem:[#allocation5 + $0x1b98] sm:$0xf0] }
 0x35c   :  { %7059 = vmatpush.bf16.msra.mxu3 %v10472_v42  ;;  %v10440_v42 = vor.u32 %v11563_v13, %v10437_v49  ;;  %v11585_v13 = vld [vmem:[#allocation5 + $0x1a44] sm:$0xf]  ;;  %v10525_v49 = vld [vmem:[#allocation5 + $0x1a48] sm:$0xf0] }
 0x35d   :  { %7021 = vmatpush.bf16.msra.mxu0 %v10272_v14  ;;  %v6795_v44 = vpop.f32.mrf.mxu2  ;;  %v10528_v31 = vor.u32 %v11585_v13, %v10525_v49  ;;  %v11593_v13 = vld [vmem:[#allocation5 + $0x1a84] sm:$0xf] }
 0x35e   :  { %7034 = vmatpush.bf16.msra.mxu1 %v10336_v38  ;;  %v6808_v14 = vpop.f32.mrf.mxu3  ;;  %v10613_v38 = vld [vmem:[#allocation5 + $0x1af8] sm:$0xf0] }
 0x35f   :  { %7047 = vmatpush.bf16.msra.mxu2 %v10400_v6  ;;  %v11623_v6 = vld [vmem:[#allocation5 + $0x1b74] sm:$0xf]  ;;  %v10616_v11 = vor.u32 %v11607_v63, %v10613_v38  ;;  %v10720_v14 = vor.u32 %v11633_v58, %v10717_v41  ;;  %v10581_v38 = vld [vmem:[#allocation5 + $0x1ab8] sm:$0xf0] }
 0x360   :  { %7060 = vmatpush.bf16.msra.mxu3 %v10464_v23  ;;  %v11639_v23 = vld [vmem:[#allocation5 + $0x1bf4] sm:$0xf]  ;;  %v10680_v26 = vor.u32 %v11623_v6, %v10677_v5  ;;  %v10645_v5 = vld [vmem:[#allocation5 + $0x1b38] sm:$0xf0] }
 0x361   :  { %7022 = vmatpush.bf16.msra.mxu0 %v10264_v54  ;;  %v10541_v54 = vld [vmem:[#allocation5 + $0x1a68] sm:$0xf0]  ;;  %v11599_v63 = vld [vmem:[#allocation5 + $0x1ab4] sm:$0xf] }
 0x362   :  { %7035 = vmatpush.bf16.msra.mxu1 %v10328_v48  ;;  %v11605_v48 = vld [vmem:[#allocation5 + $0x1ae4] sm:$0xf]  ;;  %v10544_v27 = vor.u32 %v11589_v1, %v10541_v54  ;;  %v11615_v6 = vld [vmem:[#allocation5 + $0x1b34] sm:$0xf]  ;;  %v10573_v54 = vld [vmem:[#allocation5 + $0x1aa8] sm:$0xf0] }
 0x363   :  { %7048 = vmatpush.bf16.msra.mxu2 %v10392_v56  ;;  %v10744_v56 = vor.u32 %v11639_v23, %v10741_v17  ;;  %v10608_v24 = vor.u32 %v11605_v48, %v10605_v35  ;;  %v10520_v23 = vor.u32 %v11583_v62, %v10517_v21  ;;  %v10648_v17 = vor.u32 %v11615_v6, %v10645_v5  ;;  %v11613_v48 = vld [vmem:[#allocation5 + $0x1b24] sm:$0xf] }
 0x364   :  { %7061 = vmatpush.bf16.msra.mxu3 %v10456_v34  ;;  %v11637_v34 = vld [vmem:[#allocation5 + $0x1be4] sm:$0xf] }
 0x365   :  { %7023 = vmatpush.bf16.msra.mxu0 %v10256_v30  ;;  %v10736_v29 = vor.u32 %v11637_v34, %v10733_v25  ;;  %v10597_v30 = vld [vmem:[#allocation5 + $0x1ad8] sm:$0xf0]  ;;  %v10701_v34 = vld [vmem:[#allocation5 + $0x1ba8] sm:$0xf0] }
 0x366   :  { %7036 = vmatpush.bf16.msra.mxu1 %v10320_v9  ;;  %v10661_v9 = vld [vmem:[#allocation5 + $0x1b58] sm:$0xf0]  ;;  %v10600_v12 = vor.u32 %v11603_v2, %v10597_v30  ;;  %v11579_v2 = vld [vmem:[#allocation5 + $0x1a14] sm:$0xf]  ;;  %v10704_v30 = vor.u32 %v11629_v57, %v10701_v34 }
 0x367   :  { %7049 = vmatpush.bf16.msra.mxu2 %v10384_v45  ;;  %v12167_v45 = vld [vmem:[#allocation33_spill] sm:$0xff]  ;;  %v10664_v33 = vor.u32 %v11619_v18, %v10661_v9  ;;  %v11611_v9 = vld [vmem:[#allocation5 + $0x1b14] sm:$0xf] }
 0x368   :  { %7062 = vmatpush.bf16.msra.mxu3 %v10448_v46  ;;  %v12169_v46 = vld [vmem:[#allocation35_spill] sm:$0xff]  ;;  %v10565_v18 = vld [vmem:[#allocation5 + $0x1a98] sm:$0xf0] }
 0x369   :  { %7024 = vmatpush.bf16.msra.mxu0 %v10248_v40  ;;  %v11601_v40 = vld [vmem:[#allocation5 + $0x1ac4] sm:$0xf] }
 0x36a   :  { %7037 = vmatpush.bf16.msra.mxu1 %v10312_v50  ;;  %v11617_v50 = vld [vmem:[#allocation5 + $0x1b44] sm:$0xf]  ;;  %v10592_v59 = vor.u32 %v11601_v40, %v10589_v61  ;;  %v10557_v40 = vld [vmem:[#allocation5 + $0x1a88] sm:$0xf0] }
 0x36b   :  { %7050 = vmatpush.bf16.msra.mxu2 %v10376_v32  ;;  %v10653_v32 = vld [vmem:[#allocation5 + $0x1b48] sm:$0xf0] }
 0x36c   :  { %7063 = vmatpush.bf16.msra.mxu3 %v10440_v42  ;;  %v10656_v44 = vor.u32 %v11617_v50, %v10653_v32  ;;  %v10621_v61 = vld [vmem:[#allocation5 + $0x1b08] sm:$0xf0]  ;;  %v11625_v32 = vld [vmem:[#allocation5 + $0x1b84] sm:$0xf] }
 0x36d   :  { %7025 = vmatpush.bf16.msra.mxu0 %v10240_v60  ;;  %v6819_v4 = vpop.f32.mrf.mxu0 }
 0x36e   :  { %7038 = vmatpush.bf16.msra.mxu1 %v10304_v28  ;;  %v6820_v42 = vadd.f32 %v6819_v4, %v12080_v8  ;;  %v6832_v20 = vpop.f32.mrf.mxu1  ;;  %v11631_v28 = vld [vmem:[#allocation5 + $0x1bb4] sm:$0xf]  ;;  %v10584_v8 = vor.u32 %v11599_v63, %v10581_v38  ;;  %v10685_v4 = vld [vmem:[#allocation5 + $0x1b88] sm:$0xf0] }
 0x36f   :  { %7051 = vmatpush.bf16.msra.mxu2 %v10368_v3  ;;  %v10709_v3 = vld [vmem:[#allocation5 + $0x1bb8] sm:$0xf0] }
 0x370   :  { %7064 = vmatpush.bf16.msra.mxu3 %v10432_v53  ;;  %7026 = vmatmul.bf16.vlgmr.msra.gmra.mxu0 %v12166_v55  ;;  %v6833_v60 = vadd.f32 %v6832_v20, %v6820_v42  ;;  %v11581_v53 = vld [vmem:[#allocation5 + $0x1a24] sm:$0xf]  ;;  %v10501_v55 = vld [vmem:[#allocation5 + $0x1a18] sm:$0xf0]  ;;  %v10560_v42 = vor.u32 %v11593_v13, %v10557_v40  ;;  %v10688_v20 = vor.u32 %v11625_v32, %v10685_v4  ;;  %v11648_v4 = vld [vmem:[#allocation7] sm:$0x3] }
 0x371   :  { %7070 = vmatpush.bf16.msrb.mxu0 %v10552_v19  ;;  %7039 = vmatmul.bf16.vlgmr.msra.gmra.mxu1 %v12168_v10  ;;  %v10509_v19 = vld [vmem:[#allocation5 + $0x1a28] sm:$0xf0]  ;;  %v11627_v10 = vld [vmem:[#allocation5 + $0x1b94] sm:$0xf]  ;;  %v10504_v15 = vor.u32 %v11579_v2, %v10501_v55 }
 0x372   :  { %7083 = vmatpush.bf16.msrb.mxu1 %v10616_v11  ;;  %7052 = vmatmul.bf16.vlgmr.msra.gmra.mxu2 %v12167_v45  ;;  %v11597_v11 = vld [vmem:[#allocation5 + $0x1aa4] sm:$0xf]  ;;  %v10629_v45 = vld [vmem:[#allocation5 + $0x1b18] sm:$0xf0]  ;;  %v10696_v49 = vor.u32 %v11627_v10, %v10693_v43 }
 0x373   :  { %7096 = vmatpush.bf16.msrb.mxu2 %v10680_v26  ;;  %7065 = vmatmul.bf16.vlgmr.msra.gmra.mxu3 %v12169_v46  ;;  %v10712_v26 = vor.u32 %v11631_v28, %v10709_v3  ;;  %v10576_v37 = vor.u32 %v11597_v11, %v10573_v54 }
 0x374   :  { %7109 = vmatpush.bf16.msrb.mxu3 %v10744_v56  ;;  %v10637_v56 = vld [vmem:[#allocation5 + $0x1b28] sm:$0xf0] }
 0x375   :  { %7071 = vmatpush.bf16.msrb.mxu0 %v10544_v27  ;;  %v6845_v1 = vpop.f32.mrf.mxu2  ;;  %v6821_v25 = vpop.f32.mrf.mxu0  ;;  %v10512_v27 = vor.u32 %v11581_v53, %v10509_v19  ;;  %v10640_v52 = vor.u32 %v11613_v48, %v10637_v56 }
 0x376   :  { %7084 = vmatpush.bf16.msrb.mxu1 %v10608_v24  ;;  %v6846_v35 = vadd.f32 %v6845_v1, %v6833_v60  ;;  %v6858_v22 = vpop.f32.mrf.mxu3  ;;  %v6834_v24 = vpop.f32.mrf.mxu1 }
 0x377   :  { %7097 = vmatpush.bf16.msrb.mxu2 %v10672_v39 }
 0x378   :  { %7110 = vmatpush.bf16.msrb.mxu3 %v10736_v29  ;;  %v6859_v39 = vadd.f32 %v6858_v22, %v6846_v35  ;;  %v11595_v29 = vld [vmem:[#allocation5 + $0x1a94] sm:$0xf] }
 0x379   :  { %7072 = vmatpush.bf16.msrb.mxu0 %v10536_v0  ;;  %v10568_v46 = vor.u32 %v11595_v29, %v10565_v18  ;;  %v10632_v0 = vor.u32 %v11611_v9, %v10629_v45 }
 0x37a   :  { %7085 = vmatpush.bf16.msrb.mxu1 %v10600_v12  ;;  %v11577_v12 = vld [vmem:[#allocation5 + $0x1a04] sm:$0xf] }
 0x37b   :  { %7098 = vmatpush.bf16.msrb.mxu2 %v10664_v33  ;;  %v10493_v33 = vld [vmem:[#allocation5 + $0x1a08] sm:$0xf0] }
 0x37c   :  { %7111 = vmatpush.bf16.msrb.mxu3 %v10728_v16  ;;  %v11609_v16 = vld [vmem:[#allocation5 + $0x1b04] sm:$0xf]  ;;  %v10496_v41 = vor.u32 %v11577_v12, %v10493_v33 }
 0x37d   :  { %7073 = vmatpush.bf16.msrb.mxu0 %v10528_v31  ;;  %v6847_v50 = vpop.f32.mrf.mxu2  ;;  %v10624_v31 = vor.u32 %v11609_v16, %v10621_v61 }
 0x37e   :  { %7086 = vmatpush.bf16.msrb.mxu1 %v10592_v59  ;;  %v6860_v58 = vpop.f32.mrf.mxu3 }
 0x37f   :  { %7099 = vmatpush.bf16.msrb.mxu2 %v10656_v44  ;;  %v7134_v58 = vperm.slane %v11648_v4, 1 }
 0x380   :  { %7112 = vmatpush.bf16.msrb.mxu3 %v10720_v14 }
 0x381   :  { %7074 = vmatpush.bf16.msrb.mxu0 %v10520_v23 }
 0x382   :  { %7087 = vmatpush.bf16.msrb.mxu1 %v10584_v8 }
 0x383   :  { %7100 = vmatpush.bf16.msrb.mxu2 %v10648_v17 }
 0x384   :  { %7113 = vmatpush.bf16.msrb.mxu3 %v10712_v26 }
 0x385   :  { %7075 = vmatpush.bf16.msrb.mxu0 %v10512_v27 }
 0x386   :  { %7088 = vmatpush.bf16.msrb.mxu1 %v10576_v37 }
 0x387   :  { %7101 = vmatpush.bf16.msrb.mxu2 %v10640_v52 }
 0x388   :  { %7114 = vmatpush.bf16.msrb.mxu3 %v10704_v30 }
 0x389   :  { %7076 = vmatpush.bf16.msrb.mxu0 %v10504_v15 }
 0x38a   :  { %7089 = vmatpush.bf16.msrb.mxu1 %v10568_v46 }
 0x38b   :  { %7102 = vmatpush.bf16.msrb.mxu2 %v10632_v0 }
 0x38c   :  { %7115 = vmatpush.bf16.msrb.mxu3 %v10696_v49 }
 0x38d   :  { %7077 = vmatpush.bf16.msrb.mxu0 %v10496_v41  ;;  %v6871_v59 = vpop.f32.mrf.mxu0 }
 0x38e   :  { %7090 = vmatpush.bf16.msrb.mxu1 %v10560_v42  ;;  %v6872_v44 = vadd.f32 %v6871_v59, %v6859_v39  ;;  %v6884_v62 = vpop.f32.mrf.mxu1 }
 0x38f   :  { %7103 = vmatpush.bf16.msrb.mxu2 %v10624_v31 }
 0x390   :  { %7116 = vmatpush.bf16.msrb.mxu3 %v10688_v20  ;;  %7078 = vmatmul.bf16.vlgmr.msrb.gmra.mxu0 %v11968_v51  ;;  %v6885_v21 = vadd.f32 %v6884_v62, %v6872_v44 }
 0x391   :  { %7091 = vmatmul.bf16.vlgmr.msrb.gmra.mxu1 %v11972_v7 }
 0x392   :  { %7104 = vmatmul.bf16.vlgmr.msrb.gmra.mxu2 %v11970_v47 }
 0x393   :  { %7117 = vmatmul.bf16.vlgmr.msrb.gmra.mxu3 %v11974_v36 }
 0x395   :  { %v6897_v63 = vpop.f32.mrf.mxu2  ;;  %v6873_v38 = vpop.f32.mrf.mxu0 }
 0x396   :  { %v6898_v14 = vadd.f32 %v6897_v63, %v6885_v21  ;;  %v6910_v60 = vpop.f32.mrf.mxu3  ;;  %v6886_v6 = vpop.f32.mrf.mxu1 }
 0x398   :  { %v6911_v5 = vadd.f32 %v6910_v60, %v6898_v14 }
 0x39d   :  { %v6899_v28 = vpop.f32.mrf.mxu2 }
 0x39e   :  { %v6912_v3 = vpop.f32.mrf.mxu3 }
 0x3ad   :  { %v6923_v23 = vpop.f32.mrf.mxu0 }
 0x3ae   :  { %v6924_v51 = vadd.f32 %v6923_v23, %v6911_v5  ;;  %v6936_v8 = vpop.f32.mrf.mxu1 }
 0x3b0   :  { %v6937_v7 = vadd.f32 %v6936_v8, %v6924_v51 }
 0x3b5   :  { %v6949_v17 = vpop.f32.mrf.mxu2  ;;  %v6925_v36 = vpop.f32.mrf.mxu0 }
 0x3b6   :  { %v6950_v47 = vadd.f32 %v6949_v17, %v6937_v7  ;;  %v6962_v53 = vpop.f32.mrf.mxu3  ;;  %v6938_v19 = vpop.f32.mrf.mxu1 }
 0x3b8   :  { %v6963_v11 = vadd.f32 %v6962_v53, %v6950_v47 }
 0x3bd   :  { %v6951_v26 = vpop.f32.mrf.mxu2 }
 0x3be   :  { %v6964_v1 = vpop.f32.mrf.mxu3 }
 0x3cd   :  { %v6975_v54 = vpop.f32.mrf.mxu0 }
 0x3ce   :  { %v6988_v48 = vpop.f32.mrf.mxu1  ;;  %v6976_v39 = vadd.f32 %v6975_v54, %v6963_v11 }
 0x3d0   :  { %v6989_v29 = vadd.f32 %v6988_v48, %v6976_v39 }
 0x3d5   :  { %v7001_v56 = vpop.f32.mrf.mxu2  ;;  %v6977_v22 = vpop.f32.mrf.mxu0 }
 0x3d6   :  { %v7014_v35 = vpop.f32.mrf.mxu3  ;;  %v6990_v57 = vpop.f32.mrf.mxu1  ;;  %v7002_v30 = vadd.f32 %v7001_v56, %v6989_v29 }
 0x3d8   :  { %v7015_v45 = vadd.f32 %v7014_v35, %v7002_v30 }
 0x3dd   :  { %v7003_v34 = vpop.f32.mrf.mxu2 }
 0x3de   :  { %v7016_v25 = vpop.f32.mrf.mxu3 }
 0x3ed   :  { %v7027_v27 = vpop.f32.mrf.mxu0 }
 0x3ee   :  { %v7040_v24 = vpop.f32.mrf.mxu1  ;;  %v7028_v10 = vadd.f32 %v7027_v27, %v7015_v45 }
 0x3f0   :  { %v7041_v43 = vadd.f32 %v7040_v24, %v7028_v10 }
 0x3f5   :  { %v7053_v37 = vpop.f32.mrf.mxu2  ;;  %v7029_v2 = vpop.f32.mrf.mxu0 }
 0x3f6   :  { %v7066_v52 = vpop.f32.mrf.mxu3  ;;  %v7042_v55 = vpop.f32.mrf.mxu1  ;;  %v7054_v15 = vadd.f32 %v7053_v37, %v7041_v43 }
 0x3f8   :  { %v7067_v46 = vadd.f32 %v7066_v52, %v7054_v15 }
 0x3fd   :  { %v7055_v18 = vpop.f32.mrf.mxu2 }
 0x3fe   :  { %v7068_v9 = vpop.f32.mrf.mxu3 }
 0x40d   :  { %v7079_v0 = vpop.f32.mrf.mxu0 }
 0x40e   :  { %v7092_v12 = vpop.f32.mrf.mxu1  ;;  %v7080_v33 = vadd.f32 %v7079_v0, %v7067_v46 }
 0x410   :  { %v7093_v13 = vadd.f32 %v7092_v12, %v7080_v33 }
 0x415   :  { %v7105_v49 = vpop.f32.mrf.mxu2  ;;  %v7081_v61 = vpop.f32.mrf.mxu0 }
 0x416   :  { %v7106_v40 = vadd.f32 %v7105_v49, %v7093_v13  ;;  %v7118_v16 = vpop.f32.mrf.mxu3  ;;  %v7094_v50 = vpop.f32.mrf.mxu1 }
 0x418   :  { %v7119_v32 = vadd.f32 %v7118_v16, %v7106_v40 }
 0x41a   :  { %v7138_v41 = vadd.f32 %v7134_v58, %v7119_v32 }
 0x41c   :  { %v7140_v20 = vmax.f32 %v7138_v41, 0.0 }
 0x41d   :  { %v7107_v42 = vpop.f32.mrf.mxu2 }
 0x41e   :  { %v7120_v31 = vpop.f32.mrf.mxu3  ;;  %7142 = vst [vmem:[#allocation8 + $0x8] sm:$0xff] %v7140_v20 }
 0x41f   :  { %7153 = dma.vmem_to_hbm [thread:$0]  %s7149_s2, 256, %s7151_s30, [#allocation4]  }
 0x420   :  { %11749 = dma.done.wait [#allocation4], 256  }
 0x421   :  { %11750 = vsyncadd [#allocation4], 4294967040 }
 0x422   :  { %7158 = vsyncpa [#allocation3], 1 }
 0x423   :  { %7159 = vsyncpa [#allocation6], 1 }
 0x424   :  { %7160 = vsyncpa [#allocation4], 1 }

</bundles_post_ra>
